<compile_context>
chip_gen: v6e
topology: v6e:2x2x1
jax: 0.10.0
libtpu: 0.0.40
codegen_flags: <defaults>
</compile_context>

<pallas_src>
import functools

import jax
import jax.numpy as jnp
from jax import lax
from jax.experimental import pallas as pl
from jax.experimental.pallas import tpu as pltpu


def _pair(v):
    if isinstance(v, (tuple, list)):
        return int(v[0]), int(v[1])
    return int(v), int(v)


def _spiking_maxpool_kernel(x_ref, o_ref, acc_ref, xf_ref, *,
                            tb, T, ph, pw, sh, sw, ho, wo, wv,
                            assume_binary, gate):
    """One grid step == `tb` consecutive frames of one (channel, row) block.

    Grid = (c_blocks, row_blocks, t_blocks); the time axis is last ("arbitrary",
    iterated innermost), so the running temporal cumsum is carried in `acc_ref`
    across time blocks and reset at t == 0 for each (c, row) block.
    """
    t = pl.program_id(2)

    @pl.when(t == 0)
    def _():
        acc_ref[...] = jnp.zeros_like(acc_ref)

    cb = acc_ref.shape[0]
    w_in = acc_ref.shape[2]

    # Selection matrix for the stride-`sw` column subsample (built once per grid step).
    # sel[c, w, o] = 1.0 iff w == o * sw  -> the matmul is an exact gather of lanes.
    if sw > 1:
        wi = lax.broadcasted_iota(jnp.int32, (cb, wv, wo), 1)
        oi = lax.broadcasted_iota(jnp.int32, (cb, wv, wo), 2)
        sel = (wi == oi * sw).astype(jnp.float32)
    else:
        sel = None

    def frame(i, carry):
        def body():
            # Single full read of the current frame; widen to f32 once.
            xf = x_ref[i].astype(jnp.float32)              # (cb, hblk, w_in)
            xf_ref[...] = xf
            acc_ref[...] = acc_ref[...] + xf               # running cumsum over time

            # Fused three-stream max-pool with running maxima.  Output column o lives
            # at lane o*sw of the (cb, ho, wv) slabs; other lanes are dropped by `sel`.
            ms = None   # pooled cumsum
            mi = None   # pooled cumsum * (x > 0)
            mo = None   # pooled original frame (skipped for assume_binary)
            for di in range(ph):
                rows = pl.ds(di, ho) if sh == 1 else pl.ds(di, ho, sh)
                a_slab = acc_ref[:, rows, :]               # sublane-strided loads
                x_slab = xf_ref[:, rows, :]
                for dj in range(pw):
                    if dj == 0 and wv == w_in:
                        aw, xw = a_slab, x_slab
                    else:
                        aw = a_slab[:, :, dj:dj + wv]      # unit-stride lane slice
                        xw = x_slab[:, :, dj:dj + wv]
                    iw = jnp.where(xw > 0.0, aw, 0.0)
                    if ms is None:
                        ms, mi = aw, iw
                        mo = None if assume_binary else xw
                    else:
                        ms = jnp.maximum(ms, aw)
                        mi = jnp.maximum(mi, iw)
                        if not assume_binary:
                            mo = jnp.maximum(mo, xw)

            if assume_binary:
                # For {0,1} inputs: pool(x) > 0  <=>  max_input_sum > 0.
                outw = jnp.where((mi >= ms) & (mi > 0.0), 1.0, 0.0)
            else:
                outw = jnp.where(mi >= ms, mo, 0.0)
            outw = outw.astype(jnp.float32)

            if sel is None:                                # sw == 1: already dense
                out = outw
            else:                                          # exact gather on the idle MXU
                out = jnp.einsum("chw,cwo->cho", outw, sel,
                                 preferred_element_type=jnp.float32,
                                 precision=jax.lax.Precision.HIGHEST)
            o_ref[i] = out

        if gate:
            pl.when(t * tb + i < T)(body)                  # skip padded frames of last block
        else:
            body()
        return carry

    lax.fori_loop(0, tb, frame, 0, unroll=True)


def spiking_maxpool2d(binary_input, pool_size=(2, 2), strides=None,
                      padding=(0, 0, 0, 0), *, assume_binary=False,
                      time_block=None, row_blocks=None, vmem_limit_bytes=None):
    """JAX/Pallas equivalent of SpikingMaxPooling2dLayer.forward.

    binary_input: (T, C, H, W) non-negative spike tensor (kept in its native dtype in
    HBM; widened to f32 inside the kernel).  Returns float32 (T, C, Ho, Wo).
    """
    ph, pw = _pair(pool_size)
    sh, sw = _pair(pool_size if strides is None else strides)
    pad_l, pad_r, pad_t, pad_b = (int(p) for p in padding)

    x = jnp.asarray(binary_input)
    if x.dtype == jnp.bool_:
        x = x.astype(jnp.int8)

    # Zero spatial padding commutes with the temporal cumsum and the (x > 0) mask, so
    # padding the raw input equals torch's pad-after-cumsum.  Only done when the layer
    # actually pads (default path adds no extra HBM pass).
    # TODO(synk): fold nonzero padding into the kernel's window clamping instead.
    if pad_l or pad_r or pad_t or pad_b:
        x = jnp.pad(x, ((0, 0), (0, 0), (pad_t, pad_b), (pad_l, pad_r)))

    T, C, H, W = x.shape
    Ho = (H - ph) // sh + 1
    Wo = (W - pw) // sw + 1
    Wv = (Wo - 1) * sw + 1          # lanes actually consumed by the pooling windows

    # ---- output-row split: guarantees >=2 parallel blocks for the v7x megacore.
    def _row_split_ok(n):
        if n <= 1:
            return n == 1
        if ph != sh or Ho % n != 0:
            return False
        hob = Ho // n
        return hob % 8 == 0 and (hob * sh) % 8 == 0 and hob * sh * n <= H

    if row_blocks is not None:
        nh = int(row_blocks) if _row_split_ok(int(row_blocks)) else 1
    else:
        nh = 2 if _row_split_ok(2) else 1
    Ho_blk = Ho // nh
    Hblk = H if nh == 1 else Ho_blk * sh

    # ---- per-generation VMEM budget.
    if vmem_limit_bytes is None:
        try:
            vmem_cap = int(pltpu.get_tpu_info().vmem_capacity_bytes)
        except Exception:
            vmem_cap = 64 * 1024 * 1024                    # conservative (v7x) fallback
        vmem_limit_bytes = min(int(vmem_cap * 0.75), 96 * 1024 * 1024)
    budget = int(vmem_limit_bytes * 0.7)

    itemsize = x.dtype.itemsize

    def _block_bytes(cb, tb):
        scratch = 2 * cb * Hblk * W * 4                    # acc + widened frame
        inb = tb * cb * Hblk * W * itemsize
        outb = tb * cb * Ho_blk * Wo * 4
        return scratch + 2 * (inb + outb)                  # double-buffered blocks

    # ---- channel blocking: largest divisor of C whose tb=1 block fits the budget.
    Cb = 1
    for cand in range(C, 0, -1):
        if C % cand == 0 and _block_bytes(cand, 1) <= budget:
            Cb = cand
            break
    nc = C // Cb

    # ---- time blocking: small (<=8) and fully unrolled; larger tb buys nothing for a
    # sequentially carried cumsum and only ties up VMEM.
    if time_block is not None:
        tb = int(max(1, min(T, time_block)))
    else:
        scratch = 2 * Cb * Hblk * W * 4
        per_t = 2 * (Cb * Hblk * W * itemsize + Cb * Ho_blk * Wo * 4)
        tb = int(max(1, min(T, 8, (budget - scratch) // max(per_t, 1))))
    nt = pl.cdiv(T, tb)

    kernel = functools.partial(
        _spiking_maxpool_kernel,
        tb=tb, T=T, ph=ph, pw=pw, sh=sh, sw=sw,
        ho=Ho_blk, wo=Wo, wv=Wv,
        assume_binary=bool(assume_binary), gate=(T % tb != 0))

    out = pl.pallas_call(
        kernel,
        out_shape=jax.ShapeDtypeStruct((T, C, Ho, Wo), jnp.float32),
        grid_spec=pltpu.PrefetchScalarGridSpec(
            num_scalar_prefetch=0,
            grid=(nc, nh, nt),                             # time (carry) axis last
            in_specs=[pl.BlockSpec((tb, Cb, Hblk, W),
                                   lambda c, h, t: (t, c, h, 0))],
            out_specs=pl.BlockSpec((tb, Cb, Ho_blk, Wo),
                                   lambda c, h, t: (t, c, h, 0)),
            scratch_shapes=[
                pltpu.VMEM((Cb, Hblk, W), jnp.float32),    # carried temporal cumsum
                pltpu.VMEM((Cb, Hblk, W), jnp.float32),    # current frame, widened f32
            ]),
        compiler_params=pltpu.CompilerParams(
            dimension_semantics=("parallel", "parallel", "arbitrary"),
            vmem_limit_bytes=int(vmem_limit_bytes)),
    )(x)
    return out


# ---------------------- pure-JAX reference (mirrors the torch code) ----------------------
def _maxpool_ref(x, ph, pw, sh, sw):
    T, C, H, W = x.shape
    Ho = (H - ph) // sh + 1
    Wo = (W - pw) // sw + 1
    out = jnp.full((T, C, Ho, Wo), -jnp.inf, jnp.float32)
    for di in range(ph):
        for dj in range(pw):
            out = jnp.maximum(out, x[:, :, di:di + sh * (Ho - 1) + 1:sh,
                                     dj:dj + sw * (Wo - 1) + 1:sw])
    return out


def _spiking_maxpool_ref(x, pool_size, strides, padding=(0, 0, 0, 0)):
    ph, pw = _pair(pool_size)
    sh, sw = _pair(pool_size if strides is None else strides)
    p_l, p_r, p_t, p_b = padding
    x = x.astype(jnp.float32)

    def pad(a):
        if not any(padding):
            return a
        return jnp.pad(a, ((0, 0), (0, 0), (p_t, p_b), (p_l, p_r)))

    sum_count = jnp.cumsum(x, axis=0)
    max_sum = _maxpool_ref(pad(sum_count), ph, pw, sh, sw)
    input_sum = sum_count * (x > 0).astype(jnp.float32)
    max_input_sum = _maxpool_ref(pad(input_sum), ph, pw, sh, sw)
    orig = _maxpool_ref(pad(x), ph, pw, sh, sw)
    return (max_input_sum >= max_sum).astype(jnp.float32) * orig


if __name__ == "__main__":
    key = jax.random.PRNGKey(0)
    k1, k2, k3 = jax.random.split(key, 3)

    # Test 1: default 2x2 pool / stride 2, no padding, single time block.
    T, C, H, W = 8, 4, 16, 16
    spikes = (jax.random.uniform(k1, (T, C, H, W)) < 0.3).astype(jnp.float32)
    out = jax.block_until_ready(spiking_maxpool2d(spikes, (2, 2), (2, 2)))
    ref = _spiking_maxpool_ref(spikes, (2, 2), (2, 2))
    assert out.shape == (T, C, H // 2, W // 2) and out.dtype == jnp.float32
    assert jnp.allclose(out, ref), "Pallas kernel does not match reference (test 1)"

    # Test 2: nonzero padding, overlapping 3x3 / stride-2 pool, cumsum carried across
    # time blocks with a partial last block (T=6, tb=4 -> nt=2).
    T2, C2, H2, W2 = 6, 4, 12, 12
    spikes2 = (jax.random.uniform(k2, (T2, C2, H2, W2)) < 0.4).astype(jnp.float32)
    out2 = jax.block_until_ready(
        spiking_maxpool2d(spikes2, (3, 3), (2, 2), (1, 1, 2, 0), time_block=4))
    ref2 = _spiking_maxpool_ref(spikes2, (3, 3), (2, 2), (1, 1, 2, 0))
    assert out2.shape == ref2.shape
    assert jnp.allclose(out2, ref2), "Pallas kernel does not match reference (test 2)"

    # Test 3: larger frame -> output-row split (2 'parallel' row blocks, v7x megacore
    # path), then the binary fast path on the same data.
    T3, C3, H3, W3 = 5, 2, 64, 64
    spikes3 = (jax.random.uniform(k3, (T3, C3, H3, W3)) < 0.2).astype(jnp.float32)
    ref3 = _spiking_maxpool_ref(spikes3, (2, 2), (2, 2))
    out3 = jax.block_until_ready(spiking_maxpool2d(spikes3, (2, 2), (2, 2)))
    assert jnp.allclose(out3, ref3), "Pallas kernel does not match reference (test 3)"
    out3b = jax.block_until_ready(
        spiking_maxpool2d(spikes3, (2, 2), (2, 2), assume_binary=True))
    assert jnp.allclose(out3b, ref3), "Pallas kernel does not match reference (test 3b)"

    print("KERNEL_OK")
</pallas_src>

<mosaic_0001>
module attributes {stable_mosaic.version = 11 : i64} {
  func.func @_spiking_maxpool_kernel(%arg0: i32, %arg1: i32, %arg2: i32, %arg3: memref<8x4x16x16xf32, #tpu.memory_space<vmem>>, %arg4: memref<8x4x8x8xf32, #tpu.memory_space<vmem>>, %arg5: memref<4x16x16xf32, #tpu.memory_space<vmem>>, %arg6: memref<4x16x16xf32, #tpu.memory_space<vmem>>) attributes {dimension_semantics = [#tpu.dimension_semantics<parallel>, #tpu.dimension_semantics<parallel>, #tpu.dimension_semantics<arbitrary>], iteration_bounds = array<i64: 1, 1, 1>, scalar_prefetch = 0 : i64, scratch_operands = 2 : i64, tpu.core_type = #tpu.core_type<tc>, window_params = [{transform_indices = @transform_0, window_bounds = array<i64: 8, 4, 16, 16>}, {transform_indices = @transform_1, window_bounds = array<i64: 8, 4, 8, 8>}]} {
    %c0_i32 = arith.constant 0 : i32
    %0 = arith.cmpi eq, %arg2, %c0_i32 : i32
    %1 = arith.extui %0 : i1 to i32
    %c0_i32_0 = arith.constant 0 : i32
    %2 = arith.cmpi ne, %1, %c0_i32_0 : i32
    scf.if %2 {
      %cst_296 = arith.constant 0.000000e+00 : f32
      %426 = vector.broadcast %cst_296 : f32 to vector<4x16x16xf32>
      %c0_297 = arith.constant 0 : index
      %c0_298 = arith.constant 0 : index
      %c0_299 = arith.constant 0 : index
      %427 = vector.load %arg5[%c0_297, %c0_298, %c0_299] : memref<4x16x16xf32, #tpu.memory_space<vmem>>, vector<4x16x16xf32>
      tpu.vector_store %arg5[%c0_297, %c0_298, %c0_299], %426 {strides = array<i32>} : memref<4x16x16xf32, #tpu.memory_space<vmem>>, vector<4x16x16xf32>,
    } else {
    }
    %3 = tpu.iota {dimensions = array<i32: 1>} : vector<4x15x8xi32>
    %4 = tpu.iota {dimensions = array<i32: 2>} : vector<4x15x8xi32>
    %c2_i32 = arith.constant 2 : i32
    %5 = vector.broadcast %c2_i32 : i32 to vector<4x15x8xi32>
    %6 = arith.muli %4, %5 : vector<4x15x8xi32>
    %7 = arith.cmpi eq, %3, %6 : vector<4x15x8xi32>
    %8 = arith.extui %7 : vector<4x15x8xi1> to vector<4x15x8xi32>
    %9 = arith.sitofp %8 : vector<4x15x8xi32> to vector<4x15x8xf32>
    %c0_i32_1 = arith.constant 0 : i32
    %10 = arith.index_cast %c0_i32_1 : i32 to index
    %c0 = arith.constant 0 : index
    %c0_2 = arith.constant 0 : index
    %c0_3 = arith.constant 0 : index
    %11 = vector.load %arg3[%10, %c0, %c0_2, %c0_3] : memref<8x4x16x16xf32, #tpu.memory_space<vmem>>, vector<1x4x16x16xf32>
    %12 = vector.shape_cast %11 : vector<1x4x16x16xf32> to vector<4x16x16xf32>
    %c0_4 = arith.constant 0 : index
    %c0_5 = arith.constant 0 : index
    %c0_6 = arith.constant 0 : index
    %13 = vector.load %arg6[%c0_4, %c0_5, %c0_6] : memref<4x16x16xf32, #tpu.memory_space<vmem>>, vector<4x16x16xf32>
    tpu.vector_store %arg6[%c0_4, %c0_5, %c0_6], %12 {strides = array<i32>} : memref<4x16x16xf32, #tpu.memory_space<vmem>>, vector<4x16x16xf32>,
    %c0_7 = arith.constant 0 : index
    %c0_8 = arith.constant 0 : index
    %c0_9 = arith.constant 0 : index
    %14 = vector.load %arg5[%c0_7, %c0_8, %c0_9] : memref<4x16x16xf32, #tpu.memory_space<vmem>>, vector<4x16x16xf32>
    %15 = arith.addf %14, %12 : vector<4x16x16xf32>
    %c0_10 = arith.constant 0 : index
    %c0_11 = arith.constant 0 : index
    %c0_12 = arith.constant 0 : index
    %16 = vector.load %arg5[%c0_10, %c0_11, %c0_12] : memref<4x16x16xf32, #tpu.memory_space<vmem>>, vector<4x16x16xf32>
    tpu.vector_store %arg5[%c0_10, %c0_11, %c0_12], %15 {strides = array<i32>} : memref<4x16x16xf32, #tpu.memory_space<vmem>>, vector<4x16x16xf32>,
    %c0_13 = arith.constant 0 : index
    %c0_14 = arith.constant 0 : index
    %c0_15 = arith.constant 0 : index
    %17 = tpu.strided_load %arg5[%c0_13, %c0_14, %c0_15] {strides = array<i32: 1, 2, 1>} : memref<4x16x16xf32, #tpu.memory_space<vmem>>, vector<4x8x16xf32>
    %c0_16 = arith.constant 0 : index
    %c0_17 = arith.constant 0 : index
    %c0_18 = arith.constant 0 : index
    %18 = tpu.strided_load %arg6[%c0_16, %c0_17, %c0_18] {strides = array<i32: 1, 2, 1>} : memref<4x16x16xf32, #tpu.memory_space<vmem>>, vector<4x8x16xf32>
    %19 = vector.extract_strided_slice %17 {offsets = [0, 0, 0], sizes = [4, 8, 15], strides = [1, 1, 1]} : vector<4x8x16xf32> to vector<4x8x15xf32>
    %20 = vector.extract_strided_slice %18 {offsets = [0, 0, 0], sizes = [4, 8, 15], strides = [1, 1, 1]} : vector<4x8x16xf32> to vector<4x8x15xf32>
    %cst = arith.constant 0.000000e+00 : f32
    %21 = vector.broadcast %cst : f32 to vector<4x8x15xf32>
    %22 = arith.cmpf ogt, %20, %21 : vector<4x8x15xf32>
    %cst_19 = arith.constant 0.000000e+00 : f32
    %23 = vector.broadcast %cst_19 : f32 to vector<4x8x15xf32>
    %24 = arith.select %22, %19, %23 : vector<4x8x15xi1>, vector<4x8x15xf32>
    %25 = vector.extract_strided_slice %17 {offsets = [0, 0, 1], sizes = [4, 8, 15], strides = [1, 1, 1]} : vector<4x8x16xf32> to vector<4x8x15xf32>
    %26 = vector.extract_strided_slice %18 {offsets = [0, 0, 1], sizes = [4, 8, 15], strides = [1, 1, 1]} : vector<4x8x16xf32> to vector<4x8x15xf32>
    %cst_20 = arith.constant 0.000000e+00 : f32
    %27 = vector.broadcast %cst_20 : f32 to vector<4x8x15xf32>
    %28 = arith.cmpf ogt, %26, %27 : vector<4x8x15xf32>
    %cst_21 = arith.constant 0.000000e+00 : f32
    %29 = vector.broadcast %cst_21 : f32 to vector<4x8x15xf32>
    %30 = arith.select %28, %25, %29 : vector<4x8x15xi1>, vector<4x8x15xf32>
    %31 = arith.maximumf %19, %25 : vector<4x8x15xf32>
    %32 = arith.maximumf %24, %30 : vector<4x8x15xf32>
    %33 = arith.maximumf %20, %26 : vector<4x8x15xf32>
    %c0_22 = arith.constant 0 : index
    %c1 = arith.constant 1 : index
    %c0_23 = arith.constant 0 : index
    %34 = tpu.strided_load %arg5[%c0_22, %c1, %c0_23] {strides = array<i32: 1, 2, 1>} : memref<4x16x16xf32, #tpu.memory_space<vmem>>, vector<4x8x16xf32>
    %c0_24 = arith.constant 0 : index
    %c1_25 = arith.constant 1 : index
    %c0_26 = arith.constant 0 : index
    %35 = tpu.strided_load %arg6[%c0_24, %c1_25, %c0_26] {strides = array<i32: 1, 2, 1>} : memref<4x16x16xf32, #tpu.memory_space<vmem>>, vector<4x8x16xf32>
    %36 = vector.extract_strided_slice %34 {offsets = [0, 0, 0], sizes = [4, 8, 15], strides = [1, 1, 1]} : vector<4x8x16xf32> to vector<4x8x15xf32>
    %37 = vector.extract_strided_slice %35 {offsets = [0, 0, 0], sizes = [4, 8, 15], strides = [1, 1, 1]} : vector<4x8x16xf32> to vector<4x8x15xf32>
    %cst_27 = arith.constant 0.000000e+00 : f32
    %38 = vector.broadcast %cst_27 : f32 to vector<4x8x15xf32>
    %39 = arith.cmpf ogt, %37, %38 : vector<4x8x15xf32>
    %cst_28 = arith.constant 0.000000e+00 : f32
    %40 = vector.broadcast %cst_28 : f32 to vector<4x8x15xf32>
    %41 = arith.select %39, %36, %40 : vector<4x8x15xi1>, vector<4x8x15xf32>
    %42 = arith.maximumf %31, %36 : vector<4x8x15xf32>
    %43 = arith.maximumf %32, %41 : vector<4x8x15xf32>
    %44 = arith.maximumf %33, %37 : vector<4x8x15xf32>
    %45 = vector.extract_strided_slice %34 {offsets = [0, 0, 1], sizes = [4, 8, 15], strides = [1, 1, 1]} : vector<4x8x16xf32> to vector<4x8x15xf32>
    %46 = vector.extract_strided_slice %35 {offsets = [0, 0, 1], sizes = [4, 8, 15], strides = [1, 1, 1]} : vector<4x8x16xf32> to vector<4x8x15xf32>
    %cst_29 = arith.constant 0.000000e+00 : f32
    %47 = vector.broadcast %cst_29 : f32 to vector<4x8x15xf32>
    %48 = arith.cmpf ogt, %46, %47 : vector<4x8x15xf32>
    %cst_30 = arith.constant 0.000000e+00 : f32
    %49 = vector.broadcast %cst_30 : f32 to vector<4x8x15xf32>
    %50 = arith.select %48, %45, %49 : vector<4x8x15xi1>, vector<4x8x15xf32>
    %51 = arith.maximumf %42, %45 : vector<4x8x15xf32>
    %52 = arith.maximumf %43, %50 : vector<4x8x15xf32>
    %53 = arith.maximumf %44, %46 : vector<4x8x15xf32>
    %54 = arith.cmpf oge, %52, %51 : vector<4x8x15xf32>
    %cst_31 = arith.constant 0.000000e+00 : f32
    %55 = vector.broadcast %cst_31 : f32 to vector<4x8x15xf32>
    %56 = arith.select %54, %53, %55 : vector<4x8x15xi1>, vector<4x8x15xf32>
    "tpu.trace_start"() <{level = 10 : i32, message = "chw,cwo->cho"}> : () -> ()
    %cst_32 = arith.constant dense<0.000000e+00> : vector<4x8x8xf32>
    %57 = tpu.matmul %56, %9, %cst_32 {dimension_numbers = #tpu.dot_dimension_numbers<[2], [1], [1], [2], [0, 0, 0, 1, 1, 2], [0], [0]>, precision = #tpu.contract_precision<fp32>} : vector<4x8x15xf32>, vector<4x15x8xf32>, vector<4x8x8xf32> -> vector<4x8x8xf32>
    "tpu.trace_stop"() : () -> ()
    %58 = arith.index_cast %c0_i32_1 : i32 to index
    %c0_33 = arith.constant 0 : index
    %c0_34 = arith.constant 0 : index
    %c0_35 = arith.constant 0 : index
    %59 = vector.load %arg4[%58, %c0_33, %c0_34, %c0_35] : memref<8x4x8x8xf32, #tpu.memory_space<vmem>>, vector<1x4x8x8xf32>
    %60 = vector.shape_cast %59 : vector<1x4x8x8xf32> to vector<4x8x8xf32>
    %61 = vector.shape_cast %57 : vector<4x8x8xf32> to vector<1x4x8x8xf32>
    tpu.vector_store %arg4[%58, %c0_33, %c0_34, %c0_35], %61 {strides = array<i32>} : memref<8x4x8x8xf32, #tpu.memory_space<vmem>>, vector<1x4x8x8xf32>,
    %c1_i32 = arith.constant 1 : i32
    %62 = arith.index_cast %c1_i32 : i32 to index
    %c0_36 = arith.constant 0 : index
    %c0_37 = arith.constant 0 : index
    %c0_38 = arith.constant 0 : index
    %63 = vector.load %arg3[%62, %c0_36, %c0_37, %c0_38] : memref<8x4x16x16xf32, #tpu.memory_space<vmem>>, vector<1x4x16x16xf32>
    %64 = vector.shape_cast %63 : vector<1x4x16x16xf32> to vector<4x16x16xf32>
    %c0_39 = arith.constant 0 : index
    %c0_40 = arith.constant 0 : index
    %c0_41 = arith.constant 0 : index
    %65 = vector.load %arg6[%c0_39, %c0_40, %c0_41] : memref<4x16x16xf32, #tpu.memory_space<vmem>>, vector<4x16x16xf32>
    tpu.vector_store %arg6[%c0_39, %c0_40, %c0_41], %64 {strides = array<i32>} : memref<4x16x16xf32, #tpu.memory_space<vmem>>, vector<4x16x16xf32>,
    %c0_42 = arith.constant 0 : index
    %c0_43 = arith.constant 0 : index
    %c0_44 = arith.constant 0 : index
    %66 = vector.load %arg5[%c0_42, %c0_43, %c0_44] : memref<4x16x16xf32, #tpu.memory_space<vmem>>, vector<4x16x16xf32>
    %67 = arith.addf %66, %64 : vector<4x16x16xf32>
    %c0_45 = arith.constant 0 : index
    %c0_46 = arith.constant 0 : index
    %c0_47 = arith.constant 0 : index
    %68 = vector.load %arg5[%c0_45, %c0_46, %c0_47] : memref<4x16x16xf32, #tpu.memory_space<vmem>>, vector<4x16x16xf32>
    tpu.vector_store %arg5[%c0_45, %c0_46, %c0_47], %67 {strides = array<i32>} : memref<4x16x16xf32, #tpu.memory_space<vmem>>, vector<4x16x16xf32>,
    %c0_48 = arith.constant 0 : index
    %c0_49 = arith.constant 0 : index
    %c0_50 = arith.constant 0 : index
    %69 = tpu.strided_load %arg5[%c0_48, %c0_49, %c0_50] {strides = array<i32: 1, 2, 1>} : memref<4x16x16xf32, #tpu.memory_space<vmem>>, vector<4x8x16xf32>
    %c0_51 = arith.constant 0 : index
    %c0_52 = arith.constant 0 : index
    %c0_53 = arith.constant 0 : index
    %70 = tpu.strided_load %arg6[%c0_51, %c0_52, %c0_53] {strides = array<i32: 1, 2, 1>} : memref<4x16x16xf32, #tpu.memory_space<vmem>>, vector<4x8x16xf32>
    %71 = vector.extract_strided_slice %69 {offsets = [0, 0, 0], sizes = [4, 8, 15], strides = [1, 1, 1]} : vector<4x8x16xf32> to vector<4x8x15xf32>
    %72 = vector.extract_strided_slice %70 {offsets = [0, 0, 0], sizes = [4, 8, 15], strides = [1, 1, 1]} : vector<4x8x16xf32> to vector<4x8x15xf32>
    %cst_54 = arith.constant 0.000000e+00 : f32
    %73 = vector.broadcast %cst_54 : f32 to vector<4x8x15xf32>
    %74 = arith.cmpf ogt, %72, %73 : vector<4x8x15xf32>
    %cst_55 = arith.constant 0.000000e+00 : f32
    %75 = vector.broadcast %cst_55 : f32 to vector<4x8x15xf32>
    %76 = arith.select %74, %71, %75 : vector<4x8x15xi1>, vector<4x8x15xf32>
    %77 = vector.extract_strided_slice %69 {offsets = [0, 0, 1], sizes = [4, 8, 15], strides = [1, 1, 1]} : vector<4x8x16xf32> to vector<4x8x15xf32>
    %78 = vector.extract_strided_slice %70 {offsets = [0, 0, 1], sizes = [4, 8, 15], strides = [1, 1, 1]} : vector<4x8x16xf32> to vector<4x8x15xf32>
    %cst_56 = arith.constant 0.000000e+00 : f32
    %79 = vector.broadcast %cst_56 : f32 to vector<4x8x15xf32>
    %80 = arith.cmpf ogt, %78, %79 : vector<4x8x15xf32>
    %cst_57 = arith.constant 0.000000e+00 : f32
    %81 = vector.broadcast %cst_57 : f32 to vector<4x8x15xf32>
    %82 = arith.select %80, %77, %81 : vector<4x8x15xi1>, vector<4x8x15xf32>
    %83 = arith.maximumf %71, %77 : vector<4x8x15xf32>
    %84 = arith.maximumf %76, %82 : vector<4x8x15xf32>
    %85 = arith.maximumf %72, %78 : vector<4x8x15xf32>
    %c0_58 = arith.constant 0 : index
    %c1_59 = arith.constant 1 : index
    %c0_60 = arith.constant 0 : index
    %86 = tpu.strided_load %arg5[%c0_58, %c1_59, %c0_60] {strides = array<i32: 1, 2, 1>} : memref<4x16x16xf32, #tpu.memory_space<vmem>>, vector<4x8x16xf32>
    %c0_61 = arith.constant 0 : index
    %c1_62 = arith.constant 1 : index
    %c0_63 = arith.constant 0 : index
    %87 = tpu.strided_load %arg6[%c0_61, %c1_62, %c0_63] {strides = array<i32: 1, 2, 1>} : memref<4x16x16xf32, #tpu.memory_space<vmem>>, vector<4x8x16xf32>
    %88 = vector.extract_strided_slice %86 {offsets = [0, 0, 0], sizes = [4, 8, 15], strides = [1, 1, 1]} : vector<4x8x16xf32> to vector<4x8x15xf32>
    %89 = vector.extract_strided_slice %87 {offsets = [0, 0, 0], sizes = [4, 8, 15], strides = [1, 1, 1]} : vector<4x8x16xf32> to vector<4x8x15xf32>
    %cst_64 = arith.constant 0.000000e+00 : f32
    %90 = vector.broadcast %cst_64 : f32 to vector<4x8x15xf32>
    %91 = arith.cmpf ogt, %89, %90 : vector<4x8x15xf32>
    %cst_65 = arith.constant 0.000000e+00 : f32
    %92 = vector.broadcast %cst_65 : f32 to vector<4x8x15xf32>
    %93 = arith.select %91, %88, %92 : vector<4x8x15xi1>, vector<4x8x15xf32>
    %94 = arith.maximumf %83, %88 : vector<4x8x15xf32>
    %95 = arith.maximumf %84, %93 : vector<4x8x15xf32>
    %96 = arith.maximumf %85, %89 : vector<4x8x15xf32>
    %97 = vector.extract_strided_slice %86 {offsets = [0, 0, 1], sizes = [4, 8, 15], strides = [1, 1, 1]} : vector<4x8x16xf32> to vector<4x8x15xf32>
    %98 = vector.extract_strided_slice %87 {offsets = [0, 0, 1], sizes = [4, 8, 15], strides = [1, 1, 1]} : vector<4x8x16xf32> to vector<4x8x15xf32>
    %cst_66 = arith.constant 0.000000e+00 : f32
    %99 = vector.broadcast %cst_66 : f32 to vector<4x8x15xf32>
    %100 = arith.cmpf ogt, %98, %99 : vector<4x8x15xf32>
    %cst_67 = arith.constant 0.000000e+00 : f32
    %101 = vector.broadcast %cst_67 : f32 to vector<4x8x15xf32>
    %102 = arith.select %100, %97, %101 : vector<4x8x15xi1>, vector<4x8x15xf32>
    %103 = arith.maximumf %94, %97 : vector<4x8x15xf32>
    %104 = arith.maximumf %95, %102 : vector<4x8x15xf32>
    %105 = arith.maximumf %96, %98 : vector<4x8x15xf32>
    %106 = arith.cmpf oge, %104, %103 : vector<4x8x15xf32>
    %cst_68 = arith.constant 0.000000e+00 : f32
    %107 = vector.broadcast %cst_68 : f32 to vector<4x8x15xf32>
    %108 = arith.select %106, %105, %107 : vector<4x8x15xi1>, vector<4x8x15xf32>
    "tpu.trace_start"() <{level = 10 : i32, message = "chw,cwo->cho"}> : () -> ()
    %cst_69 = arith.constant dense<0.000000e+00> : vector<4x8x8xf32>
    %109 = tpu.matmul %108, %9, %cst_69 {dimension_numbers = #tpu.dot_dimension_numbers<[2], [1], [1], [2], [0, 0, 0, 1, 1, 2], [0], [0]>, precision = #tpu.contract_precision<fp32>} : vector<4x8x15xf32>, vector<4x15x8xf32>, vector<4x8x8xf32> -> vector<4x8x8xf32>
    "tpu.trace_stop"() : () -> ()
    %110 = arith.index_cast %c1_i32 : i32 to index
    %c0_70 = arith.constant 0 : index
    %c0_71 = arith.constant 0 : index
    %c0_72 = arith.constant 0 : index
    %111 = vector.load %arg4[%110, %c0_70, %c0_71, %c0_72] : memref<8x4x8x8xf32, #tpu.memory_space<vmem>>, vector<1x4x8x8xf32>
    %112 = vector.shape_cast %111 : vector<1x4x8x8xf32> to vector<4x8x8xf32>
    %113 = vector.shape_cast %109 : vector<4x8x8xf32> to vector<1x4x8x8xf32>
    tpu.vector_store %arg4[%110, %c0_70, %c0_71, %c0_72], %113 {strides = array<i32>} : memref<8x4x8x8xf32, #tpu.memory_space<vmem>>, vector<1x4x8x8xf32>,
    %c2_i32_73 = arith.constant 2 : i32
    %114 = arith.index_cast %c2_i32_73 : i32 to index
    %c0_74 = arith.constant 0 : index
    %c0_75 = arith.constant 0 : index
    %c0_76 = arith.constant 0 : index
    %115 = vector.load %arg3[%114, %c0_74, %c0_75, %c0_76] : memref<8x4x16x16xf32, #tpu.memory_space<vmem>>, vector<1x4x16x16xf32>
    %116 = vector.shape_cast %115 : vector<1x4x16x16xf32> to vector<4x16x16xf32>
    %c0_77 = arith.constant 0 : index
    %c0_78 = arith.constant 0 : index
    %c0_79 = arith.constant 0 : index
    %117 = vector.load %arg6[%c0_77, %c0_78, %c0_79] : memref<4x16x16xf32, #tpu.memory_space<vmem>>, vector<4x16x16xf32>
    tpu.vector_store %arg6[%c0_77, %c0_78, %c0_79], %116 {strides = array<i32>} : memref<4x16x16xf32, #tpu.memory_space<vmem>>, vector<4x16x16xf32>,
    %c0_80 = arith.constant 0 : index
    %c0_81 = arith.constant 0 : index
    %c0_82 = arith.constant 0 : index
    %118 = vector.load %arg5[%c0_80, %c0_81, %c0_82] : memref<4x16x16xf32, #tpu.memory_space<vmem>>, vector<4x16x16xf32>
    %119 = arith.addf %118, %116 : vector<4x16x16xf32>
    %c0_83 = arith.constant 0 : index
    %c0_84 = arith.constant 0 : index
    %c0_85 = arith.constant 0 : index
    %120 = vector.load %arg5[%c0_83, %c0_84, %c0_85] : memref<4x16x16xf32, #tpu.memory_space<vmem>>, vector<4x16x16xf32>
    tpu.vector_store %arg5[%c0_83, %c0_84, %c0_85], %119 {strides = array<i32>} : memref<4x16x16xf32, #tpu.memory_space<vmem>>, vector<4x16x16xf32>,
    %c0_86 = arith.constant 0 : index
    %c0_87 = arith.constant 0 : index
    %c0_88 = arith.constant 0 : index
    %121 = tpu.strided_load %arg5[%c0_86, %c0_87, %c0_88] {strides = array<i32: 1, 2, 1>} : memref<4x16x16xf32, #tpu.memory_space<vmem>>, vector<4x8x16xf32>
    %c0_89 = arith.constant 0 : index
    %c0_90 = arith.constant 0 : index
    %c0_91 = arith.constant 0 : index
    %122 = tpu.strided_load %arg6[%c0_89, %c0_90, %c0_91] {strides = array<i32: 1, 2, 1>} : memref<4x16x16xf32, #tpu.memory_space<vmem>>, vector<4x8x16xf32>
    %123 = vector.extract_strided_slice %121 {offsets = [0, 0, 0], sizes = [4, 8, 15], strides = [1, 1, 1]} : vector<4x8x16xf32> to vector<4x8x15xf32>
    %124 = vector.extract_strided_slice %122 {offsets = [0, 0, 0], sizes = [4, 8, 15], strides = [1, 1, 1]} : vector<4x8x16xf32> to vector<4x8x15xf32>
    %cst_92 = arith.constant 0.000000e+00 : f32
    %125 = vector.broadcast %cst_92 : f32 to vector<4x8x15xf32>
    %126 = arith.cmpf ogt, %124, %125 : vector<4x8x15xf32>
    %cst_93 = arith.constant 0.000000e+00 : f32
    %127 = vector.broadcast %cst_93 : f32 to vector<4x8x15xf32>
    %128 = arith.select %126, %123, %127 : vector<4x8x15xi1>, vector<4x8x15xf32>
    %129 = vector.extract_strided_slice %121 {offsets = [0, 0, 1], sizes = [4, 8, 15], strides = [1, 1, 1]} : vector<4x8x16xf32> to vector<4x8x15xf32>
    %130 = vector.extract_strided_slice %122 {offsets = [0, 0, 1], sizes = [4, 8, 15], strides = [1, 1, 1]} : vector<4x8x16xf32> to vector<4x8x15xf32>
    %cst_94 = arith.constant 0.000000e+00 : f32
    %131 = vector.broadcast %cst_94 : f32 to vector<4x8x15xf32>
    %132 = arith.cmpf ogt, %130, %131 : vector<4x8x15xf32>
    %cst_95 = arith.constant 0.000000e+00 : f32
    %133 = vector.broadcast %cst_95 : f32 to vector<4x8x15xf32>
    %134 = arith.select %132, %129, %133 : vector<4x8x15xi1>, vector<4x8x15xf32>
    %135 = arith.maximumf %123, %129 : vector<4x8x15xf32>
    %136 = arith.maximumf %128, %134 : vector<4x8x15xf32>
    %137 = arith.maximumf %124, %130 : vector<4x8x15xf32>
    %c0_96 = arith.constant 0 : index
    %c1_97 = arith.constant 1 : index
    %c0_98 = arith.constant 0 : index
    %138 = tpu.strided_load %arg5[%c0_96, %c1_97, %c0_98] {strides = array<i32: 1, 2, 1>} : memref<4x16x16xf32, #tpu.memory_space<vmem>>, vector<4x8x16xf32>
    %c0_99 = arith.constant 0 : index
    %c1_100 = arith.constant 1 : index
    %c0_101 = arith.constant 0 : index
    %139 = tpu.strided_load %arg6[%c0_99, %c1_100, %c0_101] {strides = array<i32: 1, 2, 1>} : memref<4x16x16xf32, #tpu.memory_space<vmem>>, vector<4x8x16xf32>
    %140 = vector.extract_strided_slice %138 {offsets = [0, 0, 0], sizes = [4, 8, 15], strides = [1, 1, 1]} : vector<4x8x16xf32> to vector<4x8x15xf32>
    %141 = vector.extract_strided_slice %139 {offsets = [0, 0, 0], sizes = [4, 8, 15], strides = [1, 1, 1]} : vector<4x8x16xf32> to vector<4x8x15xf32>
    %cst_102 = arith.constant 0.000000e+00 : f32
    %142 = vector.broadcast %cst_102 : f32 to vector<4x8x15xf32>
    %143 = arith.cmpf ogt, %141, %142 : vector<4x8x15xf32>
    %cst_103 = arith.constant 0.000000e+00 : f32
    %144 = vector.broadcast %cst_103 : f32 to vector<4x8x15xf32>
    %145 = arith.select %143, %140, %144 : vector<4x8x15xi1>, vector<4x8x15xf32>
    %146 = arith.maximumf %135, %140 : vector<4x8x15xf32>
    %147 = arith.maximumf %136, %145 : vector<4x8x15xf32>
    %148 = arith.maximumf %137, %141 : vector<4x8x15xf32>
    %149 = vector.extract_strided_slice %138 {offsets = [0, 0, 1], sizes = [4, 8, 15], strides = [1, 1, 1]} : vector<4x8x16xf32> to vector<4x8x15xf32>
    %150 = vector.extract_strided_slice %139 {offsets = [0, 0, 1], sizes = [4, 8, 15], strides = [1, 1, 1]} : vector<4x8x16xf32> to vector<4x8x15xf32>
    %cst_104 = arith.constant 0.000000e+00 : f32
    %151 = vector.broadcast %cst_104 : f32 to vector<4x8x15xf32>
    %152 = arith.cmpf ogt, %150, %151 : vector<4x8x15xf32>
    %cst_105 = arith.constant 0.000000e+00 : f32
    %153 = vector.broadcast %cst_105 : f32 to vector<4x8x15xf32>
    %154 = arith.select %152, %149, %153 : vector<4x8x15xi1>, vector<4x8x15xf32>
    %155 = arith.maximumf %146, %149 : vector<4x8x15xf32>
    %156 = arith.maximumf %147, %154 : vector<4x8x15xf32>
    %157 = arith.maximumf %148, %150 : vector<4x8x15xf32>
    %158 = arith.cmpf oge, %156, %155 : vector<4x8x15xf32>
    %cst_106 = arith.constant 0.000000e+00 : f32
    %159 = vector.broadcast %cst_106 : f32 to vector<4x8x15xf32>
    %160 = arith.select %158, %157, %159 : vector<4x8x15xi1>, vector<4x8x15xf32>
    "tpu.trace_start"() <{level = 10 : i32, message = "chw,cwo->cho"}> : () -> ()
    %cst_107 = arith.constant dense<0.000000e+00> : vector<4x8x8xf32>
    %161 = tpu.matmul %160, %9, %cst_107 {dimension_numbers = #tpu.dot_dimension_numbers<[2], [1], [1], [2], [0, 0, 0, 1, 1, 2], [0], [0]>, precision = #tpu.contract_precision<fp32>} : vector<4x8x15xf32>, vector<4x15x8xf32>, vector<4x8x8xf32> -> vector<4x8x8xf32>
    "tpu.trace_stop"() : () -> ()
    %162 = arith.index_cast %c2_i32_73 : i32 to index
    %c0_108 = arith.constant 0 : index
    %c0_109 = arith.constant 0 : index
    %c0_110 = arith.constant 0 : index
    %163 = vector.load %arg4[%162, %c0_108, %c0_109, %c0_110] : memref<8x4x8x8xf32, #tpu.memory_space<vmem>>, vector<1x4x8x8xf32>
    %164 = vector.shape_cast %163 : vector<1x4x8x8xf32> to vector<4x8x8xf32>
    %165 = vector.shape_cast %161 : vector<4x8x8xf32> to vector<1x4x8x8xf32>
    tpu.vector_store %arg4[%162, %c0_108, %c0_109, %c0_110], %165 {strides = array<i32>} : memref<8x4x8x8xf32, #tpu.memory_space<vmem>>, vector<1x4x8x8xf32>,
    %c3_i32 = arith.constant 3 : i32
    %166 = arith.index_cast %c3_i32 : i32 to index
    %c0_111 = arith.constant 0 : index
    %c0_112 = arith.constant 0 : index
    %c0_113 = arith.constant 0 : index
    %167 = vector.load %arg3[%166, %c0_111, %c0_112, %c0_113] : memref<8x4x16x16xf32, #tpu.memory_space<vmem>>, vector<1x4x16x16xf32>
    %168 = vector.shape_cast %167 : vector<1x4x16x16xf32> to vector<4x16x16xf32>
    %c0_114 = arith.constant 0 : index
    %c0_115 = arith.constant 0 : index
    %c0_116 = arith.constant 0 : index
    %169 = vector.load %arg6[%c0_114, %c0_115, %c0_116] : memref<4x16x16xf32, #tpu.memory_space<vmem>>, vector<4x16x16xf32>
    tpu.vector_store %arg6[%c0_114, %c0_115, %c0_116], %168 {strides = array<i32>} : memref<4x16x16xf32, #tpu.memory_space<vmem>>, vector<4x16x16xf32>,
    %c0_117 = arith.constant 0 : index
    %c0_118 = arith.constant 0 : index
    %c0_119 = arith.constant 0 : index
    %170 = vector.load %arg5[%c0_117, %c0_118, %c0_119] : memref<4x16x16xf32, #tpu.memory_space<vmem>>, vector<4x16x16xf32>
    %171 = arith.addf %170, %168 : vector<4x16x16xf32>
    %c0_120 = arith.constant 0 : index
    %c0_121 = arith.constant 0 : index
    %c0_122 = arith.constant 0 : index
    %172 = vector.load %arg5[%c0_120, %c0_121, %c0_122] : memref<4x16x16xf32, #tpu.memory_space<vmem>>, vector<4x16x16xf32>
    tpu.vector_store %arg5[%c0_120, %c0_121, %c0_122], %171 {strides = array<i32>} : memref<4x16x16xf32, #tpu.memory_space<vmem>>, vector<4x16x16xf32>,
    %c0_123 = arith.constant 0 : index
    %c0_124 = arith.constant 0 : index
    %c0_125 = arith.constant 0 : index
    %173 = tpu.strided_load %arg5[%c0_123, %c0_124, %c0_125] {strides = array<i32: 1, 2, 1>} : memref<4x16x16xf32, #tpu.memory_space<vmem>>, vector<4x8x16xf32>
    %c0_126 = arith.constant 0 : index
    %c0_127 = arith.constant 0 : index
    %c0_128 = arith.constant 0 : index
    %174 = tpu.strided_load %arg6[%c0_126, %c0_127, %c0_128] {strides = array<i32: 1, 2, 1>} : memref<4x16x16xf32, #tpu.memory_space<vmem>>, vector<4x8x16xf32>
    %175 = vector.extract_strided_slice %173 {offsets = [0, 0, 0], sizes = [4, 8, 15], strides = [1, 1, 1]} : vector<4x8x16xf32> to vector<4x8x15xf32>
    %176 = vector.extract_strided_slice %174 {offsets = [0, 0, 0], sizes = [4, 8, 15], strides = [1, 1, 1]} : vector<4x8x16xf32> to vector<4x8x15xf32>
    %cst_129 = arith.constant 0.000000e+00 : f32
    %177 = vector.broadcast %cst_129 : f32 to vector<4x8x15xf32>
    %178 = arith.cmpf ogt, %176, %177 : vector<4x8x15xf32>
    %cst_130 = arith.constant 0.000000e+00 : f32
    %179 = vector.broadcast %cst_130 : f32 to vector<4x8x15xf32>
    %180 = arith.select %178, %175, %179 : vector<4x8x15xi1>, vector<4x8x15xf32>
    %181 = vector.extract_strided_slice %173 {offsets = [0, 0, 1], sizes = [4, 8, 15], strides = [1, 1, 1]} : vector<4x8x16xf32> to vector<4x8x15xf32>
    %182 = vector.extract_strided_slice %174 {offsets = [0, 0, 1], sizes = [4, 8, 15], strides = [1, 1, 1]} : vector<4x8x16xf32> to vector<4x8x15xf32>
    %cst_131 = arith.constant 0.000000e+00 : f32
    %183 = vector.broadcast %cst_131 : f32 to vector<4x8x15xf32>
    %184 = arith.cmpf ogt, %182, %183 : vector<4x8x15xf32>
    %cst_132 = arith.constant 0.000000e+00 : f32
    %185 = vector.broadcast %cst_132 : f32 to vector<4x8x15xf32>
    %186 = arith.select %184, %181, %185 : vector<4x8x15xi1>, vector<4x8x15xf32>
    %187 = arith.maximumf %175, %181 : vector<4x8x15xf32>
    %188 = arith.maximumf %180, %186 : vector<4x8x15xf32>
    %189 = arith.maximumf %176, %182 : vector<4x8x15xf32>
    %c0_133 = arith.constant 0 : index
    %c1_134 = arith.constant 1 : index
    %c0_135 = arith.constant 0 : index
    %190 = tpu.strided_load %arg5[%c0_133, %c1_134, %c0_135] {strides = array<i32: 1, 2, 1>} : memref<4x16x16xf32, #tpu.memory_space<vmem>>, vector<4x8x16xf32>
    %c0_136 = arith.constant 0 : index
    %c1_137 = arith.constant 1 : index
    %c0_138 = arith.constant 0 : index
    %191 = tpu.strided_load %arg6[%c0_136, %c1_137, %c0_138] {strides = array<i32: 1, 2, 1>} : memref<4x16x16xf32, #tpu.memory_space<vmem>>, vector<4x8x16xf32>
    %192 = vector.extract_strided_slice %190 {offsets = [0, 0, 0], sizes = [4, 8, 15], strides = [1, 1, 1]} : vector<4x8x16xf32> to vector<4x8x15xf32>
    %193 = vector.extract_strided_slice %191 {offsets = [0, 0, 0], sizes = [4, 8, 15], strides = [1, 1, 1]} : vector<4x8x16xf32> to vector<4x8x15xf32>
    %cst_139 = arith.constant 0.000000e+00 : f32
    %194 = vector.broadcast %cst_139 : f32 to vector<4x8x15xf32>
    %195 = arith.cmpf ogt, %193, %194 : vector<4x8x15xf32>
    %cst_140 = arith.constant 0.000000e+00 : f32
    %196 = vector.broadcast %cst_140 : f32 to vector<4x8x15xf32>
    %197 = arith.select %195, %192, %196 : vector<4x8x15xi1>, vector<4x8x15xf32>
    %198 = arith.maximumf %187, %192 : vector<4x8x15xf32>
    %199 = arith.maximumf %188, %197 : vector<4x8x15xf32>
    %200 = arith.maximumf %189, %193 : vector<4x8x15xf32>
    %201 = vector.extract_strided_slice %190 {offsets = [0, 0, 1], sizes = [4, 8, 15], strides = [1, 1, 1]} : vector<4x8x16xf32> to vector<4x8x15xf32>
    %202 = vector.extract_strided_slice %191 {offsets = [0, 0, 1], sizes = [4, 8, 15], strides = [1, 1, 1]} : vector<4x8x16xf32> to vector<4x8x15xf32>
    %cst_141 = arith.constant 0.000000e+00 : f32
    %203 = vector.broadcast %cst_141 : f32 to vector<4x8x15xf32>
    %204 = arith.cmpf ogt, %202, %203 : vector<4x8x15xf32>
    %cst_142 = arith.constant 0.000000e+00 : f32
    %205 = vector.broadcast %cst_142 : f32 to vector<4x8x15xf32>
    %206 = arith.select %204, %201, %205 : vector<4x8x15xi1>, vector<4x8x15xf32>
    %207 = arith.maximumf %198, %201 : vector<4x8x15xf32>
    %208 = arith.maximumf %199, %206 : vector<4x8x15xf32>
    %209 = arith.maximumf %200, %202 : vector<4x8x15xf32>
    %210 = arith.cmpf oge, %208, %207 : vector<4x8x15xf32>
    %cst_143 = arith.constant 0.000000e+00 : f32
    %211 = vector.broadcast %cst_143 : f32 to vector<4x8x15xf32>
    %212 = arith.select %210, %209, %211 : vector<4x8x15xi1>, vector<4x8x15xf32>
    "tpu.trace_start"() <{level = 10 : i32, message = "chw,cwo->cho"}> : () -> ()
    %cst_144 = arith.constant dense<0.000000e+00> : vector<4x8x8xf32>
    %213 = tpu.matmul %212, %9, %cst_144 {dimension_numbers = #tpu.dot_dimension_numbers<[2], [1], [1], [2], [0, 0, 0, 1, 1, 2], [0], [0]>, precision = #tpu.contract_precision<fp32>} : vector<4x8x15xf32>, vector<4x15x8xf32>, vector<4x8x8xf32> -> vector<4x8x8xf32>
    "tpu.trace_stop"() : () -> ()
    %214 = arith.index_cast %c3_i32 : i32 to index
    %c0_145 = arith.constant 0 : index
    %c0_146 = arith.constant 0 : index
    %c0_147 = arith.constant 0 : index
    %215 = vector.load %arg4[%214, %c0_145, %c0_146, %c0_147] : memref<8x4x8x8xf32, #tpu.memory_space<vmem>>, vector<1x4x8x8xf32>
    %216 = vector.shape_cast %215 : vector<1x4x8x8xf32> to vector<4x8x8xf32>
    %217 = vector.shape_cast %213 : vector<4x8x8xf32> to vector<1x4x8x8xf32>
    tpu.vector_store %arg4[%214, %c0_145, %c0_146, %c0_147], %217 {strides = array<i32>} : memref<8x4x8x8xf32, #tpu.memory_space<vmem>>, vector<1x4x8x8xf32>,
    %c4_i32 = arith.constant 4 : i32
    %218 = arith.index_cast %c4_i32 : i32 to index
    %c0_148 = arith.constant 0 : index
    %c0_149 = arith.constant 0 : index
    %c0_150 = arith.constant 0 : index
    %219 = vector.load %arg3[%218, %c0_148, %c0_149, %c0_150] : memref<8x4x16x16xf32, #tpu.memory_space<vmem>>, vector<1x4x16x16xf32>
    %220 = vector.shape_cast %219 : vector<1x4x16x16xf32> to vector<4x16x16xf32>
    %c0_151 = arith.constant 0 : index
    %c0_152 = arith.constant 0 : index
    %c0_153 = arith.constant 0 : index
    %221 = vector.load %arg6[%c0_151, %c0_152, %c0_153] : memref<4x16x16xf32, #tpu.memory_space<vmem>>, vector<4x16x16xf32>
    tpu.vector_store %arg6[%c0_151, %c0_152, %c0_153], %220 {strides = array<i32>} : memref<4x16x16xf32, #tpu.memory_space<vmem>>, vector<4x16x16xf32>,
    %c0_154 = arith.constant 0 : index
    %c0_155 = arith.constant 0 : index
    %c0_156 = arith.constant 0 : index
    %222 = vector.load %arg5[%c0_154, %c0_155, %c0_156] : memref<4x16x16xf32, #tpu.memory_space<vmem>>, vector<4x16x16xf32>
    %223 = arith.addf %222, %220 : vector<4x16x16xf32>
    %c0_157 = arith.constant 0 : index
    %c0_158 = arith.constant 0 : index
    %c0_159 = arith.constant 0 : index
    %224 = vector.load %arg5[%c0_157, %c0_158, %c0_159] : memref<4x16x16xf32, #tpu.memory_space<vmem>>, vector<4x16x16xf32>
    tpu.vector_store %arg5[%c0_157, %c0_158, %c0_159], %223 {strides = array<i32>} : memref<4x16x16xf32, #tpu.memory_space<vmem>>, vector<4x16x16xf32>,
    %c0_160 = arith.constant 0 : index
    %c0_161 = arith.constant 0 : index
    %c0_162 = arith.constant 0 : index
    %225 = tpu.strided_load %arg5[%c0_160, %c0_161, %c0_162] {strides = array<i32: 1, 2, 1>} : memref<4x16x16xf32, #tpu.memory_space<vmem>>, vector<4x8x16xf32>
    %c0_163 = arith.constant 0 : index
    %c0_164 = arith.constant 0 : index
    %c0_165 = arith.constant 0 : index
    %226 = tpu.strided_load %arg6[%c0_163, %c0_164, %c0_165] {strides = array<i32: 1, 2, 1>} : memref<4x16x16xf32, #tpu.memory_space<vmem>>, vector<4x8x16xf32>
    %227 = vector.extract_strided_slice %225 {offsets = [0, 0, 0], sizes = [4, 8, 15], strides = [1, 1, 1]} : vector<4x8x16xf32> to vector<4x8x15xf32>
    %228 = vector.extract_strided_slice %226 {offsets = [0, 0, 0], sizes = [4, 8, 15], strides = [1, 1, 1]} : vector<4x8x16xf32> to vector<4x8x15xf32>
    %cst_166 = arith.constant 0.000000e+00 : f32
    %229 = vector.broadcast %cst_166 : f32 to vector<4x8x15xf32>
    %230 = arith.cmpf ogt, %228, %229 : vector<4x8x15xf32>
    %cst_167 = arith.constant 0.000000e+00 : f32
    %231 = vector.broadcast %cst_167 : f32 to vector<4x8x15xf32>
    %232 = arith.select %230, %227, %231 : vector<4x8x15xi1>, vector<4x8x15xf32>
    %233 = vector.extract_strided_slice %225 {offsets = [0, 0, 1], sizes = [4, 8, 15], strides = [1, 1, 1]} : vector<4x8x16xf32> to vector<4x8x15xf32>
    %234 = vector.extract_strided_slice %226 {offsets = [0, 0, 1], sizes = [4, 8, 15], strides = [1, 1, 1]} : vector<4x8x16xf32> to vector<4x8x15xf32>
    %cst_168 = arith.constant 0.000000e+00 : f32
    %235 = vector.broadcast %cst_168 : f32 to vector<4x8x15xf32>
    %236 = arith.cmpf ogt, %234, %235 : vector<4x8x15xf32>
    %cst_169 = arith.constant 0.000000e+00 : f32
    %237 = vector.broadcast %cst_169 : f32 to vector<4x8x15xf32>
    %238 = arith.select %236, %233, %237 : vector<4x8x15xi1>, vector<4x8x15xf32>
    %239 = arith.maximumf %227, %233 : vector<4x8x15xf32>
    %240 = arith.maximumf %232, %238 : vector<4x8x15xf32>
    %241 = arith.maximumf %228, %234 : vector<4x8x15xf32>
    %c0_170 = arith.constant 0 : index
    %c1_171 = arith.constant 1 : index
    %c0_172 = arith.constant 0 : index
    %242 = tpu.strided_load %arg5[%c0_170, %c1_171, %c0_172] {strides = array<i32: 1, 2, 1>} : memref<4x16x16xf32, #tpu.memory_space<vmem>>, vector<4x8x16xf32>
    %c0_173 = arith.constant 0 : index
    %c1_174 = arith.constant 1 : index
    %c0_175 = arith.constant 0 : index
    %243 = tpu.strided_load %arg6[%c0_173, %c1_174, %c0_175] {strides = array<i32: 1, 2, 1>} : memref<4x16x16xf32, #tpu.memory_space<vmem>>, vector<4x8x16xf32>
    %244 = vector.extract_strided_slice %242 {offsets = [0, 0, 0], sizes = [4, 8, 15], strides = [1, 1, 1]} : vector<4x8x16xf32> to vector<4x8x15xf32>
    %245 = vector.extract_strided_slice %243 {offsets = [0, 0, 0], sizes = [4, 8, 15], strides = [1, 1, 1]} : vector<4x8x16xf32> to vector<4x8x15xf32>
    %cst_176 = arith.constant 0.000000e+00 : f32
    %246 = vector.broadcast %cst_176 : f32 to vector<4x8x15xf32>
    %247 = arith.cmpf ogt, %245, %246 : vector<4x8x15xf32>
    %cst_177 = arith.constant 0.000000e+00 : f32
    %248 = vector.broadcast %cst_177 : f32 to vector<4x8x15xf32>
    %249 = arith.select %247, %244, %248 : vector<4x8x15xi1>, vector<4x8x15xf32>
    %250 = arith.maximumf %239, %244 : vector<4x8x15xf32>
    %251 = arith.maximumf %240, %249 : vector<4x8x15xf32>
    %252 = arith.maximumf %241, %245 : vector<4x8x15xf32>
    %253 = vector.extract_strided_slice %242 {offsets = [0, 0, 1], sizes = [4, 8, 15], strides = [1, 1, 1]} : vector<4x8x16xf32> to vector<4x8x15xf32>
    %254 = vector.extract_strided_slice %243 {offsets = [0, 0, 1], sizes = [4, 8, 15], strides = [1, 1, 1]} : vector<4x8x16xf32> to vector<4x8x15xf32>
    %cst_178 = arith.constant 0.000000e+00 : f32
    %255 = vector.broadcast %cst_178 : f32 to vector<4x8x15xf32>
    %256 = arith.cmpf ogt, %254, %255 : vector<4x8x15xf32>
    %cst_179 = arith.constant 0.000000e+00 : f32
    %257 = vector.broadcast %cst_179 : f32 to vector<4x8x15xf32>
    %258 = arith.select %256, %253, %257 : vector<4x8x15xi1>, vector<4x8x15xf32>
    %259 = arith.maximumf %250, %253 : vector<4x8x15xf32>
    %260 = arith.maximumf %251, %258 : vector<4x8x15xf32>
    %261 = arith.maximumf %252, %254 : vector<4x8x15xf32>
    %262 = arith.cmpf oge, %260, %259 : vector<4x8x15xf32>
    %cst_180 = arith.constant 0.000000e+00 : f32
    %263 = vector.broadcast %cst_180 : f32 to vector<4x8x15xf32>
    %264 = arith.select %262, %261, %263 : vector<4x8x15xi1>, vector<4x8x15xf32>
    "tpu.trace_start"() <{level = 10 : i32, message = "chw,cwo->cho"}> : () -> ()
    %cst_181 = arith.constant dense<0.000000e+00> : vector<4x8x8xf32>
    %265 = tpu.matmul %264, %9, %cst_181 {dimension_numbers = #tpu.dot_dimension_numbers<[2], [1], [1], [2], [0, 0, 0, 1, 1, 2], [0], [0]>, precision = #tpu.contract_precision<fp32>} : vector<4x8x15xf32>, vector<4x15x8xf32>, vector<4x8x8xf32> -> vector<4x8x8xf32>
    "tpu.trace_stop"() : () -> ()
    %266 = arith.index_cast %c4_i32 : i32 to index
    %c0_182 = arith.constant 0 : index
    %c0_183 = arith.constant 0 : index
    %c0_184 = arith.constant 0 : index
    %267 = vector.load %arg4[%266, %c0_182, %c0_183, %c0_184] : memref<8x4x8x8xf32, #tpu.memory_space<vmem>>, vector<1x4x8x8xf32>
    %268 = vector.shape_cast %267 : vector<1x4x8x8xf32> to vector<4x8x8xf32>
    %269 = vector.shape_cast %265 : vector<4x8x8xf32> to vector<1x4x8x8xf32>
    tpu.vector_store %arg4[%266, %c0_182, %c0_183, %c0_184], %269 {strides = array<i32>} : memref<8x4x8x8xf32, #tpu.memory_space<vmem>>, vector<1x4x8x8xf32>,
    %c5_i32 = arith.constant 5 : i32
    %270 = arith.index_cast %c5_i32 : i32 to index
    %c0_185 = arith.constant 0 : index
    %c0_186 = arith.constant 0 : index
    %c0_187 = arith.constant 0 : index
    %271 = vector.load %arg3[%270, %c0_185, %c0_186, %c0_187] : memref<8x4x16x16xf32, #tpu.memory_space<vmem>>, vector<1x4x16x16xf32>
    %272 = vector.shape_cast %271 : vector<1x4x16x16xf32> to vector<4x16x16xf32>
    %c0_188 = arith.constant 0 : index
    %c0_189 = arith.constant 0 : index
    %c0_190 = arith.constant 0 : index
    %273 = vector.load %arg6[%c0_188, %c0_189, %c0_190] : memref<4x16x16xf32, #tpu.memory_space<vmem>>, vector<4x16x16xf32>
    tpu.vector_store %arg6[%c0_188, %c0_189, %c0_190], %272 {strides = array<i32>} : memref<4x16x16xf32, #tpu.memory_space<vmem>>, vector<4x16x16xf32>,
    %c0_191 = arith.constant 0 : index
    %c0_192 = arith.constant 0 : index
    %c0_193 = arith.constant 0 : index
    %274 = vector.load %arg5[%c0_191, %c0_192, %c0_193] : memref<4x16x16xf32, #tpu.memory_space<vmem>>, vector<4x16x16xf32>
    %275 = arith.addf %274, %272 : vector<4x16x16xf32>
    %c0_194 = arith.constant 0 : index
    %c0_195 = arith.constant 0 : index
    %c0_196 = arith.constant 0 : index
    %276 = vector.load %arg5[%c0_194, %c0_195, %c0_196] : memref<4x16x16xf32, #tpu.memory_space<vmem>>, vector<4x16x16xf32>
    tpu.vector_store %arg5[%c0_194, %c0_195, %c0_196], %275 {strides = array<i32>} : memref<4x16x16xf32, #tpu.memory_space<vmem>>, vector<4x16x16xf32>,
    %c0_197 = arith.constant 0 : index
    %c0_198 = arith.constant 0 : index
    %c0_199 = arith.constant 0 : index
    %277 = tpu.strided_load %arg5[%c0_197, %c0_198, %c0_199] {strides = array<i32: 1, 2, 1>} : memref<4x16x16xf32, #tpu.memory_space<vmem>>, vector<4x8x16xf32>
    %c0_200 = arith.constant 0 : index
    %c0_201 = arith.constant 0 : index
    %c0_202 = arith.constant 0 : index
    %278 = tpu.strided_load %arg6[%c0_200, %c0_201, %c0_202] {strides = array<i32: 1, 2, 1>} : memref<4x16x16xf32, #tpu.memory_space<vmem>>, vector<4x8x16xf32>
    %279 = vector.extract_strided_slice %277 {offsets = [0, 0, 0], sizes = [4, 8, 15], strides = [1, 1, 1]} : vector<4x8x16xf32> to vector<4x8x15xf32>
    %280 = vector.extract_strided_slice %278 {offsets = [0, 0, 0], sizes = [4, 8, 15], strides = [1, 1, 1]} : vector<4x8x16xf32> to vector<4x8x15xf32>
    %cst_203 = arith.constant 0.000000e+00 : f32
    %281 = vector.broadcast %cst_203 : f32 to vector<4x8x15xf32>
    %282 = arith.cmpf ogt, %280, %281 : vector<4x8x15xf32>
    %cst_204 = arith.constant 0.000000e+00 : f32
    %283 = vector.broadcast %cst_204 : f32 to vector<4x8x15xf32>
    %284 = arith.select %282, %279, %283 : vector<4x8x15xi1>, vector<4x8x15xf32>
    %285 = vector.extract_strided_slice %277 {offsets = [0, 0, 1], sizes = [4, 8, 15], strides = [1, 1, 1]} : vector<4x8x16xf32> to vector<4x8x15xf32>
    %286 = vector.extract_strided_slice %278 {offsets = [0, 0, 1], sizes = [4, 8, 15], strides = [1, 1, 1]} : vector<4x8x16xf32> to vector<4x8x15xf32>
    %cst_205 = arith.constant 0.000000e+00 : f32
    %287 = vector.broadcast %cst_205 : f32 to vector<4x8x15xf32>
    %288 = arith.cmpf ogt, %286, %287 : vector<4x8x15xf32>
    %cst_206 = arith.constant 0.000000e+00 : f32
    %289 = vector.broadcast %cst_206 : f32 to vector<4x8x15xf32>
    %290 = arith.select %288, %285, %289 : vector<4x8x15xi1>, vector<4x8x15xf32>
    %291 = arith.maximumf %279, %285 : vector<4x8x15xf32>
    %292 = arith.maximumf %284, %290 : vector<4x8x15xf32>
    %293 = arith.maximumf %280, %286 : vector<4x8x15xf32>
    %c0_207 = arith.constant 0 : index
    %c1_208 = arith.constant 1 : index
    %c0_209 = arith.constant 0 : index
    %294 = tpu.strided_load %arg5[%c0_207, %c1_208, %c0_209] {strides = array<i32: 1, 2, 1>} : memref<4x16x16xf32, #tpu.memory_space<vmem>>, vector<4x8x16xf32>
    %c0_210 = arith.constant 0 : index
    %c1_211 = arith.constant 1 : index
    %c0_212 = arith.constant 0 : index
    %295 = tpu.strided_load %arg6[%c0_210, %c1_211, %c0_212] {strides = array<i32: 1, 2, 1>} : memref<4x16x16xf32, #tpu.memory_space<vmem>>, vector<4x8x16xf32>
    %296 = vector.extract_strided_slice %294 {offsets = [0, 0, 0], sizes = [4, 8, 15], strides = [1, 1, 1]} : vector<4x8x16xf32> to vector<4x8x15xf32>
    %297 = vector.extract_strided_slice %295 {offsets = [0, 0, 0], sizes = [4, 8, 15], strides = [1, 1, 1]} : vector<4x8x16xf32> to vector<4x8x15xf32>
    %cst_213 = arith.constant 0.000000e+00 : f32
    %298 = vector.broadcast %cst_213 : f32 to vector<4x8x15xf32>
    %299 = arith.cmpf ogt, %297, %298 : vector<4x8x15xf32>
    %cst_214 = arith.constant 0.000000e+00 : f32
    %300 = vector.broadcast %cst_214 : f32 to vector<4x8x15xf32>
    %301 = arith.select %299, %296, %300 : vector<4x8x15xi1>, vector<4x8x15xf32>
    %302 = arith.maximumf %291, %296 : vector<4x8x15xf32>
    %303 = arith.maximumf %292, %301 : vector<4x8x15xf32>
    %304 = arith.maximumf %293, %297 : vector<4x8x15xf32>
    %305 = vector.extract_strided_slice %294 {offsets = [0, 0, 1], sizes = [4, 8, 15], strides = [1, 1, 1]} : vector<4x8x16xf32> to vector<4x8x15xf32>
    %306 = vector.extract_strided_slice %295 {offsets = [0, 0, 1], sizes = [4, 8, 15], strides = [1, 1, 1]} : vector<4x8x16xf32> to vector<4x8x15xf32>
    %cst_215 = arith.constant 0.000000e+00 : f32
    %307 = vector.broadcast %cst_215 : f32 to vector<4x8x15xf32>
    %308 = arith.cmpf ogt, %306, %307 : vector<4x8x15xf32>
    %cst_216 = arith.constant 0.000000e+00 : f32
    %309 = vector.broadcast %cst_216 : f32 to vector<4x8x15xf32>
    %310 = arith.select %308, %305, %309 : vector<4x8x15xi1>, vector<4x8x15xf32>
    %311 = arith.maximumf %302, %305 : vector<4x8x15xf32>
    %312 = arith.maximumf %303, %310 : vector<4x8x15xf32>
    %313 = arith.maximumf %304, %306 : vector<4x8x15xf32>
    %314 = arith.cmpf oge, %312, %311 : vector<4x8x15xf32>
    %cst_217 = arith.constant 0.000000e+00 : f32
    %315 = vector.broadcast %cst_217 : f32 to vector<4x8x15xf32>
    %316 = arith.select %314, %313, %315 : vector<4x8x15xi1>, vector<4x8x15xf32>
    "tpu.trace_start"() <{level = 10 : i32, message = "chw,cwo->cho"}> : () -> ()
    %cst_218 = arith.constant dense<0.000000e+00> : vector<4x8x8xf32>
    %317 = tpu.matmul %316, %9, %cst_218 {dimension_numbers = #tpu.dot_dimension_numbers<[2], [1], [1], [2], [0, 0, 0, 1, 1, 2], [0], [0]>, precision = #tpu.contract_precision<fp32>} : vector<4x8x15xf32>, vector<4x15x8xf32>, vector<4x8x8xf32> -> vector<4x8x8xf32>
    "tpu.trace_stop"() : () -> ()
    %318 = arith.index_cast %c5_i32 : i32 to index
    %c0_219 = arith.constant 0 : index
    %c0_220 = arith.constant 0 : index
    %c0_221 = arith.constant 0 : index
    %319 = vector.load %arg4[%318, %c0_219, %c0_220, %c0_221] : memref<8x4x8x8xf32, #tpu.memory_space<vmem>>, vector<1x4x8x8xf32>
    %320 = vector.shape_cast %319 : vector<1x4x8x8xf32> to vector<4x8x8xf32>
    %321 = vector.shape_cast %317 : vector<4x8x8xf32> to vector<1x4x8x8xf32>
    tpu.vector_store %arg4[%318, %c0_219, %c0_220, %c0_221], %321 {strides = array<i32>} : memref<8x4x8x8xf32, #tpu.memory_space<vmem>>, vector<1x4x8x8xf32>,
    %c6_i32 = arith.constant 6 : i32
    %322 = arith.index_cast %c6_i32 : i32 to index
    %c0_222 = arith.constant 0 : index
    %c0_223 = arith.constant 0 : index
    %c0_224 = arith.constant 0 : index
    %323 = vector.load %arg3[%322, %c0_222, %c0_223, %c0_224] : memref<8x4x16x16xf32, #tpu.memory_space<vmem>>, vector<1x4x16x16xf32>
    %324 = vector.shape_cast %323 : vector<1x4x16x16xf32> to vector<4x16x16xf32>
    %c0_225 = arith.constant 0 : index
    %c0_226 = arith.constant 0 : index
    %c0_227 = arith.constant 0 : index
    %325 = vector.load %arg6[%c0_225, %c0_226, %c0_227] : memref<4x16x16xf32, #tpu.memory_space<vmem>>, vector<4x16x16xf32>
    tpu.vector_store %arg6[%c0_225, %c0_226, %c0_227], %324 {strides = array<i32>} : memref<4x16x16xf32, #tpu.memory_space<vmem>>, vector<4x16x16xf32>,
    %c0_228 = arith.constant 0 : index
    %c0_229 = arith.constant 0 : index
    %c0_230 = arith.constant 0 : index
    %326 = vector.load %arg5[%c0_228, %c0_229, %c0_230] : memref<4x16x16xf32, #tpu.memory_space<vmem>>, vector<4x16x16xf32>
    %327 = arith.addf %326, %324 : vector<4x16x16xf32>
    %c0_231 = arith.constant 0 : index
    %c0_232 = arith.constant 0 : index
    %c0_233 = arith.constant 0 : index
    %328 = vector.load %arg5[%c0_231, %c0_232, %c0_233] : memref<4x16x16xf32, #tpu.memory_space<vmem>>, vector<4x16x16xf32>
    tpu.vector_store %arg5[%c0_231, %c0_232, %c0_233], %327 {strides = array<i32>} : memref<4x16x16xf32, #tpu.memory_space<vmem>>, vector<4x16x16xf32>,
    %c0_234 = arith.constant 0 : index
    %c0_235 = arith.constant 0 : index
    %c0_236 = arith.constant 0 : index
    %329 = tpu.strided_load %arg5[%c0_234, %c0_235, %c0_236] {strides = array<i32: 1, 2, 1>} : memref<4x16x16xf32, #tpu.memory_space<vmem>>, vector<4x8x16xf32>
    %c0_237 = arith.constant 0 : index
    %c0_238 = arith.constant 0 : index
    %c0_239 = arith.constant 0 : index
    %330 = tpu.strided_load %arg6[%c0_237, %c0_238, %c0_239] {strides = array<i32: 1, 2, 1>} : memref<4x16x16xf32, #tpu.memory_space<vmem>>, vector<4x8x16xf32>
    %331 = vector.extract_strided_slice %329 {offsets = [0, 0, 0], sizes = [4, 8, 15], strides = [1, 1, 1]} : vector<4x8x16xf32> to vector<4x8x15xf32>
    %332 = vector.extract_strided_slice %330 {offsets = [0, 0, 0], sizes = [4, 8, 15], strides = [1, 1, 1]} : vector<4x8x16xf32> to vector<4x8x15xf32>
    %cst_240 = arith.constant 0.000000e+00 : f32
    %333 = vector.broadcast %cst_240 : f32 to vector<4x8x15xf32>
    %334 = arith.cmpf ogt, %332, %333 : vector<4x8x15xf32>
    %cst_241 = arith.constant 0.000000e+00 : f32
    %335 = vector.broadcast %cst_241 : f32 to vector<4x8x15xf32>
    %336 = arith.select %334, %331, %335 : vector<4x8x15xi1>, vector<4x8x15xf32>
    %337 = vector.extract_strided_slice %329 {offsets = [0, 0, 1], sizes = [4, 8, 15], strides = [1, 1, 1]} : vector<4x8x16xf32> to vector<4x8x15xf32>
    %338 = vector.extract_strided_slice %330 {offsets = [0, 0, 1], sizes = [4, 8, 15], strides = [1, 1, 1]} : vector<4x8x16xf32> to vector<4x8x15xf32>
    %cst_242 = arith.constant 0.000000e+00 : f32
    %339 = vector.broadcast %cst_242 : f32 to vector<4x8x15xf32>
    %340 = arith.cmpf ogt, %338, %339 : vector<4x8x15xf32>
    %cst_243 = arith.constant 0.000000e+00 : f32
    %341 = vector.broadcast %cst_243 : f32 to vector<4x8x15xf32>
    %342 = arith.select %340, %337, %341 : vector<4x8x15xi1>, vector<4x8x15xf32>
    %343 = arith.maximumf %331, %337 : vector<4x8x15xf32>
    %344 = arith.maximumf %336, %342 : vector<4x8x15xf32>
    %345 = arith.maximumf %332, %338 : vector<4x8x15xf32>
    %c0_244 = arith.constant 0 : index
    %c1_245 = arith.constant 1 : index
    %c0_246 = arith.constant 0 : index
    %346 = tpu.strided_load %arg5[%c0_244, %c1_245, %c0_246] {strides = array<i32: 1, 2, 1>} : memref<4x16x16xf32, #tpu.memory_space<vmem>>, vector<4x8x16xf32>
    %c0_247 = arith.constant 0 : index
    %c1_248 = arith.constant 1 : index
    %c0_249 = arith.constant 0 : index
    %347 = tpu.strided_load %arg6[%c0_247, %c1_248, %c0_249] {strides = array<i32: 1, 2, 1>} : memref<4x16x16xf32, #tpu.memory_space<vmem>>, vector<4x8x16xf32>
    %348 = vector.extract_strided_slice %346 {offsets = [0, 0, 0], sizes = [4, 8, 15], strides = [1, 1, 1]} : vector<4x8x16xf32> to vector<4x8x15xf32>
    %349 = vector.extract_strided_slice %347 {offsets = [0, 0, 0], sizes = [4, 8, 15], strides = [1, 1, 1]} : vector<4x8x16xf32> to vector<4x8x15xf32>
    %cst_250 = arith.constant 0.000000e+00 : f32
    %350 = vector.broadcast %cst_250 : f32 to vector<4x8x15xf32>
    %351 = arith.cmpf ogt, %349, %350 : vector<4x8x15xf32>
    %cst_251 = arith.constant 0.000000e+00 : f32
    %352 = vector.broadcast %cst_251 : f32 to vector<4x8x15xf32>
    %353 = arith.select %351, %348, %352 : vector<4x8x15xi1>, vector<4x8x15xf32>
    %354 = arith.maximumf %343, %348 : vector<4x8x15xf32>
    %355 = arith.maximumf %344, %353 : vector<4x8x15xf32>
    %356 = arith.maximumf %345, %349 : vector<4x8x15xf32>
    %357 = vector.extract_strided_slice %346 {offsets = [0, 0, 1], sizes = [4, 8, 15], strides = [1, 1, 1]} : vector<4x8x16xf32> to vector<4x8x15xf32>
    %358 = vector.extract_strided_slice %347 {offsets = [0, 0, 1], sizes = [4, 8, 15], strides = [1, 1, 1]} : vector<4x8x16xf32> to vector<4x8x15xf32>
    %cst_252 = arith.constant 0.000000e+00 : f32
    %359 = vector.broadcast %cst_252 : f32 to vector<4x8x15xf32>
    %360 = arith.cmpf ogt, %358, %359 : vector<4x8x15xf32>
    %cst_253 = arith.constant 0.000000e+00 : f32
    %361 = vector.broadcast %cst_253 : f32 to vector<4x8x15xf32>
    %362 = arith.select %360, %357, %361 : vector<4x8x15xi1>, vector<4x8x15xf32>
    %363 = arith.maximumf %354, %357 : vector<4x8x15xf32>
    %364 = arith.maximumf %355, %362 : vector<4x8x15xf32>
    %365 = arith.maximumf %356, %358 : vector<4x8x15xf32>
    %366 = arith.cmpf oge, %364, %363 : vector<4x8x15xf32>
    %cst_254 = arith.constant 0.000000e+00 : f32
    %367 = vector.broadcast %cst_254 : f32 to vector<4x8x15xf32>
    %368 = arith.select %366, %365, %367 : vector<4x8x15xi1>, vector<4x8x15xf32>
    "tpu.trace_start"() <{level = 10 : i32, message = "chw,cwo->cho"}> : () -> ()
    %cst_255 = arith.constant dense<0.000000e+00> : vector<4x8x8xf32>
    %369 = tpu.matmul %368, %9, %cst_255 {dimension_numbers = #tpu.dot_dimension_numbers<[2], [1], [1], [2], [0, 0, 0, 1, 1, 2], [0], [0]>, precision = #tpu.contract_precision<fp32>} : vector<4x8x15xf32>, vector<4x15x8xf32>, vector<4x8x8xf32> -> vector<4x8x8xf32>
    "tpu.trace_stop"() : () -> ()
    %370 = arith.index_cast %c6_i32 : i32 to index
    %c0_256 = arith.constant 0 : index
    %c0_257 = arith.constant 0 : index
    %c0_258 = arith.constant 0 : index
    %371 = vector.load %arg4[%370, %c0_256, %c0_257, %c0_258] : memref<8x4x8x8xf32, #tpu.memory_space<vmem>>, vector<1x4x8x8xf32>
    %372 = vector.shape_cast %371 : vector<1x4x8x8xf32> to vector<4x8x8xf32>
    %373 = vector.shape_cast %369 : vector<4x8x8xf32> to vector<1x4x8x8xf32>
    tpu.vector_store %arg4[%370, %c0_256, %c0_257, %c0_258], %373 {strides = array<i32>} : memref<8x4x8x8xf32, #tpu.memory_space<vmem>>, vector<1x4x8x8xf32>,
    %c7_i32 = arith.constant 7 : i32
    %374 = arith.index_cast %c7_i32 : i32 to index
    %c0_259 = arith.constant 0 : index
    %c0_260 = arith.constant 0 : index
    %c0_261 = arith.constant 0 : index
    %375 = vector.load %arg3[%374, %c0_259, %c0_260, %c0_261] : memref<8x4x16x16xf32, #tpu.memory_space<vmem>>, vector<1x4x16x16xf32>
    %376 = vector.shape_cast %375 : vector<1x4x16x16xf32> to vector<4x16x16xf32>
    %c0_262 = arith.constant 0 : index
    %c0_263 = arith.constant 0 : index
    %c0_264 = arith.constant 0 : index
    %377 = vector.load %arg6[%c0_262, %c0_263, %c0_264] : memref<4x16x16xf32, #tpu.memory_space<vmem>>, vector<4x16x16xf32>
    tpu.vector_store %arg6[%c0_262, %c0_263, %c0_264], %376 {strides = array<i32>} : memref<4x16x16xf32, #tpu.memory_space<vmem>>, vector<4x16x16xf32>,
    %c0_265 = arith.constant 0 : index
    %c0_266 = arith.constant 0 : index
    %c0_267 = arith.constant 0 : index
    %378 = vector.load %arg5[%c0_265, %c0_266, %c0_267] : memref<4x16x16xf32, #tpu.memory_space<vmem>>, vector<4x16x16xf32>
    %379 = arith.addf %378, %376 : vector<4x16x16xf32>
    %c0_268 = arith.constant 0 : index
    %c0_269 = arith.constant 0 : index
    %c0_270 = arith.constant 0 : index
    %380 = vector.load %arg5[%c0_268, %c0_269, %c0_270] : memref<4x16x16xf32, #tpu.memory_space<vmem>>, vector<4x16x16xf32>
    tpu.vector_store %arg5[%c0_268, %c0_269, %c0_270], %379 {strides = array<i32>} : memref<4x16x16xf32, #tpu.memory_space<vmem>>, vector<4x16x16xf32>,
    %c0_271 = arith.constant 0 : index
    %c0_272 = arith.constant 0 : index
    %c0_273 = arith.constant 0 : index
    %381 = tpu.strided_load %arg5[%c0_271, %c0_272, %c0_273] {strides = array<i32: 1, 2, 1>} : memref<4x16x16xf32, #tpu.memory_space<vmem>>, vector<4x8x16xf32>
    %c0_274 = arith.constant 0 : index
    %c0_275 = arith.constant 0 : index
    %c0_276 = arith.constant 0 : index
    %382 = tpu.strided_load %arg6[%c0_274, %c0_275, %c0_276] {strides = array<i32: 1, 2, 1>} : memref<4x16x16xf32, #tpu.memory_space<vmem>>, vector<4x8x16xf32>
    %383 = vector.extract_strided_slice %381 {offsets = [0, 0, 0], sizes = [4, 8, 15], strides = [1, 1, 1]} : vector<4x8x16xf32> to vector<4x8x15xf32>
    %384 = vector.extract_strided_slice %382 {offsets = [0, 0, 0], sizes = [4, 8, 15], strides = [1, 1, 1]} : vector<4x8x16xf32> to vector<4x8x15xf32>
    %cst_277 = arith.constant 0.000000e+00 : f32
    %385 = vector.broadcast %cst_277 : f32 to vector<4x8x15xf32>
    %386 = arith.cmpf ogt, %384, %385 : vector<4x8x15xf32>
    %cst_278 = arith.constant 0.000000e+00 : f32
    %387 = vector.broadcast %cst_278 : f32 to vector<4x8x15xf32>
    %388 = arith.select %386, %383, %387 : vector<4x8x15xi1>, vector<4x8x15xf32>
    %389 = vector.extract_strided_slice %381 {offsets = [0, 0, 1], sizes = [4, 8, 15], strides = [1, 1, 1]} : vector<4x8x16xf32> to vector<4x8x15xf32>
    %390 = vector.extract_strided_slice %382 {offsets = [0, 0, 1], sizes = [4, 8, 15], strides = [1, 1, 1]} : vector<4x8x16xf32> to vector<4x8x15xf32>
    %cst_279 = arith.constant 0.000000e+00 : f32
    %391 = vector.broadcast %cst_279 : f32 to vector<4x8x15xf32>
    %392 = arith.cmpf ogt, %390, %391 : vector<4x8x15xf32>
    %cst_280 = arith.constant 0.000000e+00 : f32
    %393 = vector.broadcast %cst_280 : f32 to vector<4x8x15xf32>
    %394 = arith.select %392, %389, %393 : vector<4x8x15xi1>, vector<4x8x15xf32>
    %395 = arith.maximumf %383, %389 : vector<4x8x15xf32>
    %396 = arith.maximumf %388, %394 : vector<4x8x15xf32>
    %397 = arith.maximumf %384, %390 : vector<4x8x15xf32>
    %c0_281 = arith.constant 0 : index
    %c1_282 = arith.constant 1 : index
    %c0_283 = arith.constant 0 : index
    %398 = tpu.strided_load %arg5[%c0_281, %c1_282, %c0_283] {strides = array<i32: 1, 2, 1>} : memref<4x16x16xf32, #tpu.memory_space<vmem>>, vector<4x8x16xf32>
    %c0_284 = arith.constant 0 : index
    %c1_285 = arith.constant 1 : index
    %c0_286 = arith.constant 0 : index
    %399 = tpu.strided_load %arg6[%c0_284, %c1_285, %c0_286] {strides = array<i32: 1, 2, 1>} : memref<4x16x16xf32, #tpu.memory_space<vmem>>, vector<4x8x16xf32>
    %400 = vector.extract_strided_slice %398 {offsets = [0, 0, 0], sizes = [4, 8, 15], strides = [1, 1, 1]} : vector<4x8x16xf32> to vector<4x8x15xf32>
    %401 = vector.extract_strided_slice %399 {offsets = [0, 0, 0], sizes = [4, 8, 15], strides = [1, 1, 1]} : vector<4x8x16xf32> to vector<4x8x15xf32>
    %cst_287 = arith.constant 0.000000e+00 : f32
    %402 = vector.broadcast %cst_287 : f32 to vector<4x8x15xf32>
    %403 = arith.cmpf ogt, %401, %402 : vector<4x8x15xf32>
    %cst_288 = arith.constant 0.000000e+00 : f32
    %404 = vector.broadcast %cst_288 : f32 to vector<4x8x15xf32>
    %405 = arith.select %403, %400, %404 : vector<4x8x15xi1>, vector<4x8x15xf32>
    %406 = arith.maximumf %395, %400 : vector<4x8x15xf32>
    %407 = arith.maximumf %396, %405 : vector<4x8x15xf32>
    %408 = arith.maximumf %397, %401 : vector<4x8x15xf32>
    %409 = vector.extract_strided_slice %398 {offsets = [0, 0, 1], sizes = [4, 8, 15], strides = [1, 1, 1]} : vector<4x8x16xf32> to vector<4x8x15xf32>
    %410 = vector.extract_strided_slice %399 {offsets = [0, 0, 1], sizes = [4, 8, 15], strides = [1, 1, 1]} : vector<4x8x16xf32> to vector<4x8x15xf32>
    %cst_289 = arith.constant 0.000000e+00 : f32
    %411 = vector.broadcast %cst_289 : f32 to vector<4x8x15xf32>
    %412 = arith.cmpf ogt, %410, %411 : vector<4x8x15xf32>
    %cst_290 = arith.constant 0.000000e+00 : f32
    %413 = vector.broadcast %cst_290 : f32 to vector<4x8x15xf32>
    %414 = arith.select %412, %409, %413 : vector<4x8x15xi1>, vector<4x8x15xf32>
    %415 = arith.maximumf %406, %409 : vector<4x8x15xf32>
    %416 = arith.maximumf %407, %414 : vector<4x8x15xf32>
    %417 = arith.maximumf %408, %410 : vector<4x8x15xf32>
    %418 = arith.cmpf oge, %416, %415 : vector<4x8x15xf32>
    %cst_291 = arith.constant 0.000000e+00 : f32
    %419 = vector.broadcast %cst_291 : f32 to vector<4x8x15xf32>
    %420 = arith.select %418, %417, %419 : vector<4x8x15xi1>, vector<4x8x15xf32>
    "tpu.trace_start"() <{level = 10 : i32, message = "chw,cwo->cho"}> : () -> ()
    %cst_292 = arith.constant dense<0.000000e+00> : vector<4x8x8xf32>
    %421 = tpu.matmul %420, %9, %cst_292 {dimension_numbers = #tpu.dot_dimension_numbers<[2], [1], [1], [2], [0, 0, 0, 1, 1, 2], [0], [0]>, precision = #tpu.contract_precision<fp32>} : vector<4x8x15xf32>, vector<4x15x8xf32>, vector<4x8x8xf32> -> vector<4x8x8xf32>
    "tpu.trace_stop"() : () -> ()
    %422 = arith.index_cast %c7_i32 : i32 to index
    %c0_293 = arith.constant 0 : index
    %c0_294 = arith.constant 0 : index
    %c0_295 = arith.constant 0 : index
    %423 = vector.load %arg4[%422, %c0_293, %c0_294, %c0_295] : memref<8x4x8x8xf32, #tpu.memory_space<vmem>>, vector<1x4x8x8xf32>
    %424 = vector.shape_cast %423 : vector<1x4x8x8xf32> to vector<4x8x8xf32>
    %425 = vector.shape_cast %421 : vector<4x8x8xf32> to vector<1x4x8x8xf32>
    tpu.vector_store %arg4[%422, %c0_293, %c0_294, %c0_295], %425 {strides = array<i32>} : memref<8x4x8x8xf32, #tpu.memory_space<vmem>>, vector<1x4x8x8xf32>,
    %c8_i32 = arith.constant 8 : i32
    return
  }
  func.func @transform_0(%arg0: i32, %arg1: i32, %arg2: i32) -> (i32, i32, i32, i32) {
    %c0_i32 = arith.constant 0 : i32
    %c0_i32_0 = arith.constant 0 : i32
    return %arg2, %arg0, %arg1, %c0_i32 : i32, i32, i32, i32
  }
  func.func @transform_1(%arg0: i32, %arg1: i32, %arg2: i32) -> (i32, i32, i32, i32) {
    %c0_i32 = arith.constant 0 : i32
    %c0_i32_0 = arith.constant 0 : i32
    return %arg2, %arg0, %arg1, %c0_i32 : i32, i32, i32, i32
  }
}

</mosaic_0001>

<bundles_post_ra>
// kernel: tpu_custom_call.1
= control target key start
LH: loop header
LB: loop body
LE: loop exit
PB: predicated region body
PF: predicated region fallthrough
CT: control target
= control target key end

     0   :  { %6 = vsyncpa [#allocation5], 0  ;;  %s22098_s0 = inlined_call_operand.hbm [shape: f32[8,4,16,16], index: 0, kind: input, shape index: {}]   ;;  %s22099_s1 = inlined_call_operand.hbm [shape: f32[8,4,8,8], index: 1, kind: output, shape index: {}]  }
   0x1   :  { %7 = vsyncpa [#allocation6], 0  ;;  %s18794_s6 = smov [#allocation4]  }
   0x2   :  { %s13_s7 = sshll.u32 %s18794_s6, 4  ;;  %s14_s7 = int_to_ptr.vmem [resolvable:$true] %s13_s7 }
   0x3   :  { %s18758_s8 = scalar_lea.vmem %s14_s7, 8192  ;;  %p18763_p1 = scmp.lt.s32.totalorder %s14_s7, %s14_s7 }
   0x4   :  { %p18759_p0 = scmp.ne.s32.totalorder %s14_s7, %s18758_s8  ;;  %p18764_p2 = scmp.lt.s32.totalorder %s18758_s8, %s18758_s8 }
   0x6   :  { %p18765_p3 = por %p18764_p2, %p18763_p1 }
   0x8   :  { %p18766_p4 = pnand %p18765_p3, %p18759_p0 }
   0xa   :  { %18769 = shalt.err (!%p18766_p4)
}
   0xb   :  { %s18795_s9 = smov 128   ;;  %s18796_s10 = smov 8  }
   0xc   :  { %19 = dma.hbm_to_vmem [thread:$0]  %s22098_s0, 8192, %s14_s7, [#allocation5], %s18795_s9, %s18795_s9, %s18796_s10  }
   0xd   :  { %18790 = dma.done.wait [#allocation5], 8192  }
   0xe   :  { %18791 = vsyncadd [#allocation5], 4294959104  ;;  %vm27_vm0 = vcmask 130048   ;;  %v22102_v0 = vmov 0.0   ;;  %v36_v1 = vlaneseq  ;;  %v48_v6 = vld [vmem:[#allocation4] sm:$0xff]  ;;  %v49_v7 = vld [vmem:[#allocation4 + $0x8] sm:$0xff] }
   0xf   :  { %28 = vst.msk [vmem:[#allocation2] sm:$0xff] %vm27_vm0, %v22102_v0  ;;  %29 = vst.msk [vmem:[#allocation2 + $0x8] sm:$0xff] %vm27_vm0, %v22102_v0  ;;  %17389 = vmatprep.subr.mxu1 %v22102_v0  ;;  %17382 = vmatprep.subr.mxu0 %v22102_v0  ;;  %v50_v8 = vld [vmem:[#allocation4 + $0x10] sm:$0xff]  ;;  %v51_v11 = vld [vmem:[#allocation4 + $0x18] sm:$0xff]  ;;  %vm279_vm2 = vcmask 1046528   ;;  %s18798_s0 = smov 127  }
  0x10   :  { %30 = vst.msk [vmem:[#allocation2 + $0x10] sm:$0xff] %vm27_vm0, %v22102_v0  ;;  %31 = vst.msk [vmem:[#allocation2 + $0x18] sm:$0xff] %vm27_vm0, %v22102_v0  ;;  %v37_v2 = vshrl.u32 %v36_v1, 7  ;;  %v40_v3 = vand.u32 127, %v36_v1  ;;  %v52_v17 = vld [vmem:[#allocation4 + $0x20] sm:$0xff]  ;;  %v53_v21 = vld [vmem:[#allocation4 + $0x28] sm:$0xff] }
  0x11   :  { %32 = vst.msk [vmem:[#allocation2 + $0x20] sm:$0xff] %vm27_vm0, %v22102_v0  ;;  %33 = vst.msk [vmem:[#allocation2 + $0x28] sm:$0xff] %vm27_vm0, %v22102_v0  ;;  %v54_v28 = vld [vmem:[#allocation4 + $0x30] sm:$0xff]  ;;  %v55_v29 = vld [vmem:[#allocation4 + $0x38] sm:$0xff]  ;;  %vm18799_vm7 = vmmov 0   ;;  %s18801_s13 = smov [#allocation7]  }
  0x12   :  { %34 = vst.msk [vmem:[#allocation2 + $0x30] sm:$0xff] %vm27_vm0, %v22102_v0  ;;  %35 = vst.msk [vmem:[#allocation2 + $0x38] sm:$0xff] %vm27_vm0, %v22102_v0  ;;  %v38_v4 = vadd.s32 8, %v37_v2  ;;  %v41_v5 = vmul.u32 2, %v40_v3  ;;  %v2134_v36 = vld [vmem:[#allocation4 + $0x40] sm:$0xff]  ;;  %v2135_v37 = vld [vmem:[#allocation4 + $0x48] sm:$0xff]  ;;  %17393 = vmatprep.mubr.msk.f32.mxu1 %vm18799_vm7, %v22102_v0  ;;  %17386 = vmatprep.mubr.msk.f32.mxu0 %vm18799_vm7, %v22102_v0 }
  0x13   :  { %57 = vst.msk [vmem:[#allocation3] sm:$0xff] %vm27_vm0, %v48_v6  ;;  %58 = vst.msk [vmem:[#allocation3 + $0x8] sm:$0xff] %vm27_vm0, %v49_v7  ;;  %v2136_v38 = vld [vmem:[#allocation4 + $0x50] sm:$0xff]  ;;  %v18871_v39 = vld [vmem:[#allocation4 + $0x58] sm:$0xff]  ;;  %s16600_s14 = sshll.u32 %s18801_s13, 4  ;;  %s16601_s14 = int_to_ptr.vmem [resolvable:$true] %s16600_s14 }
  0x14   :  { %vm43_vm1 = vcmp.eq.s32.totalorder %v38_v4, %v41_v5  ;;  %59 = vst.msk [vmem:[#allocation3 + $0x10] sm:$0xff] %vm27_vm0, %v50_v8  ;;  %60 = vst.msk [vmem:[#allocation3 + $0x18] sm:$0xff] %vm27_vm0, %v51_v11  ;;  %vm18850_vm3 = vcmp.eq.s32.totalorder %v37_v2, %v41_v5  ;;  %v2138_v49 = vld [vmem:[#allocation4 + $0x60] sm:$0xff]  ;;  %v2139_v51 = vld [vmem:[#allocation4 + $0x68] sm:$0xff]  ;;  %s18770_s15 = scalar_lea.vmem %s16601_s14, 4096  ;;  %p18775_p6 = scmp.lt.s32.totalorder %s16601_s14, %s16601_s14 }
  0x15   :  { %v18840_v12 = vsel %vm43_vm1, 1.0, %v22102_v0  ;;  %61 = vst.msk [vmem:[#allocation3 + $0x20] sm:$0xff] %vm27_vm0, %v52_v17  ;;  %62 = vst.msk [vmem:[#allocation3 + $0x28] sm:$0xff] %vm27_vm0, %v53_v21  ;;  %v16612_v31 = vsel %vm18850_vm3, 1.0, %v22102_v0  ;;  %v2140_v52 = vld [vmem:[#allocation4 + $0x70] sm:$0xff]  ;;  %v2141_v53 = vld [vmem:[#allocation4 + $0x78] sm:$0xff]  ;;  %p18771_p5 = scmp.ne.s32.totalorder %s16601_s14, %s18770_s15  ;;  %p18776_p7 = scmp.lt.s32.totalorder %s18770_s15, %s18770_s15 }
  0x16   :  { %v65_v9 = vld [vmem:[#allocation2] sm:$0xff]  ;;  %v66_v10 = vld [vmem:[#allocation2 + $0x8] sm:$0xff]  ;;  %v281_v18 = vsel %vm279_vm2, %v18840_v12, 0  ;;  %17383 = vmatpush3.msk.msra.mxu0 %vm279_vm2, %v18840_v12  ;;  %63 = vst.msk [vmem:[#allocation3 + $0x30] sm:$0xff] %vm27_vm0, %v54_v28  ;;  %64 = vst.msk [vmem:[#allocation3 + $0x38] sm:$0xff] %vm27_vm0, %v55_v29  ;;  %v18875_v41 = vsub.f32 %v16612_v31, %v16612_v31 }
  0x17   :  { %v73_v13 = vadd.f32 %v65_v9, %v48_v6  ;;  %v74_v14 = vadd.f32 %v66_v10, %v49_v7  ;;  %v67_v15 = vld [vmem:[#allocation2 + $0x10] sm:$0xff]  ;;  %v68_v16 = vld [vmem:[#allocation2 + $0x18] sm:$0xff]  ;;  %v18848_v24 = vsub.f32 %v281_v18, %v281_v18  ;;  %17384 = vmatprep.subr.mxu0 %v22102_v0  ;;  %v18912_v56 = vld [vmem:[#allocation4 + $0x80] sm:$0xff]  ;;  %p18777_p8 = por %p18776_p7, %p18775_p6 }
  0x18   :  { %v75_v19 = vadd.f32 %v67_v15, %v50_v8  ;;  %v76_v20 = vadd.f32 %v68_v16, %v51_v11  ;;  %v69_v22 = vld [vmem:[#allocation2 + $0x20] sm:$0xff]  ;;  %v70_v23 = vld [vmem:[#allocation2 + $0x28] sm:$0xff]  ;;  %v18901_v50 = vand.u32 4294901760, %v18875_v41  ;;  %v18926_v2 = vld [vmem:[#allocation4 + $0x90] sm:$0xff] }
  0x19   :  { %81 = vst.msk [vmem:[#allocation2] sm:$0xff] %vm27_vm0, %v73_v13  ;;  %82 = vst.msk [vmem:[#allocation2 + $0x8] sm:$0xff] %vm27_vm0, %v74_v14  ;;  %v77_v26 = vadd.f32 %v69_v22, %v52_v17  ;;  %v78_v27 = vadd.f32 %v70_v23, %v53_v21  ;;  %v71_v30 = vld [vmem:[#allocation2 + $0x30] sm:$0xff]  ;;  %v72_v32 = vld [vmem:[#allocation2 + $0x38] sm:$0xff]  ;;  %v18866_v34 = vand.u32 4294901760, %v18848_v24  ;;  %p18778_p9 = pnand %p18777_p8, %p18771_p5 }
  0x1a   :  { %83 = vst.msk [vmem:[#allocation2 + $0x10] sm:$0xff] %vm27_vm0, %v75_v19  ;;  %84 = vst.msk [vmem:[#allocation2 + $0x18] sm:$0xff] %vm27_vm0, %v76_v20  ;;  %v79_v33 = vadd.f32 %v71_v30, %v54_v28  ;;  %v80_v35 = vadd.f32 %v72_v32, %v55_v29  ;;  %v18877_v42 = vld [vmem:[#allocation3] ss:$2 sm:$0xff]  ;;  %v18879_v43 = vld [vmem:[#allocation3 + $0x1] ss:$2 sm:$0xff]  ;;  %v399_v3 = vsub.f32 %v18875_v41, %v18901_v50 }
  0x1b   :  { %85 = vst.msk [vmem:[#allocation2 + $0x20] sm:$0xff] %vm27_vm0, %v77_v26  ;;  %86 = vst.msk [vmem:[#allocation2 + $0x28] sm:$0xff] %vm27_vm0, %v78_v27  ;;  %v392_v40 = vsub.f32 %v18848_v24, %v18866_v34  ;;  %155 = vrot.lane.b32.xlu1 %v18877_v42, %s18798_s0  ;;  %v18884_v44 = vld [vmem:[#allocation3 + $0x10] ss:$2 sm:$0xff]  ;;  %v18886_v45 = vld [vmem:[#allocation3 + $0x11] ss:$2 sm:$0xff] }
  0x1c   :  { %87 = vst.msk [vmem:[#allocation2 + $0x30] sm:$0xff] %vm27_vm0, %v79_v33  ;;  %88 = vst.msk [vmem:[#allocation2 + $0x38] sm:$0xff] %vm27_vm0, %v80_v35  ;;  %vm103_vm4 = vcmp.gt.f32.partialorder %v18877_v42, 0.0  ;;  %vm187_vm5 = vcmp.gt.f32.partialorder %v18879_v43, 0.0  ;;  %v18914_v57 = vld [vmem:[#allocation4 + $0x88] sm:$0xff]  ;;  %vm104_vm6 = vcmp.gt.f32.partialorder %v18884_v44, 0.0 }
  0x1d   :  { %2142 = vst.msk [vmem:[#allocation3] sm:$0xff] %vm27_vm0, %v2134_v36  ;;  %2143 = vst.msk [vmem:[#allocation3 + $0x8] sm:$0xff] %vm27_vm0, %v2135_v37  ;;  %v18894_v46 = vand.u32 4294901760, %v392_v40  ;;  %v18917_v58 = vld [vmem:[#allocation3 + $0x20] ss:$2 sm:$0xff]  ;;  %v18942_v8 = vld [vmem:[#allocation4 + $0x98] sm:$0xff] }
  0x1e   :  { %2144 = vst.msk [vmem:[#allocation3 + $0x10] sm:$0xff] %vm27_vm0, %v2136_v38  ;;  %2145 = vst.msk [vmem:[#allocation3 + $0x18] sm:$0xff] %vm27_vm0, %v18871_v39  ;;  %v18919_v59 = vld [vmem:[#allocation3 + $0x21] ss:$2 sm:$0xff]  ;;  %v18937_v5 = vld [vmem:[#allocation3 + $0x30] ss:$2 sm:$0xff] }
  0x1f   :  { %17390 = vmatpush3.msra.mxu1 %v18894_v46  ;;  %2146 = vst.msk [vmem:[#allocation3 + $0x20] sm:$0xff] %vm27_vm0, %v2138_v49  ;;  %2147 = vst.msk [vmem:[#allocation3 + $0x28] sm:$0xff] %vm27_vm0, %v2139_v51  ;;  %v18939_v6 = vld [vmem:[#allocation3 + $0x31] ss:$2 sm:$0xff]  ;;  %v18974_v22 = vand.u32 4294901760, %v399_v3  ;;  %v18982_v29 = vld [vmem:[#allocation4 + $0xa0] sm:$0xff] }
  0x20   :  { %v18896_v47 = vld [vmem:[#allocation2] ss:$2 sm:$0xff]  ;;  %v18898_v48 = vld [vmem:[#allocation2 + $0x1] ss:$2 sm:$0xff]  ;;  %17391 = vmatprep.subr.mxu1 %v22102_v0  ;;  %22215 = vst [vmem:[#allocation10_spill] sm:$0xff] %v18939_v6  ;;  %2148 = vst.msk [vmem:[#allocation3 + $0x30] sm:$0xff] %vm27_vm0, %v2140_v52 }
  0x21   :  { %115 = vrot.lane.b32.xlu0 %v18896_v47, %s18798_s0  ;;  %211 = vrot.lane.b32.xlu1 %v18898_v48, %s18798_s0  ;;  %v18909_v54 = vsel %vm103_vm4, %v18896_v47, 0.0  ;;  %v2150_v55 = vld [vmem:[#allocation2] sm:$0xff]  ;;  %v2151_v60 = vld [vmem:[#allocation2 + $0x8] sm:$0xff]  ;;  %v18921_v62 = vld [vmem:[#allocation2 + $0x10] ss:$2 sm:$0xff]  ;;  %v18935_v4 = vsel %vm187_vm5, %v18898_v48, 0.0 }
  0x22   :  { %v2158_v61 = vadd.f32 %v2150_v55, %v2134_v36  ;;  %v2159_v63 = vadd.f32 %v2151_v60, %v2135_v37  ;;  %v2152_v1 = vld [vmem:[#allocation2 + $0x10] sm:$0xff]  ;;  %2149 = vst.msk [vmem:[#allocation3 + $0x38] sm:$0xff] %vm27_vm0, %v2141_v53  ;;  %v18958_v13 = vsel %vm104_vm6, %v18921_v62, 0.0  ;;  %v2153_v14 = vld [vmem:[#allocation2 + $0x18] sm:$0xff]  ;;  %v18967_v16 = vld [vmem:[#allocation2 + $0x20] ss:$2 sm:$0xff]  ;;  %17392 = vmatpush3.msra.mxu1 %v18974_v22 }
  0x23   :  { %v2160_v7 = vadd.f32 %v2152_v1, %v2136_v38  ;;  %v18946_v9 = vld [vmem:[#allocation2 + $0x11] ss:$2 sm:$0xff]  ;;  %v18969_v17 = vld [vmem:[#allocation2 + $0x21] ss:$2 sm:$0xff]  ;;  %v2161_v18 = vadd.f32 %v2153_v14, %v18871_v39  ;;  %v18986_v30 = vld [vmem:[#allocation2 + $0x30] ss:$2 sm:$0xff]  ;;  %17403 = vmatprep.subr.mxu1 %v22102_v0 }
  0x24   :  { %2166 = vst.msk [vmem:[#allocation2] sm:$0xff] %vm27_vm0, %v2158_v61  ;;  %2167 = vst.msk [vmem:[#allocation2 + $0x8] sm:$0xff] %vm27_vm0, %v2159_v63  ;;  %v18949_v10 = vld [vmem:[#allocation3] ss:$2 sm:$0xff]  ;;  %v18951_v11 = vld [vmem:[#allocation3 + $0x1] ss:$2 sm:$0xff] }
  0x25   :  { %135 = vrot.lane.b32.xlu0 %v18909_v54, %s18798_s0  ;;  %251 = vrot.lane.b32.xlu1 %v18879_v43, %s18798_s0  ;;  %22216 = vst [vmem:[#allocation11_spill] sm:$0xff] %v18951_v11  ;;  %2168 = vst.msk [vmem:[#allocation2 + $0x10] sm:$0xff] %vm27_vm0, %v2160_v7  ;;  %v18961_v15 = vld [vmem:[#allocation3 + $0x10] ss:$2 sm:$0xff]  ;;  %v18972_v19 = vld [vmem:[#allocation3 + $0x11] ss:$2 sm:$0xff] }
  0x26   :  { %22217 = vst [vmem:[#allocation12_spill] sm:$0xff] %v18961_v15  ;;  %4208 = vst.msk [vmem:[#allocation3] sm:$0xff] %vm27_vm0, %v18912_v56  ;;  %v2154_v20 = vld [vmem:[#allocation2 + $0x20] sm:$0xff]  ;;  %v2155_v21 = vld [vmem:[#allocation2 + $0x28] sm:$0xff]  ;;  %vm188_vm8 = vcmp.gt.f32.partialorder %v18886_v45, 0.0  ;;  %vm105_vm9 = vcmp.gt.f32.partialorder %v18917_v58, 0.0 }
  0x27   :  { %4209 = vst.msk [vmem:[#allocation3 + $0x8] sm:$0xff] %vm27_vm0, %v18914_v57  ;;  %22218 = vst [vmem:[#allocation13_spill] sm:$0xff] %v18972_v19  ;;  %v2162_v23 = vadd.f32 %v2154_v20, %v2138_v49  ;;  %v2163_v26 = vadd.f32 %v2155_v21, %v2139_v51  ;;  %v2156_v27 = vld [vmem:[#allocation2 + $0x30] sm:$0xff]  ;;  %v2157_v28 = vld [vmem:[#allocation2 + $0x38] sm:$0xff]  ;;  %v22100_v49 = vmov 1.0   ;;  %vm189_vm10 = vcmp.gt.f32.partialorder %v18919_v59, 0.0 }
  0x28   :  { %4210 = vst.msk [vmem:[#allocation3 + $0x10] sm:$0xff] %vm27_vm0, %v18926_v2  ;;  %4211 = vst.msk [vmem:[#allocation3 + $0x18] sm:$0xff] %vm27_vm0, %v18942_v8  ;;  %v18988_v31 = vld [vmem:[#allocation2 + $0x31] ss:$2 sm:$0xff]  ;;  %v2164_v32 = vadd.f32 %v2156_v27, %v2140_v52  ;;  %v2165_v33 = vadd.f32 %v2157_v28, %v2141_v53  ;;  %v4205_v35 = vld [vmem:[#allocation4 + $0xa8] sm:$0xff]  ;;  %17385 = vmatpush3.msk.msra.mxu0 %vm18850_vm3, %v22100_v49  ;;  %vm106_vm11 = vcmp.gt.f32.partialorder %v18937_v5, 0.0 }
  0x29   :  { %231 = vrot.lane.b32.xlu0 %v18935_v4, %s18798_s0  ;;  %137 = vrot.lane.b32.xlu1 %v18958_v13, %s18798_s0  ;;  %22219 = vst [vmem:[#allocation14_spill] sm:$0xff] %v18988_v31  ;;  %2169 = vst.msk [vmem:[#allocation2 + $0x18] sm:$0xff] %vm27_vm0, %v2161_v18  ;;  %v18994_v36 = vld [vmem:[#allocation3 + $0x20] ss:$2 sm:$0xff]  ;;  %v18996_v37 = vld [vmem:[#allocation3 + $0x21] ss:$2 sm:$0xff] }
  0x2a   :  { %2170 = vst.msk [vmem:[#allocation2 + $0x20] sm:$0xff] %vm27_vm0, %v2162_v23  ;;  %2171 = vst.msk [vmem:[#allocation2 + $0x28] sm:$0xff] %vm27_vm0, %v2163_v26  ;;  %v4206_v38 = vld [vmem:[#allocation4 + $0xb0] sm:$0xff]  ;;  %v4207_v40 = vld [vmem:[#allocation4 + $0xb8] sm:$0xff]  ;;  %17396 = vmatprep.subr.mxu0 %v22102_v0  ;;  %v19055_v26 = vsel %vm105_vm9, %v18967_v16, 0.0  ;;  %vm190_vm12 = vcmp.gt.f32.partialorder %v18939_v6, 0.0 }
  0x2b   :  { %22220 = vst [vmem:[#allocation15_spill] sm:$0xff] %v18994_v36  ;;  %22221 = vst [vmem:[#allocation16_spill] sm:$0xff] %v18996_v37  ;;  %v4216_v39 = vld [vmem:[#allocation2] sm:$0xff]  ;;  %v6267_v60 = vld [vmem:[#allocation4 + $0xc8] sm:$0xff]  ;;  %vm2182_vm13 = vcmp.gt.f32.partialorder %v18949_v10, 0.0  ;;  %vm2258_vm14 = vcmp.gt.f32.partialorder %v18951_v11, 0.0 }
  0x2c   :  { %2172 = vst.msk [vmem:[#allocation2 + $0x30] sm:$0xff] %vm27_vm0, %v2164_v32  ;;  %2173 = vst.msk [vmem:[#allocation2 + $0x38] sm:$0xff] %vm27_vm0, %v2165_v33  ;;  %v6266_v51 = vld [vmem:[#allocation4 + $0xc0] sm:$0xff]  ;;  %v4224_v55 = vadd.f32 %v4216_v39, %v18912_v56  ;;  %v19021_v61 = vld [vmem:[#allocation3 + $0x30] ss:$2 sm:$0xff]  ;;  %vm2183_vm15 = vcmp.gt.f32.partialorder %v18961_v15, 0.0 }
  0x2d   :  { %4212 = vst.msk [vmem:[#allocation3 + $0x20] sm:$0xff] %vm27_vm0, %v18982_v29  ;;  %4213 = vst.msk [vmem:[#allocation3 + $0x28] sm:$0xff] %vm27_vm0, %v4205_v35  ;;  %117 = vrot.lane.b32.xlu0 %v18921_v62, %s18798_s0  ;;  %v19013_v52 = vld [vmem:[#allocation2] ss:$2 sm:$0xff]  ;;  %v19015_v53 = vld [vmem:[#allocation2 + $0x1] ss:$2 sm:$0xff]  ;;  %213 = vrot.lane.b32.xlu1 %v18946_v9, %s18798_s0 }
  0x2e   :  { %22222 = vst [vmem:[#allocation17_spill] sm:$0xff] %v19013_v52  ;;  %22223 = vst [vmem:[#allocation18_spill] sm:$0xff] %v19021_v61  ;;  %v19023_v63 = vld [vmem:[#allocation3 + $0x31] ss:$2 sm:$0xff]  ;;  %v4217_v1 = vld [vmem:[#allocation2 + $0x8] sm:$0xff]  ;;  %vm2259_vm1 = vcmp.gt.f32.partialorder %v18972_v19, 0.0 }
  0x2f   :  { %22224 = vst [vmem:[#allocation19_spill] sm:$0xff] %v19023_v63  ;;  %v4225_v3 = vadd.f32 %v4217_v1, %v18914_v57  ;;  %4232 = vst.msk [vmem:[#allocation2] sm:$0xff] %vm27_vm0, %v4224_v55  ;;  %v19028_v7 = vld [vmem:[#allocation3] ss:$2 sm:$0xff]  ;;  %v19030_v56 = vld [vmem:[#allocation3 + $0x1] ss:$2 sm:$0xff] }
  0x30   :  { %22225 = vst [vmem:[#allocation20_spill] sm:$0xff] %v19028_v7  ;;  %22226 = vst [vmem:[#allocation21_spill] sm:$0xff] %v19030_v56  ;;  %v4218_v14 = vld [vmem:[#allocation2 + $0x10] sm:$0xff]  ;;  %v4219_v21 = vld [vmem:[#allocation2 + $0x18] sm:$0xff]  ;;  %vm2184_vm4 = vcmp.gt.f32.partialorder %v18994_v36, 0.0  ;;  %vm2260_vm5 = vcmp.gt.f32.partialorder %v18996_v37, 0.0 }
  0x31   :  { %4214 = vst.msk [vmem:[#allocation3 + $0x30] sm:$0xff] %vm27_vm0, %v4206_v38  ;;  %4215 = vst.msk [vmem:[#allocation3 + $0x38] sm:$0xff] %vm27_vm0, %v4207_v40  ;;  %v4226_v18 = vadd.f32 %v4218_v14, %v18926_v2  ;;  %157 = vrot.lane.b32.xlu0 %v18884_v44, %s18798_s0  ;;  %v19040_v57 = vld [vmem:[#allocation2 + $0x10] ss:$2 sm:$0xff]  ;;  %v19042_v20 = vld [vmem:[#allocation2 + $0x11] ss:$2 sm:$0xff]  ;;  %253 = vrot.lane.b32.xlu1 %v18886_v45, %s18798_s0  ;;  %v4227_v23 = vadd.f32 %v4219_v21, %v18942_v8 }
  0x32   :  { %6274 = vst.msk [vmem:[#allocation3] sm:$0xff] %vm27_vm0, %v6266_v51  ;;  %6275 = vst.msk [vmem:[#allocation3 + $0x8] sm:$0xff] %vm27_vm0, %v6267_v60  ;;  %v19050_v2 = vsel %vm188_vm8, %v18946_v9, 0.0  ;;  %v4220_v27 = vld [vmem:[#allocation2 + $0x20] sm:$0xff]  ;;  %v4221_v28 = vld [vmem:[#allocation2 + $0x28] sm:$0xff]  ;;  %vm2185_vm6 = vcmp.gt.f32.partialorder %v19021_v61, 0.0 }
  0x33   :  { %22227 = vst [vmem:[#allocation22_spill] sm:$0xff] %v19040_v57  ;;  %22228 = vst [vmem:[#allocation23_spill] sm:$0xff] %v19042_v20  ;;  %v4222_v32 = vld [vmem:[#allocation2 + $0x30] sm:$0xff]  ;;  %v19060_v33 = vld [vmem:[#allocation2 + $0x20] ss:$2 sm:$0xff]  ;;  %v4228_v39 = vadd.f32 %v4220_v27, %v18982_v29  ;;  %v4229_v55 = vadd.f32 %v4221_v28, %v4205_v35  ;;  %vm2261_vm8 = vcmp.gt.f32.partialorder %v19023_v63, 0.0 }
  0x34   :  { %4233 = vst.msk [vmem:[#allocation2 + $0x8] sm:$0xff] %vm27_vm0, %v4225_v3  ;;  %4234 = vst.msk [vmem:[#allocation2 + $0x10] sm:$0xff] %vm27_vm0, %v4226_v18  ;;  %v4223_v1 = vld [vmem:[#allocation2 + $0x38] sm:$0xff]  ;;  %v4230_v8 = vadd.f32 %v4222_v32, %v4206_v38  ;;  %v19065_v3 = vld [vmem:[#allocation2 + $0x21] ss:$2 sm:$0xff]  ;;  %vm4248_vm9 = vcmp.gt.f32.partialorder %v19028_v7, 0.0 }
  0x35   :  { %4235 = vst.msk [vmem:[#allocation2 + $0x18] sm:$0xff] %vm27_vm0, %v4227_v23  ;;  %233 = vrot.lane.b32.xlu0 %v19050_v2, %s18798_s0  ;;  %22229 = vst [vmem:[#allocation24_spill] sm:$0xff] %v19060_v33  ;;  %139 = vrot.lane.b32.xlu1 %v19055_v26, %s18798_s0  ;;  %v19067_v14 = vld [vmem:[#allocation2 + $0x30] ss:$2 sm:$0xff]  ;;  %v19069_v18 = vld [vmem:[#allocation2 + $0x31] ss:$2 sm:$0xff]  ;;  %v4231_v21 = vadd.f32 %v4223_v1, %v4207_v40 }
  0x36   :  { %22230 = vst [vmem:[#allocation25_spill] sm:$0xff] %v19065_v3  ;;  %22231 = vst [vmem:[#allocation26_spill] sm:$0xff] %v19067_v14  ;;  %v6282_v29 = vld [vmem:[#allocation2] sm:$0xff]  ;;  %v19092_v40 = vsel %vm189_vm10, %v18969_v17, 0.0  ;;  %v6268_v32 = vld [vmem:[#allocation4 + $0xd0] sm:$0xff]  ;;  %vm4324_vm10 = vcmp.gt.f32.partialorder %v19030_v56, 0.0 }
  0x37   :  { %22232 = vst [vmem:[#allocation27_spill] sm:$0xff] %v19069_v18  ;;  %4236 = vst.msk [vmem:[#allocation2 + $0x20] sm:$0xff] %vm27_vm0, %v4228_v39  ;;  %v6290_v38 = vadd.f32 %v6282_v29, %v6266_v51  ;;  %v19094_v51 = vld [vmem:[#allocation3 + $0x10] ss:$2 sm:$0xff]  ;;  %v19099_v39 = vsel %vm106_vm11, %v18986_v30, 0.0 }
  0x38   :  { %4237 = vst.msk [vmem:[#allocation2 + $0x28] sm:$0xff] %vm27_vm0, %v4229_v55  ;;  %4238 = vst.msk [vmem:[#allocation2 + $0x30] sm:$0xff] %vm27_vm0, %v4230_v8  ;;  %v6269_v55 = vld [vmem:[#allocation4 + $0xd8] sm:$0xff]  ;;  %vm4249_vm11 = vcmp.gt.f32.partialorder %v19094_v51, 0.0 }
  0x39   :  { %4239 = vst.msk [vmem:[#allocation2 + $0x38] sm:$0xff] %vm27_vm0, %v4231_v21  ;;  %119 = vrot.lane.b32.xlu0 %v18967_v16, %s18798_s0  ;;  %215 = vrot.lane.b32.xlu1 %v18969_v17, %s18798_s0  ;;  %22235 = vst [vmem:[#allocation30_spill] sm:$0xff] %v19094_v51 }
  0x3b   :  { %v6283_v35 = vld [vmem:[#allocation2 + $0x8] sm:$0xff]  ;;  %v6284_v1 = vld [vmem:[#allocation2 + $0x10] sm:$0xff] }
  0x3c   :  { %v19077_v23 = vld [vmem:[#allocation2] ss:$2 sm:$0xff]  ;;  %v19079_v27 = vld [vmem:[#allocation2 + $0x1] ss:$2 sm:$0xff]  ;;  %v6291_v28 = vadd.f32 %v6283_v35, %v6267_v60  ;;  %v19096_v60 = vld [vmem:[#allocation3 + $0x11] ss:$2 sm:$0xff]  ;;  %v6292_v21 = vadd.f32 %v6284_v1, %v6268_v32 }
  0x3d   :  { %22233 = vst [vmem:[#allocation28_spill] sm:$0xff] %v19077_v23  ;;  %22234 = vst [vmem:[#allocation29_spill] sm:$0xff] %v19079_v27  ;;  %159 = vrot.lane.b32.xlu0 %v18917_v58, %s18798_s0  ;;  %255 = vrot.lane.b32.xlu1 %v18919_v59, %s18798_s0  ;;  %v6285_v8 = vld [vmem:[#allocation2 + $0x18] sm:$0xff]  ;;  %v19139_v1 = vld [vmem:[#allocation3 + $0x21] ss:$2 sm:$0xff] }
  0x3e   :  { %6298 = vst.msk [vmem:[#allocation2] sm:$0xff] %vm27_vm0, %v6290_v38  ;;  %6299 = vst.msk [vmem:[#allocation2 + $0x8] sm:$0xff] %vm27_vm0, %v6291_v28  ;;  %v19107_v29 = vld [vmem:[#allocation2 + $0x10] ss:$2 sm:$0xff]  ;;  %v19109_v35 = vld [vmem:[#allocation2 + $0x11] ss:$2 sm:$0xff]  ;;  %v6293_v38 = vadd.f32 %v6285_v8, %v6269_v55 }
  0x3f   :  { %22236 = vst [vmem:[#allocation31_spill] sm:$0xff] %v19096_v60  ;;  %6276 = vst.msk [vmem:[#allocation3 + $0x10] sm:$0xff] %vm27_vm0, %v6268_v32  ;;  %v19124_v28 = vsel %vm190_vm12, %v18988_v31, 0.0  ;;  %v19127_v32 = vsel %vm2182_vm13, %v19013_v52, 0.0  ;;  %v6270_v8 = vld [vmem:[#allocation4 + $0xe0] sm:$0xff]  ;;  %v6287_v49 = vld [vmem:[#allocation2 + $0x28] sm:$0xff] }
  0x40   :  { %6277 = vst.msk [vmem:[#allocation3 + $0x18] sm:$0xff] %vm27_vm0, %v6269_v55  ;;  %22237 = vst [vmem:[#allocation32_spill] sm:$0xff] %v19107_v29  ;;  %v19137_v55 = vld [vmem:[#allocation3 + $0x20] ss:$2 sm:$0xff]  ;;  %vm4325_vm12 = vcmp.gt.f32.partialorder %v19096_v60, 0.0 }
  0x41   :  { %235 = vrot.lane.b32.xlu0 %v19092_v40, %s18798_s0  ;;  %141 = vrot.lane.b32.xlu1 %v19099_v39, %s18798_s0  ;;  %22238 = vst [vmem:[#allocation33_spill] sm:$0xff] %v19109_v35  ;;  %6300 = vst.msk [vmem:[#allocation2 + $0x10] sm:$0xff] %vm27_vm0, %v6292_v21  ;;  %v6271_v21 = vld [vmem:[#allocation4 + $0xe8] sm:$0xff]  ;;  %vm4250_vm13 = vcmp.gt.f32.partialorder %v19137_v55, 0.0 }
  0x42   :  { %6301 = vst.msk [vmem:[#allocation2 + $0x18] sm:$0xff] %vm27_vm0, %v6293_v38  ;;  %22239 = vst [vmem:[#allocation34_spill] sm:$0xff] %v19124_v28  ;;  %v6286_v38 = vld [vmem:[#allocation2 + $0x20] sm:$0xff] }
  0x43   :  { %22240 = vst [vmem:[#allocation35_spill] sm:$0xff] %v19127_v32  ;;  %22241 = vst [vmem:[#allocation36_spill] sm:$0xff] %v19139_v1  ;;  %v6294_v0 = vadd.f32 %v6286_v38, %v6270_v8  ;;  %v6273_v38 = vld [vmem:[#allocation4 + $0xf8] sm:$0xff] }
  0x44   :  { %6278 = vst.msk [vmem:[#allocation3 + $0x20] sm:$0xff] %vm27_vm0, %v6270_v8  ;;  %6279 = vst.msk [vmem:[#allocation3 + $0x28] sm:$0xff] %vm27_vm0, %v6271_v21  ;;  %v19187_v8 = vld [vmem:[#allocation3 + $0x31] ss:$2 sm:$0xff] }
  0x45   :  { %121 = vrot.lane.b32.xlu0 %v18986_v30, %s18798_s0  ;;  %217 = vrot.lane.b32.xlu1 %v18988_v31, %s18798_s0  ;;  %v19158_v31 = vsel %vm2183_vm15, %v19040_v57, 0.0 }
  0x46   :  { %22243 = vst [vmem:[#allocation38_spill] sm:$0xff] %v19158_v31 }
  0x49   :  { %161 = vrot.lane.b32.xlu0 %v18937_v5, %s18798_s0  ;;  %257 = vrot.lane.b32.xlu1 %v18939_v6, %s18798_s0  ;;  %v6295_v6 = vadd.f32 %v6287_v49, %v6271_v21  ;;  %v19185_v49 = vld [vmem:[#allocation3 + $0x30] ss:$2 sm:$0xff] }
  0x4a   :  { %v6272_v21 = vld [vmem:[#allocation4 + $0xf0] sm:$0xff]  ;;  %6281 = vst.msk [vmem:[#allocation3 + $0x38] sm:$0xff] %vm27_vm0, %v6273_v38  ;;  %vm4251_vm15 = vcmp.gt.f32.partialorder %v19185_v49, 0.0 }
  0x4b   :  { %6280 = vst.msk [vmem:[#allocation3 + $0x30] sm:$0xff] %vm27_vm0, %v6272_v21 }
  0x4d   :  { %237 = vrot.lane.b32.xlu0 %v19124_v28, %s18798_s0  ;;  %2214 = vrot.lane.b32.xlu1 %v19127_v32, %s18798_s0  ;;  %v19149_v32 = vld [vmem:[#allocation2 + $0x21] ss:$2 sm:$0xff]  ;;  %v19154_v28 = vsel %vm2258_vm14, %v19015_v53, 0.0  ;;  %vm4326_vm14 = vcmp.gt.f32.partialorder %v19139_v1, 0.0 }
  0x4e   :  { %22242 = vst [vmem:[#allocation37_spill] sm:$0xff] %v19154_v28 }
  0x51   :  { %2194 = vrot.lane.b32.xlu0 %v19013_v52, %s18798_s0  ;;  %2282 = vrot.lane.b32.xlu1 %v19015_v53, %s18798_s0  ;;  %v19147_v52 = vld [vmem:[#allocation2 + $0x20] ss:$2 sm:$0xff] }
  0x52   :  { %6302 = vst.msk [vmem:[#allocation2 + $0x20] sm:$0xff] %vm27_vm0, %v6294_v0  ;;  %6303 = vst.msk [vmem:[#allocation2 + $0x28] sm:$0xff] %vm27_vm0, %v6295_v6  ;;  %v19176_v0 = vsel %vm2259_vm1, %v19042_v20, 0.0  ;;  %v19179_v6 = vsel %vm2184_vm4, %v19060_v33, 0.0  ;;  %vm275_vm1 = vcmask 121856  }
  0x53   :  { %22244 = vst [vmem:[#allocation39_spill] sm:$0xff] %v19176_v0  ;;  %22245 = vst [vmem:[#allocation40_spill] sm:$0xff] %v19179_v6 }
  0x55   :  { %2234 = vrot.lane.b32.xlu0 %v18949_v10, %s18798_s0  ;;  %2322 = vrot.lane.b32.xlu1 %v18951_v11, %s18798_s0 }
  0x59   :  { %2302 = vrot.lane.b32.xlu0 %v19154_v28, %s18798_s0  ;;  %2216 = vrot.lane.b32.xlu1 %v19158_v31, %s18798_s0 }
  0x5d   :  { %2196 = vrot.lane.b32.xlu0 %v19040_v57, %s18798_s0  ;;  %2284 = vrot.lane.b32.xlu1 %v19042_v20, %s18798_s0 }
  0x61   :  { %2236 = vrot.lane.b32.xlu0 %v18961_v15, %s18798_s0  ;;  %2324 = vrot.lane.b32.xlu1 %v18972_v19, %s18798_s0  ;;  %v6288_v15 = vld [vmem:[#allocation2 + $0x30] sm:$0xff]  ;;  %v6289_v19 = vld [vmem:[#allocation2 + $0x38] sm:$0xff] }
  0x62   :  { %v6296_v20 = vadd.f32 %v6288_v15, %v6272_v21  ;;  %v6297_v57 = vadd.f32 %v6289_v19, %v6273_v38  ;;  %v19208_v15 = vsel %vm2260_vm5, %v19065_v3, 0.0  ;;  %v19211_v21 = vsel %vm2185_vm6, %v19067_v14, 0.0  ;;  %v19235_v38 = vld [vmem:[#allocation3 + $0x1] ss:$2 sm:$0xff] }
  0x63   :  { %22247 = vst [vmem:[#allocation42_spill] sm:$0xff] %v19208_v15  ;;  %22248 = vst [vmem:[#allocation43_spill] sm:$0xff] %v19211_v21  ;;  %v19228_v19 = vsel %vm2261_vm8, %v19069_v18, 0.0  ;;  %vm4327_vm5 = vcmp.gt.f32.partialorder %v19187_v8, 0.0 }
  0x64   :  { %22249 = vst [vmem:[#allocation44_spill] sm:$0xff] %v19228_v19  ;;  %22252 = vst [vmem:[#allocation47_spill] sm:$0xff] %v19235_v38 }
  0x65   :  { %2304 = vrot.lane.b32.xlu0 %v19176_v0, %s18798_s0  ;;  %2218 = vrot.lane.b32.xlu1 %v19179_v6, %s18798_s0  ;;  %v19195_v6 = vld [vmem:[#allocation2 + $0x30] ss:$2 sm:$0xff]  ;;  %v19197_v0 = vld [vmem:[#allocation2 + $0x31] ss:$2 sm:$0xff] }
  0x66   :  { %22246 = vst [vmem:[#allocation41_spill] sm:$0xff] %v19195_v6  ;;  %6304 = vst.msk [vmem:[#allocation2 + $0x30] sm:$0xff] %vm27_vm0, %v6296_v20  ;;  %v19233_v20 = vld [vmem:[#allocation3] ss:$2 sm:$0xff] }
  0x67   :  { %6305 = vst.msk [vmem:[#allocation2 + $0x38] sm:$0xff] %vm27_vm0, %v6297_v57  ;;  %v19231_v57 = vsel %vm4248_vm9, %v19077_v23, 0.0  ;;  %22251 = vst [vmem:[#allocation46_spill] sm:$0xff] %v19233_v20  ;;  %vm6314_vm8 = vcmp.gt.f32.partialorder %v19233_v20, 0.0 }
  0x68   :  { %22250 = vst [vmem:[#allocation45_spill] sm:$0xff] %v19231_v57 }
  0x69   :  { %2198 = vrot.lane.b32.xlu0 %v19060_v33, %s18798_s0  ;;  %2286 = vrot.lane.b32.xlu1 %v19065_v3, %s18798_s0 }
  0x6d   :  { %2238 = vrot.lane.b32.xlu0 %v18994_v36, %s18798_s0  ;;  %2326 = vrot.lane.b32.xlu1 %v18996_v37, %s18798_s0  ;;  %v8348_v37 = vld [vmem:[#allocation2] sm:$0xff] }
  0x71   :  { %2306 = vrot.lane.b32.xlu0 %v19208_v15, %s18798_s0  ;;  %2220 = vrot.lane.b32.xlu1 %v19211_v21, %s18798_s0  ;;  %v8333_v21 = vld [vmem:[#allocation4 + $0x108] sm:$0xff] }
  0x72   :  { %8341 = vst.msk [vmem:[#allocation3 + $0x8] sm:$0xff] %vm27_vm0, %v8333_v21  ;;  %v19245_v15 = vld [vmem:[#allocation2 + $0x1] ss:$2 sm:$0xff] }
  0x73   :  { %22254 = vst [vmem:[#allocation49_spill] sm:$0xff] %v19245_v15 }
  0x75   :  { %2200 = vrot.lane.b32.xlu0 %v19067_v14, %s18798_s0  ;;  %2288 = vrot.lane.b32.xlu1 %v19069_v18, %s18798_s0  ;;  %v8332_v14 = vld [vmem:[#allocation4 + $0x100] sm:$0xff] }
  0x76   :  { %8340 = vst.msk [vmem:[#allocation3] sm:$0xff] %vm27_vm0, %v8332_v14  ;;  %v8356_v18 = vadd.f32 %v8348_v37, %v8332_v14  ;;  %v19260_v37 = vsel %vm4324_vm10, %v19079_v27, 0.0  ;;  %v10399_v14 = vld [vmem:[#allocation4 + $0x148] sm:$0xff]  ;;  %vm6390_vm10 = vcmp.gt.f32.partialorder %v19235_v38, 0.0 }
  0x77   :  { %22255 = vst [vmem:[#allocation50_spill] sm:$0xff] %v19260_v37 }
  0x79   :  { %2240 = vrot.lane.b32.xlu0 %v19021_v61, %s18798_s0  ;;  %2328 = vrot.lane.b32.xlu1 %v19023_v63, %s18798_s0  ;;  %v8349_v63 = vld [vmem:[#allocation2 + $0x8] sm:$0xff] }
  0x7a   :  { %v19243_v61 = vld [vmem:[#allocation2] ss:$2 sm:$0xff]  ;;  %v8357_v3 = vadd.f32 %v8349_v63, %v8333_v21  ;;  %v19263_v63 = vsel %vm4249_vm11, %v19107_v29, 0.0 }
  0x7b   :  { %22253 = vst [vmem:[#allocation48_spill] sm:$0xff] %v19243_v61  ;;  %8364 = vst.msk [vmem:[#allocation2] sm:$0xff] %vm27_vm0, %v8356_v18 }
  0x7c   :  { %8365 = vst.msk [vmem:[#allocation2 + $0x8] sm:$0xff] %vm27_vm0, %v8357_v3  ;;  %22256 = vst [vmem:[#allocation51_spill] sm:$0xff] %v19263_v63  ;;  %v10398_v3 = vld [vmem:[#allocation4 + $0x140] sm:$0xff] }
  0x7d   :  { %2308 = vrot.lane.b32.xlu0 %v19228_v19, %s18798_s0  ;;  %4280 = vrot.lane.b32.xlu1 %v19231_v57, %s18798_s0  ;;  %v8335_v57 = vld [vmem:[#allocation4 + $0x118] sm:$0xff]  ;;  %v8350_v19 = vld [vmem:[#allocation2 + $0x10] sm:$0xff]  ;;  %v19302_v33 = vld [vmem:[#allocation3] ss:$2 sm:$0xff] }
  0x7e   :  { %22263 = vst [vmem:[#allocation58_spill] sm:$0xff] %v19302_v33  ;;  %v19304_v31 = vld [vmem:[#allocation3 + $0x1] ss:$2 sm:$0xff] }
  0x7f   :  { %22264 = vst [vmem:[#allocation59_spill] sm:$0xff] %v19304_v31  ;;  %10406 = vst.msk [vmem:[#allocation3] sm:$0xff] %vm27_vm0, %v10398_v3 }
  0x80   :  { %10407 = vst.msk [vmem:[#allocation3 + $0x8] sm:$0xff] %vm27_vm0, %v10399_v14 }
  0x81   :  { %4260 = vrot.lane.b32.xlu0 %v19077_v23, %s18798_s0  ;;  %4348 = vrot.lane.b32.xlu1 %v19079_v27, %s18798_s0 }
  0x82   :  { %v10414_v18 = vld [vmem:[#allocation2] sm:$0xff] }
  0x83   :  { %v10415_v21 = vld [vmem:[#allocation2 + $0x8] sm:$0xff] }
  0x84   :  { %v10423_v23 = vadd.f32 %v10415_v21, %v10399_v14  ;;  %v19276_v27 = vld [vmem:[#allocation2 + $0x1] ss:$2 sm:$0xff]  ;;  %v19285_v21 = vld [vmem:[#allocation3 + $0x11] ss:$2 sm:$0xff]  ;;  %v19337_v14 = vsel %vm4251_vm15, %v19195_v6, 0.0 }
  0x85   :  { %4300 = vrot.lane.b32.xlu0 %v19028_v7, %s18798_s0  ;;  %4388 = vrot.lane.b32.xlu1 %v19030_v56, %s18798_s0  ;;  %v10422_v7 = vadd.f32 %v10414_v18, %v10398_v3  ;;  %v19274_v56 = vld [vmem:[#allocation2] ss:$2 sm:$0xff]  ;;  %22258 = vst [vmem:[#allocation53_spill] sm:$0xff] %v19276_v27  ;;  %v19283_v18 = vld [vmem:[#allocation3 + $0x10] ss:$2 sm:$0xff]  ;;  %22260 = vst [vmem:[#allocation55_spill] sm:$0xff] %v19285_v21 }
  0x86   :  { %22257 = vst [vmem:[#allocation52_spill] sm:$0xff] %v19274_v56  ;;  %10431 = vst.msk [vmem:[#allocation2 + $0x8] sm:$0xff] %vm27_vm0, %v10423_v23  ;;  %v19295_v23 = vld [vmem:[#allocation2 + $0x10] ss:$2 sm:$0xff]  ;;  %vm6315_vm11 = vcmp.gt.f32.partialorder %v19283_v18, 0.0 }
  0x87   :  { %10430 = vst.msk [vmem:[#allocation2] sm:$0xff] %vm27_vm0, %v10422_v7  ;;  %22259 = vst [vmem:[#allocation54_spill] sm:$0xff] %v19283_v18  ;;  %v19293_v7 = vsel %vm4250_vm13, %v19147_v52, 0.0  ;;  %vm6391_vm13 = vcmp.gt.f32.partialorder %v19285_v21, 0.0 }
  0x88   :  { %22261 = vst [vmem:[#allocation56_spill] sm:$0xff] %v19295_v23  ;;  %8343 = vst.msk [vmem:[#allocation3 + $0x18] sm:$0xff] %vm27_vm0, %v8335_v57 }
  0x89   :  { %4368 = vrot.lane.b32.xlu0 %v19260_v37, %s18798_s0  ;;  %4282 = vrot.lane.b32.xlu1 %v19263_v63, %s18798_s0  ;;  %v8334_v63 = vld [vmem:[#allocation4 + $0x110] sm:$0xff]  ;;  %22265 = vst [vmem:[#allocation60_spill] sm:$0xff] %v19337_v14 }
  0x8a   :  { %8342 = vst.msk [vmem:[#allocation3 + $0x10] sm:$0xff] %vm27_vm0, %v8334_v63  ;;  %v8358_v56 = vadd.f32 %v8350_v19, %v8334_v63 }
  0x8d   :  { %4262 = vrot.lane.b32.xlu0 %v19107_v29, %s18798_s0  ;;  %4350 = vrot.lane.b32.xlu1 %v19109_v35, %s18798_s0  ;;  %v156_v37 = vpop.permute.xlu1 %155  ;;  %v19290_v29 = vsel %vm4325_vm12, %v19109_v35, 0.0  ;;  %v19300_v35 = vld [vmem:[#allocation2 + $0x11] ss:$2 sm:$0xff] }
  0x8e   :  { %22262 = vst [vmem:[#allocation57_spill] sm:$0xff] %v19300_v35  ;;  %v167_v28 = vmax.f32 %v18877_v42, %v156_v37  ;;  %8366 = vst.msk [vmem:[#allocation2 + $0x10] sm:$0xff] %vm27_vm0, %v8358_v56 }
  0x90   :  { %v203_v19 = vmax.f32 %v167_v28, %v18879_v43  ;;  %v19327_v43 = vld [vmem:[#allocation4 + $0x150] sm:$0xff] }
  0x91   :  { %4302 = vrot.lane.b32.xlu0 %v19094_v51, %s18798_s0  ;;  %4390 = vrot.lane.b32.xlu1 %v19096_v60, %s18798_s0  ;;  %v8351_v51 = vld [vmem:[#allocation2 + $0x18] sm:$0xff] }
  0x92   :  { %v8359_v11 = vadd.f32 %v8351_v51, %v8335_v57 }
  0x93   :  { %v116_v27 = vpop.permute.xlu0 %115  ;;  %v212_v36 = vpop.permute.xlu1 %211 }
  0x94   :  { %v127_v60 = vmax.f32 %v18896_v47, %v116_v27  ;;  %8367 = vst.msk [vmem:[#allocation2 + $0x18] sm:$0xff] %vm27_vm0, %v8359_v11 }
  0x95   :  { %4370 = vrot.lane.b32.xlu0 %v19290_v29, %s18798_s0  ;;  %4284 = vrot.lane.b32.xlu1 %v19293_v7, %s18798_s0 }
  0x96   :  { %v195_v27 = vmax.f32 %v127_v60, %v18898_v48 }
  0x97   :  { %v136_v47 = vpop.permute.xlu0 %135  ;;  %v252_v42 = vpop.permute.xlu1 %251 }
  0x98   :  { %v147_v51 = vmax.f32 %v18909_v54, %v136_v47  ;;  %v223_v11 = vmax.f32 %v195_v27, %v212_v36  ;;  %v263_v48 = vmax.f32 %v203_v19, %v252_v42  ;;  %v19332_v54 = vsel %vm4326_vm14, %v19149_v32, 0.0  ;;  %v10416_v36 = vld [vmem:[#allocation2 + $0x10] sm:$0xff] }
  0x99   :  { %4264 = vrot.lane.b32.xlu0 %v19147_v52, %s18798_s0  ;;  %4352 = vrot.lane.b32.xlu1 %v19149_v32, %s18798_s0  ;;  %v10424_v19 = vadd.f32 %v10416_v36, %v19327_v43  ;;  %v22266_v36 = vmov 0.0  }
  0x9a   :  { %v199_v57 = vmax.f32 %v147_v51, %v18935_v4  ;;  %v19334_v4 = vld [vmem:[#allocation4 + $0x158] sm:$0xff] }
  0x9b   :  { %v232_v56 = vpop.permute.xlu0 %231  ;;  %v138_v63 = vpop.permute.xlu1 %137  ;;  %v10417_v60 = vld [vmem:[#allocation2 + $0x18] sm:$0xff] }
  0x9c   :  { %v243_v37 = vmax.f32 %v199_v57, %v232_v56  ;;  %v10425_v57 = vadd.f32 %v10417_v60, %v19334_v4  ;;  %v148_v56 = vmax.f32 %v18958_v13, %v138_v63  ;;  %v19360_v63 = vld [vmem:[#allocation2 + $0x10] ss:$2 sm:$0xff]  ;;  %v19362_v60 = vld [vmem:[#allocation2 + $0x11] ss:$2 sm:$0xff] }
  0x9d   :  { %4304 = vrot.lane.b32.xlu0 %v19137_v55, %s18798_s0  ;;  %4392 = vrot.lane.b32.xlu1 %v19139_v1, %s18798_s0  ;;  %22267 = vst [vmem:[#allocation61_spill] sm:$0xff] %v19360_v63  ;;  %22268 = vst [vmem:[#allocation62_spill] sm:$0xff] %v19362_v60  ;;  %v8352_v1 = vld [vmem:[#allocation2 + $0x20] sm:$0xff] }
  0x9e   :  { %vm267_vm4 = vcmp.ge.f32.partialorder %v243_v37, %v223_v11  ;;  %10432 = vst.msk [vmem:[#allocation2 + $0x10] sm:$0xff] %vm27_vm0, %v10424_v19  ;;  %10433 = vst.msk [vmem:[#allocation2 + $0x18] sm:$0xff] %vm27_vm0, %v10425_v57 }
  0x9f   :  { %v271_v28 = vsel %vm267_vm4, %v263_v48, 0.0  ;;  %v118_v3 = vpop.permute.xlu0 %117  ;;  %v214_v51 = vpop.permute.xlu1 %213 }
  0xa0   :  { %v277_v47 = vsel %vm275_vm1, %v271_v28, 0  ;;  %v128_v27 = vmax.f32 %v18921_v62, %v118_v3  ;;  %v200_v3 = vmax.f32 %v148_v56, %v19050_v2  ;;  %v19390_v56 = vld [vmem:[#allocation2 + $0x21] ss:$2 sm:$0xff] }
  0xa1   :  { %v19341_v42 = vand.u32 4294901760, %v277_v47  ;;  %4372 = vrot.lane.b32.xlu0 %v19332_v54, %s18798_s0  ;;  %4286 = vrot.lane.b32.xlu1 %v19337_v14, %s18798_s0  ;;  %v8337_v14 = vld [vmem:[#allocation4 + $0x128] sm:$0xff]  ;;  %22273 = vst [vmem:[#allocation66_spill] sm:$0xff] %v19390_v56 }
  0xa2   :  { %v196_v62 = vmax.f32 %v128_v27, %v18946_v9  ;;  %v19379_v27 = vld [vmem:[#allocation3 + $0x21] ss:$2 sm:$0xff] }
  0xa3   :  { %v19351_v11 = vsub.f32 %v277_v47, %v19341_v42  ;;  %17394 = vmatmul.mubr.f32.vlgmr.msra.gmra.mxu1 %v19341_v42  ;;  %v158_v37 = vpop.permute.xlu0 %157  ;;  %v254_v13 = vpop.permute.xlu1 %253  ;;  %v19377_v47 = vld [vmem:[#allocation3 + $0x20] ss:$2 sm:$0xff]  ;;  %22271 = vst [vmem:[#allocation64_spill] sm:$0xff] %v19379_v27  ;;  %vm6392_vm4 = vcmp.gt.f32.partialorder %v19379_v27, 0.0 }
  0xa4   :  { %v168_v48 = vmax.f32 %v18884_v44, %v158_v37  ;;  %17404 = vmatpush3.msk.msra.mxu1 %vm279_vm2, %v18840_v12  ;;  %17407 = vmatprep.mubr.msk.f32.mxu1 %vm18799_vm7, %v22266_v36  ;;  %v22269_v44 = vmov 1.0   ;;  %22270 = vst [vmem:[#allocation63_spill] sm:$0xff] %v19377_v47  ;;  %v224_v37 = vmax.f32 %v196_v62, %v214_v51  ;;  %v19388_v51 = vld [vmem:[#allocation2 + $0x20] ss:$2 sm:$0xff]  ;;  %8345 = vst.msk [vmem:[#allocation3 + $0x28] sm:$0xff] %vm27_vm0, %v8337_v14  ;;  %vm6316_vm14 = vcmp.gt.f32.partialorder %v19377_v47, 0.0 }
  0xa5   :  { %4266 = vrot.lane.b32.xlu0 %v19195_v6, %s18798_s0  ;;  %17405 = vmatprep.subr.mxu1 %v22266_v36  ;;  %v352_v9 = vand.u32 4294901760, %v19351_v11  ;;  %v8336_v6 = vld [vmem:[#allocation4 + $0x120] sm:$0xff]  ;;  %22272 = vst [vmem:[#allocation65_spill] sm:$0xff] %v19388_v51  ;;  %v8353_v62 = vld [vmem:[#allocation2 + $0x28] sm:$0xff] }
  0xa6   :  { %17406 = vmatpush3.msk.msra.mxu1 %vm18850_vm3, %v22269_v44  ;;  %v204_v28 = vmax.f32 %v168_v48, %v18886_v45  ;;  %4354 = vrot.lane.b32.xlu1 %v19197_v0, %s18798_s0  ;;  %8344 = vst.msk [vmem:[#allocation3 + $0x20] sm:$0xff] %vm27_vm0, %v8336_v6 }
  0xa7   :  { %17408 = vmatmul.mubr.f32.vlgmr.msra.gmra.mxu1 %v352_v9  ;;  %17417 = vmatprep.subr.mxu1 %v22266_v36  ;;  %v234_v19 = vpop.permute.xlu0 %233  ;;  %v353_v57 = vsub.f32 %v19351_v11, %v352_v9  ;;  %v140_v2 = vpop.permute.xlu1 %139 }
  0xa8   :  { %v264_v45 = vmax.f32 %v204_v28, %v254_v13  ;;  %v244_v48 = vmax.f32 %v200_v3, %v234_v19  ;;  %17418 = vmatpush3.msk.msra.mxu1 %vm279_vm2, %v18840_v12  ;;  %17421 = vmatprep.mubr.msk.f32.mxu1 %vm18799_vm7, %v22266_v36  ;;  %v8360_v13 = vadd.f32 %v8352_v1, %v8336_v6  ;;  %v19397_v28 = vld [vmem:[#allocation3 + $0x10] ss:$2 sm:$0xff]  ;;  %v19399_v3 = vld [vmem:[#allocation3 + $0x11] ss:$2 sm:$0xff] }
  0xa9   :  { %4306 = vrot.lane.b32.xlu0 %v19185_v49, %s18798_s0  ;;  %17419 = vmatprep.subr.mxu1 %v22266_v36  ;;  %v354_v9 = vand.u32 4294901760, %v353_v57  ;;  %22274 = vst [vmem:[#allocation67_spill] sm:$0xff] %v19397_v28  ;;  %22275 = vst [vmem:[#allocation68_spill] sm:$0xff] %v19399_v3  ;;  %v8361_v19 = vadd.f32 %v8353_v62, %v8337_v14  ;;  %v19415_v14 = vsel %vm4327_vm5, %v19197_v0, 0.0  ;;  %v19445_v62 = vsel %vm6314_vm8, %v19243_v61, 0.0 }
  0xaa   :  { %vm268_vm6 = vcmp.ge.f32.partialorder %v244_v48, %v224_v37  ;;  %17420 = vmatpush3.msk.msra.mxu1 %vm18850_vm3, %v22269_v44  ;;  %4394 = vrot.lane.b32.xlu1 %v19187_v8, %s18798_s0  ;;  %10408 = vst.msk [vmem:[#allocation3 + $0x10] sm:$0xff] %vm27_vm0, %v19327_v43  ;;  %10409 = vst.msk [vmem:[#allocation3 + $0x18] sm:$0xff] %vm27_vm0, %v19334_v4 }
  0xab   :  { %8368 = vst.msk [vmem:[#allocation2 + $0x20] sm:$0xff] %vm27_vm0, %v8360_v13  ;;  %v272_v1 = vsel %vm268_vm6, %v264_v45, 0.0  ;;  %17387 = vmatmul.mubr.f32.vlgmr.msra.gmra.mxu0 %v354_v9  ;;  %17422 = vmatmul.mubr.f32.vlgmr.msra.gmra.mxu1 %v19341_v42  ;;  %v120_v6 = vpop.permute.xlu0 %119  ;;  %8369 = vst.msk [vmem:[#allocation2 + $0x28] sm:$0xff] %vm27_vm0, %v8361_v19  ;;  %v216_v57 = vpop.permute.xlu1 %215  ;;  %v149_v45 = vmax.f32 %v19055_v26, %v140_v2  ;;  %v19451_v19 = vld [vmem:[#allocation4 + $0x160] sm:$0xff] }
  0xac   :  { %v743_v37 = vsel %vm275_vm1, %v272_v1, 0  ;;  %17397 = vmatpush3.msra.mxu0 %v18848_v24  ;;  %17431 = vmatprep.subr.mxu1 %v22266_v36  ;;  %v129_v4 = vmax.f32 %v18967_v16, %v120_v6  ;;  %22276 = vst [vmem:[#allocation69_spill] sm:$0xff] %v19445_v62  ;;  %v10403_v1 = vld [vmem:[#allocation4 + $0x168] sm:$0xff] }
  0xad   :  { %v19421_v43 = vand.u32 4294901760, %v743_v37  ;;  %17398 = vmatprep.subr.mxu0 %v22266_v36  ;;  %17432 = vmatpush3.msra.mxu1 %v18894_v46  ;;  %v201_v9 = vmax.f32 %v149_v45, %v19092_v40 }
  0xae   :  { %4374 = vrot.lane.b32.xlu0 %v19415_v14, %s18798_s0  ;;  %17399 = vmatpush3.msra.mxu0 %v18875_v41  ;;  %v197_v2 = vmax.f32 %v129_v4, %v18969_v17 }
  0xaf   :  { %v19432_v48 = vsub.f32 %v743_v37, %v19421_v43  ;;  %17433 = vmatprep.subr.mxu1 %v22266_v36  ;;  %17400 = vmatprep.mubr.msk.f32.mxu0 %vm18799_vm7, %v22266_v36  ;;  %v160_v16 = vpop.permute.xlu0 %159 }
  0xb0   :  { %17410 = vmatprep.subr.mxu0 %v22266_v36  ;;  %17434 = vmatpush3.msra.mxu1 %v18974_v22  ;;  %v169_v26 = vmax.f32 %v18917_v58, %v160_v16  ;;  %v256_v58 = vpop.permute.xlu1 %255  ;;  %v225_v40 = vmax.f32 %v197_v2, %v216_v57 }
  0xb1   :  { %17435 = vmatprep.mubr.msk.f32.mxu1 %vm18799_vm7, %v22266_v36  ;;  %17401 = vmatmul.mubr.f32.vlgmr.msra.gmra.mxu0 %v19351_v11  ;;  %v814_v17 = vand.u32 4294901760, %v19432_v48 }
  0xb2   :  { %17411 = vmatpush3.msra.mxu0 %v18866_v34  ;;  %17436 = vmatmul.mubr.f32.vlgmr.msra.gmra.mxu1 %v19421_v43  ;;  %v205_v13 = vmax.f32 %v169_v26, %v18919_v59  ;;  %v10418_v6 = vld [vmem:[#allocation2 + $0x20] sm:$0xff]  ;;  %v10419_v37 = vld [vmem:[#allocation2 + $0x28] sm:$0xff] }
  0xb3   :  { %17445 = vmatprep.subr.mxu1 %v22266_v36  ;;  %17412 = vmatprep.subr.mxu0 %v22266_v36  ;;  %v236_v11 = vpop.permute.xlu0 %235  ;;  %v10426_v45 = vadd.f32 %v10418_v6, %v19451_v19  ;;  %v10427_v16 = vadd.f32 %v10419_v37, %v10403_v1  ;;  %v815_v57 = vsub.f32 %v19432_v48, %v814_v17  ;;  %v19479_v2 = vld [vmem:[#allocation2 + $0x20] ss:$2 sm:$0xff]  ;;  %v8338_v6 = vld [vmem:[#allocation4 + $0x130] sm:$0xff]  ;;  %v8339_v37 = vld [vmem:[#allocation4 + $0x138] sm:$0xff] }
  0xb4   :  { %17446 = vmatpush3.msk.msra.mxu1 %vm279_vm2, %v18840_v12  ;;  %6346 = vrot.lane.b32.xlu1 %v19445_v62, %s18798_s0  ;;  %v245_v59 = vmax.f32 %v201_v9, %v236_v11  ;;  %v265_v4 = vmax.f32 %v205_v13, %v256_v58  ;;  %22277 = vst [vmem:[#allocation70_spill] sm:$0xff] %v19479_v2  ;;  %v19481_v13 = vld [vmem:[#allocation2 + $0x21] ss:$2 sm:$0xff]  ;;  %v19491_v58 = vld [vmem:[#allocation3 + $0x30] ss:$2 sm:$0xff]  ;;  %v142_v11 = vpop.permute.xlu1 %141 }
  0xb5   :  { %6326 = vrot.lane.b32.xlu0 %v19243_v61, %s18798_s0  ;;  %17413 = vmatpush3.msra.mxu0 %v18901_v50  ;;  %22278 = vst [vmem:[#allocation71_spill] sm:$0xff] %v19481_v13  ;;  %10434 = vst.msk [vmem:[#allocation2 + $0x20] sm:$0xff] %vm27_vm0, %v10426_v45  ;;  %v8355_v45 = vld [vmem:[#allocation2 + $0x38] sm:$0xff]  ;;  %vm6317_vm5 = vcmp.gt.f32.partialorder %v19491_v58, 0.0 }
  0xb6   :  { %17447 = vmatprep.subr.mxu1 %v22266_v36  ;;  %17414 = vmatprep.mubr.msk.f32.mxu0 %vm18799_vm7, %v22266_v36  ;;  %vm269_vm9 = vcmp.ge.f32.partialorder %v245_v59, %v225_v40  ;;  %10435 = vst.msk [vmem:[#allocation2 + $0x28] sm:$0xff] %vm27_vm0, %v10427_v16  ;;  %22279 = vst [vmem:[#allocation72_spill] sm:$0xff] %v19491_v58  ;;  %v8354_v59 = vld [vmem:[#allocation2 + $0x30] sm:$0xff]  ;;  %v8363_v61 = vadd.f32 %v8355_v45, %v8339_v37 }
  0xb7   :  { %17424 = vmatprep.subr.mxu0 %v22266_v36  ;;  %17448 = vmatpush3.msk.msra.mxu1 %vm18850_vm3, %v22269_v44  ;;  %v19477_v26 = vpop.permute.xlu0 %121  ;;  %v273_v9 = vsel %vm269_vm9, %v265_v4, 0.0  ;;  %v19505_v4 = vld [vmem:[#allocation2 + $0x30] ss:$2 sm:$0xff]  ;;  %v8362_v16 = vadd.f32 %v8354_v59, %v8338_v6  ;;  %vm8380_vm9 = vcmp.gt.f32.partialorder %v19302_v33, 0.0 }
  0xb8   :  { %17449 = vmatprep.mubr.msk.f32.mxu1 %vm18799_vm7, %v22266_v36  ;;  %17415 = vmatmul.mubr.f32.vlgmr.msra.gmra.mxu0 %v19341_v42  ;;  %v816_v42 = vand.u32 4294901760, %v815_v57  ;;  %v1205_v40 = vsel %vm275_vm1, %v273_v9, 0  ;;  %22281 = vst [vmem:[#allocation74_spill] sm:$0xff] %v19505_v4  ;;  %v19513_v57 = vld [vmem:[#allocation2 + $0x31] ss:$2 sm:$0xff] }
  0xb9   :  { %17425 = vmatpush3.msk.msra.mxu0 %vm279_vm2, %v18840_v12  ;;  %17450 = vmatmul.mubr.f32.vlgmr.msra.gmra.mxu1 %v814_v17  ;;  %v19493_v17 = vld [vmem:[#allocation3 + $0x31] ss:$2 sm:$0xff]  ;;  %22282 = vst [vmem:[#allocation75_spill] sm:$0xff] %v19513_v57  ;;  %v19515_v9 = vld [vmem:[#allocation3 + $0x20] ss:$2 sm:$0xff]  ;;  %8370 = vst.msk [vmem:[#allocation2 + $0x30] sm:$0xff] %vm27_vm0, %v8362_v16 }
  0xba   :  { %17459 = vmatprep.subr.mxu1 %v22266_v36  ;;  %17426 = vmatprep.subr.mxu0 %v22266_v36  ;;  %22280 = vst [vmem:[#allocation73_spill] sm:$0xff] %v19493_v17  ;;  %8346 = vst.msk [vmem:[#allocation3 + $0x30] sm:$0xff] %vm27_vm0, %v8338_v6  ;;  %v19525_v6 = vand.u32 4294901760, %v1205_v40  ;;  %v10404_v16 = vld [vmem:[#allocation4 + $0x170] sm:$0xff]  ;;  %vm6393_vm8 = vcmp.gt.f32.partialorder %v19493_v17, 0.0 }
  0xbb   :  { %17460 = vmatpush3.msk.msra.mxu1 %vm279_vm2, %v18840_v12  ;;  %6414 = vrot.lane.b32.xlu1 %v19245_v15, %s18798_s0  ;;  %8347 = vst.msk [vmem:[#allocation3 + $0x38] sm:$0xff] %vm27_vm0, %v8339_v37  ;;  %22283 = vst [vmem:[#allocation76_spill] sm:$0xff] %v19515_v9  ;;  %v162_v62 = vpop.permute.xlu0 %161  ;;  %v19532_v37 = vsel %vm6390_vm10, %v19245_v15, 0.0 }
  0xbc   :  { %6366 = vrot.lane.b32.xlu0 %v19233_v20, %s18798_s0  ;;  %17427 = vmatpush3.msk.msra.mxu0 %vm18850_vm3, %v22269_v44  ;;  %v19517_v20 = vld [vmem:[#allocation3 + $0x21] ss:$2 sm:$0xff]  ;;  %22285 = vst [vmem:[#allocation78_spill] sm:$0xff] %v19532_v37  ;;  %8371 = vst.msk [vmem:[#allocation2 + $0x38] sm:$0xff] %vm27_vm0, %v8363_v61  ;;  %v170_v61 = vmax.f32 %v18937_v5, %v162_v62  ;;  %v19561_v62 = vsel %vm6315_vm11, %v19295_v23, 0.0  ;;  %vm8456_vm11 = vcmp.gt.f32.partialorder %v19304_v31, 0.0 }
  0xbd   :  { %17461 = vmatprep.subr.mxu1 %v22266_v36  ;;  %17428 = vmatprep.mubr.msk.f32.mxu0 %vm18799_vm7, %v22266_v36  ;;  %22284 = vst [vmem:[#allocation77_spill] sm:$0xff] %v19517_v20  ;;  %10410 = vst.msk [vmem:[#allocation3 + $0x20] sm:$0xff] %vm27_vm0, %v19451_v19  ;;  %v150_v19 = vmax.f32 %v19099_v39, %v142_v11  ;;  %v19549_v39 = vsub.f32 %v1205_v40, %v19525_v6  ;;  %v22288_v11 = vld [vmem:[#allocation34_spill] sm:$0xff] }
  0xbe   :  { %17438 = vmatprep.subr.mxu0 %v22266_v36  ;;  %17462 = vmatpush3.msk.msra.mxu1 %vm18850_vm3, %v22269_v44  ;;  %10411 = vst.msk [vmem:[#allocation3 + $0x28] sm:$0xff] %vm27_vm0, %v10403_v1  ;;  %v130_v1 = vmax.f32 %v18986_v30, %v19477_v26  ;;  %v22286_v26 = vld [vmem:[#allocation14_spill] sm:$0xff] }
  0xbf   :  { %17463 = vmatprep.mubr.msk.f32.mxu1 %vm18799_vm7, %v22266_v36  ;;  %17429 = vmatmul.mubr.f32.vlgmr.msra.gmra.mxu0 %v816_v42  ;;  %v218_v42 = vpop.permute.xlu1 %217  ;;  %v238_v30 = vpop.permute.xlu0 %237  ;;  %22287 = vst [vmem:[#allocation14_spill] sm:$0xff] %v19561_v62  ;;  %v202_v59 = vmax.f32 %v150_v19, %v22288_v11  ;;  %v22289_v40 = vld [vmem:[#allocation10_spill] sm:$0xff] }
  0xc0   :  { %17439 = vmatpush3.msra.mxu0 %v18848_v24  ;;  %17464 = vmatmul.mubr.f32.vlgmr.msra.gmra.mxu1 %v19421_v43  ;;  %v198_v5 = vmax.f32 %v130_v1, %v22286_v26  ;;  %v206_v45 = vmax.f32 %v170_v61, %v22289_v40  ;;  %v1276_v1 = vand.u32 4294901760, %v19549_v39  ;;  %v10405_v26 = vld [vmem:[#allocation4 + $0x178] sm:$0xff] }
  0xc1   :  { %17473 = vmatprep.subr.mxu1 %v22266_v36  ;;  %17440 = vmatprep.subr.mxu0 %v22266_v36 }
  0xc2   :  { %17474 = vmatpush3.msra.mxu1 %v18894_v46  ;;  %6454 = vrot.lane.b32.xlu1 %v19235_v38, %s18798_s0  ;;  %v226_v19 = vmax.f32 %v198_v5, %v218_v42  ;;  %v1277_v42 = vsub.f32 %v19549_v39, %v1276_v1 }
  0xc3   :  { %6434 = vrot.lane.b32.xlu0 %v19532_v37, %s18798_s0  ;;  %17441 = vmatpush3.msra.mxu0 %v18875_v41  ;;  %v258_v38 = vpop.permute.xlu1 %257  ;;  %v10420_v37 = vld [vmem:[#allocation2 + $0x30] sm:$0xff]  ;;  %v10421_v15 = vld [vmem:[#allocation2 + $0x38] sm:$0xff] }
  0xc4   :  { %17475 = vmatprep.subr.mxu1 %v22266_v36  ;;  %17442 = vmatprep.mubr.msk.f32.mxu0 %vm18799_vm7, %v22266_v36  ;;  %v266_v61 = vmax.f32 %v206_v45, %v258_v38  ;;  %v10429_v11 = vadd.f32 %v10421_v15, %v10405_v26  ;;  %v2195_v38 = vpop.permute.xlu0 %2194  ;;  %v19590_v15 = vld [vmem:[#allocation2 + $0x30] ss:$2 sm:$0xff] }
  0xc5   :  { %17452 = vmatprep.subr.mxu0 %v22266_v36  ;;  %17476 = vmatpush3.msra.mxu1 %v18974_v22  ;;  %v19616_v45 = vld [vmem:[#allocation3 + $0x30] ss:$2 sm:$0xff] }
  0xc6   :  { %17477 = vmatprep.mubr.msk.f32.mxu1 %vm18799_vm7, %v22266_v36  ;;  %17443 = vmatmul.mubr.f32.vlgmr.msra.gmra.mxu0 %v19432_v48  ;;  %v246_v48 = vmax.f32 %v202_v59, %v238_v30  ;;  %v10428_v30 = vadd.f32 %v10420_v37, %v10404_v16  ;;  %v19592_v37 = vld [vmem:[#allocation2 + $0x31] ss:$2 sm:$0xff] }
  0xc7   :  { %17453 = vmatpush3.msra.mxu0 %v18866_v34  ;;  %17478 = vmatmul.mubr.f32.vlgmr.msra.gmra.mxu1 %v19525_v6  ;;  %10437 = vst.msk [vmem:[#allocation2 + $0x38] sm:$0xff] %vm27_vm0, %v10429_v11  ;;  %v2215_v59 = vpop.permute.xlu1 %2214 }
  0xc8   :  { %17487 = vmatprep.subr.mxu1 %v22266_v36  ;;  %17454 = vmatprep.subr.mxu0 %v22266_v36  ;;  %vm270_vm12 = vcmp.ge.f32.partialorder %v246_v48, %v226_v19  ;;  %10436 = vst.msk [vmem:[#allocation2 + $0x30] sm:$0xff] %vm27_vm0, %v10428_v30  ;;  %v2235_v48 = vpop.permute.xlu0 %2234  ;;  %v22292_v30 = vld [vmem:[#allocation35_spill] sm:$0xff] }
  0xc9   :  { %17488 = vmatpush3.msk.msra.mxu1 %vm279_vm2, %v18840_v12  ;;  %6348 = vrot.lane.b32.xlu1 %v19561_v62, %s18798_s0  ;;  %v274_v5 = vsel %vm270_vm12, %v266_v61, 0.0  ;;  %v19629_v61 = vsel %vm6391_vm13, %v19300_v35, 0.0  ;;  %v2226_v11 = vmax.f32 %v22292_v30, %v2215_v59  ;;  %v19656_v59 = vsel %vm6316_vm14, %v19388_v51, 0.0  ;;  %v22296_v30 = vld [vmem:[#allocation11_spill] sm:$0xff] }
  0xca   :  { %6328 = vrot.lane.b32.xlu0 %v19295_v23, %s18798_s0  ;;  %17455 = vmatpush3.msra.mxu0 %v18901_v50  ;;  %v1667_v40 = vsel %vm275_vm1, %v274_v5, 0  ;;  %22291 = vst [vmem:[#allocation10_spill] sm:$0xff] %v19629_v61  ;;  %22294 = vst [vmem:[#allocation35_spill] sm:$0xff] %v19656_v59  ;;  %v12485_v23 = vld [vmem:[#allocation2 + $0x28] sm:$0xff]  ;;  %vm8381_vm12 = vcmp.gt.f32.partialorder %v19397_v28, 0.0  ;;  %vm8457_vm14 = vcmp.gt.f32.partialorder %v19399_v3, 0.0 }
  0xcb   :  { %17489 = vmatprep.subr.mxu1 %v22266_v36  ;;  %17456 = vmatprep.mubr.msk.f32.mxu0 %vm18799_vm7, %v22266_v36  ;;  %v19624_v19 = vand.u32 4294901760, %v1667_v40 }
  0xcc   :  { %17466 = vmatprep.subr.mxu0 %v22266_v36  ;;  %17490 = vmatpush3.msk.msra.mxu1 %vm18850_vm3, %v22269_v44 }
  0xcd   :  { %17491 = vmatprep.mubr.msk.f32.mxu1 %vm18799_vm7, %v22266_v36  ;;  %17457 = vmatmul.mubr.f32.vlgmr.msra.gmra.mxu0 %v19421_v43  ;;  %v1278_v43 = vand.u32 4294901760, %v1277_v42  ;;  %v22293_v42 = vld [vmem:[#allocation17_spill] sm:$0xff] }
  0xce   :  { %17467 = vmatpush3.msk.msra.mxu0 %vm279_vm2, %v18840_v12  ;;  %17492 = vmatmul.mubr.f32.vlgmr.msra.gmra.mxu1 %v1276_v1  ;;  %v19618_v1 = vld [vmem:[#allocation3 + $0x31] ss:$2 sm:$0xff]  ;;  %v2206_v5 = vmax.f32 %v22293_v42, %v2195_v38  ;;  %v2303_v38 = vpop.permute.xlu0 %2302 }
  0xcf   :  { %17501 = vmatprep.subr.mxu1 %v22266_v36  ;;  %17468 = vmatprep.subr.mxu0 %v22266_v36  ;;  %22290 = vst [vmem:[#allocation34_spill] sm:$0xff] %v19618_v1  ;;  %10412 = vst.msk [vmem:[#allocation3 + $0x30] sm:$0xff] %vm27_vm0, %v10404_v16  ;;  %v2283_v16 = vpop.permute.xlu1 %2282  ;;  %v12487_v62 = vld [vmem:[#allocation2 + $0x38] sm:$0xff] }
  0xd0   :  { %17502 = vmatpush3.msk.msra.mxu1 %vm279_vm2, %v18840_v12  ;;  %6416 = vrot.lane.b32.xlu1 %v19300_v35, %s18798_s0  ;;  %10413 = vst.msk [vmem:[#allocation3 + $0x38] sm:$0xff] %vm27_vm0, %v10405_v26  ;;  %v2246_v26 = vmax.f32 %v18949_v10, %v2235_v48  ;;  %v2266_v10 = vmax.f32 %v2206_v5, %v19015_v53  ;;  %v12465_v5 = vld [vmem:[#allocation4 + $0x188] sm:$0xff]  ;;  %v12480_v35 = vld [vmem:[#allocation2] sm:$0xff] }
  0xd1   :  { %6368 = vrot.lane.b32.xlu0 %v19283_v18, %s18798_s0  ;;  %17469 = vmatpush3.msk.msra.mxu0 %vm18850_vm3, %v22269_v44  ;;  %v12481_v18 = vld [vmem:[#allocation2 + $0x8] sm:$0xff] }
  0xd2   :  { %17503 = vmatprep.subr.mxu1 %v22266_v36  ;;  %17470 = vmatprep.mubr.msk.f32.mxu0 %vm18799_vm7, %v22266_v36  ;;  %v2274_v42 = vmax.f32 %v2246_v26, %v22296_v30 }
  0xd3   :  { %17480 = vmatprep.subr.mxu0 %v22266_v36  ;;  %17504 = vmatpush3.msk.msra.mxu1 %vm18850_vm3, %v22269_v44 }
  0xd4   :  { %17505 = vmatprep.mubr.msk.f32.mxu1 %vm18799_vm7, %v22266_v36  ;;  %17471 = vmatmul.mubr.f32.vlgmr.msra.gmra.mxu0 %v1278_v43  ;;  %v19644_v43 = vsub.f32 %v1667_v40, %v19624_v19  ;;  %v22295_v40 = vld [vmem:[#allocation37_spill] sm:$0xff] }
  0xd5   :  { %17481 = vmatpush3.msra.mxu0 %v18848_v24  ;;  %17506 = vmatmul.mubr.f32.vlgmr.msra.gmra.mxu1 %v19525_v6  ;;  %v2270_v48 = vmax.f32 %v2226_v11, %v22295_v40  ;;  %v2294_v11 = vmax.f32 %v2266_v10, %v2283_v16  ;;  %v12489_v40 = vadd.f32 %v12481_v18, %v12465_v5  ;;  %v19685_v18 = vld [vmem:[#allocation2] ss:$2 sm:$0xff] }
  0xd6   :  { %17515 = vmatprep.subr.mxu1 %v22266_v36  ;;  %17482 = vmatprep.subr.mxu0 %v22266_v36  ;;  %v1738_v53 = vand.u32 4294901760, %v19644_v43  ;;  %22297 = vst [vmem:[#allocation17_spill] sm:$0xff] %v19685_v18 }
  0xd7   :  { %17516 = vmatpush3.msra.mxu1 %v18894_v46  ;;  %6456 = vrot.lane.b32.xlu1 %v19285_v21, %s18798_s0  ;;  %v12464_v21 = vld [vmem:[#allocation4 + $0x180] sm:$0xff] }
  0xd8   :  { %6436 = vrot.lane.b32.xlu0 %v19629_v61, %s18798_s0  ;;  %17483 = vmatpush3.msra.mxu0 %v18875_v41  ;;  %v2323_v61 = vpop.permute.xlu1 %2322  ;;  %v1739_v16 = vsub.f32 %v19644_v43, %v1738_v53 }
  0xd9   :  { %17517 = vmatprep.subr.mxu1 %v22266_v36  ;;  %17484 = vmatprep.mubr.msk.f32.mxu0 %vm18799_vm7, %v22266_v36  ;;  %v2334_v26 = vmax.f32 %v2274_v42, %v2323_v61  ;;  %v19687_v61 = vld [vmem:[#allocation2 + $0x1] ss:$2 sm:$0xff]  ;;  %v19711_v42 = vld [vmem:[#allocation3] ss:$2 sm:$0xff] }
  0xda   :  { %17494 = vmatprep.subr.mxu0 %v22266_v36  ;;  %17518 = vmatpush3.msra.mxu1 %v18974_v22  ;;  %22298 = vst [vmem:[#allocation37_spill] sm:$0xff] %v19687_v61  ;;  %12497 = vst.msk [vmem:[#allocation2 + $0x8] sm:$0xff] %vm27_vm0, %v12489_v40 }
  0xdb   :  { %17519 = vmatprep.mubr.msk.f32.mxu1 %vm18799_vm7, %v22266_v36  ;;  %17485 = vmatmul.mubr.f32.vlgmr.msra.gmra.mxu0 %v19549_v39  ;;  %v2314_v39 = vmax.f32 %v2270_v48, %v2303_v38  ;;  %v12488_v38 = vadd.f32 %v12480_v35, %v12464_v21  ;;  %v2197_v35 = vpop.permute.xlu0 %2196  ;;  %22299 = vst [vmem:[#allocation11_spill] sm:$0xff] %v19711_v42 }
  0xdc   :  { %17495 = vmatpush3.msra.mxu0 %v18866_v34  ;;  %17520 = vmatmul.mubr.f32.vlgmr.msra.gmra.mxu1 %v19624_v19  ;;  %v2217_v48 = vpop.permute.xlu1 %2216 }
  0xdd   :  { %17529 = vmatprep.subr.mxu1 %v22266_v36  ;;  %17496 = vmatprep.subr.mxu0 %v22266_v36  ;;  %vm2338_vm15 = vcmp.ge.f32.partialorder %v2314_v39, %v2294_v11  ;;  %12496 = vst.msk [vmem:[#allocation2] sm:$0xff] %vm27_vm0, %v12488_v38  ;;  %v22302_v38 = vld [vmem:[#allocation38_spill] sm:$0xff] }
  0xde   :  { %17530 = vmatpush3.msk.msra.mxu1 %vm279_vm2, %v18840_v12  ;;  %6350 = vrot.lane.b32.xlu1 %v19656_v59, %s18798_s0  ;;  %v2342_v10 = vsel %vm2338_vm15, %v2334_v26, 0.0  ;;  %v19724_v26 = vsel %vm6392_vm4, %v19390_v56, 0.0  ;;  %v2227_v40 = vmax.f32 %v22302_v38, %v2217_v48  ;;  %v22305_v48 = vld [vmem:[#allocation23_spill] sm:$0xff]  ;;  %v12483_v59 = vld [vmem:[#allocation2 + $0x18] sm:$0xff]  ;;  %vm8382_vm15 = vcmp.gt.f32.partialorder %v19515_v9, 0.0 }
  0xdf   :  { %6330 = vrot.lane.b32.xlu0 %v19388_v51, %s18798_s0  ;;  %17497 = vmatpush3.msra.mxu0 %v18901_v50  ;;  %v2347_v30 = vsel %vm275_vm1, %v2342_v10, 0  ;;  %v2237_v39 = vpop.permute.xlu0 %2236  ;;  %22301 = vst [vmem:[#allocation80_spill] sm:$0xff] %v19724_v26  ;;  %v22307_v38 = vld [vmem:[#allocation39_spill] sm:$0xff]  ;;  %v12482_v51 = vld [vmem:[#allocation2 + $0x10] sm:$0xff] }
  0xe0   :  { %17531 = vmatprep.subr.mxu1 %v22266_v36  ;;  %17498 = vmatprep.mubr.msk.f32.mxu0 %vm18799_vm7, %v22266_v36  ;;  %v19719_v11 = vand.u32 4294901760, %v2347_v30 }
  0xe1   :  { %17508 = vmatprep.subr.mxu0 %v22266_v36  ;;  %17532 = vmatpush3.msk.msra.mxu1 %vm18850_vm3, %v22269_v44 }
  0xe2   :  { %17533 = vmatprep.mubr.msk.f32.mxu1 %vm18799_vm7, %v22266_v36  ;;  %17499 = vmatmul.mubr.f32.vlgmr.msra.gmra.mxu0 %v19525_v6  ;;  %v1740_v6 = vand.u32 4294901760, %v1739_v16  ;;  %v22303_v16 = vld [vmem:[#allocation22_spill] sm:$0xff] }
  0xe3   :  { %17509 = vmatpush3.msk.msra.mxu0 %vm279_vm2, %v18840_v12  ;;  %17534 = vmatmul.mubr.f32.vlgmr.msra.gmra.mxu1 %v1738_v53  ;;  %v19713_v53 = vld [vmem:[#allocation3 + $0x1] ss:$2 sm:$0xff]  ;;  %v2207_v10 = vmax.f32 %v22303_v16, %v2197_v35  ;;  %v2305_v35 = vpop.permute.xlu0 %2304  ;;  %v2271_v16 = vmax.f32 %v2227_v40, %v22307_v38 }
  0xe4   :  { %17543 = vmatprep.subr.mxu1 %v22266_v36  ;;  %17510 = vmatprep.subr.mxu0 %v22266_v36  ;;  %22300 = vst [vmem:[#allocation79_spill] sm:$0xff] %v19713_v53  ;;  %12472 = vst.msk [vmem:[#allocation3] sm:$0xff] %vm27_vm0, %v12464_v21  ;;  %v2285_v21 = vpop.permute.xlu1 %2284 }
  0xe5   :  { %17544 = vmatpush3.msk.msra.mxu1 %vm279_vm2, %v18840_v12  ;;  %6418 = vrot.lane.b32.xlu1 %v19390_v56, %s18798_s0  ;;  %12473 = vst.msk [vmem:[#allocation3 + $0x8] sm:$0xff] %vm27_vm0, %v12465_v5  ;;  %v22304_v5 = vld [vmem:[#allocation12_spill] sm:$0xff]  ;;  %v19739_v56 = vsub.f32 %v2347_v30, %v19719_v11  ;;  %v19751_v30 = vsel %vm6317_vm5, %v19505_v4, 0.0  ;;  %vm8458_vm5 = vcmp.gt.f32.partialorder %v19517_v20, 0.0 }
  0xe6   :  { %6370 = vrot.lane.b32.xlu0 %v19377_v47, %s18798_s0  ;;  %17511 = vmatpush3.msk.msra.mxu0 %vm18850_vm3, %v22269_v44  ;;  %22306 = vst [vmem:[#allocation38_spill] sm:$0xff] %v19751_v30 }
  0xe7   :  { %17545 = vmatprep.subr.mxu1 %v22266_v36  ;;  %17512 = vmatprep.mubr.msk.f32.mxu0 %vm18799_vm7, %v22266_v36 }
  0xe8   :  { %17522 = vmatprep.subr.mxu0 %v22266_v36  ;;  %17546 = vmatpush3.msk.msra.mxu1 %vm18850_vm3, %v22269_v44  ;;  %v2325_v47 = vpop.permute.xlu1 %2324 }
  0xe9   :  { %17547 = vmatprep.mubr.msk.f32.mxu1 %vm18799_vm7, %v22266_v36  ;;  %17513 = vmatmul.mubr.f32.vlgmr.msra.gmra.mxu0 %v1740_v6  ;;  %v2247_v6 = vmax.f32 %v22304_v5, %v2237_v39  ;;  %v2267_v39 = vmax.f32 %v2207_v10, %v22305_v48  ;;  %v22308_v5 = vld [vmem:[#allocation13_spill] sm:$0xff]  ;;  %v2418_v10 = vand.u32 4294901760, %v19739_v56 }
  0xea   :  { %17523 = vmatpush3.msra.mxu0 %v18848_v24  ;;  %17548 = vmatmul.mubr.f32.vlgmr.msra.gmra.mxu1 %v19624_v19  ;;  %v12467_v48 = vld [vmem:[#allocation4 + $0x198] sm:$0xff] }
  0xeb   :  { %17557 = vmatprep.subr.mxu1 %v22266_v36  ;;  %17524 = vmatprep.subr.mxu0 %v22266_v36  ;;  %v2295_v40 = vmax.f32 %v2267_v39, %v2285_v21  ;;  %v12491_v38 = vadd.f32 %v12483_v59, %v12467_v48  ;;  %v2419_v21 = vsub.f32 %v19739_v56, %v2418_v10 }
  0xec   :  { %17558 = vmatpush3.msra.mxu1 %v18894_v46  ;;  %6458 = vrot.lane.b32.xlu1 %v19379_v27, %s18798_s0  ;;  %v2275_v27 = vmax.f32 %v2247_v6, %v22308_v5  ;;  %v2219_v39 = vpop.permute.xlu1 %2218  ;;  %v19806_v5 = vld [vmem:[#allocation3 + $0x10] ss:$2 sm:$0xff] }
  0xed   :  { %6438 = vrot.lane.b32.xlu0 %v19724_v26, %s18798_s0  ;;  %17525 = vmatpush3.msra.mxu0 %v18875_v41  ;;  %v12466_v26 = vld [vmem:[#allocation4 + $0x190] sm:$0xff]  ;;  %22311 = vst [vmem:[#allocation23_spill] sm:$0xff] %v19806_v5 }
  0xee   :  { %17559 = vmatprep.subr.mxu1 %v22266_v36  ;;  %17526 = vmatprep.mubr.msk.f32.mxu0 %vm18799_vm7, %v22266_v36  ;;  %v2335_v6 = vmax.f32 %v2275_v27, %v2325_v47  ;;  %v2199_v47 = vpop.permute.xlu0 %2198  ;;  %v19780_v27 = vld [vmem:[#allocation2 + $0x10] ss:$2 sm:$0xff] }
  0xef   :  { %17536 = vmatprep.subr.mxu0 %v22266_v36  ;;  %17560 = vmatpush3.msra.mxu1 %v18974_v22  ;;  %22309 = vst [vmem:[#allocation22_spill] sm:$0xff] %v19780_v27 }
  0xf0   :  { %17561 = vmatprep.mubr.msk.f32.mxu1 %vm18799_vm7, %v22266_v36  ;;  %17527 = vmatmul.mubr.f32.vlgmr.msra.gmra.mxu0 %v19644_v43  ;;  %v2315_v43 = vmax.f32 %v2271_v16, %v2305_v35  ;;  %v12490_v35 = vadd.f32 %v12482_v51, %v12466_v26  ;;  %v19782_v51 = vld [vmem:[#allocation2 + $0x11] ss:$2 sm:$0xff] }
  0xf1   :  { %17537 = vmatpush3.msra.mxu0 %v18866_v34  ;;  %17562 = vmatmul.mubr.f32.vlgmr.msra.gmra.mxu1 %v19719_v11  ;;  %22310 = vst [vmem:[#allocation12_spill] sm:$0xff] %v19782_v51  ;;  %12499 = vst.msk [vmem:[#allocation2 + $0x18] sm:$0xff] %vm27_vm0, %v12491_v38 }
  0xf2   :  { %17571 = vmatprep.subr.mxu1 %v22266_v36  ;;  %17538 = vmatprep.subr.mxu0 %v22266_v36  ;;  %vm2339_vm6 = vcmp.ge.f32.partialorder %v2315_v43, %v2295_v40  ;;  %12498 = vst.msk [vmem:[#allocation2 + $0x10] sm:$0xff] %vm27_vm0, %v12490_v35  ;;  %v2239_v43 = vpop.permute.xlu0 %2238  ;;  %v22314_v35 = vld [vmem:[#allocation40_spill] sm:$0xff] }
  0xf3   :  { %17572 = vmatpush3.msk.msra.mxu1 %vm279_vm2, %v18840_v12  ;;  %6352 = vrot.lane.b32.xlu1 %v19751_v30, %s18798_s0  ;;  %v2343_v59 = vsel %vm2339_vm6, %v2335_v6, 0.0  ;;  %v19819_v6 = vsel %vm6393_vm8, %v19513_v57, 0.0  ;;  %v2228_v38 = vmax.f32 %v22314_v35, %v2219_v39  ;;  %v22317_v39 = vld [vmem:[#allocation25_spill] sm:$0xff]  ;;  %v22318_v35 = vld [vmem:[#allocation52_spill] sm:$0xff]  ;;  %v12484_v30 = vld [vmem:[#allocation2 + $0x20] sm:$0xff]  ;;  %vm8383_vm6 = vcmp.gt.f32.partialorder %v19616_v45, 0.0 }
  0xf4   :  { %6332 = vrot.lane.b32.xlu0 %v19505_v4, %s18798_s0  ;;  %17539 = vmatpush3.msra.mxu0 %v18901_v50  ;;  %v2809_v16 = vsel %vm275_vm1, %v2343_v59, 0  ;;  %22313 = vst [vmem:[#allocation13_spill] sm:$0xff] %v19819_v6 }
  0xf5   :  { %17573 = vmatprep.subr.mxu1 %v22266_v36  ;;  %17540 = vmatprep.mubr.msk.f32.mxu0 %vm18799_vm7, %v22266_v36  ;;  %v19814_v40 = vand.u32 4294901760, %v2809_v16 }
  0xf6   :  { %17550 = vmatprep.subr.mxu0 %v22266_v36  ;;  %17574 = vmatpush3.msk.msra.mxu1 %vm18850_vm3, %v22269_v44 }
  0xf7   :  { %17575 = vmatprep.mubr.msk.f32.mxu1 %vm18799_vm7, %v22266_v36  ;;  %17541 = vmatmul.mubr.f32.vlgmr.msra.gmra.mxu0 %v19624_v19  ;;  %v2420_v19 = vand.u32 4294901760, %v2419_v21  ;;  %v22315_v21 = vld [vmem:[#allocation24_spill] sm:$0xff] }
  0xf8   :  { %17551 = vmatpush3.msk.msra.mxu0 %vm279_vm2, %v18840_v12  ;;  %17576 = vmatmul.mubr.f32.vlgmr.msra.gmra.mxu1 %v2418_v10  ;;  %v19808_v10 = vld [vmem:[#allocation3 + $0x11] ss:$2 sm:$0xff]  ;;  %v2208_v59 = vmax.f32 %v22315_v21, %v2199_v47  ;;  %v2307_v47 = vpop.permute.xlu0 %2306  ;;  %v22320_v21 = vld [vmem:[#allocation42_spill] sm:$0xff] }
  0xf9   :  { %17585 = vmatprep.subr.mxu1 %v22266_v36  ;;  %17552 = vmatprep.subr.mxu0 %v22266_v36  ;;  %22312 = vst [vmem:[#allocation39_spill] sm:$0xff] %v19808_v10  ;;  %12474 = vst.msk [vmem:[#allocation3 + $0x10] sm:$0xff] %vm27_vm0, %v12466_v26  ;;  %v2287_v26 = vpop.permute.xlu1 %2286 }
  0xfa   :  { %17586 = vmatpush3.msk.msra.mxu1 %vm279_vm2, %v18840_v12  ;;  %6420 = vrot.lane.b32.xlu1 %v19513_v57, %s18798_s0  ;;  %12475 = vst.msk [vmem:[#allocation3 + $0x18] sm:$0xff] %vm27_vm0, %v12467_v48  ;;  %v22316_v48 = vld [vmem:[#allocation15_spill] sm:$0xff]  ;;  %v19834_v57 = vsub.f32 %v2809_v16, %v19814_v40  ;;  %v19846_v16 = vsel %vm8380_vm9, %v22318_v35, 0.0  ;;  %vm8459_vm9 = vcmp.gt.f32.partialorder %v19618_v1, 0.0 }
  0xfb   :  { %6372 = vrot.lane.b32.xlu0 %v19491_v58, %s18798_s0  ;;  %17553 = vmatpush3.msk.msra.mxu0 %vm18850_vm3, %v22269_v44  ;;  %22319 = vst [vmem:[#allocation40_spill] sm:$0xff] %v19846_v16  ;;  %v12468_v58 = vld [vmem:[#allocation4 + $0x1a0] sm:$0xff] }
  0xfc   :  { %17587 = vmatprep.subr.mxu1 %v22266_v36  ;;  %17554 = vmatprep.mubr.msk.f32.mxu0 %vm18799_vm7, %v22266_v36 }
  0xfd   :  { %17564 = vmatprep.subr.mxu0 %v22266_v36  ;;  %17588 = vmatpush3.msk.msra.mxu1 %vm18850_vm3, %v22269_v44  ;;  %v2327_v4 = vpop.permute.xlu1 %2326 }
  0xfe   :  { %17589 = vmatprep.mubr.msk.f32.mxu1 %vm18799_vm7, %v22266_v36  ;;  %17555 = vmatmul.mubr.f32.vlgmr.msra.gmra.mxu0 %v2420_v19  ;;  %v2248_v19 = vmax.f32 %v22316_v48, %v2239_v43  ;;  %v2268_v43 = vmax.f32 %v2208_v59, %v22317_v39  ;;  %v2272_v48 = vmax.f32 %v2228_v38, %v22320_v21  ;;  %v2880_v59 = vand.u32 4294901760, %v19834_v57  ;;  %v12469_v39 = vld [vmem:[#allocation4 + $0x1a8] sm:$0xff] }
  0xff   :  { %17565 = vmatpush3.msra.mxu0 %v18848_v24  ;;  %17590 = vmatmul.mubr.f32.vlgmr.msra.gmra.mxu1 %v19719_v11 }
 0x100   :  { %17599 = vmatprep.subr.mxu1 %v22266_v36  ;;  %17566 = vmatprep.subr.mxu0 %v22266_v36  ;;  %v2296_v38 = vmax.f32 %v2268_v43, %v2287_v26  ;;  %v2881_v26 = vsub.f32 %v19834_v57, %v2880_v59 }
 0x101   :  { %17600 = vmatpush3.msra.mxu1 %v18894_v46  ;;  %6460 = vrot.lane.b32.xlu1 %v19493_v17, %s18798_s0  ;;  %v22321_v17 = vld [vmem:[#allocation16_spill] sm:$0xff]  ;;  %v2221_v21 = vpop.permute.xlu1 %2220 }
 0x102   :  { %6440 = vrot.lane.b32.xlu0 %v19819_v6, %s18798_s0  ;;  %17567 = vmatpush3.msra.mxu0 %v18875_v41  ;;  %v2276_v6 = vmax.f32 %v2248_v19, %v22321_v17  ;;  %v12492_v19 = vadd.f32 %v12484_v30, %v12468_v58  ;;  %v19877_v30 = vld [vmem:[#allocation2 + $0x21] ss:$2 sm:$0xff]  ;;  %v2882_v43 = vand.u32 4294901760, %v2881_v26 }
 0x103   :  { %17601 = vmatprep.subr.mxu1 %v22266_v36  ;;  %17568 = vmatprep.mubr.msk.f32.mxu0 %vm18799_vm7, %v22266_v36 }
 0x104   :  { %17578 = vmatprep.subr.mxu0 %v22266_v36  ;;  %17602 = vmatpush3.msra.mxu1 %v18974_v22  ;;  %v2336_v17 = vmax.f32 %v2276_v6, %v2327_v4  ;;  %v2201_v4 = vpop.permute.xlu0 %2200 }
 0x105   :  { %17603 = vmatprep.mubr.msk.f32.mxu1 %vm18799_vm7, %v22266_v36  ;;  %17569 = vmatmul.mubr.f32.vlgmr.msra.gmra.mxu0 %v19739_v56  ;;  %v2316_v56 = vmax.f32 %v2272_v48, %v2307_v47  ;;  %v12493_v47 = vadd.f32 %v12485_v23, %v12469_v39  ;;  %v19875_v23 = vld [vmem:[#allocation2 + $0x20] ss:$2 sm:$0xff] }
 0x106   :  { %17579 = vmatpush3.msra.mxu0 %v18866_v34  ;;  %17604 = vmatmul.mubr.f32.vlgmr.msra.gmra.mxu1 %v19814_v40  ;;  %12500 = vst.msk [vmem:[#allocation2 + $0x20] sm:$0xff] %vm27_vm0, %v12492_v19 }
 0x107   :  { %17613 = vmatprep.subr.mxu1 %v22266_v36  ;;  %17580 = vmatprep.subr.mxu0 %v22266_v36  ;;  %vm2340_vm10 = vcmp.ge.f32.partialorder %v2316_v56, %v2296_v38  ;;  %12501 = vst.msk [vmem:[#allocation2 + $0x28] sm:$0xff] %vm27_vm0, %v12493_v47  ;;  %v19903_v56 = vld [vmem:[#allocation3 + $0x21] ss:$2 sm:$0xff] }
 0x108   :  { %17614 = vmatpush3.msk.msra.mxu1 %vm279_vm2, %v18840_v12  ;;  %8412 = vrot.lane.b32.xlu1 %v19846_v16, %s18798_s0  ;;  %v2344_v6 = vsel %vm2340_vm10, %v2336_v17, 0.0  ;;  %22323 = vst [vmem:[#allocation24_spill] sm:$0xff] %v19903_v56  ;;  %v2241_v38 = vpop.permute.xlu0 %2240  ;;  %v22325_v47 = vld [vmem:[#allocation43_spill] sm:$0xff]  ;;  %v12486_v16 = vld [vmem:[#allocation2 + $0x30] sm:$0xff]  ;;  %vm10446_vm10 = vcmp.gt.f32.partialorder %v19711_v42, 0.0 }
 0x109   :  { %8392 = vrot.lane.b32.xlu0 %v22318_v35, %s18798_s0  ;;  %17581 = vmatpush3.msra.mxu0 %v18901_v50  ;;  %v3271_v48 = vsel %vm275_vm1, %v2344_v6, 0  ;;  %v2229_v26 = vmax.f32 %v22325_v47, %v2221_v21  ;;  %v22326_v6 = vld [vmem:[#allocation26_spill] sm:$0xff]  ;;  %v22328_v21 = vld [vmem:[#allocation27_spill] sm:$0xff]  ;;  %v22330_v47 = vld [vmem:[#allocation44_spill] sm:$0xff] }
 0x10a   :  { %17615 = vmatprep.subr.mxu1 %v22266_v36  ;;  %17582 = vmatprep.mubr.msk.f32.mxu0 %vm18799_vm7, %v22266_v36  ;;  %v19909_v17 = vand.u32 4294901760, %v3271_v48 }
 0x10b   :  { %17592 = vmatprep.subr.mxu0 %v22266_v36  ;;  %17616 = vmatpush3.msk.msra.mxu1 %vm18850_vm3, %v22269_v44 }
 0x10c   :  { %17617 = vmatprep.mubr.msk.f32.mxu1 %vm18799_vm7, %v22266_v36  ;;  %17583 = vmatmul.mubr.f32.vlgmr.msra.gmra.mxu0 %v19719_v11  ;;  %v22322_v11 = vld [vmem:[#allocation53_spill] sm:$0xff] }
 0x10d   :  { %17593 = vmatpush3.msk.msra.mxu0 %vm279_vm2, %v18840_v12  ;;  %17618 = vmatmul.mubr.f32.vlgmr.msra.gmra.mxu1 %v2880_v59  ;;  %v19901_v59 = vld [vmem:[#allocation3 + $0x20] ss:$2 sm:$0xff]  ;;  %v19914_v19 = vsel %vm8456_vm11, %v22322_v11, 0.0 }
 0x10e   :  { %17627 = vmatprep.subr.mxu1 %v22266_v36  ;;  %17594 = vmatprep.subr.mxu0 %v22266_v36  ;;  %12476 = vst.msk [vmem:[#allocation3 + $0x20] sm:$0xff] %vm27_vm0, %v12468_v58  ;;  %12477 = vst.msk [vmem:[#allocation3 + $0x28] sm:$0xff] %vm27_vm0, %v12469_v39  ;;  %v2289_v58 = vpop.permute.xlu1 %2288  ;;  %v22327_v39 = vld [vmem:[#allocation18_spill] sm:$0xff] }
 0x10f   :  { %17628 = vmatpush3.msk.msra.mxu1 %vm279_vm2, %v18840_v12  ;;  %8480 = vrot.lane.b32.xlu1 %v22322_v11, %s18798_s0  ;;  %22324 = vst [vmem:[#allocation15_spill] sm:$0xff] %v19914_v19  ;;  %v2249_v11 = vmax.f32 %v22327_v39, %v2241_v38  ;;  %v22331_v39 = vld [vmem:[#allocation19_spill] sm:$0xff] }
 0x110   :  { %8432 = vrot.lane.b32.xlu0 %v19302_v33, %s18798_s0  ;;  %17595 = vmatpush3.msk.msra.mxu0 %vm18850_vm3, %v22269_v44  ;;  %v19929_v33 = vsub.f32 %v3271_v48, %v19909_v17  ;;  %v19941_v48 = vsel %vm8381_vm12, %v19360_v63, 0.0  ;;  %vm10522_vm12 = vcmp.gt.f32.partialorder %v19713_v53, 0.0 }
 0x111   :  { %17629 = vmatprep.subr.mxu1 %v22266_v36  ;;  %17596 = vmatprep.mubr.msk.f32.mxu0 %vm18799_vm7, %v22266_v36  ;;  %22329 = vst [vmem:[#allocation25_spill] sm:$0xff] %v19941_v48 }
 0x112   :  { %17606 = vmatprep.subr.mxu0 %v22266_v36  ;;  %17630 = vmatpush3.msk.msra.mxu1 %vm18850_vm3, %v22269_v44  ;;  %v2329_v35 = vpop.permute.xlu1 %2328 }
 0x113   :  { %17631 = vmatprep.mubr.msk.f32.mxu1 %vm18799_vm7, %v22266_v36  ;;  %17597 = vmatmul.mubr.f32.vlgmr.msra.gmra.mxu0 %v2882_v43  ;;  %v2209_v43 = vmax.f32 %v22326_v6, %v2201_v4  ;;  %v2309_v4 = vpop.permute.xlu0 %2308  ;;  %v2273_v6 = vmax.f32 %v2229_v26, %v22330_v47 }
 0x114   :  { %17607 = vmatpush3.msra.mxu0 %v18848_v24  ;;  %17632 = vmatmul.mubr.f32.vlgmr.msra.gmra.mxu1 %v19814_v40 }
 0x115   :  { %17641 = vmatprep.subr.mxu1 %v22266_v36  ;;  %17608 = vmatprep.subr.mxu0 %v22266_v36  ;;  %v2269_v38 = vmax.f32 %v2209_v43, %v22328_v21  ;;  %v3342_v43 = vand.u32 4294901760, %v19929_v33  ;;  %v12471_v21 = vld [vmem:[#allocation4 + $0x1b8] sm:$0xff] }
 0x116   :  { %17642 = vmatpush3.msra.mxu1 %v18894_v46  ;;  %8520 = vrot.lane.b32.xlu1 %v19304_v31, %s18798_s0  ;;  %v2277_v31 = vmax.f32 %v2249_v11, %v22331_v39  ;;  %v12495_v47 = vadd.f32 %v12487_v62, %v12471_v21  ;;  %v19970_v62 = vld [vmem:[#allocation2 + $0x30] ss:$2 sm:$0xff] }
 0x117   :  { %8500 = vrot.lane.b32.xlu0 %v19914_v19, %s18798_s0  ;;  %17609 = vmatpush3.msra.mxu0 %v18875_v41  ;;  %v12470_v19 = vld [vmem:[#allocation4 + $0x1b0] sm:$0xff]  ;;  %v2297_v26 = vmax.f32 %v2269_v38, %v2289_v58  ;;  %v3343_v58 = vsub.f32 %v19929_v33, %v3342_v43  ;;  %v4281_v38 = vpop.permute.xlu1 %4280 }
 0x118   :  { %17643 = vmatprep.subr.mxu1 %v22266_v36  ;;  %17610 = vmatprep.mubr.msk.f32.mxu0 %vm18799_vm7, %v22266_v36  ;;  %v2337_v11 = vmax.f32 %v2277_v31, %v2329_v35  ;;  %v4261_v31 = vpop.permute.xlu0 %4260  ;;  %v19972_v35 = vld [vmem:[#allocation2 + $0x31] ss:$2 sm:$0xff]  ;;  %v19996_v39 = vld [vmem:[#allocation3 + $0x30] ss:$2 sm:$0xff] }
 0x119   :  { %17620 = vmatprep.subr.mxu0 %v22266_v36  ;;  %17644 = vmatpush3.msra.mxu1 %v18974_v22  ;;  %12503 = vst.msk [vmem:[#allocation2 + $0x38] sm:$0xff] %vm27_vm0, %v12495_v47 }
 0x11a   :  { %17645 = vmatprep.mubr.msk.f32.mxu1 %vm18799_vm7, %v22266_v36  ;;  %17611 = vmatmul.mubr.f32.vlgmr.msra.gmra.mxu0 %v19834_v57  ;;  %v2317_v57 = vmax.f32 %v2273_v6, %v2309_v4  ;;  %v12494_v4 = vadd.f32 %v12486_v16, %v12470_v19 }
 0x11b   :  { %17621 = vmatpush3.msra.mxu0 %v18866_v34  ;;  %17646 = vmatmul.mubr.f32.vlgmr.msra.gmra.mxu1 %v19909_v17 }
 0x11c   :  { %17655 = vmatprep.subr.mxu1 %v22266_v36  ;;  %17622 = vmatprep.subr.mxu0 %v22266_v36  ;;  %vm2341_vm13 = vcmp.ge.f32.partialorder %v2317_v57, %v2297_v26  ;;  %12502 = vst.msk [vmem:[#allocation2 + $0x30] sm:$0xff] %vm27_vm0, %v12494_v4  ;;  %v4301_v57 = vpop.permute.xlu0 %4300  ;;  %v22334_v4 = vld [vmem:[#allocation45_spill] sm:$0xff] }
 0x11d   :  { %17656 = vmatpush3.msk.msra.mxu1 %vm279_vm2, %v18840_v12  ;;  %8414 = vrot.lane.b32.xlu1 %v19941_v48, %s18798_s0  ;;  %v2345_v16 = vsel %vm2341_vm13, %v2337_v11, 0.0  ;;  %v20009_v11 = vsel %vm8457_vm14, %v19362_v60, 0.0  ;;  %v4292_v47 = vmax.f32 %v22334_v4, %v4281_v38  ;;  %v22337_v38 = vld [vmem:[#allocation29_spill] sm:$0xff]  ;;  %v22338_v4 = vld [vmem:[#allocation50_spill] sm:$0xff]  ;;  %v14547_v48 = vld [vmem:[#allocation2 + $0x8] sm:$0xff]  ;;  %vm10447_vm13 = vcmp.gt.f32.partialorder %v19806_v5, 0.0 }
 0x11e   :  { %8394 = vrot.lane.b32.xlu0 %v19360_v63, %s18798_s0  ;;  %17623 = vmatpush3.msra.mxu0 %v18901_v50  ;;  %v3733_v6 = vsel %vm275_vm1, %v2345_v16, 0  ;;  %22333 = vst [vmem:[#allocation16_spill] sm:$0xff] %v20009_v11  ;;  %v14546_v63 = vld [vmem:[#allocation2] sm:$0xff] }
 0x11f   :  { %17657 = vmatprep.subr.mxu1 %v22266_v36  ;;  %17624 = vmatprep.mubr.msk.f32.mxu0 %vm18799_vm7, %v22266_v36  ;;  %v20004_v26 = vand.u32 4294901760, %v3733_v6 }
 0x120   :  { %17634 = vmatprep.subr.mxu0 %v22266_v36  ;;  %17658 = vmatpush3.msk.msra.mxu1 %vm18850_vm3, %v22269_v44 }
 0x121   :  { %17659 = vmatprep.mubr.msk.f32.mxu1 %vm18799_vm7, %v22266_v36  ;;  %17625 = vmatmul.mubr.f32.vlgmr.msra.gmra.mxu0 %v19814_v40  ;;  %v3344_v40 = vand.u32 4294901760, %v3343_v58  ;;  %v22335_v58 = vld [vmem:[#allocation28_spill] sm:$0xff] }
 0x122   :  { %17635 = vmatpush3.msk.msra.mxu0 %vm279_vm2, %v18840_v12  ;;  %17660 = vmatmul.mubr.f32.vlgmr.msra.gmra.mxu1 %v3342_v43  ;;  %v19998_v43 = vld [vmem:[#allocation3 + $0x31] ss:$2 sm:$0xff]  ;;  %v4272_v16 = vmax.f32 %v22335_v58, %v4261_v31  ;;  %v4369_v31 = vpop.permute.xlu0 %4368  ;;  %v4336_v58 = vmax.f32 %v4292_v47, %v22338_v4 }
 0x123   :  { %17669 = vmatprep.subr.mxu1 %v22266_v36  ;;  %17636 = vmatprep.subr.mxu0 %v22266_v36  ;;  %22332 = vst [vmem:[#allocation42_spill] sm:$0xff] %v19998_v43  ;;  %12478 = vst.msk [vmem:[#allocation3 + $0x30] sm:$0xff] %vm27_vm0, %v12470_v19  ;;  %v4349_v19 = vpop.permute.xlu1 %4348 }
 0x124   :  { %17670 = vmatpush3.msk.msra.mxu1 %vm279_vm2, %v18840_v12  ;;  %8482 = vrot.lane.b32.xlu1 %v19362_v60, %s18798_s0  ;;  %12479 = vst.msk [vmem:[#allocation3 + $0x38] sm:$0xff] %vm27_vm0, %v12471_v21  ;;  %v22336_v21 = vld [vmem:[#allocation20_spill] sm:$0xff]  ;;  %v20024_v60 = vsub.f32 %v3733_v6, %v20004_v26  ;;  %v20036_v6 = vsel %vm8382_vm15, %v19479_v2, 0.0  ;;  %vm10523_vm15 = vcmp.gt.f32.partialorder %v19808_v10, 0.0 }
 0x125   :  { %8434 = vrot.lane.b32.xlu0 %v19397_v28, %s18798_s0  ;;  %17637 = vmatpush3.msk.msra.mxu0 %vm18850_vm3, %v22269_v44 }
 0x126   :  { %17671 = vmatprep.subr.mxu1 %v22266_v36  ;;  %17638 = vmatprep.mubr.msk.f32.mxu0 %vm18799_vm7, %v22266_v36 }
 0x127   :  { %17648 = vmatprep.subr.mxu0 %v22266_v36  ;;  %17672 = vmatpush3.msk.msra.mxu1 %vm18850_vm3, %v22269_v44  ;;  %v4389_v28 = vpop.permute.xlu1 %4388 }
 0x128   :  { %17673 = vmatprep.mubr.msk.f32.mxu1 %vm18799_vm7, %v22266_v36  ;;  %17639 = vmatmul.mubr.f32.vlgmr.msra.gmra.mxu0 %v3344_v40  ;;  %v4312_v40 = vmax.f32 %v22336_v21, %v4301_v57  ;;  %v4332_v57 = vmax.f32 %v4272_v16, %v22337_v38  ;;  %v22339_v21 = vld [vmem:[#allocation21_spill] sm:$0xff]  ;;  %v3804_v16 = vand.u32 4294901760, %v20024_v60  ;;  %v14531_v38 = vld [vmem:[#allocation4 + $0x1c8] sm:$0xff] }
 0x129   :  { %17649 = vmatpush3.msra.mxu0 %v18848_v24  ;;  %17674 = vmatmul.mubr.f32.vlgmr.msra.gmra.mxu1 %v19909_v17  ;;  %v14555_v4 = vadd.f32 %v14547_v48, %v14531_v38 }
 0x12a   :  { %17683 = vmatprep.subr.mxu1 %v22266_v36  ;;  %17650 = vmatprep.subr.mxu0 %v22266_v36  ;;  %v4360_v47 = vmax.f32 %v4332_v57, %v4349_v19  ;;  %v3805_v19 = vsub.f32 %v20024_v60, %v3804_v16 }
 0x12b   :  { %17684 = vmatpush3.msra.mxu1 %v18894_v46  ;;  %8522 = vrot.lane.b32.xlu1 %v19399_v3, %s18798_s0  ;;  %v4340_v3 = vmax.f32 %v4312_v40, %v22339_v21  ;;  %v4283_v57 = vpop.permute.xlu1 %4282  ;;  %v20091_v21 = vld [vmem:[#allocation3] ss:$2 sm:$0xff] }
 0x12c   :  { %8502 = vrot.lane.b32.xlu0 %v20009_v11, %s18798_s0  ;;  %17651 = vmatpush3.msra.mxu0 %v18875_v41  ;;  %v14530_v11 = vld [vmem:[#allocation4 + $0x1c0] sm:$0xff] }
 0x12d   :  { %17685 = vmatprep.subr.mxu1 %v22266_v36  ;;  %17652 = vmatprep.mubr.msk.f32.mxu0 %vm18799_vm7, %v22266_v36  ;;  %v4400_v40 = vmax.f32 %v4340_v3, %v4389_v28  ;;  %v20065_v28 = vld [vmem:[#allocation2] ss:$2 sm:$0xff]  ;;  %v20067_v3 = vld [vmem:[#allocation2 + $0x1] ss:$2 sm:$0xff] }
 0x12e   :  { %17662 = vmatprep.subr.mxu0 %v22266_v36  ;;  %17686 = vmatpush3.msra.mxu1 %v18974_v22  ;;  %14563 = vst.msk [vmem:[#allocation2 + $0x8] sm:$0xff] %vm27_vm0, %v14555_v4 }
 0x12f   :  { %17687 = vmatprep.mubr.msk.f32.mxu1 %vm18799_vm7, %v22266_v36  ;;  %17653 = vmatmul.mubr.f32.vlgmr.msra.gmra.mxu0 %v19929_v33  ;;  %v4380_v33 = vmax.f32 %v4336_v58, %v4369_v31  ;;  %v14554_v31 = vadd.f32 %v14546_v63, %v14530_v11  ;;  %v4263_v63 = vpop.permute.xlu0 %4262 }
 0x130   :  { %17663 = vmatpush3.msra.mxu0 %v18866_v34  ;;  %17688 = vmatmul.mubr.f32.vlgmr.msra.gmra.mxu1 %v20004_v26 }
 0x131   :  { %17697 = vmatprep.subr.mxu1 %v22266_v36  ;;  %17664 = vmatprep.subr.mxu0 %v22266_v36  ;;  %vm4404_vm4 = vcmp.ge.f32.partialorder %v4380_v33, %v4360_v47  ;;  %14562 = vst.msk [vmem:[#allocation2] sm:$0xff] %vm27_vm0, %v14554_v31  ;;  %v22342_v31 = vld [vmem:[#allocation51_spill] sm:$0xff] }
 0x132   :  { %17698 = vmatpush3.msk.msra.mxu1 %vm279_vm2, %v18840_v12  ;;  %8416 = vrot.lane.b32.xlu1 %v20036_v6, %s18798_s0  ;;  %v4408_v48 = vsel %vm4404_vm4, %v4400_v40, 0.0  ;;  %v20104_v40 = vsel %vm8458_vm5, %v19481_v13, 0.0  ;;  %v4293_v4 = vmax.f32 %v22342_v31, %v4283_v57  ;;  %v22345_v57 = vld [vmem:[#allocation33_spill] sm:$0xff]  ;;  %vm2128_vm5 = vcmask 64512  }
 0x133   :  { %8396 = vrot.lane.b32.xlu0 %v19479_v2, %s18798_s0  ;;  %17665 = vmatpush3.msra.mxu0 %v18901_v50  ;;  %v4413_v58 = vsel %vm275_vm1, %v4408_v48, 0  ;;  %v4303_v33 = vpop.permute.xlu0 %4302  ;;  %22341 = vst [vmem:[#allocation26_spill] sm:$0xff] %v20104_v40  ;;  %v14549_v2 = vld [vmem:[#allocation2 + $0x18] sm:$0xff] }
 0x134   :  { %17699 = vmatprep.subr.mxu1 %v22266_v36  ;;  %17666 = vmatprep.mubr.msk.f32.mxu0 %vm18799_vm7, %v22266_v36  ;;  %v20099_v47 = vand.u32 4294901760, %v4413_v58  ;;  %v4337_v31 = vmax.f32 %v4293_v4, %v19290_v29 }
 0x135   :  { %17676 = vmatprep.subr.mxu0 %v22266_v36  ;;  %17700 = vmatpush3.msk.msra.mxu1 %vm18850_vm3, %v22269_v44 }
 0x136   :  { %17701 = vmatprep.mubr.msk.f32.mxu1 %vm18799_vm7, %v22266_v36  ;;  %17667 = vmatmul.mubr.f32.vlgmr.msra.gmra.mxu0 %v19909_v17  ;;  %v3806_v17 = vand.u32 4294901760, %v3805_v19  ;;  %v22343_v19 = vld [vmem:[#allocation32_spill] sm:$0xff] }
 0x137   :  { %17677 = vmatpush3.msk.msra.mxu0 %vm279_vm2, %v18840_v12  ;;  %17702 = vmatmul.mubr.f32.vlgmr.msra.gmra.mxu1 %v3804_v16  ;;  %v20093_v16 = vld [vmem:[#allocation3 + $0x1] ss:$2 sm:$0xff]  ;;  %v4273_v48 = vmax.f32 %v22343_v19, %v4263_v63  ;;  %v4371_v63 = vpop.permute.xlu0 %4370 }
 0x138   :  { %17711 = vmatprep.subr.mxu1 %v22266_v36  ;;  %17678 = vmatprep.subr.mxu0 %v22266_v36  ;;  %22340 = vst [vmem:[#allocation43_spill] sm:$0xff] %v20093_v16  ;;  %14538 = vst.msk [vmem:[#allocation3] sm:$0xff] %vm27_vm0, %v14530_v11  ;;  %v4351_v11 = vpop.permute.xlu1 %4350  ;;  %v22346_v19 = vld [vmem:[#allocation31_spill] sm:$0xff] }
 0x139   :  { %17712 = vmatpush3.msk.msra.mxu1 %vm279_vm2, %v18840_v12  ;;  %8484 = vrot.lane.b32.xlu1 %v19481_v13, %s18798_s0  ;;  %14539 = vst.msk [vmem:[#allocation3 + $0x8] sm:$0xff] %vm27_vm0, %v14531_v38  ;;  %v22344_v38 = vld [vmem:[#allocation30_spill] sm:$0xff]  ;;  %v20119_v13 = vsub.f32 %v4413_v58, %v20099_v47  ;;  %v20131_v58 = vsel %vm8383_vm6, %v19590_v15, 0.0  ;;  %vm10524_vm6 = vcmp.gt.f32.partialorder %v19903_v56, 0.0 }
 0x13a   :  { %8436 = vrot.lane.b32.xlu0 %v19515_v9, %s18798_s0  ;;  %17679 = vmatpush3.msk.msra.mxu0 %vm18850_vm3, %v22269_v44  ;;  %v14548_v9 = vld [vmem:[#allocation2 + $0x10] sm:$0xff] }
 0x13b   :  { %17713 = vmatprep.subr.mxu1 %v22266_v36  ;;  %17680 = vmatprep.mubr.msk.f32.mxu0 %vm18799_vm7, %v22266_v36 }
 0x13c   :  { %17690 = vmatprep.subr.mxu0 %v22266_v36  ;;  %17714 = vmatpush3.msk.msra.mxu1 %vm18850_vm3, %v22269_v44 }
 0x13d   :  { %17715 = vmatprep.mubr.msk.f32.mxu1 %vm18799_vm7, %v22266_v36  ;;  %17681 = vmatmul.mubr.f32.vlgmr.msra.gmra.mxu0 %v3806_v17  ;;  %v4313_v17 = vmax.f32 %v22344_v38, %v4303_v33  ;;  %v4333_v33 = vmax.f32 %v4273_v48, %v22345_v57  ;;  %v4484_v48 = vand.u32 4294901760, %v20119_v13  ;;  %v14533_v57 = vld [vmem:[#allocation4 + $0x1d8] sm:$0xff] }
 0x13e   :  { %17691 = vmatpush3.msra.mxu0 %v18848_v24  ;;  %17716 = vmatmul.mubr.f32.vlgmr.msra.gmra.mxu1 %v20004_v26 }
 0x13f   :  { %17725 = vmatprep.subr.mxu1 %v22266_v36  ;;  %17692 = vmatprep.subr.mxu0 %v22266_v36  ;;  %v4341_v38 = vmax.f32 %v4313_v17, %v22346_v19  ;;  %v4361_v29 = vmax.f32 %v4333_v33, %v4351_v11  ;;  %v4485_v11 = vsub.f32 %v20119_v13, %v4484_v48 }
 0x140   :  { %17726 = vmatpush3.msra.mxu1 %v18894_v46  ;;  %8524 = vrot.lane.b32.xlu1 %v19517_v20, %s18798_s0  ;;  %v14532_v20 = vld [vmem:[#allocation4 + $0x1d0] sm:$0xff] }
 0x141   :  { %8504 = vrot.lane.b32.xlu0 %v20104_v40, %s18798_s0  ;;  %17693 = vmatpush3.msra.mxu0 %v18875_v41  ;;  %v4391_v40 = vpop.permute.xlu1 %4390  ;;  %v14556_v17 = vadd.f32 %v14548_v9, %v14532_v20  ;;  %v4265_v9 = vpop.permute.xlu0 %4264 }
 0x142   :  { %17727 = vmatprep.subr.mxu1 %v22266_v36  ;;  %17694 = vmatprep.mubr.msk.f32.mxu0 %vm18799_vm7, %v22266_v36  ;;  %v4401_v4 = vmax.f32 %v4341_v38, %v4391_v40  ;;  %v20162_v40 = vld [vmem:[#allocation2 + $0x11] ss:$2 sm:$0xff]  ;;  %v20186_v38 = vld [vmem:[#allocation3 + $0x10] ss:$2 sm:$0xff] }
 0x143   :  { %17704 = vmatprep.subr.mxu0 %v22266_v36  ;;  %17728 = vmatpush3.msra.mxu1 %v18974_v22 }
 0x144   :  { %17729 = vmatprep.mubr.msk.f32.mxu1 %vm18799_vm7, %v22266_v36  ;;  %17695 = vmatmul.mubr.f32.vlgmr.msra.gmra.mxu0 %v20024_v60  ;;  %v4381_v60 = vmax.f32 %v4337_v31, %v4371_v63  ;;  %v14557_v63 = vadd.f32 %v14549_v2, %v14533_v57  ;;  %v20160_v2 = vld [vmem:[#allocation2 + $0x10] ss:$2 sm:$0xff] }
 0x145   :  { %17705 = vmatpush3.msra.mxu0 %v18866_v34  ;;  %17730 = vmatmul.mubr.f32.vlgmr.msra.gmra.mxu1 %v20099_v47  ;;  %14564 = vst.msk [vmem:[#allocation2 + $0x10] sm:$0xff] %vm27_vm0, %v14556_v17  ;;  %v4285_v31 = vpop.permute.xlu1 %4284 }
 0x146   :  { %17739 = vmatprep.subr.mxu1 %v22266_v36  ;;  %17706 = vmatprep.subr.mxu0 %v22266_v36  ;;  %vm4405_vm8 = vcmp.ge.f32.partialorder %v4381_v60, %v4361_v29  ;;  %14565 = vst.msk [vmem:[#allocation2 + $0x18] sm:$0xff] %vm27_vm0, %v14557_v63  ;;  %v4305_v60 = vpop.permute.xlu0 %4304  ;;  %v4294_v17 = vmax.f32 %v19293_v7, %v4285_v31  ;;  %v20226_v7 = vsel %vm10446_vm10, %v19685_v18, 0.0  ;;  %v14534_v31 = vld [vmem:[#allocation4 + $0x1e0] sm:$0xff]  ;;  %vm10525_vm10 = vcmp.gt.f32.partialorder %v19998_v43, 0.0 }
 0x147   :  { %17740 = vmatpush3.msk.msra.mxu1 %vm279_vm2, %v18840_v12  ;;  %8418 = vrot.lane.b32.xlu1 %v20131_v58, %s18798_s0  ;;  %v4409_v33 = vsel %vm4405_vm8, %v4401_v4, 0.0  ;;  %v20199_v4 = vsel %vm8459_vm9, %v19592_v37, 0.0  ;;  %v4274_v63 = vmax.f32 %v19147_v52, %v4265_v9  ;;  %22348 = vst [vmem:[#allocation27_spill] sm:$0xff] %v20226_v7  ;;  %vm10449_vm8 = vcmp.gt.f32.partialorder %v19996_v39, 0.0 }
 0x148   :  { %8398 = vrot.lane.b32.xlu0 %v19590_v15, %s18798_s0  ;;  %17707 = vmatpush3.msra.mxu0 %v18901_v50  ;;  %v4875_v19 = vsel %vm275_vm1, %v4409_v33, 0  ;;  %v4338_v9 = vmax.f32 %v4294_v17, %v19332_v54  ;;  %v22349_v33 = vld [vmem:[#allocation36_spill] sm:$0xff] }
 0x149   :  { %17741 = vmatprep.subr.mxu1 %v22266_v36  ;;  %17708 = vmatprep.mubr.msk.f32.mxu0 %vm18799_vm7, %v22266_v36  ;;  %v20194_v29 = vand.u32 4294901760, %v4875_v19 }
 0x14a   :  { %17718 = vmatprep.subr.mxu0 %v22266_v36  ;;  %17742 = vmatpush3.msk.msra.mxu1 %vm18850_vm3, %v22269_v44  ;;  %v4373_v52 = vpop.permute.xlu0 %4372 }
 0x14b   :  { %17743 = vmatprep.mubr.msk.f32.mxu1 %vm18799_vm7, %v22266_v36  ;;  %17709 = vmatmul.mubr.f32.vlgmr.msra.gmra.mxu0 %v20004_v26  ;;  %v4486_v26 = vand.u32 4294901760, %v4485_v11  ;;  %v20214_v11 = vsub.f32 %v4875_v19, %v20194_v29 }
 0x14c   :  { %17719 = vmatpush3.msk.msra.mxu0 %vm279_vm2, %v18840_v12  ;;  %17744 = vmatmul.mubr.f32.vlgmr.msra.gmra.mxu1 %v4484_v48  ;;  %v20188_v48 = vld [vmem:[#allocation3 + $0x11] ss:$2 sm:$0xff] }
 0x14d   :  { %17753 = vmatprep.subr.mxu1 %v22266_v36  ;;  %17720 = vmatprep.subr.mxu0 %v22266_v36  ;;  %22347 = vst [vmem:[#allocation18_spill] sm:$0xff] %v20188_v48  ;;  %14540 = vst.msk [vmem:[#allocation3 + $0x10] sm:$0xff] %vm27_vm0, %v14532_v20  ;;  %v4353_v20 = vpop.permute.xlu1 %4352 }
 0x14e   :  { %17754 = vmatpush3.msk.msra.mxu1 %vm279_vm2, %v18840_v12  ;;  %8486 = vrot.lane.b32.xlu1 %v19592_v37, %s18798_s0  ;;  %14541 = vst.msk [vmem:[#allocation3 + $0x18] sm:$0xff] %vm27_vm0, %v14533_v57  ;;  %v4314_v57 = vmax.f32 %v19137_v55, %v4305_v60  ;;  %v4334_v55 = vmax.f32 %v4274_v63, %v19149_v32  ;;  %v4946_v32 = vand.u32 4294901760, %v20214_v11  ;;  %v14535_v60 = vld [vmem:[#allocation4 + $0x1e8] sm:$0xff]  ;;  %v14550_v63 = vld [vmem:[#allocation2 + $0x20] sm:$0xff] }
 0x14f   :  { %8438 = vrot.lane.b32.xlu0 %v19616_v45, %s18798_s0  ;;  %17721 = vmatpush3.msk.msra.mxu0 %vm18850_vm3, %v22269_v44 }
 0x150   :  { %17755 = vmatprep.subr.mxu1 %v22266_v36  ;;  %17722 = vmatprep.mubr.msk.f32.mxu0 %vm18799_vm7, %v22266_v36  ;;  %v4362_v54 = vmax.f32 %v4334_v55, %v4353_v20  ;;  %v4947_v20 = vsub.f32 %v20214_v11, %v4946_v32  ;;  %v4267_v55 = vpop.permute.xlu0 %4266 }
 0x151   :  { %17732 = vmatprep.subr.mxu0 %v22266_v36  ;;  %17756 = vmatpush3.msk.msra.mxu1 %vm18850_vm3, %v22269_v44  ;;  %v4393_v19 = vpop.permute.xlu1 %4392 }
 0x152   :  { %17757 = vmatprep.mubr.msk.f32.mxu1 %vm18799_vm7, %v22266_v36  ;;  %17723 = vmatmul.mubr.f32.vlgmr.msra.gmra.mxu0 %v4486_v26  ;;  %v4342_v26 = vmax.f32 %v4314_v57, %v22349_v33  ;;  %v14558_v57 = vadd.f32 %v14550_v63, %v14534_v31 }
 0x153   :  { %17733 = vmatpush3.msra.mxu0 %v18848_v24  ;;  %17758 = vmatmul.mubr.f32.vlgmr.msra.gmra.mxu1 %v20099_v47 }
 0x154   :  { %17767 = vmatprep.subr.mxu1 %v22266_v36  ;;  %17734 = vmatprep.subr.mxu0 %v22266_v36  ;;  %v4402_v17 = vmax.f32 %v4342_v26, %v4393_v19  ;;  %v4307_v63 = vpop.permute.xlu0 %4306 }
 0x155   :  { %17768 = vmatpush3.msra.mxu1 %v18894_v46  ;;  %8526 = vrot.lane.b32.xlu1 %v19618_v1, %s18798_s0  ;;  %v14551_v1 = vld [vmem:[#allocation2 + $0x28] sm:$0xff]  ;;  %v4287_v26 = vpop.permute.xlu1 %4286 }
 0x156   :  { %8506 = vrot.lane.b32.xlu0 %v20199_v4, %s18798_s0  ;;  %17735 = vmatpush3.msra.mxu0 %v18875_v41 }
 0x157   :  { %17769 = vmatprep.subr.mxu1 %v22266_v36  ;;  %17736 = vmatprep.mubr.msk.f32.mxu0 %vm18799_vm7, %v22266_v36 }
 0x158   :  { %17746 = vmatprep.subr.mxu0 %v22266_v36  ;;  %17770 = vmatpush3.msra.mxu1 %v18974_v22 }
 0x159   :  { %17771 = vmatprep.mubr.msk.f32.mxu1 %vm18799_vm7, %v22266_v36  ;;  %17737 = vmatmul.mubr.f32.vlgmr.msra.gmra.mxu0 %v20119_v13  ;;  %v4382_v13 = vmax.f32 %v4338_v9, %v4373_v52  ;;  %v14559_v52 = vadd.f32 %v14551_v1, %v14535_v60  ;;  %v20255_v1 = vld [vmem:[#allocation2 + $0x20] ss:$2 sm:$0xff]  ;;  %v20257_v9 = vld [vmem:[#allocation2 + $0x21] ss:$2 sm:$0xff] }
 0x15a   :  { %17747 = vmatpush3.msra.mxu0 %v18866_v34  ;;  %17772 = vmatmul.mubr.f32.vlgmr.msra.gmra.mxu1 %v20194_v29  ;;  %14566 = vst.msk [vmem:[#allocation2 + $0x20] sm:$0xff] %vm27_vm0, %v14558_v57  ;;  %v22352_v57 = vld [vmem:[#allocation60_spill] sm:$0xff] }
 0x15b   :  { %17781 = vmatprep.subr.mxu1 %v22266_v36  ;;  %17748 = vmatprep.subr.mxu0 %v22266_v36  ;;  %vm4406_vm11 = vcmp.ge.f32.partialorder %v4382_v13, %v4362_v54  ;;  %14567 = vst.msk [vmem:[#allocation2 + $0x28] sm:$0xff] %vm27_vm0, %v14559_v52  ;;  %v20283_v13 = vld [vmem:[#allocation3 + $0x21] ss:$2 sm:$0xff]  ;;  %v4295_v52 = vmax.f32 %v22352_v57, %v4287_v26  ;;  %v4375_v26 = vpop.permute.xlu0 %4374 }
 0x15c   :  { %17782 = vmatpush3.msk.msra.mxu1 %vm279_vm2, %v18840_v12  ;;  %10478 = vrot.lane.b32.xlu1 %v20226_v7, %s18798_s0  ;;  %v4410_v33 = vsel %vm4406_vm11, %v4402_v17, 0.0  ;;  %22350 = vst [vmem:[#allocation44_spill] sm:$0xff] %v20283_v13  ;;  %v20294_v17 = vsel %vm10522_vm12, %v19687_v61, 0.0  ;;  %vm12512_vm11 = vcmp.gt.f32.partialorder %v20091_v21, 0.0 }
 0x15d   :  { %10458 = vrot.lane.b32.xlu0 %v19685_v18, %s18798_s0  ;;  %17749 = vmatpush3.msra.mxu0 %v18901_v50  ;;  %v5337_v19 = vsel %vm275_vm1, %v4410_v33, 0  ;;  %22351 = vst [vmem:[#allocation19_spill] sm:$0xff] %v20294_v17 }
 0x15e   :  { %17783 = vmatprep.subr.mxu1 %v22266_v36  ;;  %17750 = vmatprep.mubr.msk.f32.mxu0 %vm18799_vm7, %v22266_v36  ;;  %v20289_v54 = vand.u32 4294901760, %v5337_v19 }
 0x15f   :  { %17760 = vmatprep.subr.mxu0 %v22266_v36  ;;  %17784 = vmatpush3.msk.msra.mxu1 %vm18850_vm3, %v22269_v44 }
 0x160   :  { %17785 = vmatprep.mubr.msk.f32.mxu1 %vm18799_vm7, %v22266_v36  ;;  %17751 = vmatmul.mubr.f32.vlgmr.msra.gmra.mxu0 %v20099_v47  ;;  %v4948_v47 = vand.u32 4294901760, %v4947_v20  ;;  %v22353_v20 = vld [vmem:[#allocation41_spill] sm:$0xff] }
 0x161   :  { %17761 = vmatpush3.msk.msra.mxu0 %vm279_vm2, %v18840_v12  ;;  %17786 = vmatmul.mubr.f32.vlgmr.msra.gmra.mxu1 %v4946_v32  ;;  %v20281_v32 = vld [vmem:[#allocation3 + $0x20] ss:$2 sm:$0xff]  ;;  %v4275_v33 = vmax.f32 %v22353_v20, %v4267_v55 }
 0x162   :  { %17795 = vmatprep.subr.mxu1 %v22266_v36  ;;  %17762 = vmatprep.subr.mxu0 %v22266_v36  ;;  %14542 = vst.msk [vmem:[#allocation3 + $0x20] sm:$0xff] %vm27_vm0, %v14534_v31  ;;  %14543 = vst.msk [vmem:[#allocation3 + $0x28] sm:$0xff] %vm27_vm0, %v14535_v60  ;;  %v4355_v31 = vpop.permute.xlu1 %4354  ;;  %v4315_v60 = vmax.f32 %v19185_v49, %v4307_v63  ;;  %v4339_v63 = vmax.f32 %v4295_v52, %v19415_v14 }
 0x163   :  { %17796 = vmatpush3.msk.msra.mxu1 %vm279_vm2, %v18840_v12  ;;  %10546 = vrot.lane.b32.xlu1 %v19687_v61, %s18798_s0  ;;  %v20314_v55 = vpop.f32.mrf.mxu1  ;;  %v4335_v49 = vmax.f32 %v4275_v33, %v19197_v0  ;;  %v14552_v61 = vld [vmem:[#allocation2 + $0x30] sm:$0xff] }
 0x164   :  { %10498 = vrot.lane.b32.xlu0 %v19711_v42, %s18798_s0  ;;  %17763 = vmatpush3.msk.msra.mxu0 %vm18850_vm3, %v22269_v44  ;;  %v4343_v20 = vmax.f32 %v4315_v60, %v19187_v8  ;;  %v4383_v33 = vmax.f32 %v4339_v63, %v4375_v26  ;;  %v14553_v42 = vld [vmem:[#allocation2 + $0x38] sm:$0xff] }
 0x165   :  { %17797 = vmatprep.subr.mxu1 %v22266_v36  ;;  %17764 = vmatprep.mubr.msk.f32.mxu0 %vm18799_vm7, %v22266_v36  ;;  %v17395_v57 = vpop.f32.mrf.mxu1  ;;  %v4363_v14 = vmax.f32 %v4335_v49, %v4355_v31  ;;  %v20356_v63 = vld [vmem:[#allocation2 + $0x31] ss:$2 sm:$0xff] }
 0x166   :  { %17774 = vmatprep.subr.mxu0 %v22266_v36  ;;  %17798 = vmatpush3.msk.msra.mxu1 %vm18850_vm3, %v22269_v44  ;;  %v4395_v0 = vpop.permute.xlu1 %4394  ;;  %22356 = vst [vmem:[#allocation20_spill] sm:$0xff] %v20356_v63 }
 0x167   :  { %17799 = vmatprep.mubr.msk.f32.mxu1 %vm18799_vm7, %v22266_v36  ;;  %17765 = vmatmul.mubr.f32.vlgmr.msra.gmra.mxu0 %v4948_v47  ;;  %v20309_v47 = vsub.f32 %v5337_v19, %v20289_v54  ;;  %v20323_v19 = vsel %vm10447_vm13, %v19780_v27, 0.0  ;;  %v4403_v8 = vmax.f32 %v4343_v20, %v4395_v0  ;;  %v20342_v26 = vpop.f32.mrf.mxu1  ;;  %vm4407_vm14 = vcmp.ge.f32.partialorder %v4383_v33, %v4363_v14  ;;  %v20380_v33 = vld [vmem:[#allocation3 + $0x30] ss:$2 sm:$0xff] }
 0x168   :  { %17775 = vmatpush3.msra.mxu0 %v18848_v24  ;;  %17800 = vmatmul.mubr.f32.vlgmr.msra.gmra.mxu1 %v20194_v29  ;;  %22354 = vst [vmem:[#allocation45_spill] sm:$0xff] %v20323_v19  ;;  %22357 = vst [vmem:[#allocation29_spill] sm:$0xff] %v20380_v33  ;;  %vm12588_vm13 = vcmp.gt.f32.partialorder %v20093_v16, 0.0 }
 0x169   :  { %17809 = vmatprep.subr.mxu1 %v22266_v36  ;;  %17776 = vmatprep.subr.mxu0 %v22266_v36  ;;  %v17409_v49 = vpop.f32.mrf.mxu1  ;;  %v4411_v57 = vsel %vm4407_vm14, %v4403_v8, 0.0  ;;  %v20384_v8 = vld [vmem:[#allocation3 + $0x31] ss:$2 sm:$0xff]  ;;  %vm12513_vm14 = vcmp.gt.f32.partialorder %v20186_v38, 0.0 }
 0x16a   :  { %17810 = vmatpush3.msra.mxu1 %v18894_v46  ;;  %10586 = vrot.lane.b32.xlu1 %v19713_v53, %s18798_s0  ;;  %v14536_v53 = vld [vmem:[#allocation4 + $0x1f0] sm:$0xff]  ;;  %v6347_v20 = vpop.permute.xlu1 %6346  ;;  %v5799_v0 = vsel %vm275_vm1, %v4411_v57, 0  ;;  %22358 = vst [vmem:[#allocation50_spill] sm:$0xff] %v20384_v8  ;;  %v20397_v49 = vsel %vm10523_vm15, %v19782_v51, 0.0 }
 0x16b   :  { %10566 = vrot.lane.b32.xlu0 %v20294_v17, %s18798_s0  ;;  %17777 = vmatpush3.msra.mxu0 %v18875_v41  ;;  %v14537_v17 = vld [vmem:[#allocation4 + $0x1f8] sm:$0xff]  ;;  %v14560_v52 = vadd.f32 %v14552_v61, %v14536_v53  ;;  %v6327_v61 = vpop.permute.xlu0 %6326  ;;  %v20382_v14 = vpop.f32.mrf.mxu1  ;;  %14544 = vst.msk [vmem:[#allocation3 + $0x30] sm:$0xff] %vm27_vm0, %v14536_v53  ;;  %22359 = vst [vmem:[#allocation21_spill] sm:$0xff] %v20397_v49 }
 0x16c   :  { %17811 = vmatprep.subr.mxu1 %v22266_v36  ;;  %17778 = vmatprep.mubr.msk.f32.mxu0 %vm18799_vm7, %v22266_v36  ;;  %v14561_v60 = vadd.f32 %v14553_v42, %v14537_v17  ;;  %v20354_v42 = vld [vmem:[#allocation2 + $0x30] ss:$2 sm:$0xff]  ;;  %14545 = vst.msk [vmem:[#allocation3 + $0x38] sm:$0xff] %vm27_vm0, %v14537_v17 }
 0x16d   :  { %17788 = vmatprep.subr.mxu0 %v22266_v36  ;;  %17812 = vmatpush3.msra.mxu1 %v18974_v22  ;;  %22355 = vst [vmem:[#allocation28_spill] sm:$0xff] %v20354_v42  ;;  %14568 = vst.msk [vmem:[#allocation2 + $0x30] sm:$0xff] %vm27_vm0, %v14560_v52  ;;  %v17423_v57 = vpop.f32.mrf.mxu1  ;;  %v22360_v53 = vld [vmem:[#allocation69_spill] sm:$0xff]  ;;  %v22361_v17 = vld [vmem:[#allocation48_spill] sm:$0xff] }
 0x16e   :  { %17813 = vmatprep.mubr.msk.f32.mxu1 %vm18799_vm7, %v22266_v36  ;;  %17779 = vmatmul.mubr.f32.vlgmr.msra.gmra.mxu0 %v20214_v11  ;;  %v5408_v11 = vand.u32 4294901760, %v20309_v47  ;;  %14569 = vst.msk [vmem:[#allocation2 + $0x38] sm:$0xff] %vm27_vm0, %v14561_v60  ;;  %v22362_v57 = vld [vmem:[#allocation46_spill] sm:$0xff]  ;;  %vm10448_vm0 = vcmp.gt.f32.partialorder %v19901_v59, 0.0 }
 0x16f   :  { %17789 = vmatpush3.msra.mxu0 %v18866_v34  ;;  %17814 = vmatmul.mubr.f32.vlgmr.msra.gmra.mxu1 %v20289_v54  ;;  %v6367_v52 = vpop.permute.xlu0 %6366 }
 0x170   :  { %17823 = vmatprep.subr.mxu1 %v22266_v36  ;;  %17790 = vmatprep.subr.mxu0 %v22266_v36  ;;  %v5409_v31 = vsub.f32 %v20309_v47, %v5408_v11 }
 0x171   :  { %17824 = vmatpush3.msk.msra.mxu1 %vm279_vm2, %v18840_v12  ;;  %10480 = vrot.lane.b32.xlu1 %v20323_v19, %s18798_s0 }
 0x172   :  { %10460 = vrot.lane.b32.xlu0 %v19780_v27, %s18798_s0  ;;  %17791 = vmatpush3.msra.mxu0 %v18901_v50 }
 0x173   :  { %17825 = vmatprep.subr.mxu1 %v22266_v36  ;;  %17792 = vmatprep.mubr.msk.f32.mxu0 %vm18799_vm7, %v22266_v36 }
 0x174   :  { %17802 = vmatprep.subr.mxu0 %v22266_v36  ;;  %17826 = vmatpush3.msk.msra.mxu1 %vm18850_vm3, %v22269_v44 }
 0x175   :  { %17827 = vmatprep.mubr.msk.f32.mxu1 %vm18799_vm7, %v22266_v36  ;;  %17793 = vmatmul.mubr.f32.vlgmr.msra.gmra.mxu0 %v20194_v29  ;;  %v5410_v29 = vand.u32 4294901760, %v5409_v31  ;;  %v20390_v31 = vand.u32 4294901760, %v5799_v0 }
 0x176   :  { %17803 = vmatpush3.msk.msra.mxu0 %vm279_vm2, %v18840_v12  ;;  %17828 = vmatmul.mubr.f32.vlgmr.msra.gmra.mxu1 %v5408_v11  ;;  %v356_v11 = vpop.f32.mrf.mxu0 }
 0x177   :  { %17837 = vmatprep.subr.mxu1 %v22266_v36  ;;  %17804 = vmatprep.subr.mxu0 %v22266_v36  ;;  %v20412_v27 = vsub.f32 %v5799_v0, %v20390_v31  ;;  %v22363_v0 = vld [vmem:[#allocation49_spill] sm:$0xff] }
 0x178   :  { %17838 = vmatpush3.msk.msra.mxu1 %vm279_vm2, %v18840_v12  ;;  %10548 = vrot.lane.b32.xlu1 %v19782_v51, %s18798_s0  ;;  %v17388_v60 = vpop.f32.mrf.mxu0  ;;  %v6378_v51 = vmax.f32 %v22362_v57, %v6367_v52  ;;  %v20427_v57 = vsel %vm10448_vm0, %v19875_v23, 0.0  ;;  %vm12589_vm0 = vcmp.gt.f32.partialorder %v20188_v48, 0.0 }
 0x179   :  { %10500 = vrot.lane.b32.xlu0 %v19806_v5, %s18798_s0  ;;  %17805 = vmatpush3.msk.msra.mxu0 %vm18850_vm3, %v22269_v44  ;;  %v6338_v60 = vmax.f32 %v22361_v17, %v6327_v61  ;;  %v6415_v5 = vpop.permute.xlu1 %6414  ;;  %v20420_v17 = vpop.f32.mrf.mxu1 }
 0x17a   :  { %17839 = vmatprep.subr.mxu1 %v22266_v36  ;;  %17806 = vmatprep.mubr.msk.f32.mxu0 %vm18799_vm7, %v22266_v36  ;;  %v513_v61 = vpop.f32.mrf.mxu0 }
 0x17b   :  { %17816 = vmatprep.subr.mxu0 %v22266_v36  ;;  %17840 = vmatpush3.msk.msra.mxu1 %vm18850_vm3, %v22269_v44  ;;  %v6398_v52 = vmax.f32 %v6338_v60, %v22363_v0  ;;  %v17437_v7 = vpop.f32.mrf.mxu1 }
 0x17c   :  { %17841 = vmatprep.mubr.msk.f32.mxu1 %vm18799_vm7, %v22266_v36  ;;  %17807 = vmatmul.mubr.f32.vlgmr.msra.gmra.mxu0 %v5410_v29  ;;  %v6358_v29 = vmax.f32 %v22360_v53, %v6347_v20  ;;  %v6435_v20 = vpop.permute.xlu0 %6434  ;;  %v438_v53 = vadd.f32 %v20314_v55, %v356_v11  ;;  %v17402_v19 = vpop.f32.mrf.mxu0  ;;  %v22365_v55 = vld [vmem:[#allocation47_spill] sm:$0xff] }
 0x17d   :  { %17817 = vmatpush3.msra.mxu0 %v18848_v24  ;;  %17842 = vmatmul.mubr.f32.vlgmr.msra.gmra.mxu1 %v20289_v54  ;;  %v6406_v11 = vmax.f32 %v6378_v51, %v22365_v55  ;;  %v6455_v60 = vpop.permute.xlu1 %6454 }
 0x17e   :  { %17851 = vmatprep.subr.mxu1 %v22266_v36  ;;  %17818 = vmatprep.subr.mxu0 %v22266_v36  ;;  %v514_v18 = vadd.f32 %v513_v61, %v438_v53  ;;  %v665_v19 = vpop.f32.mrf.mxu0 }
 0x17f   :  { %17852 = vmatpush3.msra.mxu1 %v18894_v46  ;;  %10588 = vrot.lane.b32.xlu1 %v19808_v10, %s18798_s0  ;;  %v22364_v10 = vld [vmem:[#allocation78_spill] sm:$0xff]  ;;  %v6466_v51 = vmax.f32 %v6406_v11, %v6455_v60 }
 0x180   :  { %10568 = vrot.lane.b32.xlu0 %v20397_v49, %s18798_s0  ;;  %17819 = vmatpush3.msra.mxu0 %v18875_v41  ;;  %v6402_v49 = vmax.f32 %v6358_v29, %v22364_v10  ;;  %v6426_v10 = vmax.f32 %v6398_v52, %v6415_v5  ;;  %v589_v7 = vadd.f32 %v20342_v26, %v514_v18  ;;  %v17416_v61 = vpop.f32.mrf.mxu0  ;;  %v6329_v18 = vpop.permute.xlu0 %6328 }
 0x181   :  { %17853 = vmatprep.subr.mxu1 %v22266_v36  ;;  %17820 = vmatprep.mubr.msk.f32.mxu0 %vm18799_vm7, %v22266_v36  ;;  %v6349_v52 = vpop.permute.xlu1 %6348 }
 0x182   :  { %17830 = vmatprep.subr.mxu0 %v22266_v36  ;;  %17854 = vmatpush3.msra.mxu1 %v18974_v22  ;;  %v6446_v0 = vmax.f32 %v6402_v49, %v6435_v20  ;;  %v20452_v49 = vpop.f32.mrf.mxu1  ;;  %v666_v29 = vadd.f32 %v665_v19, %v589_v7  ;;  %v22367_v7 = vld [vmem:[#allocation14_spill] sm:$0xff] }
 0x183   :  { %17855 = vmatprep.mubr.msk.f32.mxu1 %vm18799_vm7, %v22266_v36  ;;  %17821 = vmatmul.mubr.f32.vlgmr.msra.gmra.mxu0 %v20309_v47  ;;  %v5870_v47 = vand.u32 4294901760, %v20412_v27  ;;  %v6359_v19 = vmax.f32 %v22367_v7, %v6349_v52  ;;  %v22371_v7 = vld [vmem:[#allocation10_spill] sm:$0xff] }
 0x184   :  { %17831 = vmatpush3.msra.mxu0 %v18866_v34  ;;  %17856 = vmatmul.mubr.f32.vlgmr.msra.gmra.mxu1 %v20390_v31  ;;  %vm6470_vm4 = vcmp.ge.f32.partialorder %v6446_v0, %v6426_v10  ;;  %v17451_v26 = vpop.f32.mrf.mxu1  ;;  %v739_v53 = vadd.f32 %v20382_v14, %v666_v29  ;;  %v818_v14 = vpop.f32.mrf.mxu0  ;;  %v20490_v10 = vsel %vm10524_vm6, %v19877_v30, 0.0 }
 0x185   :  { %17865 = vmatprep.subr.mxu1 %v22266_v36  ;;  %17832 = vmatprep.subr.mxu0 %v22266_v36  ;;  %v5871_v5 = vsub.f32 %v20412_v27, %v5870_v47  ;;  %v6474_v20 = vsel %vm6470_vm4, %v6466_v51, 0.0  ;;  %v6369_v60 = vpop.permute.xlu0 %6368  ;;  %22366 = vst [vmem:[#allocation51_spill] sm:$0xff] %v20490_v10  ;;  %v6417_v61 = vpop.permute.xlu1 %6416  ;;  %v22369_v26 = vld [vmem:[#allocation54_spill] sm:$0xff]  ;;  %v900_v52 = vadd.f32 %v20420_v17, %v818_v14  ;;  %v22372_v17 = vld [vmem:[#allocation55_spill] sm:$0xff]  ;;  %vm12514_vm4 = vcmp.gt.f32.partialorder %v20281_v32, 0.0 }
 0x186   :  { %17866 = vmatpush3.msk.msra.mxu1 %vm279_vm2, %v18840_v12  ;;  %10482 = vrot.lane.b32.xlu1 %v20427_v57, %s18798_s0  ;;  %2129 = vst.msk [vmem:[#allocation7] sm:$0xff] %vm2128_vm5, %v739_v53  ;;  %v6479_v55 = vsel %vm275_vm1, %v6474_v20, 0  ;;  %v20481_v11 = vpop.f32.mrf.mxu1  ;;  %v6379_v20 = vmax.f32 %v22369_v26, %v6369_v60 }
 0x187   :  { %10462 = vrot.lane.b32.xlu0 %v19875_v23, %s18798_s0  ;;  %17833 = vmatpush3.msra.mxu0 %v18901_v50  ;;  %v20485_v0 = vand.u32 4294901760, %v6479_v55 }
 0x188   :  { %17867 = vmatprep.subr.mxu1 %v22266_v36  ;;  %17834 = vmatprep.mubr.msk.f32.mxu0 %vm18799_vm7, %v22266_v36  ;;  %v17465_v51 = vpop.f32.mrf.mxu1  ;;  %v6407_v14 = vmax.f32 %v6379_v20, %v22372_v17 }
 0x189   :  { %17844 = vmatprep.subr.mxu0 %v22266_v36  ;;  %17868 = vmatpush3.msk.msra.mxu1 %vm18850_vm3, %v22269_v44  ;;  %v20505_v53 = vsub.f32 %v6479_v55, %v20485_v0  ;;  %v22370_v55 = vld [vmem:[#allocation57_spill] sm:$0xff]  ;;  %v20520_v51 = vsel %vm10449_vm8, %v19970_v62, 0.0  ;;  %vm12590_vm8 = vcmp.gt.f32.partialorder %v20283_v13, 0.0 }
 0x18a   :  { %17869 = vmatprep.mubr.msk.f32.mxu1 %vm18799_vm7, %v22266_v36  ;;  %17835 = vmatmul.mubr.f32.vlgmr.msra.gmra.mxu0 %v20289_v54  ;;  %v5872_v54 = vand.u32 4294901760, %v5871_v5  ;;  %v22368_v5 = vld [vmem:[#allocation56_spill] sm:$0xff] }
 0x18b   :  { %17845 = vmatpush3.msk.msra.mxu0 %vm279_vm2, %v18840_v12  ;;  %17870 = vmatmul.mubr.f32.vlgmr.msra.gmra.mxu1 %v5870_v47  ;;  %v17430_v47 = vpop.f32.mrf.mxu0  ;;  %v6339_v29 = vmax.f32 %v22368_v5, %v6329_v18  ;;  %v6403_v5 = vmax.f32 %v6359_v19, %v22371_v7 }
 0x18c   :  { %17879 = vmatprep.subr.mxu1 %v22266_v36  ;;  %17846 = vmatprep.subr.mxu0 %v22266_v36  ;;  %v20513_v47 = vpop.f32.mrf.mxu1 }
 0x18d   :  { %17880 = vmatpush3.msk.msra.mxu1 %vm279_vm2, %v18840_v12  ;;  %10550 = vrot.lane.b32.xlu1 %v19877_v30, %s18798_s0  ;;  %v975_v18 = vpop.f32.mrf.mxu0  ;;  %v6399_v60 = vmax.f32 %v6339_v29, %v22370_v55  ;;  %v6457_v29 = vpop.permute.xlu1 %6456 }
 0x18e   :  { %10502 = vrot.lane.b32.xlu0 %v19901_v59, %s18798_s0  ;;  %17847 = vmatpush3.msk.msra.mxu0 %vm18850_vm3, %v22269_v44 }
 0x18f   :  { %17881 = vmatprep.subr.mxu1 %v22266_v36  ;;  %17848 = vmatprep.mubr.msk.f32.mxu0 %vm18799_vm7, %v22266_v36  ;;  %v17444_v26 = vpop.f32.mrf.mxu0  ;;  %v6427_v19 = vmax.f32 %v6399_v60, %v6417_v61 }
 0x190   :  { %17858 = vmatprep.subr.mxu0 %v22266_v36  ;;  %17882 = vmatpush3.msk.msra.mxu1 %vm18850_vm3, %v22269_v44 }
 0x191   :  { %17883 = vmatprep.mubr.msk.f32.mxu1 %vm18799_vm7, %v22266_v36  ;;  %17849 = vmatmul.mubr.f32.vlgmr.msra.gmra.mxu0 %v5872_v54  ;;  %v6437_v54 = vpop.permute.xlu0 %6436  ;;  %v6351_v26 = vpop.permute.xlu1 %6350 }
 0x192   :  { %17859 = vmatpush3.msra.mxu0 %v18848_v24  ;;  %17884 = vmatmul.mubr.f32.vlgmr.msra.gmra.mxu1 %v20390_v31  ;;  %v6447_v55 = vmax.f32 %v6403_v5, %v6437_v54 }
 0x193   :  { %17893 = vmatprep.subr.mxu1 %v22266_v36  ;;  %17860 = vmatprep.subr.mxu0 %v22266_v36 }
 0x194   :  { %17894 = vmatpush3.msra.mxu1 %v18894_v46  ;;  %10590 = vrot.lane.b32.xlu1 %v19903_v56, %s18798_s0  ;;  %v976_v56 = vadd.f32 %v975_v18, %v900_v52  ;;  %v1127_v18 = vpop.f32.mrf.mxu0  ;;  %vm6471_vm9 = vcmp.ge.f32.partialorder %v6447_v55, %v6427_v19  ;;  %v20583_v19 = vsel %vm10525_vm10, %v19972_v35, 0.0 }
 0x195   :  { %10570 = vrot.lane.b32.xlu0 %v20490_v10, %s18798_s0  ;;  %17861 = vmatpush3.msra.mxu0 %v18875_v41  ;;  %v17479_v10 = vpop.f32.mrf.mxu1  ;;  %22373 = vst [vmem:[#allocation32_spill] sm:$0xff] %v20583_v19 }
 0x196   :  { %17895 = vmatprep.subr.mxu1 %v22266_v36  ;;  %17862 = vmatprep.mubr.msk.f32.mxu0 %vm18799_vm7, %v22266_v36  ;;  %v6467_v10 = vmax.f32 %v6407_v14, %v6457_v29  ;;  %v1051_v20 = vadd.f32 %v20452_v49, %v976_v56  ;;  %v17458_v60 = vpop.f32.mrf.mxu0  ;;  %v6331_v56 = vpop.permute.xlu0 %6330 }
 0x197   :  { %17872 = vmatprep.subr.mxu0 %v22266_v36  ;;  %17896 = vmatpush3.msra.mxu1 %v18974_v22  ;;  %v20545_v54 = vpop.f32.mrf.mxu1  ;;  %v6419_v60 = vpop.permute.xlu1 %6418 }
 0x198   :  { %17897 = vmatprep.mubr.msk.f32.mxu1 %vm18799_vm7, %v22266_v36  ;;  %17863 = vmatmul.mubr.f32.vlgmr.msra.gmra.mxu0 %v20412_v27  ;;  %v6550_v27 = vand.u32 4294901760, %v20505_v53  ;;  %v1128_v52 = vadd.f32 %v1127_v18, %v1051_v20  ;;  %v6475_v7 = vsel %vm6471_vm9, %v6467_v10, 0.0  ;;  %v22374_v20 = vld [vmem:[#allocation35_spill] sm:$0xff]  ;;  %vm12515_vm9 = vcmp.gt.f32.partialorder %v20380_v33, 0.0 }
 0x199   :  { %17873 = vmatpush3.msra.mxu0 %v18866_v34  ;;  %17898 = vmatmul.mubr.f32.vlgmr.msra.gmra.mxu1 %v20485_v0  ;;  %v17493_v49 = vpop.f32.mrf.mxu1  ;;  %v6941_v17 = vsel %vm275_vm1, %v6475_v7, 0  ;;  %v6360_v18 = vmax.f32 %v22374_v20, %v6351_v26  ;;  %v22378_v20 = vld [vmem:[#allocation80_spill] sm:$0xff] }
 0x19a   :  { %17907 = vmatprep.subr.mxu1 %v22266_v36  ;;  %17874 = vmatprep.subr.mxu0 %v22266_v36  ;;  %v6551_v61 = vsub.f32 %v20505_v53, %v6550_v27  ;;  %v1201_v5 = vadd.f32 %v20481_v11, %v1128_v52  ;;  %v1280_v11 = vpop.f32.mrf.mxu0  ;;  %v6371_v29 = vpop.permute.xlu0 %6370  ;;  %v20578_v55 = vand.u32 4294901760, %v6941_v17  ;;  %v22376_v49 = vld [vmem:[#allocation63_spill] sm:$0xff] }
 0x19b   :  { %17908 = vmatpush3.msk.msra.mxu1 %vm279_vm2, %v18840_v12  ;;  %10484 = vrot.lane.b32.xlu1 %v20520_v51, %s18798_s0  ;;  %v20574_v14 = vpop.f32.mrf.mxu1  ;;  %v6380_v7 = vmax.f32 %v22376_v49, %v6371_v29  ;;  %v1362_v26 = vadd.f32 %v20513_v47, %v1280_v11  ;;  %v22379_v47 = vld [vmem:[#allocation64_spill] sm:$0xff] }
 0x19c   :  { %10464 = vrot.lane.b32.xlu0 %v19970_v62, %s18798_s0  ;;  %17875 = vmatpush3.msra.mxu0 %v18901_v50  ;;  %2130 = vst.msk [vmem:[#allocation7 + $0x8] sm:$0xff] %vm2128_vm5, %v1201_v5  ;;  %v20598_v5 = vsub.f32 %v6941_v17, %v20578_v55  ;;  %v22377_v17 = vld [vmem:[#allocation66_spill] sm:$0xff] }
 0x19d   :  { %17909 = vmatprep.subr.mxu1 %v22266_v36  ;;  %17876 = vmatprep.mubr.msk.f32.mxu0 %vm18799_vm7, %v22266_v36  ;;  %v17507_v10 = vpop.f32.mrf.mxu1  ;;  %v6408_v11 = vmax.f32 %v6380_v7, %v22379_v47 }
 0x19e   :  { %17886 = vmatprep.subr.mxu0 %v22266_v36  ;;  %17910 = vmatpush3.msk.msra.mxu1 %vm18850_vm3, %v22269_v44  ;;  %v20613_v10 = vsel %vm12512_vm11, %v20065_v28, 0.0  ;;  %vm12591_vm11 = vcmp.gt.f32.partialorder %v20384_v8, 0.0 }
 0x19f   :  { %17911 = vmatprep.mubr.msk.f32.mxu1 %vm18799_vm7, %v22266_v36  ;;  %17877 = vmatmul.mubr.f32.vlgmr.msra.gmra.mxu0 %v20390_v31  ;;  %v6552_v31 = vand.u32 4294901760, %v6551_v61  ;;  %v22375_v61 = vld [vmem:[#allocation65_spill] sm:$0xff] }
 0x1a0   :  { %17887 = vmatpush3.msk.msra.mxu0 %vm279_vm2, %v18840_v12  ;;  %17912 = vmatmul.mubr.f32.vlgmr.msra.gmra.mxu1 %v6550_v27  ;;  %v17472_v27 = vpop.f32.mrf.mxu0  ;;  %v6340_v52 = vmax.f32 %v22375_v61, %v6331_v56  ;;  %v6404_v61 = vmax.f32 %v6360_v18, %v22378_v20 }
 0x1a1   :  { %17921 = vmatprep.subr.mxu1 %v22266_v36  ;;  %17888 = vmatprep.subr.mxu0 %v22266_v36  ;;  %v20606_v27 = vpop.f32.mrf.mxu1 }
 0x1a2   :  { %17922 = vmatpush3.msk.msra.mxu1 %vm279_vm2, %v18840_v12  ;;  %10552 = vrot.lane.b32.xlu1 %v19972_v35, %s18798_s0  ;;  %v1437_v56 = vpop.f32.mrf.mxu0  ;;  %v6400_v29 = vmax.f32 %v6340_v52, %v22377_v17  ;;  %v6459_v52 = vpop.permute.xlu1 %6458 }
 0x1a3   :  { %10504 = vrot.lane.b32.xlu0 %v19996_v39, %s18798_s0  ;;  %17889 = vmatpush3.msk.msra.mxu0 %vm18850_vm3, %v22269_v44 }
 0x1a4   :  { %17923 = vmatprep.subr.mxu1 %v22266_v36  ;;  %17890 = vmatprep.mubr.msk.f32.mxu0 %vm18799_vm7, %v22266_v36  ;;  %v17486_v49 = vpop.f32.mrf.mxu0  ;;  %v6428_v18 = vmax.f32 %v6400_v29, %v6419_v60 }
 0x1a5   :  { %17900 = vmatprep.subr.mxu0 %v22266_v36  ;;  %17924 = vmatpush3.msk.msra.mxu1 %vm18850_vm3, %v22269_v44 }
 0x1a6   :  { %17925 = vmatprep.mubr.msk.f32.mxu1 %vm18799_vm7, %v22266_v36  ;;  %17891 = vmatmul.mubr.f32.vlgmr.msra.gmra.mxu0 %v6552_v31  ;;  %v6439_v31 = vpop.permute.xlu0 %6438  ;;  %v6353_v49 = vpop.permute.xlu1 %6352 }
 0x1a7   :  { %17901 = vmatpush3.msra.mxu0 %v18848_v24  ;;  %17926 = vmatmul.mubr.f32.vlgmr.msra.gmra.mxu1 %v20485_v0  ;;  %v6448_v17 = vmax.f32 %v6404_v61, %v6439_v31 }
 0x1a8   :  { %17935 = vmatprep.subr.mxu1 %v22266_v36  ;;  %17902 = vmatprep.subr.mxu0 %v22266_v36 }
 0x1a9   :  { %17936 = vmatpush3.msra.mxu1 %v18894_v46  ;;  %10592 = vrot.lane.b32.xlu1 %v19998_v43, %s18798_s0  ;;  %v1438_v43 = vadd.f32 %v1437_v56, %v1362_v26  ;;  %v1589_v56 = vpop.f32.mrf.mxu0  ;;  %vm6472_vm12 = vcmp.ge.f32.partialorder %v6448_v17, %v6428_v18  ;;  %v20676_v18 = vsel %vm12588_vm13, %v20067_v3, 0.0 }
 0x1aa   :  { %10572 = vrot.lane.b32.xlu0 %v20583_v19, %s18798_s0  ;;  %17903 = vmatpush3.msra.mxu0 %v18875_v41  ;;  %v17521_v19 = vpop.f32.mrf.mxu1  ;;  %22380 = vst [vmem:[#allocation30_spill] sm:$0xff] %v20676_v18 }
 0x1ab   :  { %17937 = vmatprep.subr.mxu1 %v22266_v36  ;;  %17904 = vmatprep.mubr.msk.f32.mxu0 %vm18799_vm7, %v22266_v36  ;;  %v6468_v19 = vmax.f32 %v6408_v11, %v6459_v52  ;;  %v1513_v7 = vadd.f32 %v20545_v54, %v1438_v43  ;;  %v17500_v29 = vpop.f32.mrf.mxu0  ;;  %v6333_v43 = vpop.permute.xlu0 %6332 }
 0x1ac   :  { %17914 = vmatprep.subr.mxu0 %v22266_v36  ;;  %17938 = vmatpush3.msra.mxu1 %v18974_v22  ;;  %v20638_v31 = vpop.f32.mrf.mxu1  ;;  %v6421_v29 = vpop.permute.xlu1 %6420 }
 0x1ad   :  { %17939 = vmatprep.mubr.msk.f32.mxu1 %vm18799_vm7, %v22266_v36  ;;  %17905 = vmatmul.mubr.f32.vlgmr.msra.gmra.mxu0 %v20505_v53  ;;  %v7012_v53 = vand.u32 4294901760, %v20598_v5  ;;  %v1590_v26 = vadd.f32 %v1589_v56, %v1513_v7  ;;  %v6476_v20 = vsel %vm6472_vm12, %v6468_v19, 0.0  ;;  %v22381_v7 = vld [vmem:[#allocation38_spill] sm:$0xff] }
 0x1ae   :  { %17915 = vmatpush3.msra.mxu0 %v18866_v34  ;;  %17940 = vmatmul.mubr.f32.vlgmr.msra.gmra.mxu1 %v20578_v55  ;;  %v17535_v54 = vpop.f32.mrf.mxu1  ;;  %v7403_v47 = vsel %vm275_vm1, %v6476_v20, 0  ;;  %v6361_v56 = vmax.f32 %v22381_v7, %v6353_v49  ;;  %v22385_v7 = vld [vmem:[#allocation13_spill] sm:$0xff] }
 0x1af   :  { %17949 = vmatprep.subr.mxu1 %v22266_v36  ;;  %17916 = vmatprep.subr.mxu0 %v22266_v36  ;;  %v7013_v60 = vsub.f32 %v20598_v5, %v7012_v53  ;;  %v1663_v61 = vadd.f32 %v20574_v14, %v1590_v26  ;;  %v1742_v14 = vpop.f32.mrf.mxu0  ;;  %v6373_v52 = vpop.permute.xlu0 %6372  ;;  %v20671_v17 = vand.u32 4294901760, %v7403_v47  ;;  %v22383_v54 = vld [vmem:[#allocation72_spill] sm:$0xff] }
 0x1b0   :  { %17950 = vmatpush3.msk.msra.mxu1 %vm279_vm2, %v18840_v12  ;;  %12544 = vrot.lane.b32.xlu1 %v20613_v10, %s18798_s0  ;;  %v20667_v11 = vpop.f32.mrf.mxu1  ;;  %v6381_v20 = vmax.f32 %v22383_v54, %v6373_v52  ;;  %v1824_v49 = vadd.f32 %v20606_v27, %v1742_v14  ;;  %v22386_v27 = vld [vmem:[#allocation73_spill] sm:$0xff] }
 0x1b1   :  { %12524 = vrot.lane.b32.xlu0 %v20065_v28, %s18798_s0  ;;  %17917 = vmatpush3.msra.mxu0 %v18901_v50  ;;  %2131 = vst.msk [vmem:[#allocation7 + $0x10] sm:$0xff] %vm2128_vm5, %v1663_v61  ;;  %v20691_v61 = vsub.f32 %v7403_v47, %v20671_v17  ;;  %v22384_v47 = vld [vmem:[#allocation75_spill] sm:$0xff] }
 0x1b2   :  { %17951 = vmatprep.subr.mxu1 %v22266_v36  ;;  %17918 = vmatprep.mubr.msk.f32.mxu0 %vm18799_vm7, %v22266_v36  ;;  %v17549_v19 = vpop.f32.mrf.mxu1  ;;  %v6409_v14 = vmax.f32 %v6381_v20, %v22386_v27 }
 0x1b3   :  { %17928 = vmatprep.subr.mxu0 %v22266_v36  ;;  %17952 = vmatpush3.msk.msra.mxu1 %vm18850_vm3, %v22269_v44  ;;  %v20706_v19 = vsel %vm12513_vm14, %v20160_v2, 0.0 }
 0x1b4   :  { %17953 = vmatprep.mubr.msk.f32.mxu1 %vm18799_vm7, %v22266_v36  ;;  %17919 = vmatmul.mubr.f32.vlgmr.msra.gmra.mxu0 %v20485_v0  ;;  %v7014_v0 = vand.u32 4294901760, %v7013_v60  ;;  %v22382_v60 = vld [vmem:[#allocation74_spill] sm:$0xff] }
 0x1b5   :  { %17929 = vmatpush3.msk.msra.mxu0 %vm279_vm2, %v18840_v12  ;;  %17954 = vmatmul.mubr.f32.vlgmr.msra.gmra.mxu1 %v7012_v53  ;;  %v17514_v53 = vpop.f32.mrf.mxu0  ;;  %v6341_v26 = vmax.f32 %v22382_v60, %v6333_v43  ;;  %v6405_v60 = vmax.f32 %v6361_v56, %v22385_v7 }
 0x1b6   :  { %17963 = vmatprep.subr.mxu1 %v22266_v36  ;;  %17930 = vmatprep.subr.mxu0 %v22266_v36  ;;  %v20699_v53 = vpop.f32.mrf.mxu1 }
 0x1b7   :  { %17964 = vmatpush3.msk.msra.mxu1 %vm279_vm2, %v18840_v12  ;;  %12612 = vrot.lane.b32.xlu1 %v20067_v3, %s18798_s0  ;;  %v1899_v43 = vpop.f32.mrf.mxu0  ;;  %v6401_v52 = vmax.f32 %v6341_v26, %v22384_v47  ;;  %v6461_v26 = vpop.permute.xlu1 %6460 }
 0x1b8   :  { %12564 = vrot.lane.b32.xlu0 %v20091_v21, %s18798_s0  ;;  %17931 = vmatpush3.msk.msra.mxu0 %vm18850_vm3, %v22269_v44 }
 0x1b9   :  { %17965 = vmatprep.subr.mxu1 %v22266_v36  ;;  %17932 = vmatprep.mubr.msk.f32.mxu0 %vm18799_vm7, %v22266_v36  ;;  %v17528_v54 = vpop.f32.mrf.mxu0  ;;  %v6429_v56 = vmax.f32 %v6401_v52, %v6421_v29 }
 0x1ba   :  { %17942 = vmatprep.subr.mxu0 %v22266_v36  ;;  %17966 = vmatpush3.msk.msra.mxu1 %vm18850_vm3, %v22269_v44 }
 0x1bb   :  { %17967 = vmatprep.mubr.msk.f32.mxu1 %vm18799_vm7, %v22266_v36  ;;  %17933 = vmatmul.mubr.f32.vlgmr.msra.gmra.mxu0 %v7014_v0  ;;  %v6441_v0 = vpop.permute.xlu0 %6440  ;;  %v8413_v54 = vpop.permute.xlu1 %8412 }
 0x1bc   :  { %17943 = vmatpush3.msra.mxu0 %v18848_v24  ;;  %17968 = vmatmul.mubr.f32.vlgmr.msra.gmra.mxu1 %v20578_v55  ;;  %v6449_v47 = vmax.f32 %v6405_v60, %v6441_v0 }
 0x1bd   :  { %17977 = vmatprep.subr.mxu1 %v22266_v36  ;;  %17944 = vmatprep.subr.mxu0 %v22266_v36 }
 0x1be   :  { %17978 = vmatpush3.msra.mxu1 %v18894_v46  ;;  %12652 = vrot.lane.b32.xlu1 %v20093_v16, %s18798_s0  ;;  %v1900_v16 = vadd.f32 %v1899_v43, %v1824_v49  ;;  %v2051_v43 = vpop.f32.mrf.mxu0  ;;  %vm6473_vm15 = vcmp.ge.f32.partialorder %v6449_v47, %v6429_v56  ;;  %v20769_v56 = vsel %vm12589_vm0, %v20162_v40, 0.0 }
 0x1bf   :  { %12632 = vrot.lane.b32.xlu0 %v20676_v18, %s18798_s0  ;;  %17945 = vmatpush3.msra.mxu0 %v18875_v41  ;;  %v17563_v18 = vpop.f32.mrf.mxu1  ;;  %22387 = vst [vmem:[#allocation33_spill] sm:$0xff] %v20769_v56 }
 0x1c0   :  { %17979 = vmatprep.subr.mxu1 %v22266_v36  ;;  %17946 = vmatprep.mubr.msk.f32.mxu0 %vm18799_vm7, %v22266_v36  ;;  %v6469_v18 = vmax.f32 %v6409_v14, %v6461_v26  ;;  %v1975_v20 = vadd.f32 %v20638_v31, %v1900_v16  ;;  %v17542_v52 = vpop.f32.mrf.mxu0  ;;  %v8393_v16 = vpop.permute.xlu0 %8392 }
 0x1c1   :  { %17956 = vmatprep.subr.mxu0 %v22266_v36  ;;  %17980 = vmatpush3.msra.mxu1 %v18974_v22  ;;  %v20731_v0 = vpop.f32.mrf.mxu1  ;;  %v8481_v52 = vpop.permute.xlu1 %8480 }
 0x1c2   :  { %17981 = vmatprep.mubr.msk.f32.mxu1 %vm18799_vm7, %v22266_v36  ;;  %17947 = vmatmul.mubr.f32.vlgmr.msra.gmra.mxu0 %v20598_v5  ;;  %v7474_v5 = vand.u32 4294901760, %v20691_v61  ;;  %v2052_v49 = vadd.f32 %v2051_v43, %v1975_v20  ;;  %v6477_v7 = vsel %vm6473_vm15, %v6469_v18, 0.0  ;;  %v22388_v20 = vld [vmem:[#allocation40_spill] sm:$0xff] }
 0x1c3   :  { %17957 = vmatpush3.msra.mxu0 %v18866_v34  ;;  %17982 = vmatmul.mubr.f32.vlgmr.msra.gmra.mxu1 %v20671_v17  ;;  %v17577_v31 = vpop.f32.mrf.mxu1  ;;  %v7865_v27 = vsel %vm275_vm1, %v6477_v7, 0  ;;  %v8424_v43 = vmax.f32 %v22388_v20, %v8413_v54  ;;  %v22392_v20 = vld [vmem:[#allocation15_spill] sm:$0xff] }
 0x1c4   :  { %17991 = vmatprep.subr.mxu1 %v22266_v36  ;;  %17958 = vmatprep.subr.mxu0 %v22266_v36  ;;  %v7475_v29 = vsub.f32 %v20691_v61, %v7474_v5  ;;  %v2125_v60 = vadd.f32 %v20667_v11, %v2052_v49  ;;  %v2422_v11 = vpop.f32.mrf.mxu0  ;;  %v8433_v26 = vpop.permute.xlu0 %8432  ;;  %v20764_v47 = vand.u32 4294901760, %v7865_v27  ;;  %v22390_v31 = vld [vmem:[#allocation58_spill] sm:$0xff] }
 0x1c5   :  { %17992 = vmatpush3.msk.msra.mxu1 %vm279_vm2, %v18840_v12  ;;  %12546 = vrot.lane.b32.xlu1 %v20706_v19, %s18798_s0  ;;  %v20760_v14 = vpop.f32.mrf.mxu1  ;;  %v8444_v7 = vmax.f32 %v22390_v31, %v8433_v26  ;;  %v22393_v31 = vld [vmem:[#allocation59_spill] sm:$0xff] }
 0x1c6   :  { %12526 = vrot.lane.b32.xlu0 %v20160_v2, %s18798_s0  ;;  %17959 = vmatpush3.msra.mxu0 %v18901_v50  ;;  %2132 = vst.msk [vmem:[#allocation7 + $0x18] sm:$0xff] %vm2128_vm5, %v2125_v60  ;;  %v20784_v60 = vsub.f32 %v7865_v27, %v20764_v47  ;;  %v22391_v27 = vld [vmem:[#allocation53_spill] sm:$0xff] }
 0x1c7   :  { %17993 = vmatprep.subr.mxu1 %v22266_v36  ;;  %17960 = vmatprep.mubr.msk.f32.mxu0 %vm18799_vm7, %v22266_v36  ;;  %v17591_v18 = vpop.f32.mrf.mxu1 }
 0x1c8   :  { %17970 = vmatprep.subr.mxu0 %v22266_v36  ;;  %17994 = vmatpush3.msk.msra.mxu1 %vm18850_vm3, %v22269_v44  ;;  %v8501_v54 = vpop.permute.xlu0 %8500  ;;  %v20799_v18 = vsel %vm12514_vm4, %v20255_v1, 0.0 }
 0x1c9   :  { %17995 = vmatprep.mubr.msk.f32.mxu1 %vm18799_vm7, %v22266_v36  ;;  %17961 = vmatmul.mubr.f32.vlgmr.msra.gmra.mxu0 %v20578_v55  ;;  %v7476_v55 = vand.u32 4294901760, %v7475_v29  ;;  %v22389_v29 = vld [vmem:[#allocation52_spill] sm:$0xff] }
 0x1ca   :  { %17971 = vmatpush3.msk.msra.mxu0 %vm279_vm2, %v18840_v12  ;;  %17996 = vmatmul.mubr.f32.vlgmr.msra.gmra.mxu1 %v7474_v5  ;;  %v17556_v5 = vpop.f32.mrf.mxu0  ;;  %v8404_v49 = vmax.f32 %v22389_v29, %v8393_v16  ;;  %v2504_v16 = vadd.f32 %v20699_v53, %v2422_v11  ;;  %v8468_v53 = vmax.f32 %v8424_v43, %v22392_v20 }
 0x1cb   :  { %18005 = vmatprep.subr.mxu1 %v22266_v36  ;;  %17972 = vmatprep.subr.mxu0 %v22266_v36  ;;  %v20792_v5 = vpop.f32.mrf.mxu1 }
 0x1cc   :  { %18006 = vmatpush3.msk.msra.mxu1 %vm279_vm2, %v18840_v12  ;;  %12614 = vrot.lane.b32.xlu1 %v20162_v40, %s18798_s0  ;;  %v8464_v26 = vmax.f32 %v8404_v49, %v22391_v27  ;;  %v8521_v49 = vpop.permute.xlu1 %8520  ;;  %v8512_v27 = vmax.f32 %v8468_v53, %v8501_v54 }
 0x1cd   :  { %12566 = vrot.lane.b32.xlu0 %v20186_v38, %s18798_s0  ;;  %17973 = vmatpush3.msk.msra.mxu0 %vm18850_vm3, %v22269_v44 }
 0x1ce   :  { %18007 = vmatprep.subr.mxu1 %v22266_v36  ;;  %17974 = vmatprep.mubr.msk.f32.mxu0 %vm18799_vm7, %v22266_v36  ;;  %v8492_v43 = vmax.f32 %v8464_v26, %v8481_v52 }
 0x1cf   :  { %17984 = vmatprep.subr.mxu0 %v22266_v36  ;;  %18008 = vmatpush3.msk.msra.mxu1 %vm18850_vm3, %v22269_v44 }
 0x1d0   :  { %18009 = vmatprep.mubr.msk.f32.mxu1 %vm18799_vm7, %v22266_v36  ;;  %17975 = vmatmul.mubr.f32.vlgmr.msra.gmra.mxu0 %v7476_v55  ;;  %v2579_v55 = vpop.f32.mrf.mxu0  ;;  %vm8536_vm6 = vcmp.ge.f32.partialorder %v8512_v27, %v8492_v43 }
 0x1d1   :  { %17985 = vmatpush3.msra.mxu0 %v18848_v24  ;;  %18010 = vmatmul.mubr.f32.vlgmr.msra.gmra.mxu1 %v20671_v17  ;;  %v2580_v11 = vadd.f32 %v2579_v55, %v2504_v16 }
 0x1d2   :  { %18019 = vmatprep.subr.mxu1 %v22266_v36  ;;  %17986 = vmatprep.subr.mxu0 %v22266_v36  ;;  %v17570_v29 = vpop.f32.mrf.mxu0 }
 0x1d3   :  { %18020 = vmatpush3.msra.mxu1 %v18894_v46  ;;  %12654 = vrot.lane.b32.xlu1 %v20188_v48, %s18798_s0  ;;  %v8472_v48 = vmax.f32 %v8444_v7, %v22393_v31 }
 0x1d4   :  { %12634 = vrot.lane.b32.xlu0 %v20769_v56, %s18798_s0  ;;  %17987 = vmatpush3.msra.mxu0 %v18875_v41  ;;  %v17605_v56 = vpop.f32.mrf.mxu1  ;;  %v2731_v7 = vpop.f32.mrf.mxu0 }
 0x1d5   :  { %18021 = vmatprep.subr.mxu1 %v22266_v36  ;;  %17988 = vmatprep.mubr.msk.f32.mxu0 %vm18799_vm7, %v22266_v36  ;;  %v2655_v56 = vadd.f32 %v20731_v0, %v2580_v11  ;;  %v8532_v55 = vmax.f32 %v8472_v48, %v8521_v49  ;;  %v8395_v48 = vpop.permute.xlu0 %8394 }
 0x1d6   :  { %17998 = vmatprep.subr.mxu0 %v22266_v36  ;;  %18022 = vmatpush3.msra.mxu1 %v18974_v22  ;;  %v20816_v16 = vpop.f32.mrf.mxu1  ;;  %v17584_v0 = vpop.f32.mrf.mxu0 }
 0x1d7   :  { %18023 = vmatprep.mubr.msk.f32.mxu1 %vm18799_vm7, %v22266_v36  ;;  %17989 = vmatmul.mubr.f32.vlgmr.msra.gmra.mxu0 %v20691_v61  ;;  %v7936_v61 = vand.u32 4294901760, %v20784_v60  ;;  %v2732_v54 = vadd.f32 %v2731_v7, %v2655_v56  ;;  %v8540_v53 = vsel %vm8536_vm6, %v8532_v55, 0.0  ;;  %v20862_v56 = vsel %vm12590_vm8, %v20257_v9, 0.0 }
 0x1d8   :  { %17999 = vmatpush3.msra.mxu0 %v18866_v34  ;;  %18024 = vmatmul.mubr.f32.vlgmr.msra.gmra.mxu1 %v20764_v47  ;;  %v17619_v26 = vpop.f32.mrf.mxu1  ;;  %v2884_v11 = vpop.f32.mrf.mxu0  ;;  %v8545_v31 = vsel %vm275_vm1, %v8540_v53, 0 }
 0x1d9   :  { %18033 = vmatprep.subr.mxu1 %v22266_v36  ;;  %18000 = vmatprep.subr.mxu0 %v22266_v36  ;;  %v7937_v52 = vsub.f32 %v20784_v60, %v7936_v61  ;;  %v2805_v20 = vadd.f32 %v20760_v14, %v2732_v54  ;;  %v8415_v14 = vpop.permute.xlu1 %8414  ;;  %v8435_v27 = vpop.permute.xlu0 %8434  ;;  %v20857_v43 = vand.u32 4294901760, %v8545_v31  ;;  %v2966_v7 = vadd.f32 %v20792_v5, %v2884_v11  ;;  %v22394_v54 = vld [vmem:[#allocation25_spill] sm:$0xff] }
 0x1da   :  { %18034 = vmatpush3.msk.msra.mxu1 %vm279_vm2, %v18840_v12  ;;  %12548 = vrot.lane.b32.xlu1 %v20799_v18, %s18798_s0  ;;  %v20839_v29 = vpop.f32.mrf.mxu1  ;;  %v17598_v49 = vpop.f32.mrf.mxu0  ;;  %v8425_v0 = vmax.f32 %v22394_v54, %v8415_v14  ;;  %v22395_v26 = vld [vmem:[#allocation61_spill] sm:$0xff] }
 0x1db   :  { %12528 = vrot.lane.b32.xlu0 %v20255_v1, %s18798_s0  ;;  %18001 = vmatpush3.msra.mxu0 %v18901_v50  ;;  %4195 = vst.msk [vmem:[#allocation7 + $0x20] sm:$0xff] %vm2128_vm5, %v2805_v20  ;;  %v8405_v20 = vmax.f32 %v22395_v26, %v8395_v48  ;;  %v20880_v48 = vsub.f32 %v8545_v31, %v20857_v43  ;;  %v20892_v31 = vsel %vm12515_vm9, %v20354_v42, 0.0  ;;  %v22399_v26 = vld [vmem:[#allocation68_spill] sm:$0xff] }
 0x1dc   :  { %18035 = vmatprep.subr.mxu1 %v22266_v36  ;;  %18002 = vmatprep.mubr.msk.f32.mxu0 %vm18799_vm7, %v22266_v36  ;;  %v3041_v55 = vpop.f32.mrf.mxu0 }
 0x1dd   :  { %18012 = vmatprep.subr.mxu0 %v22266_v36  ;;  %18036 = vmatpush3.msk.msra.mxu1 %vm18850_vm3, %v22269_v44  ;;  %v8483_v53 = vpop.permute.xlu1 %8482  ;;  %v3042_v11 = vadd.f32 %v3041_v55, %v2966_v7  ;;  %v22398_v55 = vld [vmem:[#allocation16_spill] sm:$0xff] }
 0x1de   :  { %18037 = vmatprep.mubr.msk.f32.mxu1 %vm18799_vm7, %v22266_v36  ;;  %18003 = vmatmul.mubr.f32.vlgmr.msra.gmra.mxu0 %v20671_v17  ;;  %v7938_v17 = vand.u32 4294901760, %v7937_v52  ;;  %v17612_v49 = vpop.f32.mrf.mxu0  ;;  %v8469_v54 = vmax.f32 %v8425_v0, %v22398_v55 }
 0x1df   :  { %18013 = vmatpush3.msk.msra.mxu0 %vm279_vm2, %v18840_v12  ;;  %18038 = vmatmul.mubr.f32.vlgmr.msra.gmra.mxu1 %v7936_v61  ;;  %v17633_v61 = vpop.f32.mrf.mxu1  ;;  %v3117_v49 = vadd.f32 %v20816_v16, %v3042_v11 }
 0x1e0   :  { %18047 = vmatprep.subr.mxu1 %v22266_v36  ;;  %18014 = vmatprep.subr.mxu0 %v22266_v36  ;;  %v8503_v61 = vpop.permute.xlu0 %8502 }
 0x1e1   :  { %18048 = vmatpush3.msk.msra.mxu1 %vm279_vm2, %v18840_v12  ;;  %12616 = vrot.lane.b32.xlu1 %v20257_v9, %s18798_s0  ;;  %v20867_v52 = vpop.f32.mrf.mxu1 }
 0x1e2   :  { %12568 = vrot.lane.b32.xlu0 %v20281_v32, %s18798_s0  ;;  %18015 = vmatpush3.msk.msra.mxu0 %vm18850_vm3, %v22269_v44 }
 0x1e3   :  { %18049 = vmatprep.subr.mxu1 %v22266_v36  ;;  %18016 = vmatprep.mubr.msk.f32.mxu0 %vm18799_vm7, %v22266_v36  ;;  %v17647_v14 = vpop.f32.mrf.mxu1 }
 0x1e4   :  { %18026 = vmatprep.subr.mxu0 %v22266_v36  ;;  %18050 = vmatpush3.msk.msra.mxu1 %vm18850_vm3, %v22269_v44  ;;  %v3193_v14 = vpop.f32.mrf.mxu0 }
 0x1e5   :  { %18051 = vmatprep.mubr.msk.f32.mxu1 %vm18799_vm7, %v22266_v36  ;;  %18017 = vmatmul.mubr.f32.vlgmr.msra.gmra.mxu0 %v7938_v17  ;;  %v22396_v17 = vld [vmem:[#allocation67_spill] sm:$0xff]  ;;  %v3194_v0 = vadd.f32 %v3193_v14, %v3117_v49 }
 0x1e6   :  { %18027 = vmatpush3.msra.mxu0 %v18848_v24  ;;  %18052 = vmatmul.mubr.f32.vlgmr.msra.gmra.mxu1 %v20764_v47  ;;  %v8445_v5 = vmax.f32 %v22396_v17, %v8435_v27  ;;  %v22397_v27 = vld [vmem:[#allocation62_spill] sm:$0xff] }
 0x1e7   :  { %18061 = vmatprep.subr.mxu1 %v22266_v36  ;;  %18028 = vmatprep.subr.mxu0 %v22266_v36  ;;  %v8465_v7 = vmax.f32 %v8405_v20, %v22397_v27  ;;  %v8616_v20 = vand.u32 4294901760, %v20880_v48  ;;  %v8513_v27 = vmax.f32 %v8469_v54, %v8503_v61  ;;  %v3267_v55 = vadd.f32 %v20839_v29, %v3194_v0  ;;  %v8397_v29 = vpop.permute.xlu0 %8396 }
 0x1e8   :  { %18062 = vmatpush3.msra.mxu1 %v18894_v46  ;;  %12656 = vrot.lane.b32.xlu1 %v20283_v13, %s18798_s0  ;;  %v8473_v17 = vmax.f32 %v8445_v5, %v22399_v26  ;;  %v20899_v13 = vpop.f32.mrf.mxu1  ;;  %v17626_v5 = vpop.f32.mrf.mxu0 }
 0x1e9   :  { %12636 = vrot.lane.b32.xlu0 %v20862_v56, %s18798_s0  ;;  %18029 = vmatpush3.msra.mxu0 %v18875_v41  ;;  %v8493_v11 = vmax.f32 %v8465_v7, %v8483_v53  ;;  %v8617_v53 = vsub.f32 %v20880_v48, %v8616_v20  ;;  %4196 = vst.msk [vmem:[#allocation7 + $0x28] sm:$0xff] %vm2128_vm5, %v3267_v55 }
 0x1ea   :  { %18063 = vmatprep.subr.mxu1 %v22266_v36  ;;  %18030 = vmatprep.mubr.msk.f32.mxu0 %vm18799_vm7, %v22266_v36  ;;  %v17661_v16 = vpop.f32.mrf.mxu1  ;;  %v3346_v7 = vpop.f32.mrf.mxu0 }
 0x1eb   :  { %18040 = vmatprep.subr.mxu0 %v22266_v36  ;;  %18064 = vmatpush3.msra.mxu1 %v18974_v22  ;;  %vm8537_vm10 = vcmp.ge.f32.partialorder %v8513_v27, %v8493_v11  ;;  %v8437_v0 = vpop.permute.xlu0 %8436  ;;  %v20958_v11 = vsel %vm12591_vm11, %v20356_v63, 0.0 }
 0x1ec   :  { %18065 = vmatprep.mubr.msk.f32.mxu1 %vm18799_vm7, %v22266_v36  ;;  %18031 = vmatmul.mubr.f32.vlgmr.msra.gmra.mxu0 %v20784_v60  ;;  %v8523_v60 = vpop.permute.xlu1 %8522  ;;  %v20924_v54 = vpop.f32.mrf.mxu1  ;;  %22400 = vst [vmem:[#allocation31_spill] sm:$0xff] %v20958_v11 }
 0x1ed   :  { %18041 = vmatpush3.msra.mxu0 %v18866_v34  ;;  %18066 = vmatmul.mubr.f32.vlgmr.msra.gmra.mxu1 %v20857_v43  ;;  %v8533_v61 = vmax.f32 %v8473_v17, %v8523_v60  ;;  %v17640_v17 = vpop.f32.mrf.mxu0 }
 0x1ee   :  { %18075 = vmatprep.subr.mxu1 %v22266_v36  ;;  %18042 = vmatprep.subr.mxu0 %v22266_v36  ;;  %v17675_v49 = vpop.f32.mrf.mxu1 }
 0x1ef   :  { %18076 = vmatpush3.msk.msra.mxu1 %vm279_vm2, %v18840_v12  ;;  %12550 = vrot.lane.b32.xlu1 %v20892_v31, %s18798_s0  ;;  %v8541_v26 = vsel %vm8537_vm10, %v8533_v61, 0.0  ;;  %v3503_v27 = vpop.f32.mrf.mxu0  ;;  %v20960_v61 = vld [vmem:[#allocation3] ss:$2 sm:$0xff] }
 0x1f0   :  { %12530 = vrot.lane.b32.xlu0 %v20354_v42, %s18798_s0  ;;  %18043 = vmatpush3.msra.mxu0 %v18901_v50  ;;  %v8417_v14 = vpop.permute.xlu1 %8416  ;;  %v9007_v60 = vsel %vm275_vm1, %v8541_v26, 0  ;;  %v20951_v5 = vpop.f32.mrf.mxu1  ;;  %v22401_v26 = vld [vmem:[#allocation70_spill] sm:$0xff]  ;;  %vm14578_vm12 = vcmp.gt.f32.partialorder %v20960_v61, 0.0 }
 0x1f1   :  { %18077 = vmatprep.subr.mxu1 %v22266_v36  ;;  %18044 = vmatprep.mubr.msk.f32.mxu0 %vm18799_vm7, %v22266_v36  ;;  %v20953_v16 = vand.u32 4294901760, %v9007_v60  ;;  %v17654_v55 = vpop.f32.mrf.mxu0  ;;  %v8406_v17 = vmax.f32 %v22401_v26, %v8397_v29 }
 0x1f2   :  { %18054 = vmatprep.subr.mxu0 %v22266_v36  ;;  %18078 = vmatpush3.msk.msra.mxu1 %vm18850_vm3, %v22269_v44  ;;  %v8505_v55 = vpop.permute.xlu0 %8504 }
 0x1f3   :  { %18079 = vmatprep.mubr.msk.f32.mxu1 %vm18799_vm7, %v22266_v36  ;;  %18045 = vmatmul.mubr.f32.vlgmr.msra.gmra.mxu0 %v20764_v47  ;;  %v8618_v47 = vand.u32 4294901760, %v8617_v53  ;;  %v17689_v53 = vpop.f32.mrf.mxu1 }
 0x1f4   :  { %18055 = vmatpush3.msk.msra.mxu0 %vm279_vm2, %v18840_v12  ;;  %18080 = vmatmul.mubr.f32.vlgmr.msra.gmra.mxu1 %v8616_v20  ;;  %v3428_v20 = vadd.f32 %v20867_v52, %v3346_v7  ;;  %v8426_v7 = vmax.f32 %v20036_v6, %v8417_v14  ;;  %v8485_v49 = vpop.permute.xlu1 %8484  ;;  %v20975_v6 = vsub.f32 %v9007_v60, %v20953_v16  ;;  %v22403_v60 = vld [vmem:[#allocation71_spill] sm:$0xff] }
 0x1f5   :  { %18089 = vmatprep.subr.mxu1 %v22266_v36  ;;  %18056 = vmatprep.subr.mxu0 %v22266_v36  ;;  %v8466_v53 = vmax.f32 %v8406_v17, %v22403_v60 }
 0x1f6   :  { %18090 = vmatpush3.msk.msra.mxu1 %vm279_vm2, %v18840_v12  ;;  %12618 = vrot.lane.b32.xlu1 %v20356_v63, %s18798_s0  ;;  %v3504_v52 = vadd.f32 %v3503_v27, %v3428_v20  ;;  %v14570_v27 = vld [vmem:[#allocation2] ss:$2 sm:$0xff]  ;;  %v3655_v14 = vpop.f32.mrf.mxu0 }
 0x1f7   :  { %12570 = vrot.lane.b32.xlu0 %v20380_v33, %s18798_s0  ;;  %18057 = vmatpush3.msk.msra.mxu0 %vm18850_vm3, %v22269_v44  ;;  %v20989_v26 = vsel %vm14578_vm12, %v14570_v27, 0.0 }
 0x1f8   :  { %18091 = vmatprep.subr.mxu1 %v22266_v36  ;;  %18058 = vmatprep.mubr.msk.f32.mxu0 %vm18799_vm7, %v22266_v36  ;;  %v3579_v29 = vadd.f32 %v20899_v13, %v3504_v52  ;;  %v17668_v52 = vpop.f32.mrf.mxu0  ;;  %v8525_v17 = vpop.permute.xlu1 %8524 }
 0x1f9   :  { %18068 = vmatprep.subr.mxu0 %v22266_v36  ;;  %18092 = vmatpush3.msk.msra.mxu1 %vm18850_vm3, %v22269_v44 }
 0x1fa   :  { %18093 = vmatprep.mubr.msk.f32.mxu1 %vm18799_vm7, %v22266_v36  ;;  %18059 = vmatmul.mubr.f32.vlgmr.msra.gmra.mxu0 %v8618_v47  ;;  %v22402_v47 = vld [vmem:[#allocation76_spill] sm:$0xff]  ;;  %v3656_v13 = vadd.f32 %v3655_v14, %v3579_v29  ;;  %v14650_v29 = vld [vmem:[#allocation3 + $0x1] ss:$2 sm:$0xff] }
 0x1fb   :  { %18069 = vmatpush3.msra.mxu0 %v18848_v24  ;;  %18094 = vmatmul.mubr.f32.vlgmr.msra.gmra.mxu1 %v20857_v43  ;;  %v8446_v20 = vmax.f32 %v22402_v47, %v8437_v0  ;;  %v20983_v0 = vpop.f32.mrf.mxu1  ;;  %v22404_v47 = vld [vmem:[#allocation26_spill] sm:$0xff]  ;;  %vm14654_vm14 = vcmp.gt.f32.partialorder %v14650_v29, 0.0 }
 0x1fc   :  { %18103 = vmatprep.subr.mxu1 %v22266_v36  ;;  %18070 = vmatprep.subr.mxu0 %v22266_v36  ;;  %v3729_v42 = vadd.f32 %v20924_v54, %v3656_v13 }
 0x1fd   :  { %18104 = vmatpush3.msra.mxu1 %v18894_v46  ;;  %12658 = vrot.lane.b32.xlu1 %v20384_v8, %s18798_s0  ;;  %v8470_v8 = vmax.f32 %v8426_v7, %v22404_v47  ;;  %v17703_v33 = vpop.f32.mrf.mxu1  ;;  %v8494_v7 = vmax.f32 %v8466_v53, %v8485_v49  ;;  %v8419_v47 = vpop.permute.xlu1 %8418 }
 0x1fe   :  { %12638 = vrot.lane.b32.xlu0 %v20958_v11, %s18798_s0  ;;  %18071 = vmatpush3.msra.mxu0 %v18875_v41  ;;  %v22405_v11 = vld [vmem:[#allocation77_spill] sm:$0xff]  ;;  %4197 = vst.msk [vmem:[#allocation7 + $0x30] sm:$0xff] %vm2128_vm5, %v3729_v42  ;;  %v3808_v33 = vpop.f32.mrf.mxu0  ;;  %v14646_v42 = vld [vmem:[#allocation2 + $0x1] ss:$2 sm:$0xff] }
 0x1ff   :  { %18105 = vmatprep.subr.mxu1 %v22266_v36  ;;  %18072 = vmatprep.mubr.msk.f32.mxu0 %vm18799_vm7, %v22266_v36  ;;  %v8474_v63 = vmax.f32 %v8446_v20, %v22405_v11  ;;  %v8514_v60 = vmax.f32 %v8470_v8, %v8505_v55  ;;  %v21006_v11 = vpop.f32.mrf.mxu1 }
 0x200   :  { %18082 = vmatprep.subr.mxu0 %v22266_v36  ;;  %18106 = vmatpush3.msra.mxu1 %v18974_v22  ;;  %v17682_v49 = vpop.f32.mrf.mxu0 }
 0x201   :  { %18107 = vmatprep.mubr.msk.f32.mxu1 %vm18799_vm7, %v22266_v36  ;;  %18073 = vmatmul.mubr.f32.vlgmr.msra.gmra.mxu0 %v20880_v48  ;;  %v9078_v48 = vand.u32 4294901760, %v20975_v6  ;;  %v8534_v8 = vmax.f32 %v8474_v63, %v8525_v17  ;;  %vm8538_vm13 = vcmp.ge.f32.partialorder %v8514_v60, %v8494_v7  ;;  %v17717_v20 = vpop.f32.mrf.mxu1  ;;  %v8399_v63 = vpop.permute.xlu0 %8398  ;;  %v21048_v60 = vsel %vm14654_vm14, %v14646_v42, 0.0  ;;  %v21050_v7 = vld [vmem:[#allocation3 + $0x10] ss:$2 sm:$0xff] }
 0x202   :  { %18083 = vmatpush3.msra.mxu0 %v18866_v34  ;;  %18108 = vmatmul.mubr.f32.vlgmr.msra.gmra.mxu1 %v20953_v16  ;;  %v8427_v49 = vmax.f32 %v20131_v58, %v8419_v47  ;;  %v8407_v20 = vmax.f32 %v19590_v15, %v8399_v63  ;;  %vm14579_vm15 = vcmp.gt.f32.partialorder %v21050_v7, 0.0 }
 0x203   :  { %18117 = vmatprep.subr.mxu1 %v22266_v36  ;;  %18084 = vmatprep.subr.mxu0 %v22266_v36  ;;  %v9079_v54 = vsub.f32 %v20975_v6, %v9078_v48 }
 0x204   :  { %18118 = vmatpush3.msk.msra.mxu1 %vm279_vm2, %v18840_v12  ;;  %14610 = vrot.lane.b32.xlu1 %v20989_v26, %s18798_s0  ;;  %v3965_v55 = vpop.f32.mrf.mxu0  ;;  %v8471_v47 = vmax.f32 %v8427_v49, %v20199_v4 }
 0x205   :  { %14590 = vrot.lane.b32.xlu0 %v14570_v27, %s18798_s0  ;;  %18085 = vmatpush3.msra.mxu0 %v18901_v50  ;;  %v8542_v27 = vsel %vm8538_vm13, %v8534_v8, 0.0  ;;  %v9080_v14 = vand.u32 4294901760, %v9079_v54  ;;  %v21027_v53 = vpop.f32.mrf.mxu1  ;;  %v8439_v17 = vpop.permute.xlu0 %8438 }
 0x206   :  { %18119 = vmatprep.subr.mxu1 %v22266_v36  ;;  %18086 = vmatprep.mubr.msk.f32.mxu0 %vm18799_vm7, %v22266_v36  ;;  %v9469_v13 = vsel %vm275_vm1, %v8542_v27, 0  ;;  %v17696_v52 = vpop.f32.mrf.mxu0  ;;  %v8447_v27 = vmax.f32 %v19616_v45, %v8439_v17 }
 0x207   :  { %18096 = vmatprep.subr.mxu0 %v22266_v36  ;;  %18120 = vmatpush3.msk.msra.mxu1 %vm18850_vm3, %v22269_v44 }
 0x208   :  { %18121 = vmatprep.mubr.msk.f32.mxu1 %vm18799_vm7, %v22266_v36  ;;  %18087 = vmatmul.mubr.f32.vlgmr.msra.gmra.mxu0 %v20857_v43  ;;  %v3890_v43 = vadd.f32 %v20951_v5, %v3808_v33 }
 0x209   :  { %18097 = vmatpush3.msk.msra.mxu0 %vm279_vm2, %v18840_v12  ;;  %18122 = vmatmul.mubr.f32.vlgmr.msra.gmra.mxu1 %v9078_v48  ;;  %v21044_v48 = vand.u32 4294901760, %v9469_v13  ;;  %v8507_v63 = vpop.permute.xlu0 %8506 }
 0x20a   :  { %18131 = vmatprep.subr.mxu1 %v22266_v36  ;;  %18098 = vmatprep.subr.mxu0 %v22266_v36  ;;  %v3966_v5 = vadd.f32 %v3965_v55, %v3890_v43 }
 0x20b   :  { %18132 = vmatpush3.msk.msra.mxu1 %vm279_vm2, %v18840_v12  ;;  %14678 = vrot.lane.b32.xlu1 %v14646_v42, %s18798_s0  ;;  %v4117_v8 = vpop.f32.mrf.mxu0  ;;  %v8487_v42 = vpop.permute.xlu1 %8486  ;;  %v21067_v15 = vsub.f32 %v9469_v13, %v21044_v48  ;;  %v22406_v13 = vld [vmem:[#allocation34_spill] sm:$0xff] }
 0x20c   :  { %14630 = vrot.lane.b32.xlu0 %v20960_v61, %s18798_s0  ;;  %18099 = vmatpush3.msk.msra.mxu0 %vm18850_vm3, %v22269_v44  ;;  %v17731_v61 = vpop.f32.mrf.mxu1  ;;  %v4041_v33 = vadd.f32 %v20983_v0, %v3966_v5  ;;  %v14571_v0 = vld [vmem:[#allocation2 + $0x10] ss:$2 sm:$0xff]  ;;  %v8475_v5 = vmax.f32 %v8447_v27, %v22406_v13 }
 0x20d   :  { %18133 = vmatprep.subr.mxu1 %v22266_v36  ;;  %18100 = vmatprep.mubr.msk.f32.mxu0 %vm18799_vm7, %v22266_v36  ;;  %v17710_v43 = vpop.f32.mrf.mxu0  ;;  %v21079_v55 = vsel %vm14579_vm15, %v14571_v0, 0.0  ;;  %v8515_v61 = vmax.f32 %v8471_v47, %v8507_v63 }
 0x20e   :  { %18110 = vmatprep.subr.mxu0 %v22266_v36  ;;  %18134 = vmatpush3.msk.msra.mxu1 %vm18850_vm3, %v22269_v44  ;;  %v21055_v54 = vpop.f32.mrf.mxu1 }
 0x20f   :  { %18135 = vmatprep.mubr.msk.f32.mxu1 %vm18799_vm7, %v22266_v36  ;;  %18101 = vmatmul.mubr.f32.vlgmr.msra.gmra.mxu0 %v9080_v14  ;;  %v4118_v14 = vadd.f32 %v4117_v8, %v4041_v33 }
 0x210   :  { %18111 = vmatpush3.msra.mxu0 %v18848_v24  ;;  %18136 = vmatmul.mubr.f32.vlgmr.msra.gmra.mxu1 %v20953_v16  ;;  %v17745_v58 = vpop.f32.mrf.mxu1 }
 0x211   :  { %18145 = vmatprep.subr.mxu1 %v22266_v36  ;;  %18112 = vmatprep.subr.mxu0 %v22266_v36  ;;  %v4191_v45 = vadd.f32 %v21006_v11, %v4118_v14  ;;  %v10459_v14 = vpop.permute.xlu0 %10458  ;;  %v14651_v58 = vld [vmem:[#allocation3 + $0x11] ss:$2 sm:$0xff] }
 0x212   :  { %18146 = vmatpush3.msra.mxu1 %v18894_v46  ;;  %14718 = vrot.lane.b32.xlu1 %v14650_v29, %s18798_s0  ;;  %v8467_v29 = vmax.f32 %v8407_v20, %v19592_v37  ;;  %v4488_v11 = vpop.f32.mrf.mxu0  ;;  %v8527_v37 = vpop.permute.xlu1 %8526  ;;  %v14647_v20 = vld [vmem:[#allocation2 + $0x11] ss:$2 sm:$0xff]  ;;  %vm14655_vm4 = vcmp.gt.f32.partialorder %v14651_v58, 0.0 }
 0x213   :  { %14698 = vrot.lane.b32.xlu0 %v21048_v60, %s18798_s0  ;;  %18113 = vmatpush3.msra.mxu0 %v18875_v41  ;;  %4198 = vst.msk [vmem:[#allocation7 + $0x38] sm:$0xff] %vm2128_vm5, %v4191_v45  ;;  %v21086_v52 = vpop.f32.mrf.mxu1  ;;  %v8535_v8 = vmax.f32 %v8475_v5, %v8527_v37 }
 0x214   :  { %18147 = vmatprep.subr.mxu1 %v22266_v36  ;;  %18114 = vmatprep.mubr.msk.f32.mxu0 %vm18799_vm7, %v22266_v36  ;;  %v17724_v4 = vpop.f32.mrf.mxu0  ;;  %v8495_v33 = vmax.f32 %v8467_v29, %v8487_v42  ;;  %v4570_v42 = vadd.f32 %v21027_v53, %v4488_v11 }
 0x215   :  { %18124 = vmatprep.subr.mxu0 %v22266_v36  ;;  %18148 = vmatpush3.msra.mxu1 %v18974_v22  ;;  %v17759_v17 = vpop.f32.mrf.mxu1  ;;  %v10499_v5 = vpop.permute.xlu0 %10498 }
 0x216   :  { %18149 = vmatprep.mubr.msk.f32.mxu1 %vm18799_vm7, %v22266_v36  ;;  %18115 = vmatmul.mubr.f32.vlgmr.msra.gmra.mxu0 %v20975_v6  ;;  %v9540_v6 = vand.u32 4294901760, %v21067_v15  ;;  %vm8539_vm0 = vcmp.ge.f32.partialorder %v8515_v61, %v8495_v33  ;;  %v10479_v29 = vpop.permute.xlu1 %10478  ;;  %v21142_v61 = vld [vmem:[#allocation3 + $0x20] ss:$2 sm:$0xff] }
 0x217   :  { %18125 = vmatpush3.msra.mxu0 %v18866_v34  ;;  %18150 = vmatmul.mubr.f32.vlgmr.msra.gmra.mxu1 %v21044_v48  ;;  %v8543_v43 = vsel %vm8539_vm0, %v8535_v8, 0.0  ;;  %v22407_v33 = vld [vmem:[#allocation27_spill] sm:$0xff]  ;;  %vm14580_vm6 = vcmp.gt.f32.partialorder %v21142_v61, 0.0 }
 0x218   :  { %18159 = vmatprep.subr.mxu1 %v22266_v36  ;;  %18126 = vmatprep.subr.mxu0 %v22266_v36  ;;  %v9541_v49 = vsub.f32 %v21067_v15, %v9540_v6  ;;  %v9931_v47 = vsel %vm275_vm1, %v8543_v43, 0  ;;  %v10490_v8 = vmax.f32 %v22407_v33, %v10479_v29  ;;  %v22409_v43 = vld [vmem:[#allocation11_spill] sm:$0xff] }
 0x219   :  { %18160 = vmatpush3.msk.msra.mxu1 %vm279_vm2, %v18840_v12  ;;  %14612 = vrot.lane.b32.xlu1 %v21079_v55, %s18798_s0  ;;  %v4645_v27 = vpop.f32.mrf.mxu0  ;;  %v21136_v37 = vand.u32 4294901760, %v9931_v47 }
 0x21a   :  { %14592 = vrot.lane.b32.xlu0 %v14571_v0, %s18798_s0  ;;  %18127 = vmatpush3.msra.mxu0 %v18901_v50  ;;  %v21109_v0 = vpop.f32.mrf.mxu1  ;;  %v4646_v63 = vadd.f32 %v4645_v27, %v4570_v42  ;;  %v9542_v53 = vand.u32 4294901760, %v9541_v49  ;;  %v22408_v49 = vld [vmem:[#allocation17_spill] sm:$0xff]  ;;  %v10547_v27 = vpop.permute.xlu1 %10546 }
 0x21b   :  { %18161 = vmatprep.subr.mxu1 %v22266_v36  ;;  %18128 = vmatprep.mubr.msk.f32.mxu0 %vm18799_vm7, %v22266_v36  ;;  %v17738_v45 = vpop.f32.mrf.mxu0  ;;  %v10470_v42 = vmax.f32 %v22408_v49, %v10459_v14  ;;  %v10567_v14 = vpop.permute.xlu0 %10566 }
 0x21c   :  { %18138 = vmatprep.subr.mxu0 %v22266_v36  ;;  %18162 = vmatpush3.msk.msra.mxu1 %vm18850_vm3, %v22269_v44  ;;  %v14572_v45 = vld [vmem:[#allocation2 + $0x20] ss:$2 sm:$0xff] }
 0x21d   :  { %18163 = vmatprep.mubr.msk.f32.mxu1 %vm18799_vm7, %v22266_v36  ;;  %18129 = vmatmul.mubr.f32.vlgmr.msra.gmra.mxu0 %v20953_v16  ;;  %v17773_v16 = vpop.f32.mrf.mxu1 }
 0x21e   :  { %18139 = vmatpush3.msk.msra.mxu0 %vm279_vm2, %v18840_v12  ;;  %18164 = vmatmul.mubr.f32.vlgmr.msra.gmra.mxu1 %v9540_v6  ;;  %v21140_v6 = vsel %vm14655_vm4, %v14647_v20, 0.0  ;;  %v21157_v16 = vsub.f32 %v9931_v47, %v21136_v37  ;;  %v21171_v47 = vsel %vm14580_vm6, %v14572_v45, 0.0  ;;  %v10587_v49 = vpop.permute.xlu1 %10586 }
 0x21f   :  { %18173 = vmatprep.subr.mxu1 %v22266_v36  ;;  %18140 = vmatprep.subr.mxu0 %v22266_v36 }
 0x220   :  { %18174 = vmatpush3.msk.msra.mxu1 %vm279_vm2, %v18840_v12  ;;  %14680 = vrot.lane.b32.xlu1 %v14647_v20, %s18798_s0  ;;  %v4797_v13 = vpop.f32.mrf.mxu0  ;;  %v10002_v33 = vand.u32 4294901760, %v21157_v16 }
 0x221   :  { %14632 = vrot.lane.b32.xlu0 %v21050_v7, %s18798_s0  ;;  %18141 = vmatpush3.msk.msra.mxu0 %vm18850_vm3, %v22269_v44  ;;  %v4721_v7 = vadd.f32 %v21055_v54, %v4646_v63  ;;  %v21134_v11 = vpop.f32.mrf.mxu1  ;;  %v10510_v63 = vmax.f32 %v22409_v43, %v10499_v5 }
 0x222   :  { %18175 = vmatprep.subr.mxu1 %v22266_v36  ;;  %18142 = vmatprep.mubr.msk.f32.mxu0 %vm18799_vm7, %v22266_v36  ;;  %v17752_v54 = vpop.f32.mrf.mxu0 }
 0x223   :  { %18152 = vmatprep.subr.mxu0 %v22266_v36  ;;  %18176 = vmatpush3.msk.msra.mxu1 %vm18850_vm3, %v22269_v44  ;;  %v4798_v4 = vadd.f32 %v4797_v13, %v4721_v7  ;;  %v17787_v17 = vpop.f32.mrf.mxu1  ;;  %v22411_v7 = vld [vmem:[#allocation19_spill] sm:$0xff] }
 0x224   :  { %18177 = vmatprep.mubr.msk.f32.mxu1 %vm18799_vm7, %v22266_v36  ;;  %18143 = vmatmul.mubr.f32.vlgmr.msra.gmra.mxu0 %v9542_v53  ;;  %v22410_v53 = vld [vmem:[#allocation37_spill] sm:$0xff]  ;;  %v10534_v13 = vmax.f32 %v10490_v8, %v22411_v7  ;;  %v10481_v7 = vpop.permute.xlu1 %10480 }
 0x225   :  { %18153 = vmatpush3.msra.mxu0 %v18848_v24  ;;  %18178 = vmatmul.mubr.f32.vlgmr.msra.gmra.mxu1 %v21044_v48  ;;  %v4871_v20 = vadd.f32 %v21086_v52, %v4798_v4  ;;  %v10530_v29 = vmax.f32 %v10470_v42, %v22410_v53  ;;  %v22412_v4 = vld [vmem:[#allocation79_spill] sm:$0xff] }
 0x226   :  { %18187 = vmatprep.subr.mxu1 %v22266_v36  ;;  %18154 = vmatprep.subr.mxu0 %v22266_v36  ;;  %v10538_v54 = vmax.f32 %v10510_v63, %v22412_v4 }
 0x227   :  { %18188 = vmatpush3.msra.mxu1 %v18894_v46  ;;  %14720 = vrot.lane.b32.xlu1 %v14651_v58, %s18798_s0  ;;  %6261 = vst.msk [vmem:[#allocation7 + $0x40] sm:$0xff] %vm2128_vm5, %v4871_v20  ;;  %v4950_v52 = vpop.f32.mrf.mxu0  ;;  %v10558_v8 = vmax.f32 %v10530_v29, %v10547_v27  ;;  %v10461_v27 = vpop.permute.xlu0 %10460 }
 0x228   :  { %14700 = vrot.lane.b32.xlu0 %v21140_v6, %s18798_s0  ;;  %18155 = vmatpush3.msra.mxu0 %v18875_v41  ;;  %v21165_v58 = vpop.f32.mrf.mxu1  ;;  %v5032_v42 = vadd.f32 %v21109_v0, %v4950_v52  ;;  %v10598_v63 = vmax.f32 %v10538_v54, %v10587_v49  ;;  %v14648_v52 = vld [vmem:[#allocation2 + $0x21] ss:$2 sm:$0xff] }
 0x229   :  { %18189 = vmatprep.subr.mxu1 %v22266_v36  ;;  %18156 = vmatprep.mubr.msk.f32.mxu0 %vm18799_vm7, %v22266_v36  ;;  %v17766_v5 = vpop.f32.mrf.mxu0 }
 0x22a   :  { %18166 = vmatprep.subr.mxu0 %v22266_v36  ;;  %18190 = vmatpush3.msra.mxu1 %v18974_v22  ;;  %v17801_v17 = vpop.f32.mrf.mxu1 }
 0x22b   :  { %18191 = vmatprep.mubr.msk.f32.mxu1 %vm18799_vm7, %v22266_v36  ;;  %18157 = vmatmul.mubr.f32.vlgmr.msra.gmra.mxu0 %v21067_v15  ;;  %v10578_v15 = vmax.f32 %v10534_v13, %v10567_v14  ;;  %v10003_v14 = vsub.f32 %v21157_v16, %v10002_v33  ;;  %v14652_v13 = vld [vmem:[#allocation3 + $0x21] ss:$2 sm:$0xff] }
 0x22c   :  { %18167 = vmatpush3.msra.mxu0 %v18866_v34  ;;  %18192 = vmatmul.mubr.f32.vlgmr.msra.gmra.mxu1 %v21136_v37  ;;  %vm14656_vm9 = vcmp.gt.f32.partialorder %v14652_v13, 0.0 }
 0x22d   :  { %18201 = vmatprep.subr.mxu1 %v22266_v36  ;;  %18168 = vmatprep.subr.mxu0 %v22266_v36  ;;  %vm10602_vm8 = vcmp.ge.f32.partialorder %v10578_v15, %v10558_v8  ;;  %v10004_v5 = vand.u32 4294901760, %v10003_v14 }
 0x22e   :  { %18202 = vmatpush3.msk.msra.mxu1 %vm279_vm2, %v18840_v12  ;;  %14614 = vrot.lane.b32.xlu1 %v21171_v47, %s18798_s0  ;;  %v5107_v20 = vpop.f32.mrf.mxu0  ;;  %v10606_v29 = vsel %vm10602_vm8, %v10598_v63, 0.0  ;;  %v22414_v63 = vld [vmem:[#allocation22_spill] sm:$0xff] }
 0x22f   :  { %14594 = vrot.lane.b32.xlu0 %v14572_v45, %s18798_s0  ;;  %18169 = vmatpush3.msra.mxu0 %v18901_v50  ;;  %v21187_v43 = vpop.f32.mrf.mxu1  ;;  %v5108_v0 = vadd.f32 %v5107_v20, %v5032_v42  ;;  %v10611_v17 = vsel %vm275_vm1, %v10606_v29, 0  ;;  %v22413_v42 = vld [vmem:[#allocation45_spill] sm:$0xff]  ;;  %v10471_v14 = vmax.f32 %v22414_v63, %v10461_v27 }
 0x230   :  { %18203 = vmatprep.subr.mxu1 %v22266_v36  ;;  %18170 = vmatprep.mubr.msk.f32.mxu0 %vm18799_vm7, %v22266_v36  ;;  %v17780_v45 = vpop.f32.mrf.mxu0  ;;  %v21226_v8 = vand.u32 4294901760, %v10611_v17  ;;  %v10491_v20 = vmax.f32 %v22413_v42, %v10481_v7  ;;  %v14573_v27 = vld [vmem:[#allocation2 + $0x30] ss:$2 sm:$0xff] }
 0x231   :  { %18180 = vmatprep.subr.mxu0 %v22266_v36  ;;  %18204 = vmatpush3.msk.msra.mxu1 %vm18850_vm3, %v22269_v44  ;;  %v17815_v53 = vpop.f32.mrf.mxu1  ;;  %v10549_v45 = vpop.permute.xlu1 %10548 }
 0x232   :  { %18205 = vmatprep.mubr.msk.f32.mxu1 %vm18799_vm7, %v22266_v36  ;;  %18171 = vmatmul.mubr.f32.vlgmr.msra.gmra.mxu0 %v21044_v48  ;;  %v5183_v48 = vadd.f32 %v21134_v11, %v5108_v0  ;;  %v21232_v0 = vsel %vm14656_vm9, %v14648_v52, 0.0  ;;  %v21234_v53 = vld [vmem:[#allocation3 + $0x30] ss:$2 sm:$0xff] }
 0x233   :  { %18181 = vmatpush3.msk.msra.mxu0 %vm279_vm2, %v18840_v12  ;;  %18206 = vmatmul.mubr.f32.vlgmr.msra.gmra.mxu1 %v10002_v33  ;;  %v10501_v33 = vpop.permute.xlu0 %10500  ;;  %vm14581_vm10 = vcmp.gt.f32.partialorder %v21234_v53, 0.0 }
 0x234   :  { %18215 = vmatprep.subr.mxu1 %v22266_v36  ;;  %18182 = vmatprep.subr.mxu0 %v22266_v36 }
 0x235   :  { %18216 = vmatpush3.msk.msra.mxu1 %vm279_vm2, %v18840_v12  ;;  %14682 = vrot.lane.b32.xlu1 %v14648_v52, %s18798_s0  ;;  %v5259_v4 = vpop.f32.mrf.mxu0  ;;  %v10589_v63 = vpop.permute.xlu1 %10588 }
 0x236   :  { %14634 = vrot.lane.b32.xlu0 %v21142_v61, %s18798_s0  ;;  %18183 = vmatpush3.msk.msra.mxu0 %vm18850_vm3, %v22269_v44  ;;  %v21213_v54 = vpop.f32.mrf.mxu1  ;;  %v5260_v11 = vadd.f32 %v5259_v4, %v5183_v48  ;;  %v21249_v48 = vsub.f32 %v10611_v17, %v21226_v8  ;;  %v21262_v17 = vsel %vm14581_vm10, %v14573_v27, 0.0 }
 0x237   :  { %18217 = vmatprep.subr.mxu1 %v22266_v36  ;;  %18184 = vmatprep.mubr.msk.f32.mxu0 %vm18799_vm7, %v22266_v36  ;;  %v17794_v49 = vpop.f32.mrf.mxu0  ;;  %v10569_v52 = vpop.permute.xlu0 %10568 }
 0x238   :  { %18194 = vmatprep.subr.mxu0 %v22266_v36  ;;  %18218 = vmatpush3.msk.msra.mxu1 %vm18850_vm3, %v22269_v44  ;;  %v17829_v61 = vpop.f32.mrf.mxu1  ;;  %v5333_v15 = vadd.f32 %v21165_v58, %v5260_v11  ;;  %v22415_v58 = vld [vmem:[#allocation23_spill] sm:$0xff] }
 0x239   :  { %18219 = vmatprep.mubr.msk.f32.mxu1 %vm18799_vm7, %v22266_v36  ;;  %18185 = vmatmul.mubr.f32.vlgmr.msra.gmra.mxu0 %v10004_v5  ;;  %v10511_v29 = vmax.f32 %v22415_v58, %v10501_v33  ;;  %v22417_v33 = vld [vmem:[#allocation21_spill] sm:$0xff]  ;;  %v22418_v61 = vld [vmem:[#allocation39_spill] sm:$0xff] }
 0x23a   :  { %18195 = vmatpush3.msra.mxu0 %v18848_v24  ;;  %18220 = vmatmul.mubr.f32.vlgmr.msra.gmra.mxu1 %v21136_v37  ;;  %6262 = vst.msk [vmem:[#allocation7 + $0x48] sm:$0xff] %vm2128_vm5, %v5333_v15  ;;  %v10535_v11 = vmax.f32 %v10491_v20, %v22417_v33  ;;  %v10682_v20 = vand.u32 4294901760, %v21249_v48 }
 0x23b   :  { %18229 = vmatprep.subr.mxu1 %v22266_v36  ;;  %18196 = vmatprep.subr.mxu0 %v22266_v36  ;;  %v10539_v15 = vmax.f32 %v10511_v29, %v22418_v61 }
 0x23c   :  { %18230 = vmatpush3.msra.mxu1 %v18894_v46  ;;  %14722 = vrot.lane.b32.xlu1 %v14652_v13, %s18798_s0  ;;  %v5412_v7 = vpop.f32.mrf.mxu0  ;;  %v22416_v13 = vld [vmem:[#allocation12_spill] sm:$0xff]  ;;  %v10579_v58 = vmax.f32 %v10535_v11, %v10569_v52  ;;  %v10463_v52 = vpop.permute.xlu0 %10462 }
 0x23d   :  { %14702 = vrot.lane.b32.xlu0 %v21232_v0, %s18798_s0  ;;  %18197 = vmatpush3.msra.mxu0 %v18875_v41  ;;  %v21246_v5 = vpop.f32.mrf.mxu1  ;;  %v10531_v4 = vmax.f32 %v10471_v14, %v22416_v13  ;;  %v5494_v29 = vadd.f32 %v21187_v43, %v5412_v7  ;;  %v10683_v7 = vsub.f32 %v21249_v48, %v10682_v20 }
 0x23e   :  { %18231 = vmatprep.subr.mxu1 %v22266_v36  ;;  %18198 = vmatprep.mubr.msk.f32.mxu0 %vm18799_vm7, %v22266_v36  ;;  %v17808_v49 = vpop.f32.mrf.mxu0 }
 0x23f   :  { %18208 = vmatprep.subr.mxu0 %v22266_v36  ;;  %18232 = vmatpush3.msra.mxu1 %v18974_v22  ;;  %v17843_v42 = vpop.f32.mrf.mxu1  ;;  %v10559_v14 = vmax.f32 %v10531_v4, %v10549_v45  ;;  %v14649_v49 = vld [vmem:[#allocation2 + $0x31] ss:$2 sm:$0xff] }
 0x240   :  { %18233 = vmatprep.mubr.msk.f32.mxu1 %vm18799_vm7, %v22266_v36  ;;  %18199 = vmatmul.mubr.f32.vlgmr.msra.gmra.mxu0 %v21157_v16  ;;  %v10599_v16 = vmax.f32 %v10539_v15, %v10589_v63  ;;  %v14653_v15 = vld [vmem:[#allocation3 + $0x31] ss:$2 sm:$0xff]  ;;  %v10503_v42 = vpop.permute.xlu0 %10502  ;;  %v10684_v63 = vand.u32 4294901760, %v10683_v7 }
 0x241   :  { %18209 = vmatpush3.msra.mxu0 %v18866_v34  ;;  %18234 = vmatmul.mubr.f32.vlgmr.msra.gmra.mxu1 %v21226_v8  ;;  %vm10603_vm11 = vcmp.ge.f32.partialorder %v10579_v58, %v10559_v14  ;;  %vm14657_vm12 = vcmp.gt.f32.partialorder %v14653_v15, 0.0 }
 0x242   :  { %18243 = vmatprep.subr.mxu1 %v22266_v36  ;;  %18210 = vmatprep.subr.mxu0 %v22266_v36  ;;  %v10607_v11 = vsel %vm10603_vm11, %v10599_v16, 0.0 }
 0x243   :  { %18244 = vmatpush3.msk.msra.mxu1 %vm279_vm2, %v18840_v12  ;;  %14616 = vrot.lane.b32.xlu1 %v21262_v17, %s18798_s0  ;;  %v5569_v13 = vpop.f32.mrf.mxu0  ;;  %v11073_v58 = vsel %vm275_vm1, %v10607_v11, 0 }
 0x244   :  { %14596 = vrot.lane.b32.xlu0 %v14573_v27, %s18798_s0  ;;  %18211 = vmatpush3.msra.mxu0 %v18901_v50  ;;  %v5570_v45 = vadd.f32 %v5569_v13, %v5494_v29  ;;  %v21276_v4 = vpop.f32.mrf.mxu1  ;;  %v10483_v27 = vpop.permute.xlu1 %10482  ;;  %v10472_v29 = vmax.f32 %v19875_v23, %v10463_v52  ;;  %v21322_v23 = vsel %vm14657_vm12, %v14649_v49, 0.0 }
 0x245   :  { %18245 = vmatprep.subr.mxu1 %v22266_v36  ;;  %18212 = vmatprep.mubr.msk.f32.mxu0 %vm18799_vm7, %v22266_v36  ;;  %v17822_v43 = vpop.f32.mrf.mxu0  ;;  %v10492_v14 = vmax.f32 %v20427_v57, %v10483_v27  ;;  %v10571_v57 = vpop.permute.xlu0 %10570 }
 0x246   :  { %18222 = vmatprep.subr.mxu0 %v22266_v36  ;;  %18246 = vmatpush3.msk.msra.mxu1 %vm18850_vm3, %v22269_v44  ;;  %v17857_v33 = vpop.f32.mrf.mxu1  ;;  %v5645_v61 = vadd.f32 %v21213_v54, %v5570_v45  ;;  %v10512_v45 = vmax.f32 %v19901_v59, %v10503_v42  ;;  %v10532_v59 = vmax.f32 %v10472_v29, %v19877_v30 }
 0x247   :  { %18247 = vmatprep.mubr.msk.f32.mxu1 %vm18799_vm7, %v22266_v36  ;;  %18213 = vmatmul.mubr.f32.vlgmr.msra.gmra.mxu0 %v21136_v37  ;;  %v22420_v33 = vld [vmem:[#allocation24_spill] sm:$0xff] }
 0x248   :  { %18223 = vmatpush3.msk.msra.mxu0 %vm279_vm2, %v18840_v12  ;;  %18248 = vmatmul.mubr.f32.vlgmr.msra.gmra.mxu1 %v10682_v20  ;;  %v10551_v16 = vpop.permute.xlu1 %10550  ;;  %v10540_v11 = vmax.f32 %v10512_v45, %v22420_v33 }
 0x249   :  { %18257 = vmatprep.subr.mxu1 %v22266_v36  ;;  %18224 = vmatprep.subr.mxu0 %v22266_v36 }
 0x24a   :  { %18258 = vmatpush3.msk.msra.mxu1 %vm279_vm2, %v18840_v12  ;;  %14684 = vrot.lane.b32.xlu1 %v14649_v49, %s18798_s0  ;;  %v5721_v37 = vpop.f32.mrf.mxu0 }
 0x24b   :  { %14636 = vrot.lane.b32.xlu0 %v21234_v53, %s18798_s0  ;;  %18225 = vmatpush3.msk.msra.mxu0 %vm18850_vm3, %v22269_v44  ;;  %v5722_v54 = vadd.f32 %v5721_v37, %v5645_v61  ;;  %v21303_v20 = vpop.f32.mrf.mxu1  ;;  %v21310_v53 = vand.u32 4294901760, %v11073_v58 }
 0x24c   :  { %18259 = vmatprep.subr.mxu1 %v22266_v36  ;;  %18226 = vmatprep.mubr.msk.f32.mxu0 %vm18799_vm7, %v22266_v36  ;;  %v17836_v13 = vpop.f32.mrf.mxu0  ;;  %v10591_v61 = vpop.permute.xlu1 %10590 }
 0x24d   :  { %18236 = vmatprep.subr.mxu0 %v22266_v36  ;;  %18260 = vmatpush3.msk.msra.mxu1 %vm18850_vm3, %v22269_v44  ;;  %v5795_v43 = vadd.f32 %v21246_v5, %v5722_v54  ;;  %v17871_v7 = vpop.f32.mrf.mxu1  ;;  %v22419_v5 = vld [vmem:[#allocation51_spill] sm:$0xff]  ;;  %v21330_v27 = vsub.f32 %v11073_v58, %v21310_v53  ;;  %v10600_v54 = vmax.f32 %v10540_v11, %v10591_v61 }
 0x24e   :  { %18261 = vmatprep.mubr.msk.f32.mxu1 %vm18799_vm7, %v22266_v36  ;;  %18227 = vmatmul.mubr.f32.vlgmr.msra.gmra.mxu0 %v10684_v63  ;;  %v10536_v52 = vmax.f32 %v10492_v14, %v22419_v5  ;;  %v10465_v14 = vpop.permute.xlu0 %10464 }
 0x24f   :  { %18237 = vmatpush3.msra.mxu0 %v18848_v24  ;;  %18262 = vmatmul.mubr.f32.vlgmr.msra.gmra.mxu1 %v21226_v8  ;;  %6263 = vst.msk [vmem:[#allocation7 + $0x50] sm:$0xff] %vm2128_vm5, %v5795_v43  ;;  %v11144_v37 = vand.u32 4294901760, %v21330_v27  ;;  %v10473_v11 = vmax.f32 %v19970_v62, %v10465_v14 }
 0x250   :  { %18271 = vmatprep.subr.mxu1 %v22266_v36  ;;  %18238 = vmatprep.subr.mxu0 %v22266_v36  ;;  %v10580_v42 = vmax.f32 %v10536_v52, %v10571_v57 }
 0x251   :  { %18272 = vmatpush3.msra.mxu1 %v18894_v46  ;;  %14724 = vrot.lane.b32.xlu1 %v14653_v15, %s18798_s0  ;;  %v5874_v49 = vpop.f32.mrf.mxu0  ;;  %v10560_v15 = vmax.f32 %v10532_v59, %v10551_v16  ;;  %v10485_v16 = vpop.permute.xlu1 %10484  ;;  %v11145_v13 = vsub.f32 %v21330_v27, %v11144_v37 }
 0x252   :  { %14704 = vrot.lane.b32.xlu0 %v21322_v23, %s18798_s0  ;;  %18239 = vmatpush3.msra.mxu0 %v18875_v41  ;;  %v21338_v30 = vpop.f32.mrf.mxu1  ;;  %v5956_v29 = vadd.f32 %v21276_v4, %v5874_v49  ;;  %v10505_v57 = vpop.permute.xlu0 %10504 }
 0x253   :  { %18273 = vmatprep.subr.mxu1 %v22266_v36  ;;  %18240 = vmatprep.mubr.msk.f32.mxu0 %vm18799_vm7, %v22266_v36  ;;  %v17850_v63 = vpop.f32.mrf.mxu0  ;;  %vm10604_vm13 = vcmp.ge.f32.partialorder %v10580_v42, %v10560_v15  ;;  %v11146_v33 = vand.u32 4294901760, %v11145_v13 }
 0x254   :  { %18250 = vmatprep.subr.mxu0 %v22266_v36  ;;  %18274 = vmatpush3.msra.mxu1 %v18974_v22  ;;  %v17885_v58 = vpop.f32.mrf.mxu1  ;;  %v10608_v45 = vsel %vm10604_vm13, %v10600_v54, 0.0 }
 0x255   :  { %18275 = vmatprep.mubr.msk.f32.mxu1 %vm18799_vm7, %v22266_v36  ;;  %18241 = vmatmul.mubr.f32.vlgmr.msra.gmra.mxu0 %v21249_v48  ;;  %v11535_v5 = vsel %vm275_vm1, %v10608_v45, 0  ;;  %v10553_v49 = vpop.permute.xlu1 %10552  ;;  %v22421_v58 = vld [vmem:[#allocation32_spill] sm:$0xff] }
 0x256   :  { %18251 = vmatpush3.msra.mxu0 %v18866_v34  ;;  %18276 = vmatmul.mubr.f32.vlgmr.msra.gmra.mxu1 %v21310_v53  ;;  %v21383_v61 = vand.u32 4294901760, %v11535_v5  ;;  %v10573_v62 = vpop.permute.xlu0 %10572 }
 0x257   :  { %18285 = vmatprep.subr.mxu1 %v22266_v36  ;;  %18252 = vmatprep.subr.mxu0 %v22266_v36 }
 0x258   :  { %18286 = vmatpush3.msk.msra.mxu1 %vm279_vm2, %v18840_v12  ;;  %18253 = vmatpush3.msra.mxu0 %v18901_v50  ;;  %v6031_v48 = vpop.f32.mrf.mxu0 }
 0x259   :  { %18287 = vmatprep.subr.mxu1 %v22266_v36  ;;  %18254 = vmatprep.mubr.msk.f32.mxu0 %vm18799_vm7, %v22266_v36  ;;  %v6032_v43 = vadd.f32 %v6031_v48, %v5956_v29  ;;  %v21361_v7 = vpop.f32.mrf.mxu1  ;;  %v21403_v29 = vsub.f32 %v11535_v5, %v21383_v61  ;;  %v10593_v13 = vpop.permute.xlu1 %10592 }
 0x25a   :  { %18264 = vmatprep.subr.mxu0 %v22266_v36  ;;  %18288 = vmatpush3.msk.msra.mxu1 %vm18850_vm3, %v22269_v44  ;;  %v17864_v4 = vpop.f32.mrf.mxu0 }
 0x25b   :  { %18289 = vmatprep.mubr.msk.f32.mxu1 %vm18799_vm7, %v22266_v36  ;;  %18255 = vmatmul.mubr.f32.vlgmr.msra.gmra.mxu0 %v21226_v8  ;;  %v17899_v59 = vpop.f32.mrf.mxu1  ;;  %v6107_v52 = vadd.f32 %v21303_v20, %v6032_v43  ;;  %v10493_v8 = vmax.f32 %v20520_v51, %v10485_v16  ;;  %v10513_v20 = vmax.f32 %v19996_v39, %v10505_v57  ;;  %v22422_v16 = vld [vmem:[#allocation42_spill] sm:$0xff]  ;;  %v11606_v43 = vand.u32 4294901760, %v21403_v29  ;;  %v12525_v57 = vpop.permute.xlu0 %12524 }
 0x25c   :  { %18265 = vmatpush3.msk.msra.mxu0 %vm279_vm2, %v18840_v12  ;;  %18290 = vmatmul.mubr.f32.vlgmr.msra.gmra.mxu1 %v11144_v37  ;;  %v10533_v39 = vmax.f32 %v10473_v11, %v19972_v35 }
 0x25d   :  { %18299 = vmatprep.subr.mxu1 %v22266_v36  ;;  %18266 = vmatprep.subr.mxu0 %v22266_v36  ;;  %v10537_v37 = vmax.f32 %v10493_v8, %v22421_v58  ;;  %v10541_v48 = vmax.f32 %v10513_v20, %v22422_v16 }
 0x25e   :  { %18300 = vmatpush3.msk.msra.mxu1 %vm279_vm2, %v18840_v12  ;;  %18267 = vmatpush3.msk.msra.mxu0 %vm18850_vm3, %v22269_v44 }
 0x25f   :  { %18301 = vmatprep.subr.mxu1 %v22266_v36  ;;  %18268 = vmatprep.mubr.msk.f32.mxu0 %vm18799_vm7, %v22266_v36  ;;  %v6183_v42 = vpop.f32.mrf.mxu0  ;;  %v10581_v35 = vmax.f32 %v10537_v37, %v10573_v62  ;;  %v10601_v4 = vmax.f32 %v10541_v48, %v10593_v13 }
 0x260   :  { %18278 = vmatprep.subr.mxu0 %v22266_v36  ;;  %18302 = vmatpush3.msk.msra.mxu1 %vm18850_vm3, %v22269_v44  ;;  %v6184_v51 = vadd.f32 %v6183_v42, %v6107_v52  ;;  %v21393_v63 = vpop.f32.mrf.mxu1 }
 0x261   :  { %18303 = vmatprep.mubr.msk.f32.mxu1 %vm18799_vm7, %v22266_v36  ;;  %18269 = vmatmul.mubr.f32.vlgmr.msra.gmra.mxu0 %v11146_v33  ;;  %v17878_v15 = vpop.f32.mrf.mxu0  ;;  %v11607_v33 = vsub.f32 %v21403_v29, %v11606_v43 }
 0x262   :  { %18279 = vmatpush3.msra.mxu0 %v18848_v24  ;;  %18304 = vmatmul.mubr.f32.vlgmr.msra.gmra.mxu1 %v21310_v53  ;;  %v6257_v54 = vadd.f32 %v21338_v30, %v6184_v51  ;;  %v17913_v14 = vpop.f32.mrf.mxu1  ;;  %v10561_v30 = vmax.f32 %v10533_v39, %v10553_v49  ;;  %v12565_v49 = vpop.permute.xlu0 %12564  ;;  %v12536_v39 = vmax.f32 %v20065_v28, %v12525_v57 }
 0x263   :  { %18313 = vmatprep.subr.mxu1 %v22266_v36  ;;  %18280 = vmatprep.subr.mxu0 %v22266_v36  ;;  %v11608_v15 = vand.u32 4294901760, %v11607_v33  ;;  %v12576_v14 = vmax.f32 %v20091_v21, %v12565_v49  ;;  %v22423_v21 = vld [vmem:[#allocation30_spill] sm:$0xff] }
 0x264   :  { %18314 = vmatpush3.msra.mxu1 %v18894_v46  ;;  %18281 = vmatpush3.msra.mxu0 %v18875_v41  ;;  %6264 = vst.msk [vmem:[#allocation7 + $0x58] sm:$0xff] %vm2128_vm5, %v6257_v54  ;;  %vm10605_vm14 = vcmp.ge.f32.partialorder %v10581_v35, %v10561_v30  ;;  %v22424_v35 = vld [vmem:[#allocation43_spill] sm:$0xff] }
 0x265   :  { %18315 = vmatprep.subr.mxu1 %v22266_v36  ;;  %18282 = vmatprep.mubr.msk.f32.mxu0 %vm18799_vm7, %v22266_v36  ;;  %v10609_v8 = vsel %vm10605_vm14, %v10601_v4, 0.0  ;;  %v12604_v30 = vmax.f32 %v12576_v14, %v22424_v35 }
 0x266   :  { %18292 = vmatprep.subr.mxu0 %v22266_v36  ;;  %18316 = vmatpush3.msra.mxu1 %v18974_v22  ;;  %v6554_v45 = vpop.f32.mrf.mxu0  ;;  %v11997_v42 = vsel %vm275_vm1, %v10609_v8, 0  ;;  %v12633_v28 = vpop.permute.xlu0 %12632 }
 0x267   :  { %18317 = vmatprep.mubr.msk.f32.mxu1 %vm18799_vm7, %v22266_v36  ;;  %18283 = vmatmul.mubr.f32.vlgmr.msra.gmra.mxu0 %v21330_v27  ;;  %v21420_v59 = vpop.f32.mrf.mxu1  ;;  %v12545_v27 = vpop.permute.xlu1 %12544  ;;  %v6636_v11 = vadd.f32 %v21361_v7, %v6554_v45  ;;  %v21455_v54 = vand.u32 4294901760, %v11997_v42 }
 0x268   :  { %18293 = vmatpush3.msra.mxu0 %v18866_v34  ;;  %18318 = vmatmul.mubr.f32.vlgmr.msra.gmra.mxu1 %v21383_v61  ;;  %v17892_v5 = vpop.f32.mrf.mxu0 }
 0x269   :  { %18327 = vmatprep.subr.mxu1 %v22266_v36  ;;  %18294 = vmatprep.subr.mxu0 %v22266_v36  ;;  %v17927_v52 = vpop.f32.mrf.mxu1  ;;  %v21473_v13 = vsub.f32 %v11997_v42, %v21455_v54 }
 0x26a   :  { %18328 = vmatpush3.msk.msra.mxu1 %vm279_vm2, %v18840_v12  ;;  %18295 = vmatpush3.msra.mxu0 %v18901_v50 }
 0x26b   :  { %18329 = vmatprep.subr.mxu1 %v22266_v36  ;;  %18296 = vmatprep.mubr.msk.f32.mxu0 %vm18799_vm7, %v22266_v36  ;;  %v12613_v58 = vpop.permute.xlu1 %12612  ;;  %v12068_v33 = vand.u32 4294901760, %v21473_v13 }
 0x26c   :  { %18306 = vmatprep.subr.mxu0 %v22266_v36  ;;  %18330 = vmatpush3.msk.msra.mxu1 %vm18850_vm3, %v22269_v44 }
 0x26d   :  { %18331 = vmatprep.mubr.msk.f32.mxu1 %vm18799_vm7, %v22266_v36  ;;  %18297 = vmatmul.mubr.f32.vlgmr.msra.gmra.mxu0 %v21310_v53  ;;  %v6711_v20 = vpop.f32.mrf.mxu0  ;;  %v12556_v53 = vmax.f32 %v20613_v10, %v12545_v27  ;;  %v12596_v10 = vmax.f32 %v12536_v39, %v20067_v3 }
 0x26e   :  { %18307 = vmatpush3.msk.msra.mxu0 %vm279_vm2, %v18840_v12  ;;  %18332 = vmatmul.mubr.f32.vlgmr.msra.gmra.mxu1 %v11606_v43  ;;  %v6712_v51 = vadd.f32 %v6711_v20, %v6636_v11  ;;  %v21444_v62 = vpop.f32.mrf.mxu1  ;;  %v12527_v11 = vpop.permute.xlu0 %12526  ;;  %v12069_v20 = vsub.f32 %v21473_v13, %v12068_v33 }
 0x26f   :  { %18341 = vmatprep.subr.mxu1 %v22266_v36  ;;  %18308 = vmatprep.subr.mxu0 %v22266_v36  ;;  %v17906_v7 = vpop.f32.mrf.mxu0  ;;  %v12600_v48 = vmax.f32 %v12556_v53, %v22423_v21  ;;  %v12653_v3 = vpop.permute.xlu1 %12652  ;;  %v12624_v27 = vmax.f32 %v12596_v10, %v12613_v58 }
 0x270   :  { %18342 = vmatpush3.msk.msra.mxu1 %vm279_vm2, %v18840_v12  ;;  %18309 = vmatpush3.msk.msra.mxu0 %vm18850_vm3, %v22269_v44  ;;  %v17941_v37 = vpop.f32.mrf.mxu1  ;;  %v6787_v16 = vadd.f32 %v21393_v63, %v6712_v51  ;;  %v12664_v8 = vmax.f32 %v12604_v30, %v12653_v3  ;;  %v12070_v39 = vand.u32 4294901760, %v12069_v20  ;;  %v22426_v3 = vld [vmem:[#allocation18_spill] sm:$0xff] }
 0x271   :  { %18343 = vmatprep.subr.mxu1 %v22266_v36  ;;  %18310 = vmatprep.mubr.msk.f32.mxu0 %vm18799_vm7, %v22266_v36  ;;  %v12644_v4 = vmax.f32 %v12600_v48, %v12633_v28  ;;  %v12537_v37 = vmax.f32 %v20160_v2, %v12527_v11 }
 0x272   :  { %18320 = vmatprep.subr.mxu0 %v22266_v36  ;;  %18344 = vmatpush3.msk.msra.mxu1 %vm18850_vm3, %v22269_v44  ;;  %v12567_v7 = vpop.permute.xlu0 %12566 }
 0x273   :  { %18345 = vmatprep.mubr.msk.f32.mxu1 %vm18799_vm7, %v22266_v36  ;;  %18311 = vmatmul.mubr.f32.vlgmr.msra.gmra.mxu0 %v11608_v15  ;;  %vm12668_vm15 = vcmp.ge.f32.partialorder %v12644_v4, %v12624_v27 }
 0x274   :  { %18321 = vmatpush3.msra.mxu0 %v18848_v24  ;;  %18346 = vmatmul.mubr.f32.vlgmr.msra.gmra.mxu1 %v21383_v61  ;;  %v6863_v63 = vpop.f32.mrf.mxu0  ;;  %v12672_v42 = vsel %vm12668_vm15, %v12664_v8, 0.0 }
 0x275   :  { %18355 = vmatprep.subr.mxu1 %v22266_v36  ;;  %18322 = vmatprep.subr.mxu0 %v22266_v36  ;;  %v6864_v45 = vadd.f32 %v6863_v63, %v6787_v16  ;;  %v21478_v43 = vpop.f32.mrf.mxu1  ;;  %v12677_v53 = vsel %vm275_vm1, %v12672_v42, 0  ;;  %v22425_v63 = vld [vmem:[#allocation33_spill] sm:$0xff] }
 0x276   :  { %18356 = vmatpush3.msra.mxu1 %v18894_v46  ;;  %18323 = vmatpush3.msra.mxu0 %v18875_v41  ;;  %v17920_v57 = vpop.f32.mrf.mxu0  ;;  %v21526_v28 = vand.u32 4294901760, %v12677_v53 }
 0x277   :  { %18357 = vmatprep.subr.mxu1 %v22266_v36  ;;  %18324 = vmatprep.mubr.msk.f32.mxu0 %vm18799_vm7, %v22266_v36  ;;  %v6937_v5 = vadd.f32 %v21420_v59, %v6864_v45  ;;  %v17955_v52 = vpop.f32.mrf.mxu1 }
 0x278   :  { %18334 = vmatprep.subr.mxu0 %v22266_v36  ;;  %18358 = vmatpush3.msra.mxu1 %v18974_v22  ;;  %v21546_v45 = vsub.f32 %v12677_v53, %v21526_v28 }
 0x279   :  { %18359 = vmatprep.mubr.msk.f32.mxu1 %vm18799_vm7, %v22266_v36  ;;  %18325 = vmatmul.mubr.f32.vlgmr.msra.gmra.mxu0 %v21403_v29  ;;  %8327 = vst.msk [vmem:[#allocation7 + $0x60] sm:$0xff] %vm2128_vm5, %v6937_v5  ;;  %v12547_v29 = vpop.permute.xlu1 %12546 }
 0x27a   :  { %18335 = vmatpush3.msra.mxu0 %v18866_v34  ;;  %18360 = vmatmul.mubr.f32.vlgmr.msra.gmra.mxu1 %v21455_v54 }
 0x27b   :  { %18369 = vmatprep.subr.mxu1 %v22266_v36  ;;  %18336 = vmatprep.subr.mxu0 %v22266_v36  ;;  %v7016_v59 = vpop.f32.mrf.mxu0 }
 0x27c   :  { %18370 = vmatpush3.msk.msra.mxu1 %vm279_vm2, %v18840_v12  ;;  %18337 = vmatpush3.msra.mxu0 %v18901_v50  ;;  %v21500_v49 = vpop.f32.mrf.mxu1  ;;  %v7098_v58 = vadd.f32 %v21444_v62, %v7016_v59  ;;  %v12577_v62 = vmax.f32 %v20186_v38, %v12567_v7  ;;  %v12597_v38 = vmax.f32 %v12537_v37, %v20162_v40 }
 0x27d   :  { %18371 = vmatprep.subr.mxu1 %v22266_v36  ;;  %18338 = vmatprep.mubr.msk.f32.mxu0 %vm18799_vm7, %v22266_v36  ;;  %v17934_v51 = vpop.f32.mrf.mxu0  ;;  %v12615_v14 = vpop.permute.xlu1 %12614 }
 0x27e   :  { %18348 = vmatprep.subr.mxu0 %v22266_v36  ;;  %18372 = vmatpush3.msk.msra.mxu1 %vm18850_vm3, %v22269_v44  ;;  %v17969_v15 = vpop.f32.mrf.mxu1  ;;  %v12605_v4 = vmax.f32 %v12577_v62, %v22426_v3 }
 0x27f   :  { %18373 = vmatprep.mubr.msk.f32.mxu1 %vm18799_vm7, %v22266_v36  ;;  %18339 = vmatmul.mubr.f32.vlgmr.msra.gmra.mxu0 %v21383_v61  ;;  %v12557_v61 = vmax.f32 %v20706_v19, %v12547_v29  ;;  %v12635_v19 = vpop.permute.xlu0 %12634 }
 0x280   :  { %18349 = vmatpush3.msk.msra.mxu0 %vm279_vm2, %v18840_v12  ;;  %18374 = vmatmul.mubr.f32.vlgmr.msra.gmra.mxu1 %v12068_v33  ;;  %v12748_v33 = vand.u32 4294901760, %v21546_v45 }
 0x281   :  { %18383 = vmatprep.subr.mxu1 %v22266_v36  ;;  %18350 = vmatprep.subr.mxu0 %v22266_v36  ;;  %v12601_v35 = vmax.f32 %v12557_v61, %v22425_v63  ;;  %v12655_v57 = vpop.permute.xlu1 %12654 }
 0x282   :  { %18384 = vmatpush3.msk.msra.mxu1 %vm279_vm2, %v18840_v12  ;;  %18351 = vmatpush3.msk.msra.mxu0 %vm18850_vm3, %v22269_v44  ;;  %v7173_v16 = vpop.f32.mrf.mxu0  ;;  %v12665_v8 = vmax.f32 %v12605_v4, %v12655_v57  ;;  %v12749_v42 = vsub.f32 %v21546_v45, %v12748_v33 }
 0x283   :  { %18385 = vmatprep.subr.mxu1 %v22266_v36  ;;  %18352 = vmatprep.mubr.msk.f32.mxu0 %vm18799_vm7, %v22266_v36  ;;  %v7174_v10 = vadd.f32 %v7173_v16, %v7098_v58  ;;  %v21532_v21 = vpop.f32.mrf.mxu1  ;;  %v12645_v5 = vmax.f32 %v12601_v35, %v12635_v19  ;;  %v12529_v11 = vpop.permute.xlu0 %12528 }
 0x284   :  { %18362 = vmatprep.subr.mxu0 %v22266_v36  ;;  %18386 = vmatpush3.msk.msra.mxu1 %vm18850_vm3, %v22269_v44  ;;  %v17948_v2 = vpop.f32.mrf.mxu0  ;;  %v12750_v58 = vand.u32 4294901760, %v12749_v42  ;;  %v12538_v37 = vmax.f32 %v20255_v1, %v12529_v11 }
 0x285   :  { %18387 = vmatprep.mubr.msk.f32.mxu1 %vm18799_vm7, %v22266_v36  ;;  %18353 = vmatmul.mubr.f32.vlgmr.msra.gmra.mxu0 %v12070_v39  ;;  %v17983_v48 = vpop.f32.mrf.mxu1  ;;  %v7249_v30 = vadd.f32 %v21478_v43, %v7174_v10  ;;  %v12625_v43 = vmax.f32 %v12597_v38, %v12615_v14 }
 0x286   :  { %18363 = vmatpush3.msra.mxu0 %v18848_v24  ;;  %18388 = vmatmul.mubr.f32.vlgmr.msra.gmra.mxu1 %v21455_v54 }
 0x287   :  { %18397 = vmatprep.subr.mxu1 %v22266_v36  ;;  %18364 = vmatprep.subr.mxu0 %v22266_v36  ;;  %vm12669_vm0 = vcmp.ge.f32.partialorder %v12645_v5, %v12625_v43  ;;  %v12569_v15 = vpop.permute.xlu0 %12568 }
 0x288   :  { %18398 = vmatpush3.msra.mxu1 %v18894_v46  ;;  %18365 = vmatpush3.msra.mxu0 %v18875_v41  ;;  %v12578_v62 = vmax.f32 %v20281_v32, %v12569_v15  ;;  %v12598_v32 = vmax.f32 %v12538_v37, %v20257_v9 }
 0x289   :  { %18399 = vmatprep.subr.mxu1 %v22266_v36  ;;  %18366 = vmatprep.mubr.msk.f32.mxu0 %vm18799_vm7, %v22266_v36  ;;  %v7325_v40 = vpop.f32.mrf.mxu0 }
 0x28a   :  { %18376 = vmatprep.subr.mxu0 %v22266_v36  ;;  %18400 = vmatpush3.msra.mxu1 %v18974_v22  ;;  %v7326_v52 = vadd.f32 %v7325_v40, %v7249_v30  ;;  %v21558_v27 = vpop.f32.mrf.mxu1 }
 0x28b   :  { %18401 = vmatprep.mubr.msk.f32.mxu1 %vm18799_vm7, %v22266_v36  ;;  %18367 = vmatmul.mubr.f32.vlgmr.msra.gmra.mxu0 %v21473_v13  ;;  %v17962_v59 = vpop.f32.mrf.mxu0  ;;  %v12549_v13 = vpop.permute.xlu1 %12548 }
 0x28c   :  { %18377 = vmatpush3.msra.mxu0 %v18866_v34  ;;  %18402 = vmatmul.mubr.f32.vlgmr.msra.gmra.mxu1 %v21526_v28  ;;  %v7399_v29 = vadd.f32 %v21500_v49, %v7326_v52  ;;  %v17997_v20 = vpop.f32.mrf.mxu1  ;;  %v12673_v49 = vsel %vm12669_vm0, %v12665_v8, 0.0  ;;  %v12637_v1 = vpop.permute.xlu0 %12636 }
 0x28d   :  { %18411 = vmatprep.subr.mxu1 %v22266_v36  ;;  %18378 = vmatprep.subr.mxu0 %v22266_v36  ;;  %v13139_v53 = vsel %vm275_vm1, %v12673_v49, 0 }
 0x28e   :  { %18412 = vmatpush3.msk.msra.mxu1 %vm279_vm2, %v18840_v12  ;;  %18379 = vmatpush3.msra.mxu0 %v18901_v50  ;;  %8328 = vst.msk [vmem:[#allocation7 + $0x68] sm:$0xff] %vm2128_vm5, %v7399_v29  ;;  %v21598_v16 = vand.u32 4294901760, %v13139_v53 }
 0x28f   :  { %18413 = vmatprep.subr.mxu1 %v22266_v36  ;;  %18380 = vmatprep.mubr.msk.f32.mxu0 %vm18799_vm7, %v22266_v36  ;;  %v12617_v14 = vpop.permute.xlu1 %12616 }
 0x290   :  { %18390 = vmatprep.subr.mxu0 %v22266_v36  ;;  %18414 = vmatpush3.msk.msra.mxu1 %vm18850_vm3, %v22269_v44  ;;  %v7478_v51 = vpop.f32.mrf.mxu0  ;;  %v21618_v38 = vsub.f32 %v13139_v53, %v21598_v16  ;;  %v12626_v4 = vmax.f32 %v12598_v32, %v12617_v14  ;;  %v12531_v40 = vpop.permute.xlu0 %12530  ;;  %v22430_v14 = vld [vmem:[#allocation20_spill] sm:$0xff]  ;;  %v22432_v32 = vld [vmem:[#allocation50_spill] sm:$0xff] }
 0x291   :  { %18415 = vmatprep.mubr.msk.f32.mxu1 %vm18799_vm7, %v22266_v36  ;;  %18381 = vmatmul.mubr.f32.vlgmr.msra.gmra.mxu0 %v21455_v54  ;;  %v21584_v7 = vpop.f32.mrf.mxu1  ;;  %v12558_v54 = vmax.f32 %v20799_v18, %v12549_v13  ;;  %v7560_v18 = vadd.f32 %v21532_v21, %v7478_v51  ;;  %v22427_v21 = vld [vmem:[#allocation44_spill] sm:$0xff] }
 0x292   :  { %18391 = vmatpush3.msk.msra.mxu0 %vm279_vm2, %v18840_v12  ;;  %18416 = vmatmul.mubr.f32.vlgmr.msra.gmra.mxu1 %v12748_v33  ;;  %v17976_v39 = vpop.f32.mrf.mxu0  ;;  %v12606_v63 = vmax.f32 %v12578_v62, %v22427_v21  ;;  %v13210_v57 = vand.u32 4294901760, %v21618_v38  ;;  %v22428_v51 = vld [vmem:[#allocation28_spill] sm:$0xff] }
 0x293   :  { %18425 = vmatprep.subr.mxu1 %v22266_v36  ;;  %18392 = vmatprep.subr.mxu0 %v22266_v36  ;;  %v18011_v61 = vpop.f32.mrf.mxu1  ;;  %v12602_v2 = vmax.f32 %v12558_v54, %v20862_v56  ;;  %v12657_v9 = vpop.permute.xlu1 %12656  ;;  %v12539_v15 = vmax.f32 %v22428_v51, %v12531_v40 }
 0x294   :  { %18426 = vmatpush3.msk.msra.mxu1 %vm279_vm2, %v18840_v12  ;;  %18393 = vmatpush3.msk.msra.mxu0 %vm18850_vm3, %v22269_v44  ;;  %v12666_v5 = vmax.f32 %v12606_v63, %v12657_v9  ;;  %v13211_v8 = vsub.f32 %v21618_v38, %v13210_v57  ;;  %v12571_v20 = vpop.permute.xlu0 %12570 }
 0x295   :  { %18427 = vmatprep.subr.mxu1 %v22266_v36  ;;  %18394 = vmatprep.mubr.msk.f32.mxu0 %vm18799_vm7, %v22266_v36  ;;  %v12646_v30 = vmax.f32 %v12602_v2, %v12637_v1  ;;  %v12599_v62 = vmax.f32 %v12539_v15, %v22430_v14  ;;  %v18735_v15 = vld [vmem:[#allocation3] ss:$2 sm:$0xff] }
 0x296   :  { %18404 = vmatprep.subr.mxu0 %v22266_v36  ;;  %18428 = vmatpush3.msk.msra.mxu1 %vm18850_vm3, %v22269_v44  ;;  %v13212_v42 = vand.u32 4294901760, %v13211_v8 }
 0x297   :  { %18429 = vmatprep.mubr.msk.f32.mxu1 %vm18799_vm7, %v22266_v36  ;;  %18395 = vmatmul.mubr.f32.vlgmr.msra.gmra.mxu0 %v12750_v58  ;;  %v7635_v10 = vpop.f32.mrf.mxu0  ;;  %vm12670_vm4 = vcmp.ge.f32.partialorder %v12646_v30, %v12626_v4  ;;  %v22429_v58 = vld [vmem:[#allocation29_spill] sm:$0xff] }
 0x298   :  { %18405 = vmatpush3.msra.mxu0 %v18848_v24  ;;  %18430 = vmatmul.mubr.f32.vlgmr.msra.gmra.mxu1 %v21526_v28  ;;  %v7636_v19 = vadd.f32 %v7635_v10, %v7560_v18  ;;  %v21615_v48 = vpop.f32.mrf.mxu1  ;;  %v12674_v11 = vsel %vm12670_vm4, %v12666_v5, 0.0  ;;  %v12579_v61 = vmax.f32 %v22429_v58, %v12571_v20  ;;  %v12639_v37 = vpop.permute.xlu0 %12638  ;;  %v22431_v18 = vld [vmem:[#allocation31_spill] sm:$0xff] }
 0x299   :  { %18439 = vmatprep.subr.mxu1 %v22266_v36  ;;  %18406 = vmatprep.subr.mxu0 %v22266_v36  ;;  %v17990_v35 = vpop.f32.mrf.mxu0  ;;  %v13601_v13 = vsel %vm275_vm1, %v12674_v11, 0 }
 0x29a   :  { %18440 = vmatpush3.msra.mxu1 %v18894_v46  ;;  %18407 = vmatpush3.msra.mxu0 %v18875_v41  ;;  %v18025_v56 = vpop.f32.mrf.mxu1  ;;  %v7711_v3 = vadd.f32 %v21558_v27, %v7636_v19  ;;  %v21671_v39 = vand.u32 4294901760, %v13601_v13  ;;  %v12607_v2 = vmax.f32 %v12579_v61, %v22432_v32  ;;  %v18736_v61 = vld [vmem:[#allocation2 + $0x1] ss:$2 sm:$0xff] }
 0x29b   :  { %18441 = vmatprep.subr.mxu1 %v22266_v36  ;;  %18408 = vmatprep.mubr.msk.f32.mxu0 %vm18799_vm7, %v22266_v36 }
 0x29c   :  { %18418 = vmatprep.subr.mxu0 %v22266_v36  ;;  %18442 = vmatpush3.msra.mxu1 %v18974_v22  ;;  %v21688_v10 = vsub.f32 %v13601_v13, %v21671_v39 }
 0x29d   :  { %18443 = vmatprep.mubr.msk.f32.mxu1 %vm18799_vm7, %v22266_v36  ;;  %18409 = vmatmul.mubr.f32.vlgmr.msra.gmra.mxu0 %v21546_v45  ;;  %v12551_v45 = vpop.permute.xlu1 %12550 }
 0x29e   :  { %18419 = vmatpush3.msra.mxu0 %v18866_v34  ;;  %18444 = vmatmul.mubr.f32.vlgmr.msra.gmra.mxu1 %v21598_v16  ;;  %v7787_v43 = vpop.f32.mrf.mxu0 }
 0x29f   :  { %18453 = vmatprep.subr.mxu1 %v22266_v36  ;;  %18420 = vmatprep.subr.mxu0 %v22266_v36  ;;  %v7788_v52 = vadd.f32 %v7787_v43, %v7711_v3  ;;  %v21639_v27 = vpop.f32.mrf.mxu1  ;;  %v13672_v3 = vand.u32 4294901760, %v21688_v10 }
 0x2a0   :  { %18454 = vmatpush3.msk.msra.mxu1 %vm279_vm2, %v18840_v12  ;;  %18421 = vmatpush3.msra.mxu0 %v18901_v50  ;;  %v18004_v33 = vpop.f32.mrf.mxu0 }
 0x2a1   :  { %18455 = vmatprep.subr.mxu1 %v22266_v36  ;;  %18422 = vmatprep.mubr.msk.f32.mxu0 %vm18799_vm7, %v22266_v36  ;;  %v7861_v59 = vadd.f32 %v21584_v7, %v7788_v52  ;;  %v18039_v29 = vpop.f32.mrf.mxu1  ;;  %v12619_v7 = vpop.permute.xlu1 %12618  ;;  %v13673_v43 = vsub.f32 %v21688_v10, %v13672_v3 }
 0x2a2   :  { %18432 = vmatprep.subr.mxu0 %v22266_v36  ;;  %18456 = vmatpush3.msk.msra.mxu1 %vm18850_vm3, %v22269_v44 }
 0x2a3   :  { %18457 = vmatprep.mubr.msk.f32.mxu1 %vm18799_vm7, %v22266_v36  ;;  %18423 = vmatmul.mubr.f32.vlgmr.msra.gmra.mxu0 %v21526_v28  ;;  %8329 = vst.msk [vmem:[#allocation7 + $0x70] sm:$0xff] %vm2128_vm5, %v7861_v59  ;;  %v12559_v28 = vmax.f32 %v20892_v31, %v12551_v45  ;;  %v13674_v13 = vand.u32 4294901760, %v13673_v43 }
 0x2a4   :  { %18433 = vmatpush3.msk.msra.mxu0 %vm279_vm2, %v18840_v12  ;;  %18458 = vmatmul.mubr.f32.vlgmr.msra.gmra.mxu1 %v13210_v57  ;;  %v14591_v57 = vpop.permute.xlu0 %14590 }
 0x2a5   :  { %18467 = vmatprep.subr.mxu1 %v22266_v36  ;;  %18434 = vmatprep.subr.mxu0 %v22266_v36  ;;  %v7940_v49 = vpop.f32.mrf.mxu0  ;;  %v12603_v1 = vmax.f32 %v12559_v28, %v22431_v18  ;;  %v12659_v21 = vpop.permute.xlu1 %12658 }
 0x2a6   :  { %18468 = vmatpush3.msk.msra.mxu1 %vm279_vm2, %v18840_v12  ;;  %18435 = vmatpush3.msk.msra.mxu0 %vm18850_vm3, %v22269_v44  ;;  %v21669_v53 = vpop.f32.mrf.mxu1  ;;  %v8022_v19 = vadd.f32 %v21615_v48, %v7940_v49  ;;  %v12627_v48 = vmax.f32 %v12599_v62, %v12619_v7  ;;  %v12667_v4 = vmax.f32 %v12607_v2, %v12659_v21  ;;  %v18737_v62 = vld [vmem:[#allocation3 + $0x1] ss:$2 sm:$0xff] }
 0x2a7   :  { %18469 = vmatprep.subr.mxu1 %v22266_v36  ;;  %18436 = vmatprep.mubr.msk.f32.mxu0 %vm18799_vm7, %v22266_v36  ;;  %v18018_v54 = vpop.f32.mrf.mxu0  ;;  %v12647_v63 = vmax.f32 %v12603_v1, %v12639_v37 }
 0x2a8   :  { %18446 = vmatprep.subr.mxu0 %v22266_v36  ;;  %18470 = vmatpush3.msk.msra.mxu1 %vm18850_vm3, %v22269_v44  ;;  %v18053_v31 = vpop.f32.mrf.mxu1  ;;  %v14631_v8 = vpop.permute.xlu0 %14630 }
 0x2a9   :  { %18471 = vmatprep.mubr.msk.f32.mxu1 %vm18799_vm7, %v22266_v36  ;;  %18437 = vmatmul.mubr.f32.vlgmr.msra.gmra.mxu0 %v13212_v42  ;;  %vm12671_vm6 = vcmp.ge.f32.partialorder %v12647_v63, %v12627_v48  ;;  %v18734_v42 = vld [vmem:[#allocation2] ss:$2 sm:$0xff]  ;;  %v14642_v7 = vmax.f32 %v18735_v15, %v14631_v8 }
 0x2aa   :  { %18447 = vmatpush3.msra.mxu0 %v18848_v24  ;;  %18472 = vmatmul.mubr.f32.vlgmr.msra.gmra.mxu1 %v21598_v16  ;;  %v12675_v52 = vsel %vm12671_vm6, %v12667_v4, 0.0  ;;  %v14602_v49 = vmax.f32 %v18734_v42, %v14591_v57 }
 0x2ab   :  { %18481 = vmatprep.subr.mxu1 %v22266_v36  ;;  %18448 = vmatprep.subr.mxu0 %v22266_v36  ;;  %v14063_v59 = vsel %vm275_vm1, %v12675_v52, 0  ;;  %v14670_v18 = vmax.f32 %v14642_v7, %v18737_v62 }
 0x2ac   :  { %18482 = vmatpush3.msra.mxu1 %v18894_v46  ;;  %18449 = vmatpush3.msra.mxu0 %v18875_v41  ;;  %v8097_v35 = vpop.f32.mrf.mxu0  ;;  %v21741_v51 = vand.u32 4294901760, %v14063_v59  ;;  %v14662_v54 = vmax.f32 %v14602_v49, %v18736_v61  ;;  %v18740_v49 = vld [vmem:[#allocation2 + $0x11] ss:$2 sm:$0xff] }
 0x2ad   :  { %18483 = vmatprep.subr.mxu1 %v22266_v36  ;;  %18450 = vmatprep.mubr.msk.f32.mxu0 %vm18799_vm7, %v22266_v36  ;;  %v8098_v9 = vadd.f32 %v8097_v35, %v8022_v19  ;;  %v21699_v30 = vpop.f32.mrf.mxu1 }
 0x2ae   :  { %18460 = vmatprep.subr.mxu0 %v22266_v36  ;;  %18484 = vmatpush3.msra.mxu1 %v18974_v22  ;;  %v18032_v56 = vpop.f32.mrf.mxu0  ;;  %v21758_v14 = vsub.f32 %v14063_v59, %v21741_v51 }
 0x2af   :  { %18485 = vmatprep.mubr.msk.f32.mxu1 %vm18799_vm7, %v22266_v36  ;;  %18451 = vmatmul.mubr.f32.vlgmr.msra.gmra.mxu0 %v21618_v38  ;;  %v18067_v5 = vpop.f32.mrf.mxu1  ;;  %v8173_v40 = vadd.f32 %v21639_v27, %v8098_v9  ;;  %v14611_v38 = vpop.permute.xlu1 %14610 }
 0x2b0   :  { %18461 = vmatpush3.msra.mxu0 %v18866_v34  ;;  %18486 = vmatmul.mubr.f32.vlgmr.msra.gmra.mxu1 %v21671_v39  ;;  %v14134_v21 = vand.u32 4294901760, %v21758_v14 }
 0x2b1   :  { %18495 = vmatprep.subr.mxu1 %v22266_v36  ;;  %18462 = vmatprep.subr.mxu0 %v22266_v36 }
 0x2b2   :  { %18496 = vmatpush3.msk.msra.mxu1 %vm279_vm2, %v18840_v12  ;;  %18463 = vmatpush3.msra.mxu0 %v18901_v50  ;;  %v14135_v4 = vsub.f32 %v21758_v14, %v14134_v21 }
 0x2b3   :  { %18497 = vmatprep.subr.mxu1 %v22266_v36  ;;  %18464 = vmatprep.mubr.msk.f32.mxu0 %vm18799_vm7, %v22266_v36  ;;  %v8249_v45 = vpop.f32.mrf.mxu0  ;;  %v14679_v28 = vpop.permute.xlu1 %14678 }
 0x2b4   :  { %18474 = vmatprep.subr.mxu0 %v22266_v36  ;;  %18498 = vmatpush3.msk.msra.mxu1 %vm18850_vm3, %v22269_v44  ;;  %v8250_v27 = vadd.f32 %v8249_v45, %v8173_v40  ;;  %v21723_v33 = vpop.f32.mrf.mxu1  ;;  %v14136_v52 = vand.u32 4294901760, %v14135_v4  ;;  %v18742_v4 = vld [vmem:[#allocation2 + $0x20] ss:$2 sm:$0xff] }
 0x2b5   :  { %18499 = vmatprep.mubr.msk.f32.mxu1 %vm18799_vm7, %v22266_v36  ;;  %18465 = vmatmul.mubr.f32.vlgmr.msra.gmra.mxu0 %v21598_v16  ;;  %v18046_v11 = vpop.f32.mrf.mxu0  ;;  %v14622_v16 = vmax.f32 %v20989_v26, %v14611_v38 }
 0x2b6   :  { %18475 = vmatpush3.msk.msra.mxu0 %vm279_vm2, %v18840_v12  ;;  %18500 = vmatmul.mubr.f32.vlgmr.msra.gmra.mxu1 %v13672_v3  ;;  %v8323_v29 = vadd.f32 %v21669_v53, %v8250_v27  ;;  %v18081_v20 = vpop.f32.mrf.mxu1  ;;  %v14699_v53 = vpop.permute.xlu0 %14698 }
 0x2b7   :  { %18509 = vmatprep.subr.mxu1 %v22266_v36  ;;  %18476 = vmatprep.subr.mxu0 %v22266_v36  ;;  %v14666_v31 = vmax.f32 %v14622_v16, %v21048_v60  ;;  %v14719_v32 = vpop.permute.xlu1 %14718  ;;  %v14690_v60 = vmax.f32 %v14662_v54, %v14679_v28  ;;  %v18739_v20 = vld [vmem:[#allocation3 + $0x10] ss:$2 sm:$0xff] }
 0x2b8   :  { %18510 = vmatpush3.msk.msra.mxu1 %vm279_vm2, %v18840_v12  ;;  %18477 = vmatpush3.msk.msra.mxu0 %vm18850_vm3, %v22269_v44  ;;  %8330 = vst.msk [vmem:[#allocation7 + $0x78] sm:$0xff] %vm2128_vm5, %v8323_v29  ;;  %v14730_v63 = vmax.f32 %v14670_v18, %v14719_v32 }
 0x2b9   :  { %18511 = vmatprep.subr.mxu1 %v22266_v36  ;;  %18478 = vmatprep.mubr.msk.f32.mxu0 %vm18799_vm7, %v22266_v36  ;;  %v14710_v2 = vmax.f32 %v14666_v31, %v14699_v53 }
 0x2ba   :  { %18488 = vmatprep.subr.mxu0 %v22266_v36  ;;  %18512 = vmatpush3.msk.msra.mxu1 %vm18850_vm3, %v22269_v44  ;;  %v8620_v26 = vpop.f32.mrf.mxu0  ;;  %v14593_v35 = vpop.permute.xlu0 %14592 }
 0x2bb   :  { %18513 = vmatprep.mubr.msk.f32.mxu1 %vm18799_vm7, %v22266_v36  ;;  %18479 = vmatmul.mubr.f32.vlgmr.msra.gmra.mxu0 %v13674_v13  ;;  %v21752_v58 = vpop.f32.mrf.mxu1  ;;  %v8702_v19 = vadd.f32 %v21699_v30, %v8620_v26  ;;  %vm14734_vm8 = vcmp.ge.f32.partialorder %v14710_v2, %v14690_v60  ;;  %v18741_v26 = vld [vmem:[#allocation3 + $0x11] ss:$2 sm:$0xff] }
 0x2bc   :  { %18489 = vmatpush3.msra.mxu0 %v18848_v24  ;;  %18514 = vmatmul.mubr.f32.vlgmr.msra.gmra.mxu1 %v21671_v39  ;;  %v18060_v37 = vpop.f32.mrf.mxu0  ;;  %v14738_v57 = vsel %vm14734_vm8, %v14730_v63, 0.0 }
 0x2bd   :  { %18523 = vmatprep.subr.mxu1 %v22266_v36  ;;  %18490 = vmatprep.subr.mxu0 %v22266_v36  ;;  %v18095_v1 = vpop.f32.mrf.mxu1  ;;  %v14743_v38 = vsel %vm275_vm1, %v14738_v57, 0 }
 0x2be   :  { %18524 = vmatpush3.msra.mxu1 %v18894_v46  ;;  %18491 = vmatpush3.msra.mxu0 %v18875_v41  ;;  %v14633_v40 = vpop.permute.xlu0 %14632  ;;  %v21808_v29 = vand.u32 4294901760, %v14743_v38 }
 0x2bf   :  { %18525 = vmatprep.subr.mxu1 %v22266_v36  ;;  %18492 = vmatprep.mubr.msk.f32.mxu0 %vm18799_vm7, %v22266_v36  ;;  %v14643_v13 = vmax.f32 %v18739_v20, %v14633_v40 }
 0x2c0   :  { %18502 = vmatprep.subr.mxu0 %v22266_v36  ;;  %18526 = vmatpush3.msra.mxu1 %v18974_v22  ;;  %v21825_v7 = vsub.f32 %v14743_v38, %v21808_v29  ;;  %v18743_v38 = vld [vmem:[#allocation3 + $0x20] ss:$2 sm:$0xff] }
 0x2c1   :  { %18527 = vmatprep.mubr.msk.f32.mxu1 %vm18799_vm7, %v22266_v36  ;;  %18493 = vmatmul.mubr.f32.vlgmr.msra.gmra.mxu0 %v21688_v10  ;;  %v8777_v9 = vpop.f32.mrf.mxu0  ;;  %v14613_v10 = vpop.permute.xlu1 %14612  ;;  %v14671_v53 = vmax.f32 %v14643_v13, %v18741_v26 }
 0x2c2   :  { %18503 = vmatpush3.msra.mxu0 %v18866_v34  ;;  %18528 = vmatmul.mubr.f32.vlgmr.msra.gmra.mxu1 %v21741_v51  ;;  %v8778_v48 = vadd.f32 %v8777_v9, %v8702_v19  ;;  %v21776_v56 = vpop.f32.mrf.mxu1  ;;  %v14814_v18 = vand.u32 4294901760, %v21825_v7 }
 0x2c3   :  { %18537 = vmatprep.subr.mxu1 %v22266_v36  ;;  %18504 = vmatprep.subr.mxu0 %v22266_v36  ;;  %v18074_v30 = vpop.f32.mrf.mxu0 }
 0x2c4   :  { %18538 = vmatpush3.msk.msra.mxu1 %vm279_vm2, %v18840_v12  ;;  %18505 = vmatpush3.msra.mxu0 %v18901_v50  ;;  %v18109_v3 = vpop.f32.mrf.mxu1  ;;  %v8853_v5 = vadd.f32 %v21723_v33, %v8778_v48  ;;  %v18738_v33 = vld [vmem:[#allocation2 + $0x10] ss:$2 sm:$0xff]  ;;  %v14815_v19 = vsub.f32 %v21825_v7, %v14814_v18 }
 0x2c5   :  { %18539 = vmatprep.subr.mxu1 %v22266_v36  ;;  %18506 = vmatprep.mubr.msk.f32.mxu0 %vm18799_vm7, %v22266_v36  ;;  %v14603_v8 = vmax.f32 %v18738_v33, %v14593_v35  ;;  %v14681_v11 = vpop.permute.xlu1 %14680  ;;  %v18744_v33 = vld [vmem:[#allocation2 + $0x21] ss:$2 sm:$0xff] }
 0x2c6   :  { %18516 = vmatprep.subr.mxu0 %v22266_v36  ;;  %18540 = vmatpush3.msk.msra.mxu1 %vm18850_vm3, %v22269_v44  ;;  %v14816_v3 = vand.u32 4294901760, %v14815_v19  ;;  %v18746_v19 = vld [vmem:[#allocation2 + $0x30] ss:$2 sm:$0xff] }
 0x2c7   :  { %18541 = vmatprep.mubr.msk.f32.mxu1 %vm18799_vm7, %v22266_v36  ;;  %18507 = vmatmul.mubr.f32.vlgmr.msra.gmra.mxu0 %v21671_v39  ;;  %v14623_v39 = vmax.f32 %v21079_v55, %v14613_v10  ;;  %v14701_v55 = vpop.permute.xlu0 %14700  ;;  %v14663_v28 = vmax.f32 %v14603_v8, %v18740_v49 }
 0x2c8   :  { %18517 = vmatpush3.msk.msra.mxu0 %vm279_vm2, %v18840_v12  ;;  %18542 = vmatmul.mubr.f32.vlgmr.msra.gmra.mxu1 %v14134_v21  ;;  %v8929_v43 = vpop.f32.mrf.mxu0 }
 0x2c9   :  { %18551 = vmatprep.subr.mxu1 %v22266_v36  ;;  %18518 = vmatprep.subr.mxu0 %v22266_v36  ;;  %v8930_v45 = vadd.f32 %v8929_v43, %v8853_v5  ;;  %v21800_v27 = vpop.f32.mrf.mxu1  ;;  %v14667_v15 = vmax.f32 %v14623_v39, %v21140_v6  ;;  %v14721_v61 = vpop.permute.xlu1 %14720  ;;  %v14691_v37 = vmax.f32 %v14663_v28, %v14681_v11 }
 0x2ca   :  { %18552 = vmatpush3.msk.msra.mxu1 %vm279_vm2, %v18840_v12  ;;  %18519 = vmatpush3.msk.msra.mxu0 %vm18850_vm3, %v22269_v44  ;;  %v18088_v59 = vpop.f32.mrf.mxu0  ;;  %v14731_v1 = vmax.f32 %v14671_v53, %v14721_v61 }
 0x2cb   :  { %18553 = vmatprep.subr.mxu1 %v22266_v36  ;;  %18520 = vmatprep.mubr.msk.f32.mxu0 %vm18799_vm7, %v22266_v36  ;;  %v9003_v16 = vadd.f32 %v21752_v58, %v8930_v45  ;;  %v18123_v42 = vpop.f32.mrf.mxu1  ;;  %v14711_v54 = vmax.f32 %v14667_v15, %v14701_v55  ;;  %v14595_v32 = vpop.permute.xlu0 %14594 }
 0x2cc   :  { %18530 = vmatprep.subr.mxu0 %v22266_v36  ;;  %18554 = vmatpush3.msk.msra.mxu1 %vm18850_vm3, %v22269_v44  ;;  %v14604_v57 = vmax.f32 %v18742_v4, %v14595_v32 }
 0x2cd   :  { %18555 = vmatprep.mubr.msk.f32.mxu1 %vm18799_vm7, %v22266_v36  ;;  %18521 = vmatmul.mubr.f32.vlgmr.msra.gmra.mxu0 %v14136_v52  ;;  %10393 = vst.msk [vmem:[#allocation7 + $0x80] sm:$0xff] %vm2128_vm5, %v9003_v16  ;;  %vm14735_vm9 = vcmp.ge.f32.partialorder %v14711_v54, %v14691_v37  ;;  %v14615_v60 = vpop.permute.xlu1 %14614  ;;  %v18745_v16 = vld [vmem:[#allocation3 + $0x21] ss:$2 sm:$0xff] }
 0x2ce   :  { %18531 = vmatpush3.msra.mxu0 %v18848_v24  ;;  %18556 = vmatmul.mubr.f32.vlgmr.msra.gmra.mxu1 %v21741_v51  ;;  %v14739_v21 = vsel %vm14735_vm9, %v14731_v1, 0.0  ;;  %v14664_v8 = vmax.f32 %v14604_v57, %v18744_v33 }
 0x2cf   :  { %18565 = vmatprep.subr.mxu1 %v22266_v36  ;;  %18532 = vmatprep.subr.mxu0 %v22266_v36  ;;  %v9082_v58 = vpop.f32.mrf.mxu0  ;;  %v14635_v48 = vpop.permute.xlu0 %14634  ;;  %v15205_v30 = vsel %vm275_vm1, %v14739_v21, 0 }
 0x2d0   :  { %18566 = vmatpush3.msra.mxu1 %v18894_v46  ;;  %18533 = vmatpush3.msra.mxu0 %v18875_v41  ;;  %v21831_v31 = vpop.f32.mrf.mxu1  ;;  %v9164_v2 = vadd.f32 %v21776_v56, %v9082_v58  ;;  %v21875_v40 = vand.u32 4294901760, %v15205_v30  ;;  %v14644_v43 = vmax.f32 %v18743_v38, %v14635_v48  ;;  %v18747_v48 = vld [vmem:[#allocation3 + $0x30] ss:$2 sm:$0xff] }
 0x2d1   :  { %18567 = vmatprep.subr.mxu1 %v22266_v36  ;;  %18534 = vmatprep.mubr.msk.f32.mxu0 %vm18799_vm7, %v22266_v36  ;;  %v18102_v6 = vpop.f32.mrf.mxu0  ;;  %v14683_v5 = vpop.permute.xlu1 %14682 }
 0x2d2   :  { %18544 = vmatprep.subr.mxu0 %v22266_v36  ;;  %18568 = vmatpush3.msra.mxu1 %v18974_v22  ;;  %v18137_v62 = vpop.f32.mrf.mxu1  ;;  %v21893_v13 = vsub.f32 %v15205_v30, %v21875_v40  ;;  %v14672_v42 = vmax.f32 %v14644_v43, %v18745_v16 }
 0x2d3   :  { %18569 = vmatprep.mubr.msk.f32.mxu1 %vm18799_vm7, %v22266_v36  ;;  %18535 = vmatmul.mubr.f32.vlgmr.msra.gmra.mxu0 %v21758_v14 }
 0x2d4   :  { %18545 = vmatpush3.msra.mxu0 %v18866_v34  ;;  %18570 = vmatmul.mubr.f32.vlgmr.msra.gmra.mxu1 %v21808_v29  ;;  %v15276_v15 = vand.u32 4294901760, %v21893_v13 }
 0x2d5   :  { %18579 = vmatprep.subr.mxu1 %v22266_v36  ;;  %18546 = vmatprep.subr.mxu0 %v22266_v36  ;;  %v14723_v55 = vpop.permute.xlu1 %14722 }
 0x2d6   :  { %18580 = vmatpush3.msk.msra.mxu1 %vm279_vm2, %v18840_v12  ;;  %18547 = vmatpush3.msra.mxu0 %v18901_v50  ;;  %v9239_v14 = vpop.f32.mrf.mxu0  ;;  %v14732_v26 = vmax.f32 %v14672_v42, %v14723_v55 }
 0x2d7   :  { %18581 = vmatprep.subr.mxu1 %v22266_v36  ;;  %18548 = vmatprep.mubr.msk.f32.mxu0 %vm18799_vm7, %v22266_v36  ;;  %v9240_v63 = vadd.f32 %v9239_v14, %v9164_v2  ;;  %v21854_v35 = vpop.f32.mrf.mxu1 }
 0x2d8   :  { %18558 = vmatprep.subr.mxu0 %v22266_v36  ;;  %18582 = vmatpush3.msk.msra.mxu1 %vm18850_vm3, %v22269_v44  ;;  %v18116_v9 = vpop.f32.mrf.mxu0 }
 0x2d9   :  { %18583 = vmatprep.mubr.msk.f32.mxu1 %vm18799_vm7, %v22266_v36  ;;  %18549 = vmatmul.mubr.f32.vlgmr.msra.gmra.mxu0 %v21741_v51  ;;  %v18151_v56 = vpop.f32.mrf.mxu1  ;;  %v9315_v10 = vadd.f32 %v21800_v27, %v9240_v63  ;;  %v14624_v51 = vmax.f32 %v21171_v47, %v14615_v60  ;;  %v14703_v27 = vpop.permute.xlu0 %14702 }
 0x2da   :  { %18559 = vmatpush3.msk.msra.mxu0 %vm279_vm2, %v18840_v12  ;;  %18584 = vmatmul.mubr.f32.vlgmr.msra.gmra.mxu1 %v14814_v18 }
 0x2db   :  { %18593 = vmatprep.subr.mxu1 %v22266_v36  ;;  %18560 = vmatprep.subr.mxu0 %v22266_v36  ;;  %v14668_v11 = vmax.f32 %v14624_v51, %v21232_v0  ;;  %v14692_v0 = vmax.f32 %v14664_v8, %v14683_v5  ;;  %v18749_v5 = vld [vmem:[#allocation3 + $0x31] ss:$2 sm:$0xff] }
 0x2dc   :  { %18594 = vmatpush3.msk.msra.mxu1 %vm279_vm2, %v18840_v12  ;;  %18561 = vmatpush3.msk.msra.mxu0 %vm18850_vm3, %v22269_v44 }
 0x2dd   :  { %18595 = vmatprep.subr.mxu1 %v22266_v36  ;;  %18562 = vmatprep.mubr.msk.f32.mxu0 %vm18799_vm7, %v22266_v36  ;;  %v9391_v52 = vpop.f32.mrf.mxu0  ;;  %v14712_v49 = vmax.f32 %v14668_v11, %v14703_v27  ;;  %v14597_v53 = vpop.permute.xlu0 %14596 }
 0x2de   :  { %18572 = vmatprep.subr.mxu0 %v22266_v36  ;;  %18596 = vmatpush3.msk.msra.mxu1 %vm18850_vm3, %v22269_v44  ;;  %v9392_v47 = vadd.f32 %v9391_v52, %v9315_v10  ;;  %v21884_v45 = vpop.f32.mrf.mxu1  ;;  %v14605_v21 = vmax.f32 %v18746_v19, %v14597_v53  ;;  %v18748_v10 = vld [vmem:[#allocation2 + $0x31] ss:$2 sm:$0xff] }
 0x2df   :  { %18597 = vmatprep.mubr.msk.f32.mxu1 %vm18799_vm7, %v22266_v36  ;;  %18563 = vmatmul.mubr.f32.vlgmr.msra.gmra.mxu0 %v14816_v3  ;;  %v18130_v39 = vpop.f32.mrf.mxu0  ;;  %vm14736_vm10 = vcmp.ge.f32.partialorder %v14712_v49, %v14692_v0 }
 0x2e0   :  { %18573 = vmatpush3.msra.mxu0 %v18848_v24  ;;  %18598 = vmatmul.mubr.f32.vlgmr.msra.gmra.mxu1 %v21808_v29  ;;  %v9465_v59 = vadd.f32 %v21831_v31, %v9392_v47  ;;  %v18165_v20 = vpop.f32.mrf.mxu1  ;;  %v15277_v31 = vsub.f32 %v21893_v13, %v15276_v15  ;;  %v14740_v6 = vsel %vm14736_vm10, %v14732_v26, 0.0  ;;  %v14665_v3 = vmax.f32 %v14605_v21, %v18748_v10 }
 0x2e1   :  { %18607 = vmatprep.subr.mxu1 %v22266_v36  ;;  %18574 = vmatprep.subr.mxu0 %v22266_v36  ;;  %v14637_v62 = vpop.permute.xlu0 %14636  ;;  %v15667_v1 = vsel %vm275_vm1, %v14740_v6, 0 }
 0x2e2   :  { %18608 = vmatpush3.msra.mxu1 %v18894_v46  ;;  %18575 = vmatpush3.msra.mxu0 %v18875_v41  ;;  %10394 = vst.msk [vmem:[#allocation7 + $0x88] sm:$0xff] %vm2128_vm5, %v9465_v59  ;;  %v15278_v60 = vand.u32 4294901760, %v15277_v31  ;;  %v21943_v9 = vand.u32 4294901760, %v15667_v1  ;;  %v14645_v56 = vmax.f32 %v18747_v48, %v14637_v62 }
 0x2e3   :  { %18609 = vmatprep.subr.mxu1 %v22266_v36  ;;  %18576 = vmatprep.mubr.msk.f32.mxu0 %vm18799_vm7, %v22266_v36 }
 0x2e4   :  { %18586 = vmatprep.subr.mxu0 %v22266_v36  ;;  %18610 = vmatpush3.msra.mxu1 %v18974_v22  ;;  %v9544_v28 = vpop.f32.mrf.mxu0  ;;  %v21959_v57 = vsub.f32 %v15667_v1, %v21943_v9  ;;  %v14673_v38 = vmax.f32 %v14645_v56, %v18749_v5 }
 0x2e5   :  { %18611 = vmatprep.mubr.msk.f32.mxu1 %vm18799_vm7, %v22266_v36  ;;  %18577 = vmatmul.mubr.f32.vlgmr.msra.gmra.mxu0 %v21825_v7  ;;  %v21909_v58 = vpop.f32.mrf.mxu1  ;;  %v14617_v7 = vpop.permute.xlu1 %14616  ;;  %v9626_v37 = vadd.f32 %v21854_v35, %v9544_v28 }
 0x2e6   :  { %18587 = vmatpush3.msra.mxu0 %v18866_v34  ;;  %18612 = vmatmul.mubr.f32.vlgmr.msra.gmra.mxu1 %v21875_v40  ;;  %v18144_v61 = vpop.f32.mrf.mxu0  ;;  %v15738_v8 = vand.u32 4294901760, %v21959_v57 }
 0x2e7   :  { %18621 = vmatprep.subr.mxu1 %v22266_v36  ;;  %18588 = vmatprep.subr.mxu0 %v22266_v36  ;;  %v18179_v54 = vpop.f32.mrf.mxu1 }
 0x2e8   :  { %18622 = vmatpush3.msk.msra.mxu1 %vm279_vm2, %v18840_v12  ;;  %18589 = vmatpush3.msra.mxu0 %v18901_v50 }
 0x2e9   :  { %18623 = vmatprep.subr.mxu1 %v22266_v36  ;;  %18590 = vmatprep.mubr.msk.f32.mxu0 %vm18799_vm7, %v22266_v36  ;;  %v14685_v63 = vpop.permute.xlu1 %14684 }
 0x2ea   :  { %18600 = vmatprep.subr.mxu0 %v22266_v36  ;;  %18624 = vmatpush3.msk.msra.mxu1 %vm18850_vm3, %v22269_v44  ;;  %v14693_v33 = vmax.f32 %v14665_v3, %v14685_v63 }
 0x2eb   :  { %18625 = vmatprep.mubr.msk.f32.mxu1 %vm18799_vm7, %v22266_v36  ;;  %18591 = vmatmul.mubr.f32.vlgmr.msra.gmra.mxu0 %v21808_v29  ;;  %v9701_v18 = vpop.f32.mrf.mxu0  ;;  %v14625_v29 = vmax.f32 %v21262_v17, %v14617_v7  ;;  %v14705_v17 = vpop.permute.xlu0 %14704 }
 0x2ec   :  { %18601 = vmatpush3.msk.msra.mxu0 %vm279_vm2, %v18840_v12  ;;  %18626 = vmatmul.mubr.f32.vlgmr.msra.gmra.mxu1 %v15276_v15  ;;  %v9702_v32 = vadd.f32 %v9701_v18, %v9626_v37  ;;  %v21933_v2 = vpop.f32.mrf.mxu1 }
 0x2ed   :  { %18635 = vmatprep.subr.mxu1 %v22266_v36  ;;  %18602 = vmatprep.subr.mxu0 %v22266_v36  ;;  %v18158_v14 = vpop.f32.mrf.mxu0  ;;  %v14669_v51 = vmax.f32 %v14625_v29, %v21322_v23  ;;  %v14725_v47 = vpop.permute.xlu1 %14724 }
 0x2ee   :  { %18636 = vmatpush3.msk.msra.mxu1 %vm279_vm2, %v18840_v12  ;;  %18603 = vmatpush3.msk.msra.mxu0 %vm18850_vm3, %v22269_v44  ;;  %v18193_v35 = vpop.f32.mrf.mxu1  ;;  %v9777_v30 = vadd.f32 %v21884_v45, %v9702_v32  ;;  %v14733_v11 = vmax.f32 %v14673_v38, %v14725_v47 }
 0x2ef   :  { %18637 = vmatprep.subr.mxu1 %v22266_v36  ;;  %18604 = vmatprep.mubr.msk.f32.mxu0 %vm18799_vm7, %v22266_v36  ;;  %v14713_v45 = vmax.f32 %v14669_v51, %v14705_v17 }
 0x2f0   :  { %18614 = vmatprep.subr.mxu0 %v22266_v36  ;;  %18638 = vmatpush3.msk.msra.mxu1 %vm18850_vm3, %v22269_v44 }
 0x2f1   :  { %18639 = vmatprep.mubr.msk.f32.mxu1 %vm18799_vm7, %v22266_v36  ;;  %18605 = vmatmul.mubr.f32.vlgmr.msra.gmra.mxu0 %v15278_v60  ;;  %vm14737_vm11 = vcmp.ge.f32.partialorder %v14713_v45, %v14693_v33 }
 0x2f2   :  { %18615 = vmatpush3.msra.mxu0 %v18848_v24  ;;  %18640 = vmatmul.mubr.f32.vlgmr.msra.gmra.mxu1 %v21875_v40  ;;  %v9853_v4 = vpop.f32.mrf.mxu0  ;;  %v14741_v16 = vsel %vm14737_vm11, %v14733_v11, 0.0 }
 0x2f3   :  { %18649 = vmatprep.subr.mxu1 %v22266_v36  ;;  %18616 = vmatprep.subr.mxu0 %v22266_v36  ;;  %v9854_v43 = vadd.f32 %v9853_v4, %v9777_v30  ;;  %v10238_v52 = vpop.f32.mrf.mxu1  ;;  %v16129_v49 = vsel %vm275_vm1, %v14741_v16, 0 }
 0x2f4   :  { %18650 = vmatpush3.msra.mxu1 %v18894_v46  ;;  %18617 = vmatpush3.msra.mxu0 %v18875_v41  ;;  %v18172_v27 = vpop.f32.mrf.mxu0  ;;  %v22005_v15 = vand.u32 4294901760, %v16129_v49 }
 0x2f5   :  { %18651 = vmatprep.subr.mxu1 %v22266_v36  ;;  %18618 = vmatprep.mubr.msk.f32.mxu0 %vm18799_vm7, %v22266_v36  ;;  %v9927_v23 = vadd.f32 %v21909_v58, %v9854_v43  ;;  %v18207_v39 = vpop.f32.mrf.mxu1 }
 0x2f6   :  { %18628 = vmatprep.subr.mxu0 %v22266_v36  ;;  %18652 = vmatpush3.msra.mxu1 %v18974_v22  ;;  %v16199_v7 = vsub.f32 %v16129_v49, %v22005_v15 }
 0x2f7   :  { %18653 = vmatprep.mubr.msk.f32.mxu1 %vm18799_vm7, %v22266_v36  ;;  %18619 = vmatmul.mubr.f32.vlgmr.msra.gmra.mxu0 %v21893_v13  ;;  %10395 = vst.msk [vmem:[#allocation7 + $0x90] sm:$0xff] %vm2128_vm5, %v9927_v23  ;;  %v15739_v13 = vsub.f32 %v21959_v57, %v15738_v8 }
 0x2f8   :  { %18629 = vmatpush3.msra.mxu0 %v18866_v34  ;;  %18654 = vmatmul.mubr.f32.vlgmr.msra.gmra.mxu1 %v21943_v9  ;;  %v16200_v62 = vand.u32 4294901760, %v16199_v7 }
 0x2f9   :  { %18663 = vmatprep.subr.mxu1 %v22266_v36  ;;  %18630 = vmatprep.subr.mxu0 %v22266_v36  ;;  %v10006_v59 = vpop.f32.mrf.mxu0  ;;  %v15740_v0 = vand.u32 4294901760, %v15739_v13 }
 0x2fa   :  { %18664 = vmatpush3.msk.msra.mxu1 %vm279_vm2, %v18840_v12  ;;  %18631 = vmatpush3.msra.mxu0 %v18901_v50  ;;  %v10388_v20 = vpop.f32.mrf.mxu1  ;;  %v10088_v28 = vadd.f32 %v21933_v2, %v10006_v59 }
 0x2fb   :  { %18665 = vmatprep.subr.mxu1 %v22266_v36  ;;  %18632 = vmatprep.mubr.msk.f32.mxu0 %vm18799_vm7, %v22266_v36  ;;  %v18186_v42 = vpop.f32.mrf.mxu0 }
 0x2fc   :  { %18642 = vmatprep.subr.mxu0 %v22266_v36  ;;  %18666 = vmatpush3.msk.msra.mxu1 %vm18850_vm3, %v22269_v44  ;;  %v18221_v55 = vpop.f32.mrf.mxu1 }
 0x2fd   :  { %18667 = vmatprep.mubr.msk.f32.mxu1 %vm18799_vm7, %v22266_v36  ;;  %18633 = vmatmul.mubr.f32.vlgmr.msra.gmra.mxu0 %v21875_v40 }
 0x2fe   :  { %18643 = vmatpush3.msk.msra.mxu0 %vm279_vm2, %v18840_v12  ;;  %18668 = vmatmul.mubr.f32.vlgmr.msra.gmra.mxu1 %v15738_v8 }
 0x2ff   :  { %18677 = vmatprep.subr.mxu1 %v22266_v36  ;;  %18644 = vmatprep.subr.mxu0 %v22266_v36 }
 0x300   :  { %18678 = vmatpush3.msk.msra.mxu1 %vm279_vm2, %v18840_v12  ;;  %18645 = vmatpush3.msk.msra.mxu0 %vm18850_vm3, %v22269_v44  ;;  %v10163_v40 = vpop.f32.mrf.mxu0 }
 0x301   :  { %18679 = vmatprep.subr.mxu1 %v22266_v36  ;;  %18646 = vmatprep.mubr.msk.f32.mxu0 %vm18799_vm7, %v22266_v36  ;;  %v10164_v26 = vadd.f32 %v10163_v40, %v10088_v28  ;;  %v10767_v53 = vpop.f32.mrf.mxu1 }
 0x302   :  { %18656 = vmatprep.subr.mxu0 %v22266_v36  ;;  %18680 = vmatpush3.msk.msra.mxu1 %vm18850_vm3, %v22269_v44  ;;  %v18200_v58 = vpop.f32.mrf.mxu0 }
 0x303   :  { %18681 = vmatprep.mubr.msk.f32.mxu1 %vm18799_vm7, %v22266_v36  ;;  %18647 = vmatmul.mubr.f32.vlgmr.msra.gmra.mxu0 %v15740_v0  ;;  %v18235_v61 = vpop.f32.mrf.mxu1  ;;  %v10239_v54 = vadd.f32 %v10238_v52, %v10164_v26 }
 0x304   :  { %18657 = vmatpush3.msra.mxu0 %v18848_v24  ;;  %18682 = vmatmul.mubr.f32.vlgmr.msra.gmra.mxu1 %v21943_v9 }
 0x305   :  { %18691 = vmatprep.subr.mxu1 %v22266_v36  ;;  %18658 = vmatprep.subr.mxu0 %v22266_v36 }
 0x306   :  { %18692 = vmatpush3.msra.mxu1 %v18894_v46  ;;  %18659 = vmatpush3.msra.mxu0 %v18875_v41 }
 0x307   :  { %18693 = vmatprep.subr.mxu1 %v22266_v36  ;;  %18660 = vmatprep.mubr.msk.f32.mxu0 %vm18799_vm7, %v22266_v36  ;;  %v10315_v31 = vpop.f32.mrf.mxu0 }
 0x308   :  { %18670 = vmatprep.subr.mxu0 %v22266_v36  ;;  %18694 = vmatpush3.msra.mxu1 %v18974_v22  ;;  %v10316_v6 = vadd.f32 %v10315_v31, %v10239_v54  ;;  %v10918_v37 = vpop.f32.mrf.mxu1  ;;  %v16201_v22 = vsub.f32 %v16199_v7, %v16200_v62 }
 0x309   :  { %18695 = vmatprep.mubr.msk.f32.mxu1 %vm18799_vm7, %v22266_v36  ;;  %18661 = vmatmul.mubr.f32.vlgmr.msra.gmra.mxu0 %v21959_v57  ;;  %v18214_v46 = vpop.f32.mrf.mxu0 }
 0x30a   :  { %18671 = vmatpush3.msra.mxu0 %v18866_v34  ;;  %18696 = vmatmul.mubr.f32.vlgmr.msra.gmra.mxu1 %v22005_v15  ;;  %v10389_v18 = vadd.f32 %v10388_v20, %v10316_v6  ;;  %v18249_v1 = vpop.f32.mrf.mxu1  ;;  %v16202_v14 = vand.u32 4294901760, %v16201_v22 }
 0x30b   :  { %18705 = vmatprep.subr.mxu1 %v22266_v36  ;;  %18672 = vmatprep.subr.mxu0 %v22266_v36 }
 0x30c   :  { %18706 = vmatpush3.msk.msra.mxu1 %vm279_vm2, %v18840_v12  ;;  %18673 = vmatpush3.msra.mxu0 %v18901_v50  ;;  %10396 = vst.msk [vmem:[#allocation7 + $0x98] sm:$0xff] %vm2128_vm5, %v10389_v18 }
 0x30d   :  { %18707 = vmatprep.subr.mxu1 %v22266_v36  ;;  %18674 = vmatprep.mubr.msk.f32.mxu0 %vm18799_vm7, %v22266_v36 }
 0x30e   :  { %18684 = vmatprep.subr.mxu0 %v22266_v36  ;;  %18708 = vmatpush3.msk.msra.mxu1 %vm18850_vm3, %v22269_v44  ;;  %v10686_v32 = vpop.f32.mrf.mxu0 }
 0x30f   :  { %18709 = vmatprep.mubr.msk.f32.mxu1 %vm18799_vm7, %v22266_v36  ;;  %18675 = vmatmul.mubr.f32.vlgmr.msra.gmra.mxu0 %v21943_v9  ;;  %v11068_v2 = vpop.f32.mrf.mxu1  ;;  %v10768_v19 = vadd.f32 %v10767_v53, %v10686_v32 }
 0x310   :  { %18685 = vmatpush3.msk.msra.mxu0 %vm279_vm2, %v18840_v12  ;;  %18710 = vmatmul.mubr.f32.vlgmr.msra.gmra.mxu1 %v16200_v62  ;;  %v18228_v60 = vpop.f32.mrf.mxu0 }
 0x311   :  { %18719 = vmatprep.subr.mxu1 %v22266_v36  ;;  %18686 = vmatprep.subr.mxu0 %v22266_v36  ;;  %v18263_v29 = vpop.f32.mrf.mxu1 }
 0x312   :  { %18720 = vmatpush3.msk.msra.mxu1 %vm279_vm2, %v18840_v12  ;;  %18687 = vmatpush3.msk.msra.mxu0 %vm18850_vm3, %v22269_v44 }
 0x313   :  { %18721 = vmatprep.subr.mxu1 %v22266_v36  ;;  %18688 = vmatprep.mubr.msk.f32.mxu0 %vm18799_vm7, %v22266_v36 }
 0x314   :  { %18698 = vmatprep.subr.mxu0 %v22266_v36  ;;  %18722 = vmatpush3.msk.msra.mxu1 %vm18850_vm3, %v22269_v44 }
 0x315   :  { %18723 = vmatprep.mubr.msk.f32.mxu1 %vm18799_vm7, %v22266_v36  ;;  %18689 = vmatmul.mubr.f32.vlgmr.msra.gmra.mxu0 %v16202_v14  ;;  %v10843_v12 = vpop.f32.mrf.mxu0 }
 0x316   :  { %18699 = vmatpush3.msra.mxu0 %v18848_v24  ;;  %18724 = vmatmul.mubr.f32.vlgmr.msra.gmra.mxu1 %v22005_v15  ;;  %v10844_v21 = vadd.f32 %v10843_v12, %v10768_v19  ;;  %v11229_v63 = vpop.f32.mrf.mxu1 }
 0x317   :  { %18700 = vmatprep.subr.mxu0 %v22266_v36  ;;  %18702 = vmatprep.mubr.msk.f32.mxu0 %vm18799_vm7, %v22266_v36  ;;  %v18242_v35 = vpop.f32.mrf.mxu0 }
 0x318   :  { %18701 = vmatpush3.msra.mxu0 %v18875_v41  ;;  %v18277_v25 = vpop.f32.mrf.mxu1  ;;  %v10919_v44 = vadd.f32 %v10918_v37, %v10844_v21 }
 0x319   :  { %18712 = vmatprep.subr.mxu0 %v22266_v36  ;;  %18703 = vmatmul.mubr.f32.vlgmr.msra.gmra.mxu0 %v16199_v7 }
 0x31a   :  { %18713 = vmatpush3.msra.mxu0 %v18866_v34  ;;  %18716 = vmatprep.mubr.msk.f32.mxu0 %vm18799_vm7, %v22266_v36 }
 0x31b   :  { %18714 = vmatprep.subr.mxu0 %v22266_v36  ;;  %v10995_v24 = vpop.f32.mrf.mxu0 }
 0x31c   :  { %18715 = vmatpush3.msra.mxu0 %v18901_v50  ;;  %v10996_v9 = vadd.f32 %v10995_v24, %v10919_v44  ;;  %v11380_v48 = vpop.f32.mrf.mxu1 }
 0x31d   :  { %18717 = vmatmul.mubr.f32.vlgmr.msra.gmra.mxu0 %v22005_v15  ;;  %v18256_v41 = vpop.f32.mrf.mxu0 }
 0x31e   :  { %v11069_v56 = vadd.f32 %v11068_v2, %v10996_v9  ;;  %v18291_v30 = vpop.f32.mrf.mxu1 }
 0x320   :  { %12459 = vst.msk [vmem:[#allocation7 + $0xa0] sm:$0xff] %vm2128_vm5, %v11069_v56 }
 0x321   :  { %v11148_v17 = vpop.f32.mrf.mxu0 }
 0x322   :  { %v11530_v10 = vpop.f32.mrf.mxu1  ;;  %v11230_v51 = vadd.f32 %v11229_v63, %v11148_v17 }
 0x323   :  { %v18270_v34 = vpop.f32.mrf.mxu0 }
 0x324   :  { %v18305_v3 = vpop.f32.mrf.mxu1 }
 0x327   :  { %v11305_v4 = vpop.f32.mrf.mxu0 }
 0x328   :  { %v11306_v57 = vadd.f32 %v11305_v4, %v11230_v51  ;;  %v11691_v36 = vpop.f32.mrf.mxu1 }
 0x329   :  { %v18284_v5 = vpop.f32.mrf.mxu0 }
 0x32a   :  { %v18319_v38 = vpop.f32.mrf.mxu1  ;;  %v11381_v50 = vadd.f32 %v11380_v48, %v11306_v57 }
 0x32d   :  { %v11457_v43 = vpop.f32.mrf.mxu0 }
 0x32e   :  { %v11458_v52 = vadd.f32 %v11457_v43, %v11381_v50  ;;  %v11842_v47 = vpop.f32.mrf.mxu1 }
 0x32f   :  { %v18298_v45 = vpop.f32.mrf.mxu0 }
 0x330   :  { %v11531_v27 = vadd.f32 %v11530_v10, %v11458_v52  ;;  %v18333_v23 = vpop.f32.mrf.mxu1 }
 0x332   :  { %12460 = vst.msk [vmem:[#allocation7 + $0xa8] sm:$0xff] %vm2128_vm5, %v11531_v27 }
 0x333   :  { %v11610_v39 = vpop.f32.mrf.mxu0 }
 0x334   :  { %v11992_v33 = vpop.f32.mrf.mxu1  ;;  %v11692_v59 = vadd.f32 %v11691_v36, %v11610_v39 }
 0x335   :  { %v18312_v8 = vpop.f32.mrf.mxu0 }
 0x336   :  { %v18347_v11 = vpop.f32.mrf.mxu1 }
 0x339   :  { %v11767_v20 = vpop.f32.mrf.mxu0 }
 0x33a   :  { %v11768_v13 = vadd.f32 %v11767_v20, %v11692_v59  ;;  %v12153_v16 = vpop.f32.mrf.mxu1 }
 0x33b   :  { %v18326_v42 = vpop.f32.mrf.mxu0 }
 0x33c   :  { %v18361_v55 = vpop.f32.mrf.mxu1  ;;  %v11843_v49 = vadd.f32 %v11842_v47, %v11768_v13 }
 0x33f   :  { %v11919_v0 = vpop.f32.mrf.mxu0 }
 0x340   :  { %v11920_v28 = vadd.f32 %v11919_v0, %v11843_v49  ;;  %v12304_v40 = vpop.f32.mrf.mxu1 }
 0x341   :  { %v18340_v15 = vpop.f32.mrf.mxu0 }
 0x342   :  { %v11993_v26 = vadd.f32 %v11992_v33, %v11920_v28  ;;  %v18375_v53 = vpop.f32.mrf.mxu1 }
 0x344   :  { %12461 = vst.msk [vmem:[#allocation7 + $0xb0] sm:$0xff] %vm2128_vm5, %v11993_v26 }
 0x345   :  { %v12072_v58 = vpop.f32.mrf.mxu0 }
 0x346   :  { %v12454_v61 = vpop.f32.mrf.mxu1  ;;  %v12154_v31 = vadd.f32 %v12153_v16, %v12072_v58 }
 0x347   :  { %v18354_v54 = vpop.f32.mrf.mxu0 }
 0x348   :  { %v18389_v7 = vpop.f32.mrf.mxu1 }
 0x34b   :  { %v12229_v6 = vpop.f32.mrf.mxu0 }
 0x34c   :  { %v12230_v37 = vadd.f32 %v12229_v6, %v12154_v31  ;;  %v12833_v62 = vpop.f32.mrf.mxu1 }
 0x34d   :  { %v18368_v46 = vpop.f32.mrf.mxu0 }
 0x34e   :  { %v18403_v18 = vpop.f32.mrf.mxu1  ;;  %v12305_v1 = vadd.f32 %v12304_v40, %v12230_v37 }
 0x351   :  { %v12381_v22 = vpop.f32.mrf.mxu0 }
 0x352   :  { %v12382_v32 = vadd.f32 %v12381_v22, %v12305_v1  ;;  %v12984_v2 = vpop.f32.mrf.mxu1 }
 0x353   :  { %v18382_v60 = vpop.f32.mrf.mxu0 }
 0x354   :  { %v12455_v14 = vadd.f32 %v12454_v61, %v12382_v32  ;;  %v18417_v29 = vpop.f32.mrf.mxu1 }
 0x356   :  { %12462 = vst.msk [vmem:[#allocation7 + $0xb8] sm:$0xff] %vm2128_vm5, %v12455_v14 }
 0x357   :  { %v12752_v19 = vpop.f32.mrf.mxu0 }
 0x358   :  { %v13134_v12 = vpop.f32.mrf.mxu1  ;;  %v12834_v35 = vadd.f32 %v12833_v62, %v12752_v19 }
 0x359   :  { %v18396_v21 = vpop.f32.mrf.mxu0 }
 0x35a   :  { %v18431_v63 = vpop.f32.mrf.mxu1 }
 0x35d   :  { %v12909_v25 = vpop.f32.mrf.mxu0 }
 0x35e   :  { %v12910_v44 = vadd.f32 %v12909_v25, %v12834_v35  ;;  %v13295_v24 = vpop.f32.mrf.mxu1 }
 0x35f   :  { %v18410_v9 = vpop.f32.mrf.mxu0 }
 0x360   :  { %v18445_v48 = vpop.f32.mrf.mxu1  ;;  %v12985_v41 = vadd.f32 %v12984_v2, %v12910_v44 }
 0x363   :  { %v13061_v56 = vpop.f32.mrf.mxu0 }
 0x364   :  { %v13062_v30 = vadd.f32 %v13061_v56, %v12985_v41  ;;  %v13446_v17 = vpop.f32.mrf.mxu1 }
 0x365   :  { %v18424_v10 = vpop.f32.mrf.mxu0 }
 0x366   :  { %v13135_v34 = vadd.f32 %v13134_v12, %v13062_v30  ;;  %v18459_v3 = vpop.f32.mrf.mxu1 }
 0x368   :  { %14525 = vst.msk [vmem:[#allocation7 + $0xc0] sm:$0xff] %vm2128_vm5, %v13135_v34 }
 0x369   :  { %v13214_v51 = vpop.f32.mrf.mxu0 }
 0x36a   :  { %v13596_v4 = vpop.f32.mrf.mxu1  ;;  %v13296_v5 = vadd.f32 %v13295_v24, %v13214_v51 }
 0x36b   :  { %v18438_v57 = vpop.f32.mrf.mxu0 }
 0x36c   :  { %v18473_v36 = vpop.f32.mrf.mxu1 }
 0x36f   :  { %v13371_v38 = vpop.f32.mrf.mxu0 }
 0x370   :  { %v13372_v50 = vadd.f32 %v13371_v38, %v13296_v5  ;;  %v13757_v43 = vpop.f32.mrf.mxu1 }
 0x371   :  { %v18452_v52 = vpop.f32.mrf.mxu0 }
 0x372   :  { %v18487_v47 = vpop.f32.mrf.mxu1  ;;  %v13447_v45 = vadd.f32 %v13446_v17, %v13372_v50 }
 0x375   :  { %v13523_v27 = vpop.f32.mrf.mxu0 }
 0x376   :  { %v13524_v23 = vadd.f32 %v13523_v27, %v13447_v45  ;;  %v13908_v39 = vpop.f32.mrf.mxu1 }
 0x377   :  { %v18466_v33 = vpop.f32.mrf.mxu0 }
 0x378   :  { %v13597_v8 = vadd.f32 %v13596_v4, %v13524_v23  ;;  %v18501_v11 = vpop.f32.mrf.mxu1 }
 0x37a   :  { %14526 = vst.msk [vmem:[#allocation7 + $0xc8] sm:$0xff] %vm2128_vm5, %v13597_v8 }
 0x37b   :  { %v13676_v59 = vpop.f32.mrf.mxu0 }
 0x37c   :  { %v14058_v20 = vpop.f32.mrf.mxu1  ;;  %v13758_v42 = vadd.f32 %v13757_v43, %v13676_v59 }
 0x37d   :  { %v18480_v13 = vpop.f32.mrf.mxu0 }
 0x37e   :  { %v18515_v16 = vpop.f32.mrf.mxu1 }
 0x381   :  { %v13833_v55 = vpop.f32.mrf.mxu0 }
 0x382   :  { %v13834_v49 = vadd.f32 %v13833_v55, %v13758_v42  ;;  %v14219_v0 = vpop.f32.mrf.mxu1 }
 0x383   :  { %v18494_v28 = vpop.f32.mrf.mxu0 }
 0x384   :  { %v18529_v40 = vpop.f32.mrf.mxu1  ;;  %v13909_v15 = vadd.f32 %v13908_v39, %v13834_v49 }
 0x387   :  { %v13985_v26 = vpop.f32.mrf.mxu0 }
 0x388   :  { %v13986_v53 = vadd.f32 %v13985_v26, %v13909_v15  ;;  %v14370_v58 = vpop.f32.mrf.mxu1 }
 0x389   :  { %v18508_v61 = vpop.f32.mrf.mxu0 }
 0x38a   :  { %v14059_v54 = vadd.f32 %v14058_v20, %v13986_v53  ;;  %v18543_v7 = vpop.f32.mrf.mxu1 }
 0x38c   :  { %14527 = vst.msk [vmem:[#allocation7 + $0xd0] sm:$0xff] %vm2128_vm5, %v14059_v54 }
 0x38d   :  { %v14138_v31 = vpop.f32.mrf.mxu0 }
 0x38e   :  { %v14520_v6 = vpop.f32.mrf.mxu1  ;;  %v14220_v46 = vadd.f32 %v14219_v0, %v14138_v31 }
 0x38f   :  { %v18522_v37 = vpop.f32.mrf.mxu0 }
 0x390   :  { %v18557_v62 = vpop.f32.mrf.mxu1 }
 0x393   :  { %v14295_v18 = vpop.f32.mrf.mxu0 }
 0x394   :  { %v14296_v1 = vadd.f32 %v14295_v18, %v14220_v46  ;;  %v14899_v22 = vpop.f32.mrf.mxu1 }
 0x395   :  { %v18536_v32 = vpop.f32.mrf.mxu0 }
 0x396   :  { %v18571_v2 = vpop.f32.mrf.mxu1  ;;  %v14371_v60 = vadd.f32 %v14370_v58, %v14296_v1 }
 0x399   :  { %v14447_v14 = vpop.f32.mrf.mxu0 }
 0x39a   :  { %v14448_v29 = vadd.f32 %v14447_v14, %v14371_v60  ;;  %v15050_v19 = vpop.f32.mrf.mxu1 }
 0x39b   :  { %v18550_v12 = vpop.f32.mrf.mxu0 }
 0x39c   :  { %v14521_v21 = vadd.f32 %v14520_v6, %v14448_v29  ;;  %v18585_v63 = vpop.f32.mrf.mxu1 }
 0x39e   :  { %14528 = vst.msk [vmem:[#allocation7 + $0xd8] sm:$0xff] %vm2128_vm5, %v14521_v21 }
 0x39f   :  { %v14818_v35 = vpop.f32.mrf.mxu0 }
 0x3a0   :  { %v15200_v25 = vpop.f32.mrf.mxu1  ;;  %v14900_v9 = vadd.f32 %v14899_v22, %v14818_v35 }
 0x3a1   :  { %v18564_v44 = vpop.f32.mrf.mxu0 }
 0x3a2   :  { %v18599_v24 = vpop.f32.mrf.mxu1 }
 0x3a5   :  { %v14975_v48 = vpop.f32.mrf.mxu0 }
 0x3a6   :  { %v14976_v41 = vadd.f32 %v14975_v48, %v14900_v9  ;;  %v15361_v56 = vpop.f32.mrf.mxu1 }
 0x3a7   :  { %v18578_v30 = vpop.f32.mrf.mxu0 }
 0x3a8   :  { %v18613_v17 = vpop.f32.mrf.mxu1  ;;  %v15051_v10 = vadd.f32 %v15050_v19, %v14976_v41 }
 0x3ab   :  { %v15127_v34 = vpop.f32.mrf.mxu0 }
 0x3ac   :  { %v15128_v3 = vadd.f32 %v15127_v34, %v15051_v10  ;;  %v15512_v51 = vpop.f32.mrf.mxu1 }
 0x3ad   :  { %v18592_v4 = vpop.f32.mrf.mxu0 }
 0x3ae   :  { %v15201_v57 = vadd.f32 %v15200_v25, %v15128_v3  ;;  %v18627_v36 = vpop.f32.mrf.mxu1 }
 0x3b0   :  { %16591 = vst.msk [vmem:[#allocation7 + $0xe0] sm:$0xff] %vm2128_vm5, %v15201_v57 }
 0x3b1   :  { %v15280_v5 = vpop.f32.mrf.mxu0 }
 0x3b2   :  { %v15662_v38 = vpop.f32.mrf.mxu1  ;;  %v15362_v52 = vadd.f32 %v15361_v56, %v15280_v5 }
 0x3b3   :  { %v18606_v50 = vpop.f32.mrf.mxu0 }
 0x3b4   :  { %v18641_v43 = vpop.f32.mrf.mxu1 }
 0x3b7   :  { %v15437_v47 = vpop.f32.mrf.mxu0 }
 0x3b8   :  { %v15438_v45 = vadd.f32 %v15437_v47, %v15362_v52  ;;  %v15823_v27 = vpop.f32.mrf.mxu1 }
 0x3b9   :  { %v18620_v23 = vpop.f32.mrf.mxu0 }
 0x3ba   :  { %v18655_v39 = vpop.f32.mrf.mxu1  ;;  %v15513_v33 = vadd.f32 %v15512_v51, %v15438_v45 }
 0x3bd   :  { %v15589_v8 = vpop.f32.mrf.mxu0 }
 0x3be   :  { %v15590_v11 = vadd.f32 %v15589_v8, %v15513_v33  ;;  %v15974_v59 = vpop.f32.mrf.mxu1 }
 0x3bf   :  { %v18634_v20 = vpop.f32.mrf.mxu0 }
 0x3c0   :  { %v15663_v13 = vadd.f32 %v15662_v38, %v15590_v11  ;;  %v18669_v16 = vpop.f32.mrf.mxu1 }
 0x3c2   :  { %16592 = vst.msk [vmem:[#allocation7 + $0xe8] sm:$0xff] %vm2128_vm5, %v15663_v13 }
 0x3c3   :  { %v15742_v42 = vpop.f32.mrf.mxu0 }
 0x3c4   :  { %v16124_v55 = vpop.f32.mrf.mxu1  ;;  %v15824_v28 = vadd.f32 %v15823_v27, %v15742_v42 }
 0x3c5   :  { %v18648_v49 = vpop.f32.mrf.mxu0 }
 0x3c6   :  { %v18683_v0 = vpop.f32.mrf.mxu1 }
 0x3c9   :  { %v15899_v40 = vpop.f32.mrf.mxu0 }
 0x3ca   :  { %v15900_v15 = vadd.f32 %v15899_v40, %v15824_v28  ;;  %v16285_v26 = vpop.f32.mrf.mxu1 }
 0x3cb   :  { %v18662_v53 = vpop.f32.mrf.mxu0 }
 0x3cc   :  { %v18697_v58 = vpop.f32.mrf.mxu1  ;;  %v15975_v61 = vadd.f32 %v15974_v59, %v15900_v15 }
 0x3cf   :  { %v16051_v54 = vpop.f32.mrf.mxu0 }
 0x3d0   :  { %v16052_v7 = vadd.f32 %v16051_v54, %v15975_v61  ;;  %v16436_v31 = vpop.f32.mrf.mxu1 }
 0x3d1   :  { %v18676_v6 = vpop.f32.mrf.mxu0 }
 0x3d2   :  { %v16125_v37 = vadd.f32 %v16124_v55, %v16052_v7  ;;  %v18711_v62 = vpop.f32.mrf.mxu1 }
 0x3d4   :  { %16593 = vst.msk [vmem:[#allocation7 + $0xf0] sm:$0xff] %vm2128_vm5, %v16125_v37 }
 0x3d5   :  { %v16204_v46 = vpop.f32.mrf.mxu0 }
 0x3d6   :  { %v16586_v18 = vpop.f32.mrf.mxu1  ;;  %v16286_v22 = vadd.f32 %v16285_v26, %v16204_v46 }
 0x3d7   :  { %v18690_v1 = vpop.f32.mrf.mxu0 }
 0x3d8   :  { %v18725_v32 = vpop.f32.mrf.mxu1 }
 0x3d9   :  { %v16361_v2 = vpop.f32.mrf.mxu0 }
 0x3da   :  { %v16362_v60 = vadd.f32 %v16361_v2, %v16286_v22 }
 0x3db   :  { %v18704_v14 = vpop.f32.mrf.mxu0 }
 0x3dc   :  { %v16437_v29 = vadd.f32 %v16436_v31, %v16362_v60 }
 0x3dd   :  { %v16513_v19 = vpop.f32.mrf.mxu0 }
 0x3de   :  { %v16514_v12 = vadd.f32 %v16513_v19, %v16437_v29 }
 0x3df   :  { %v18718_v21 = vpop.f32.mrf.mxu0 }
 0x3e0   :  { %v16587_v63 = vadd.f32 %v16586_v18, %v16514_v12 }
 0x3e2   :  { %16594 = vst.msk [vmem:[#allocation7 + $0xf8] sm:$0xff] %vm2128_vm5, %v16587_v63 }
 0x3e3   :  { %18781 = shalt.err (!%p18778_p9)
}
 0x3e4   :  { %16606 = dma.vmem_to_hbm [thread:$0]  %s16601_s14, 4096, %s22099_s1, [#allocation6], %s18795_s9, %s18795_s9, %s18796_s10  }
 0x3e5   :  { %18792 = dma.done.wait [#allocation6], 4096  }
 0x3e6   :  { %18793 = vsyncadd [#allocation6], 4294963200 }
 0x3e7   :  { %16610 = vsyncpa [#allocation5], 1 }
 0x3e8   :  { %16611 = vsyncpa [#allocation6], 1 }

</bundles_post_ra>
